<compile_context>
chip_gen: v6e
topology: v6e:2x2x1
jax: 0.10.0
libtpu: 0.0.40
codegen_flags: <defaults>
</compile_context>

<pallas_src>
import jax
import jax.numpy as jnp
from jax.experimental import pallas as pl
from jax.experimental.pallas import tpu as pltpu

HIDDEN = 300     # logical width (matches nn.Linear(..., 300))
H_PAD = 384      # padded to 3 * 128 lanes for clean vreg / MXU tiling
TILE_B = 256     # batch rows per grid step (fills MXU rows, amortizes per-step overhead)


def mlp_kernel(x_ref,
               w1_ref, b1_ref,
               w2_ref, b2_ref,
               w3_ref, b3_ref,
               w4_ref, b4_ref,
               w5_ref, b5_ref,
               o_ref):
    x = x_ref[...]                                            # (TILE_B, 1)

    # Layer 1 (1 -> H): K=1 matmul is degenerate on the MXU -> VPU broadcast multiply.
    h = x * w1_ref[...] + b1_ref[...]                         # (TILE_B, H_PAD)
    h = jnp.maximum(h, 0.0)

    # Layers 2-4 (H -> H): dense MXU matmuls, f32 accumulation. Padded rows/cols are zero.
    h = jnp.maximum(
        jnp.dot(h, w2_ref[...], preferred_element_type=jnp.float32) + b2_ref[...], 0.0)
    h = jnp.maximum(
        jnp.dot(h, w3_ref[...], preferred_element_type=jnp.float32) + b3_ref[...], 0.0)
    h = jnp.maximum(
        jnp.dot(h, w4_ref[...], preferred_element_type=jnp.float32) + b4_ref[...], 0.0)

    # Layer 5 (H -> 1): N=1 matmul is degenerate -> VPU multiply + XLU lane reduction.
    out = jnp.sum(h * w5_ref[...], axis=-1, keepdims=True) + b5_ref[...]
    o_ref[...] = out.astype(o_ref.dtype)                      # (TILE_B, 1)


def _pad_params(params):
    """Zero-pad the 300-wide dims up to H_PAD; w5 becomes a (1, H_PAD) row vector."""
    pc = H_PAD - HIDDEN
    w1 = jnp.pad(params["w1"], ((0, 0), (0, pc)))                     # (1, H_PAD)
    b1 = jnp.pad(params["b1"], ((0, 0), (0, pc)))                     # (1, H_PAD)
    w2 = jnp.pad(params["w2"], ((0, pc), (0, pc)))                    # (H_PAD, H_PAD)
    b2 = jnp.pad(params["b2"], ((0, 0), (0, pc)))
    w3 = jnp.pad(params["w3"], ((0, pc), (0, pc)))
    b3 = jnp.pad(params["b3"], ((0, 0), (0, pc)))
    w4 = jnp.pad(params["w4"], ((0, pc), (0, pc)))
    b4 = jnp.pad(params["b4"], ((0, 0), (0, pc)))
    w5 = jnp.pad(params["w5"].reshape(1, HIDDEN), ((0, 0), (0, pc)))  # (1, H_PAD), zeros in pad
    b5 = params["b5"]                                                 # (1, 1)
    return (w1, b1, w2, b2, w3, b3, w4, b4, w5, b5)


@jax.jit
def simple_nn_forward(x, params):
    """x: (B, 1) float32. params: transposed weights (in, out) and biases (1, out)."""
    B = x.shape[0]
    b_pad = pl.cdiv(B, TILE_B) * TILE_B
    if b_pad != B:
        x = jnp.pad(x, ((0, b_pad - B), (0, 0)))

    padded = _pad_params(params)

    # Weights/biases: full-shape blocks, same block index every step -> resident in VMEM.
    def resident(shape):
        return pl.BlockSpec(shape, lambda i: (0, 0))

    in_specs = [pl.BlockSpec((TILE_B, 1), lambda i: (i, 0))] + [resident(p.shape) for p in padded]

    out = pl.pallas_call(
        mlp_kernel,
        out_shape=jax.ShapeDtypeStruct((b_pad, 1), jnp.float32),
        grid=(b_pad // TILE_B,),
        in_specs=in_specs,
        out_specs=pl.BlockSpec((TILE_B, 1), lambda i: (i, 0)),
        compiler_params=pltpu.CompilerParams(
            dimension_semantics=("parallel",),   # shard batch steps across TCs (v7x megacore)
        ),
    )(x, *padded)
    return out[:B]


def init_params(key):
    """Deterministic init matching nn.Linear shapes (stored transposed as (in, out))."""
    dims = [(1, HIDDEN), (HIDDEN, HIDDEN), (HIDDEN, HIDDEN), (HIDDEN, HIDDEN), (HIDDEN, 1)]
    params = {}
    for i, (fan_in, fan_out) in enumerate(dims, start=1):
        key, kw, kb = jax.random.split(key, 3)
        bound = 1.0 / (fan_in ** 0.5)  # PyTorch default U(-1/sqrt(fan_in), 1/sqrt(fan_in))
        params[f"w{i}"] = jax.random.uniform(kw, (fan_in, fan_out), jnp.float32, -bound, bound)
        params[f"b{i}"] = jax.random.uniform(kb, (1, fan_out), jnp.float32, -bound, bound)
    return params


def reference_forward(x, params):
    h = x
    for i in range(1, 5):
        h = jnp.maximum(h @ params[f"w{i}"] + params[f"b{i}"], 0.0)
    return h @ params["w5"] + params["b5"]


if __name__ == "__main__":
    key = jax.random.PRNGKey(0)
    kx, kp = jax.random.split(key)
    B = 8
    x = jax.random.normal(kx, (B, 1), jnp.float32)
    params = init_params(kp)

    out = jax.block_until_ready(simple_nn_forward(x, params))
    ref = reference_forward(x, params)

    assert out.shape == (B, 1)
    assert jnp.allclose(out, ref, atol=1e-3, rtol=1e-3), float(jnp.max(jnp.abs(out - ref)))
    print("KERNEL_OK")
</pallas_src>

<mosaic_0001>
module attributes {stable_mosaic.version = 11 : i64} {
  func.func @mlp_kernel(%arg0: i32, %arg1: memref<256x1xf32, #tpu.memory_space<vmem>>, %arg2: memref<1x384xf32, #tpu.memory_space<vmem>>, %arg3: memref<1x384xf32, #tpu.memory_space<vmem>>, %arg4: memref<384x384xf32, #tpu.memory_space<vmem>>, %arg5: memref<1x384xf32, #tpu.memory_space<vmem>>, %arg6: memref<384x384xf32, #tpu.memory_space<vmem>>, %arg7: memref<1x384xf32, #tpu.memory_space<vmem>>, %arg8: memref<384x384xf32, #tpu.memory_space<vmem>>, %arg9: memref<1x384xf32, #tpu.memory_space<vmem>>, %arg10: memref<1x384xf32, #tpu.memory_space<vmem>>, %arg11: memref<1x1xf32, #tpu.memory_space<vmem>>, %arg12: memref<256x1xf32, #tpu.memory_space<vmem>>) attributes {dimension_semantics = [#tpu.dimension_semantics<parallel>], iteration_bounds = array<i64: 1>, scalar_prefetch = 0 : i64, scratch_operands = 0 : i64, tpu.core_type = #tpu.core_type<tc>, window_params = [{transform_indices = @transform_0, window_bounds = array<i64: 256, 1>}, {pipeline_mode = #tpu.pipeline_mode<synchronous>, transform_indices = @transform_1, window_bounds = array<i64: 1, 384>}, {pipeline_mode = #tpu.pipeline_mode<synchronous>, transform_indices = @transform_2, window_bounds = array<i64: 1, 384>}, {pipeline_mode = #tpu.pipeline_mode<synchronous>, transform_indices = @transform_3, window_bounds = array<i64: 384, 384>}, {pipeline_mode = #tpu.pipeline_mode<synchronous>, transform_indices = @transform_4, window_bounds = array<i64: 1, 384>}, {pipeline_mode = #tpu.pipeline_mode<synchronous>, transform_indices = @transform_5, window_bounds = array<i64: 384, 384>}, {pipeline_mode = #tpu.pipeline_mode<synchronous>, transform_indices = @transform_6, window_bounds = array<i64: 1, 384>}, {pipeline_mode = #tpu.pipeline_mode<synchronous>, transform_indices = @transform_7, window_bounds = array<i64: 384, 384>}, {pipeline_mode = #tpu.pipeline_mode<synchronous>, transform_indices = @transform_8, window_bounds = array<i64: 1, 384>}, {pipeline_mode = #tpu.pipeline_mode<synchronous>, transform_indices = @transform_9, window_bounds = array<i64: 1, 384>}, {pipeline_mode = #tpu.pipeline_mode<synchronous>, transform_indices = @transform_10, window_bounds = array<i64: 1, 1>}, {transform_indices = @transform_11, window_bounds = array<i64: 256, 1>}]} {
    %c0 = arith.constant 0 : index
    %c0_0 = arith.constant 0 : index
    %0 = vector.load %arg1[%c0, %c0_0] : memref<256x1xf32, #tpu.memory_space<vmem>>, vector<256x1xf32>
    %c0_1 = arith.constant 0 : index
    %c0_2 = arith.constant 0 : index
    %1 = vector.load %arg2[%c0_1, %c0_2] : memref<1x384xf32, #tpu.memory_space<vmem>>, vector<1x384xf32>
    %2 = vector.broadcast %0 : vector<256x1xf32> to vector<256x384xf32>
    %3 = vector.broadcast %1 : vector<1x384xf32> to vector<256x384xf32>
    %4 = arith.mulf %2, %3 : vector<256x384xf32>
    %c0_3 = arith.constant 0 : index
    %c0_4 = arith.constant 0 : index
    %5 = vector.load %arg3[%c0_3, %c0_4] : memref<1x384xf32, #tpu.memory_space<vmem>>, vector<1x384xf32>
    %6 = vector.broadcast %5 : vector<1x384xf32> to vector<256x384xf32>
    %7 = arith.addf %4, %6 : vector<256x384xf32>
    %cst = arith.constant 0.000000e+00 : f32
    %8 = vector.broadcast %cst : f32 to vector<256x384xf32>
    %9 = arith.maximumf %7, %8 : vector<256x384xf32>
    %c0_5 = arith.constant 0 : index
    %c0_6 = arith.constant 0 : index
    %10 = vector.load %arg4[%c0_5, %c0_6] : memref<384x384xf32, #tpu.memory_space<vmem>>, vector<384x384xf32>
    %cst_7 = arith.constant dense<0.000000e+00> : vector<256x384xf32>
    %11 = tpu.matmul %9, %10, %cst_7 {dimension_numbers = #tpu.dot_dimension_numbers<[1], [0], [0], [1], [0, 0, 1, 1], [], []>} : vector<256x384xf32>, vector<384x384xf32>, vector<256x384xf32> -> vector<256x384xf32>
    %c0_8 = arith.constant 0 : index
    %c0_9 = arith.constant 0 : index
    %12 = vector.load %arg5[%c0_8, %c0_9] : memref<1x384xf32, #tpu.memory_space<vmem>>, vector<1x384xf32>
    %13 = vector.broadcast %12 : vector<1x384xf32> to vector<256x384xf32>
    %14 = arith.addf %11, %13 : vector<256x384xf32>
    %cst_10 = arith.constant 0.000000e+00 : f32
    %15 = vector.broadcast %cst_10 : f32 to vector<256x384xf32>
    %16 = arith.maximumf %14, %15 : vector<256x384xf32>
    %c0_11 = arith.constant 0 : index
    %c0_12 = arith.constant 0 : index
    %17 = vector.load %arg6[%c0_11, %c0_12] : memref<384x384xf32, #tpu.memory_space<vmem>>, vector<384x384xf32>
    %cst_13 = arith.constant dense<0.000000e+00> : vector<256x384xf32>
    %18 = tpu.matmul %16, %17, %cst_13 {dimension_numbers = #tpu.dot_dimension_numbers<[1], [0], [0], [1], [0, 0, 1, 1], [], []>} : vector<256x384xf32>, vector<384x384xf32>, vector<256x384xf32> -> vector<256x384xf32>
    %c0_14 = arith.constant 0 : index
    %c0_15 = arith.constant 0 : index
    %19 = vector.load %arg7[%c0_14, %c0_15] : memref<1x384xf32, #tpu.memory_space<vmem>>, vector<1x384xf32>
    %20 = vector.broadcast %19 : vector<1x384xf32> to vector<256x384xf32>
    %21 = arith.addf %18, %20 : vector<256x384xf32>
    %cst_16 = arith.constant 0.000000e+00 : f32
    %22 = vector.broadcast %cst_16 : f32 to vector<256x384xf32>
    %23 = arith.maximumf %21, %22 : vector<256x384xf32>
    %c0_17 = arith.constant 0 : index
    %c0_18 = arith.constant 0 : index
    %24 = vector.load %arg8[%c0_17, %c0_18] : memref<384x384xf32, #tpu.memory_space<vmem>>, vector<384x384xf32>
    %cst_19 = arith.constant dense<0.000000e+00> : vector<256x384xf32>
    %25 = tpu.matmul %23, %24, %cst_19 {dimension_numbers = #tpu.dot_dimension_numbers<[1], [0], [0], [1], [0, 0, 1, 1], [], []>} : vector<256x384xf32>, vector<384x384xf32>, vector<256x384xf32> -> vector<256x384xf32>
    %c0_20 = arith.constant 0 : index
    %c0_21 = arith.constant 0 : index
    %26 = vector.load %arg9[%c0_20, %c0_21] : memref<1x384xf32, #tpu.memory_space<vmem>>, vector<1x384xf32>
    %27 = vector.broadcast %26 : vector<1x384xf32> to vector<256x384xf32>
    %28 = arith.addf %25, %27 : vector<256x384xf32>
    %cst_22 = arith.constant 0.000000e+00 : f32
    %29 = vector.broadcast %cst_22 : f32 to vector<256x384xf32>
    %30 = arith.maximumf %28, %29 : vector<256x384xf32>
    %c0_23 = arith.constant 0 : index
    %c0_24 = arith.constant 0 : index
    %31 = vector.load %arg10[%c0_23, %c0_24] : memref<1x384xf32, #tpu.memory_space<vmem>>, vector<1x384xf32>
    %32 = vector.broadcast %31 : vector<1x384xf32> to vector<256x384xf32>
    %33 = arith.mulf %30, %32 : vector<256x384xf32>
    %cst_25 = arith.constant dense<0.000000e+00> : vector<256xf32>
    %34 = vector.multi_reduction <add>, %33, %cst_25 [1] : vector<256x384xf32> to vector<256xf32>
    %35 = vector.shape_cast %34 : vector<256xf32> to vector<256x1xf32>
    %c0_26 = arith.constant 0 : index
    %c0_27 = arith.constant 0 : index
    %36 = vector.load %arg11[%c0_26, %c0_27] : memref<1x1xf32, #tpu.memory_space<vmem>>, vector<1x1xf32>
    %37 = vector.broadcast %36 : vector<1x1xf32> to vector<256x1xf32>
    %38 = arith.addf %35, %37 : vector<256x1xf32>
    %c0_28 = arith.constant 0 : index
    %c0_29 = arith.constant 0 : index
    %39 = vector.load %arg12[%c0_28, %c0_29] : memref<256x1xf32, #tpu.memory_space<vmem>>, vector<256x1xf32>
    tpu.vector_store %arg12[%c0_28, %c0_29], %38 {strides = array<i32>} : memref<256x1xf32, #tpu.memory_space<vmem>>, vector<256x1xf32>,
    return
  }
  func.func @transform_0(%arg0: i32) -> (i32, i32) {
    %c0_i32 = arith.constant 0 : i32
    %c0_i32_0 = arith.constant 0 : i32
    return %arg0, %c0_i32 : i32, i32
  }
  func.func @transform_1(%arg0: i32) -> (i32, i32) {
    %c0_i32 = arith.constant 0 : i32
    %c0_i32_0 = arith.constant 0 : i32
    %c0_i32_1 = arith.constant 0 : i32
    return %c0_i32, %c0_i32_0 : i32, i32
  }
  func.func @transform_2(%arg0: i32) -> (i32, i32) {
    %c0_i32 = arith.constant 0 : i32
    %c0_i32_0 = arith.constant 0 : i32
    %c0_i32_1 = arith.constant 0 : i32
    return %c0_i32, %c0_i32_0 : i32, i32
  }
  func.func @transform_3(%arg0: i32) -> (i32, i32) {
    %c0_i32 = arith.constant 0 : i32
    %c0_i32_0 = arith.constant 0 : i32
    %c0_i32_1 = arith.constant 0 : i32
    return %c0_i32, %c0_i32_0 : i32, i32
  }
  func.func @transform_4(%arg0: i32) -> (i32, i32) {
    %c0_i32 = arith.constant 0 : i32
    %c0_i32_0 = arith.constant 0 : i32
    %c0_i32_1 = arith.constant 0 : i32
    return %c0_i32, %c0_i32_0 : i32, i32
  }
  func.func @transform_5(%arg0: i32) -> (i32, i32) {
    %c0_i32 = arith.constant 0 : i32
    %c0_i32_0 = arith.constant 0 : i32
    %c0_i32_1 = arith.constant 0 : i32
    return %c0_i32, %c0_i32_0 : i32, i32
  }
  func.func @transform_6(%arg0: i32) -> (i32, i32) {
    %c0_i32 = arith.constant 0 : i32
    %c0_i32_0 = arith.constant 0 : i32
    %c0_i32_1 = arith.constant 0 : i32
    return %c0_i32, %c0_i32_0 : i32, i32
  }
  func.func @transform_7(%arg0: i32) -> (i32, i32) {
    %c0_i32 = arith.constant 0 : i32
    %c0_i32_0 = arith.constant 0 : i32
    %c0_i32_1 = arith.constant 0 : i32
    return %c0_i32, %c0_i32_0 : i32, i32
  }
  func.func @transform_8(%arg0: i32) -> (i32, i32) {
    %c0_i32 = arith.constant 0 : i32
    %c0_i32_0 = arith.constant 0 : i32
    %c0_i32_1 = arith.constant 0 : i32
    return %c0_i32, %c0_i32_0 : i32, i32
  }
  func.func @transform_9(%arg0: i32) -> (i32, i32) {
    %c0_i32 = arith.constant 0 : i32
    %c0_i32_0 = arith.constant 0 : i32
    %c0_i32_1 = arith.constant 0 : i32
    return %c0_i32, %c0_i32_0 : i32, i32
  }
  func.func @transform_10(%arg0: i32) -> (i32, i32) {
    %c0_i32 = arith.constant 0 : i32
    %c0_i32_0 = arith.constant 0 : i32
    %c0_i32_1 = arith.constant 0 : i32
    return %c0_i32, %c0_i32_0 : i32, i32
  }
  func.func @transform_11(%arg0: i32) -> (i32, i32) {
    %c0_i32 = arith.constant 0 : i32
    %c0_i32_0 = arith.constant 0 : i32
    return %arg0, %c0_i32 : i32, i32
  }
}

</mosaic_0001>

<bundles_post_ra>
// kernel: simple_nn_forward.1
= control target key start
LH: loop header
LB: loop body
LE: loop exit
PB: predicated region body
PF: predicated region fallthrough
CT: control target
= control target key end

     0   :  { %v4924_v0 = vmov 0   ;;  %v10292_v5 = vmov 0.0   ;;  %vm4497_vm0 = vcmask 7168   ;;  %s10241_s0 = inlined_call_operand.vmem [shape: f32[256,1], index: 0, kind: input, shape index: {}]   ;;  %s10242_s3 = inlined_call_operand.vmem [shape: f32[384,384], index: 3, kind: input, shape index: {}]   ;;  %s10243_s1 = inlined_call_operand.vmem [shape: f32[1,384], index: 1, kind: input, shape index: {}]   ;;  %s10244_s2 = inlined_call_operand.vmem [shape: f32[1,384], index: 2, kind: input, shape index: {}]   ;;  %s10245_s5 = inlined_call_operand.vmem [shape: f32[384,384], index: 5, kind: input, shape index: {}]   ;;  %s10246_s4 = inlined_call_operand.vmem [shape: f32[1,384], index: 4, kind: input, shape index: {}]   ;;  %s10247_s7 = inlined_call_operand.vmem [shape: f32[384,384], index: 7, kind: input, shape index: {}]   ;;  %s10248_s6 = inlined_call_operand.vmem [shape: f32[1,384], index: 6, kind: input, shape index: {}]   ;;  %s10249_s8 = inlined_call_operand.vmem [shape: f32[1,384], index: 8, kind: input, shape index: {}]   ;;  %s10250_s9 = inlined_call_operand.vmem [shape: f32[1,384], index: 9, kind: input, shape index: {}]   ;;  %s10251_s10 = inlined_call_operand.<no memory space> [shape: f32[1,1], index: 10, kind: input, shape index: {}]   ;;  %s10252_s11 = inlined_call_operand.vmem [shape: f32[256,1], index: 11, kind: output, shape index: {}]  }
   0x1   :  { %4922 = vset.pattern.permute.xlu1 %v4924_v0  ;;  %4921 = vset.pattern.permute.xlu0 %v4924_v0  ;;  %v42_v1 = vld [vmem:[%s10241_s0 + $0x10] sm:$0xff]  ;;  %v40_v2 = vld [vmem:[%s10241_s0] sm:$0xff]  ;;  %v43_v3 = vld [vmem:[%s10241_s0 + $0x18] sm:$0xff] }
   0x2   :  { %85 = vperm.xlu1 %4922, %v42_v1   ;;  %75 = vperm.xlu0 %4921, %v40_v2   ;;  %v41_v4 = vld [vmem:[%s10241_s0 + $0x8] sm:$0xff]  ;;  %v44_v7 = vld [vmem:[%s10241_s0 + $0x20] sm:$0xff]  ;;  %v47_v8 = vld [vmem:[%s10241_s0 + $0x38] sm:$0xff] }
   0x3   :  { %1036 = vmatprep.mubr.f32.mxu1 %v10292_v5  ;;  %v45_v6 = vld [vmem:[%s10241_s0 + $0x28] sm:$0xff]  ;;  %v46_v9 = vld [vmem:[%s10241_s0 + $0x30] sm:$0xff]  ;;  %v597_v12 = vld [vmem:[%s10242_s3 + $0x158] sm:$0xff] }
   0x4   :  { %v600_v10 = vld [vmem:[%s10242_s3 + $0x170] sm:$0xff]  ;;  %v599_v11 = vld [vmem:[%s10242_s3 + $0x168] sm:$0xff]  ;;  %v594_v14 = vld [vmem:[%s10242_s3 + $0x140] sm:$0xff] }
   0x5   :  { %715 = vmatprep.subr.mxu0 %v600_v10  ;;  %v596_v13 = vld [vmem:[%s10242_s3 + $0x150] sm:$0xff]  ;;  %v49_v15 = vld [vmem:[%s10241_s0 + $0x48] sm:$0xff]  ;;  %v48_v16 = vld [vmem:[%s10241_s0 + $0x40] sm:$0xff] }
   0x6   :  { %90 = vperm.xlu1 %4922, %v43_v3   ;;  %80 = vperm.xlu0 %4921, %v41_v4   ;;  %v593_v17 = vld [vmem:[%s10242_s3 + $0x138] sm:$0xff]  ;;  %v591_v18 = vld [vmem:[%s10242_s3 + $0x128] sm:$0xff]  ;;  %v590_v19 = vld [vmem:[%s10242_s3 + $0x120] sm:$0xff] }
   0x7   :  { %716 = vmatpush1.msra.mxu0 %v599_v11  ;;  %v51_v20 = vld [vmem:[%s10241_s0 + $0x58] sm:$0xff]  ;;  %v50_v21 = vld [vmem:[%s10241_s0 + $0x50] sm:$0xff]  ;;  %v587_v23 = vld [vmem:[%s10242_s3 + $0x108] sm:$0xff] }
   0x8   :  { %717 = vmatprep.subr.mxu0 %v597_v12  ;;  %v588_v22 = vld [vmem:[%s10242_s3 + $0x110] sm:$0xff]  ;;  %v585_v24 = vld [vmem:[%s10242_s3 + $0xf8] sm:$0xff]  ;;  %v53_v26 = vld [vmem:[%s10241_s0 + $0x68] sm:$0xff] }
   0x9   :  { %718 = vmatpush1.msra.mxu0 %v596_v13  ;;  %v696_v25 = vld [vmem:[%s10242_s3 + $0x470] sm:$0xff]  ;;  %v52_v27 = vld [vmem:[%s10241_s0 + $0x60] sm:$0xff]  ;;  %v695_v28 = vld [vmem:[%s10242_s3 + $0x468] sm:$0xff] }
   0xa   :  { %100 = vperm.xlu1 %4922, %v45_v6   ;;  %95 = vperm.xlu0 %4921, %v44_v7   ;;  %v584_v29 = vld [vmem:[%s10242_s3 + $0xf0] sm:$0xff]  ;;  %v693_v30 = vld [vmem:[%s10242_s3 + $0x458] sm:$0xff]  ;;  %v582_v32 = vld [vmem:[%s10242_s3 + $0xe0] sm:$0xff] }
   0xb   :  { %719 = vmatprep.subr.mxu0 %v594_v14  ;;  %972 = vmatprep.subr.mxu1 %v696_v25  ;;  %v692_v31 = vld [vmem:[%s10242_s3 + $0x450] sm:$0xff]  ;;  %v690_v33 = vld [vmem:[%s10242_s3 + $0x440] sm:$0xff]  ;;  %v581_v34 = vld [vmem:[%s10242_s3 + $0xd8] sm:$0xff] }
   0xc   :  { %720 = vmatpush1.msra.mxu0 %v593_v17  ;;  %973 = vmatpush1.msra.mxu1 %v695_v28  ;;  %v689_v35 = vld [vmem:[%s10242_s3 + $0x438] sm:$0xff]  ;;  %v54_v37 = vld [vmem:[%s10241_s0 + $0x70] sm:$0xff]  ;;  %v579_v38 = vld [vmem:[%s10242_s3 + $0xc8] sm:$0xff] }
   0xd   :  { %721 = vmatprep.subr.mxu0 %v591_v18  ;;  %974 = vmatprep.subr.mxu1 %v693_v30  ;;  %v55_v36 = vld [vmem:[%s10241_s0 + $0x78] sm:$0xff]  ;;  %v687_v39 = vld [vmem:[%s10242_s3 + $0x428] sm:$0xff]  ;;  %v578_v40 = vld [vmem:[%s10242_s3 + $0xc0] sm:$0xff] }
   0xe   :  { %110 = vperm.xlu1 %4922, %v47_v8   ;;  %105 = vperm.xlu0 %4921, %v46_v9   ;;  %v686_v41 = vld [vmem:[%s10242_s3 + $0x420] sm:$0xff]  ;;  %v576_v42 = vld [vmem:[%s10242_s3 + $0xb0] sm:$0xff]  ;;  %v57_v44 = vld [vmem:[%s10241_s0 + $0x88] sm:$0xff] }
   0xf   :  { %722 = vmatpush1.msra.mxu0 %v590_v19  ;;  %975 = vmatpush1.msra.mxu1 %v692_v31  ;;  %v684_v43 = vld [vmem:[%s10242_s3 + $0x410] sm:$0xff]  ;;  %v56_v45 = vld [vmem:[%s10241_s0 + $0x80] sm:$0xff]  ;;  %v575_v46 = vld [vmem:[%s10242_s3 + $0xa8] sm:$0xff] }
  0x10   :  { %723 = vmatprep.subr.mxu0 %v588_v22  ;;  %976 = vmatprep.subr.mxu1 %v690_v33  ;;  %v683_v47 = vld [vmem:[%s10242_s3 + $0x408] sm:$0xff]  ;;  %v573_v48 = vld [vmem:[%s10242_s3 + $0x98] sm:$0xff]  ;;  %v572_v50 = vld [vmem:[%s10242_s3 + $0x90] sm:$0xff] }
  0x11   :  { %724 = vmatpush1.msra.mxu0 %v587_v23  ;;  %977 = vmatpush1.msra.mxu1 %v689_v35  ;;  %v681_v49 = vld [vmem:[%s10242_s3 + $0x3f8] sm:$0xff]  ;;  %v680_v51 = vld [vmem:[%s10242_s3 + $0x3f0] sm:$0xff]  ;;  %v570_v54 = vld [vmem:[%s10242_s3 + $0x80] sm:$0xff] }
  0x12   :  { %120 = vperm.xlu1 %4922, %v49_v15   ;;  %115 = vperm.xlu0 %4921, %v48_v16   ;;  %v59_v52 = vld [vmem:[%s10241_s0 + $0x98] sm:$0xff]  ;;  %v58_v53 = vld [vmem:[%s10241_s0 + $0x90] sm:$0xff]  ;;  %v678_v55 = vld [vmem:[%s10242_s3 + $0x3e0] sm:$0xff] }
  0x13   :  { %725 = vmatprep.subr.mxu0 %v585_v24  ;;  %978 = vmatprep.subr.mxu1 %v687_v39  ;;  %v569_v56 = vld [vmem:[%s10242_s3 + $0x78] sm:$0xff]  ;;  %v567_v58 = vld [vmem:[%s10242_s3 + $0x68] sm:$0xff]  ;;  %v60_v61 = vld [vmem:[%s10241_s0 + $0xa0] sm:$0xff] }
  0x14   :  { %726 = vmatpush1.msra.mxu0 %v584_v29  ;;  %979 = vmatpush1.msra.mxu1 %v686_v41  ;;  %v677_v57 = vld [vmem:[%s10242_s3 + $0x3d8] sm:$0xff]  ;;  %v675_v59 = vld [vmem:[%s10242_s3 + $0x3c8] sm:$0xff]  ;;  %v566_v62 = vld [vmem:[%s10242_s3 + $0x60] sm:$0xff] }
  0x15   :  { %727 = vmatprep.subr.mxu0 %v582_v32  ;;  %980 = vmatprep.subr.mxu1 %v684_v43  ;;  %v61_v60 = vld [vmem:[%s10241_s0 + $0xa8] sm:$0xff]  ;;  %v674_v63 = vld [vmem:[%s10242_s3 + $0x3c0] sm:$0xff]  ;;  %v564_v0 = vld [vmem:[%s10242_s3 + $0x50] sm:$0xff] }
  0x16   :  { %130 = vperm.xlu1 %4922, %v51_v20   ;;  %125 = vperm.xlu0 %4921, %v50_v21   ;;  %v672_v1 = vld [vmem:[%s10242_s3 + $0x3b0] sm:$0xff]  ;;  %v563_v2 = vld [vmem:[%s10242_s3 + $0x48] sm:$0xff]  ;;  %v63_v4 = vld [vmem:[%s10241_s0 + $0xb8] sm:$0xff] }
  0x17   :  { %728 = vmatpush1.msra.mxu0 %v581_v34  ;;  %981 = vmatpush1.msra.mxu1 %v683_v47  ;;  %v671_v3 = vld [vmem:[%s10242_s3 + $0x3a8] sm:$0xff]  ;;  %v62_v6 = vld [vmem:[%s10241_s0 + $0xb0] sm:$0xff]  ;;  %v561_v7 = vld [vmem:[%s10242_s3 + $0x38] sm:$0xff] }
  0x18   :  { %729 = vmatprep.subr.mxu0 %v579_v38  ;;  %982 = vmatprep.subr.mxu1 %v681_v49  ;;  %v669_v8 = vld [vmem:[%s10242_s3 + $0x398] sm:$0xff]  ;;  %v560_v9 = vld [vmem:[%s10242_s3 + $0x30] sm:$0xff]  ;;  %v558_v11 = vld [vmem:[%s10242_s3 + $0x20] sm:$0xff] }
  0x19   :  { %730 = vmatpush1.msra.mxu0 %v578_v40  ;;  %983 = vmatpush1.msra.mxu1 %v680_v51  ;;  %v668_v10 = vld [vmem:[%s10242_s3 + $0x390] sm:$0xff]  ;;  %v666_v12 = vld [vmem:[%s10242_s3 + $0x380] sm:$0xff]  ;;  %v65_v13 = vld [vmem:[%s10241_s0 + $0xc8] sm:$0xff] }
  0x1a   :  { %140 = vperm.xlu1 %4922, %v53_v26   ;;  %135 = vperm.xlu0 %4921, %v52_v27   ;;  %v64_v14 = vld [vmem:[%s10241_s0 + $0xc0] sm:$0xff]  ;;  %v557_v15 = vld [vmem:[%s10242_s3 + $0x18] sm:$0xff]  ;;  %v555_v17 = vld [vmem:[%s10242_s3 + $0x8] sm:$0xff] }
  0x1b   :  { %731 = vmatprep.subr.mxu0 %v576_v42  ;;  %984 = vmatprep.subr.mxu1 %v678_v55  ;;  %v665_v16 = vld [vmem:[%s10242_s3 + $0x378] sm:$0xff]  ;;  %v663_v18 = vld [vmem:[%s10242_s3 + $0x368] sm:$0xff]  ;;  %v554_v19 = vld [vmem:[%s10242_s3] sm:$0xff] }
  0x1c   :  { %732 = vmatpush1.msra.mxu0 %v575_v46  ;;  %985 = vmatpush1.msra.mxu1 %v677_v57  ;;  %v662_v20 = vld [vmem:[%s10242_s3 + $0x360] sm:$0xff]  ;;  %v67_v21 = vld [vmem:[%s10241_s0 + $0xd8] sm:$0xff]  ;;  %v66_v22 = vld [vmem:[%s10241_s0 + $0xd0] sm:$0xff] }
  0x1d   :  { %733 = vmatprep.subr.mxu0 %v573_v48  ;;  %986 = vmatprep.subr.mxu1 %v675_v59  ;;  %v648_v23 = vld [vmem:[%s10242_s3 + $0x2f0] sm:$0xff]  ;;  %v647_v25 = vld [vmem:[%s10242_s3 + $0x2e8] sm:$0xff]  ;;  %v645_v27 = vld [vmem:[%s10242_s3 + $0x2d8] sm:$0xff] }
  0x1e   :  { %150 = vperm.xlu1 %4922, %v55_v36   ;;  %145 = vperm.xlu0 %4921, %v54_v37   ;;  %v660_v24 = vld [vmem:[%s10242_s3 + $0x350] sm:$0xff]  ;;  %v659_v26 = vld [vmem:[%s10242_s3 + $0x348] sm:$0xff]  ;;  %v657_v28 = vld [vmem:[%s10242_s3 + $0x338] sm:$0xff] }
  0x1f   :  { %734 = vmatpush1.msra.mxu0 %v572_v50  ;;  %987 = vmatpush1.msra.mxu1 %v674_v63  ;;  %v69_v29 = vld [vmem:[%s10241_s0 + $0xe8] sm:$0xff]  ;;  %v68_v30 = vld [vmem:[%s10241_s0 + $0xe0] sm:$0xff]  ;;  %v644_v31 = vld [vmem:[%s10242_s3 + $0x2d0] sm:$0xff] }
  0x20   :  { %735 = vmatprep.subr.mxu0 %v570_v54  ;;  %988 = vmatprep.subr.mxu1 %v672_v1  ;;  %v656_v32 = vld [vmem:[%s10242_s3 + $0x330] sm:$0xff]  ;;  %v642_v33 = vld [vmem:[%s10242_s3 + $0x2c0] sm:$0xff]  ;;  %v641_v35 = vld [vmem:[%s10242_s3 + $0x2b8] sm:$0xff] }
  0x21   :  { %736 = vmatpush1.msra.mxu0 %v569_v56  ;;  %989 = vmatpush1.msra.mxu1 %v671_v3  ;;  %v654_v34 = vld [vmem:[%s10242_s3 + $0x320] sm:$0xff]  ;;  %v653_v36 = vld [vmem:[%s10242_s3 + $0x318] sm:$0xff]  ;;  %v70_v38 = vld [vmem:[%s10241_s0 + $0xf0] sm:$0xff] }
  0x22   :  { %160 = vperm.xlu1 %4922, %v57_v44   ;;  %155 = vperm.xlu0 %4921, %v56_v45   ;;  %v71_v37 = vld [vmem:[%s10241_s0 + $0xf8] sm:$0xff]  ;;  %v639_v39 = vld [vmem:[%s10242_s3 + $0x2a8] sm:$0xff]  ;;  %v638_v41 = vld [vmem:[%s10242_s3 + $0x2a0] sm:$0xff] }
  0x23   :  { %737 = vmatprep.subr.mxu0 %v567_v58  ;;  %990 = vmatprep.subr.mxu1 %v669_v8  ;;  %v651_v40 = vld [vmem:[%s10242_s3 + $0x308] sm:$0xff]  ;;  %v650_v42 = vld [vmem:[%s10242_s3 + $0x300] sm:$0xff]  ;;  %v636_v43 = vld [vmem:[%s10242_s3 + $0x290] sm:$0xff] }
  0x24   :  { %738 = vmatpush1.msra.mxu0 %v566_v62  ;;  %991 = vmatpush1.msra.mxu1 %v668_v10  ;;  %v635_v44 = vld [vmem:[%s10242_s3 + $0x288] sm:$0xff]  ;;  %v633_v45 = vld [vmem:[%s10242_s3 + $0x278] sm:$0xff]  ;;  %v632_v46 = vld [vmem:[%s10242_s3 + $0x270] sm:$0xff] }
  0x25   :  { %739 = vmatprep.subr.mxu0 %v564_v0  ;;  %992 = vmatprep.subr.mxu1 %v666_v12  ;;  %v630_v47 = vld [vmem:[%s10242_s3 + $0x260] sm:$0xff]  ;;  %v629_v48 = vld [vmem:[%s10242_s3 + $0x258] sm:$0xff]  ;;  %v627_v49 = vld [vmem:[%s10242_s3 + $0x248] sm:$0xff] }
  0x26   :  { %170 = vperm.xlu1 %4922, %v59_v52   ;;  %165 = vperm.xlu0 %4921, %v58_v53   ;;  %v626_v50 = vld [vmem:[%s10242_s3 + $0x240] sm:$0xff]  ;;  %v624_v51 = vld [vmem:[%s10242_s3 + $0x230] sm:$0xff]  ;;  %v623_v52 = vld [vmem:[%s10242_s3 + $0x228] sm:$0xff] }
  0x27   :  { %740 = vmatpush1.msra.mxu0 %v563_v2  ;;  %993 = vmatpush1.msra.mxu1 %v665_v16  ;;  %v621_v53 = vld [vmem:[%s10242_s3 + $0x218] sm:$0xff]  ;;  %v620_v54 = vld [vmem:[%s10242_s3 + $0x210] sm:$0xff]  ;;  %v618_v55 = vld [vmem:[%s10242_s3 + $0x200] sm:$0xff] }
  0x28   :  { %741 = vmatprep.subr.mxu0 %v561_v7  ;;  %994 = vmatprep.subr.mxu1 %v663_v18  ;;  %v617_v56 = vld [vmem:[%s10242_s3 + $0x1f8] sm:$0xff]  ;;  %v615_v57 = vld [vmem:[%s10242_s3 + $0x1e8] sm:$0xff]  ;;  %v614_v58 = vld [vmem:[%s10242_s3 + $0x1e0] sm:$0xff] }
  0x29   :  { %742 = vmatpush1.msra.mxu0 %v560_v9  ;;  %995 = vmatpush1.msra.mxu1 %v662_v20  ;;  %v612_v59 = vld [vmem:[%s10242_s3 + $0x1d0] sm:$0xff]  ;;  %v606_v63 = vld [vmem:[%s10242_s3 + $0x1a0] sm:$0xff]  ;;  %v605_v0 = vld [vmem:[%s10242_s3 + $0x198] sm:$0xff] }
  0x2a   :  { %180 = vperm.xlu1 %4922, %v61_v60   ;;  %175 = vperm.xlu0 %4921, %v60_v61   ;;  %v611_v60 = vld [vmem:[%s10242_s3 + $0x1c8] sm:$0xff]  ;;  %v609_v61 = vld [vmem:[%s10242_s3 + $0x1b8] sm:$0xff]  ;;  %v608_v62 = vld [vmem:[%s10242_s3 + $0x1b0] sm:$0xff] }
  0x2b   :  { %743 = vmatprep.subr.mxu0 %v558_v11  ;;  %996 = vmatprep.subr.mxu1 %v660_v24  ;;  %v603_v1 = vld [vmem:[%s10242_s3 + $0x188] sm:$0xff]  ;;  %v602_v2 = vld [vmem:[%s10242_s3 + $0x180] sm:$0xff]  ;;  %v697_v3 = vld [vmem:[%s10242_s3 + $0x478] sm:$0xff] }
  0x2c   :  { %744 = vmatpush1.msra.mxu0 %v557_v15  ;;  %997 = vmatpush1.msra.mxu1 %v659_v26  ;;  %v72_v8 = vld [vmem:[%s10243_s1] sm:$0x7] }
  0x2d   :  { %745 = vmatprep.subr.mxu0 %v555_v17  ;;  %998 = vmatprep.subr.mxu1 %v657_v28  ;;  %v345_v11 = vld [vmem:[%s10244_s2] sm:$0x7] }
  0x2e   :  { %190 = vperm.xlu1 %4922, %v63_v4   ;;  %185 = vperm.xlu0 %4921, %v62_v6   ;;  %v234_v4 = vlaneseq }
  0x2f   :  { %746 = vmatpush1.msra.mxu0 %v554_v19  ;;  %999 = vmatpush1.msra.mxu1 %v656_v32 }
  0x30   :  { %747 = vmatprep.subr.mxu0 %v648_v23  ;;  %1000 = vmatprep.subr.mxu1 %v654_v34  ;;  %v235_v6 = vshrl.u32 %v234_v4, 7 }
  0x31   :  { %748 = vmatpush2.msra.mxu0 %v647_v25  ;;  %1001 = vmatpush1.msra.mxu1 %v653_v36  ;;  %v601_v36 = vld [vmem:[%s10242_s3 + $0x178] sm:$0xff] }
  0x32   :  { %200 = vperm.xlu1 %4922, %v65_v13   ;;  %195 = vperm.xlu0 %4921, %v64_v14   ;;  %v5375_v7 = vsub.s32 0, %v235_v6  ;;  %v5380_v9 = vsub.s32 1, %v235_v6  ;;  %v5382_v10 = vsub.s32 2, %v235_v6  ;;  %v592_v6 = vld [vmem:[%s10242_s3 + $0x130] sm:$0xff] }
  0x33   :  { %749 = vmatprep.subr.mxu0 %v645_v27  ;;  %1002 = vmatprep.subr.mxu1 %v651_v40 }
  0x34   :  { %750 = vmatpush2.msra.mxu0 %v644_v31  ;;  %1003 = vmatpush1.msra.mxu1 %v650_v42  ;;  %10645 = vst [vmem:[#allocation3_spill] sm:$0xff] %v5375_v7  ;;  %10646 = vst [vmem:[#allocation4_spill] sm:$0xff] %v5380_v9  ;;  %v5388_v12 = vrot.slane %v72_v8, %v5375_v7  ;;  %v5391_v13 = vrot.slane %v72_v8, %v5380_v9 }
  0x35   :  { %751 = vmatprep.subr.mxu0 %v642_v33  ;;  %1229 = vmatprep.subr.mxu1 %v10292_v5  ;;  %10647 = vst [vmem:[#allocation5_spill] sm:$0xff] %v5382_v10  ;;  %v5394_v14 = vrot.slane %v72_v8, %v5382_v10  ;;  %v5397_v15 = vrot.slane %v345_v11, %v5375_v7  ;;  %v688_v8 = vld [vmem:[%s10242_s3 + $0x430] sm:$0xff] }
  0x36   :  { %210 = vperm.xlu1 %4922, %v67_v21   ;;  %205 = vperm.xlu0 %4921, %v66_v22   ;;  %v5400_v18 = vrot.slane %v345_v11, %v5380_v9  ;;  %v5403_v19 = vrot.slane %v345_v11, %v5382_v10 }
  0x37   :  { %752 = vmatpush2.msra.mxu0 %v641_v35 }
  0x38   :  { %753 = vmatprep.subr.mxu0 %v639_v39 }
  0x39   :  { %754 = vmatpush2.msra.mxu0 %v638_v41 }
  0x3a   :  { %220 = vperm.xlu1 %4922, %v69_v29   ;;  %215 = vperm.xlu0 %4921, %v68_v30  }
  0x3b   :  { %755 = vmatprep.subr.mxu0 %v636_v43  ;;  %v694_v43 = vld [vmem:[%s10242_s3 + $0x460] sm:$0xff] }
  0x3c   :  { %756 = vmatpush2.msra.mxu0 %v635_v44 }
  0x3d   :  { %757 = vmatprep.subr.mxu0 %v633_v45 }
  0x3e   :  { %230 = vperm.xlu1 %4922, %v71_v37   ;;  %225 = vperm.xlu0 %4921, %v70_v38  }
  0x3f   :  { %758 = vmatpush2.msra.mxu0 %v632_v46  ;;  %v598_v46 = vld [vmem:[%s10242_s3 + $0x160] sm:$0xff] }
  0x40   :  { %759 = vmatprep.subr.mxu0 %v630_v47 }
  0x41   :  { %760 = vmatpush2.msra.mxu0 %v629_v48 }
  0x42   :  { %761 = vmatprep.subr.mxu0 %v627_v49 }
  0x43   :  { %762 = vmatpush2.msra.mxu0 %v626_v50 }
  0x44   :  { %763 = vmatprep.subr.mxu0 %v624_v51 }
  0x45   :  { %764 = vmatpush2.msra.mxu0 %v623_v52 }
  0x46   :  { %765 = vmatprep.subr.mxu0 %v621_v53 }
  0x47   :  { %766 = vmatpush2.msra.mxu0 %v620_v54 }
  0x48   :  { %767 = vmatprep.subr.mxu0 %v618_v55 }
  0x49   :  { %768 = vmatpush2.msra.mxu0 %v617_v56 }
  0x4a   :  { %769 = vmatprep.subr.mxu0 %v615_v57 }
  0x4b   :  { %770 = vmatpush2.msra.mxu0 %v614_v58 }
  0x4c   :  { %771 = vmatprep.subr.mxu0 %v612_v59  ;;  %v595_v59 = vld [vmem:[%s10242_s3 + $0x148] sm:$0xff] }
  0x4d   :  { %772 = vmatpush2.msra.mxu0 %v611_v60  ;;  %v691_v60 = vld [vmem:[%s10242_s3 + $0x448] sm:$0xff] }
  0x4e   :  { %773 = vmatprep.subr.mxu0 %v609_v61 }
  0x4f   :  { %774 = vmatpush2.msra.mxu0 %v608_v62 }
  0x50   :  { %775 = vmatprep.subr.mxu0 %v606_v63 }
  0x51   :  { %776 = vmatpush2.msra.mxu0 %v605_v0 }
  0x52   :  { %777 = vmatprep.subr.mxu0 %v603_v1 }
  0x53   :  { %778 = vmatpush2.msra.mxu0 %v602_v2 }
  0x54   :  { %4679 = vmatprep.subr.mxu0 %v697_v3 }
  0x7d   :  { %v86_v16 = vpop.permute.xlu1 %85  ;;  %v76_v17 = vpop.permute.xlu0 %75 }
  0x7e   :  { %v256_v20 = vmul.f32 %v5391_v13, %v86_v16  ;;  %v249_v21 = vmul.f32 %v5388_v12, %v76_v17  ;;  %v250_v22 = vmul.f32 %v5391_v13, %v76_v17  ;;  %v251_v23 = vmul.f32 %v5394_v14, %v76_v17 }
  0x7f   :  { %v255_v28 = vmul.f32 %v5388_v12, %v86_v16  ;;  %v257_v29 = vmul.f32 %v5394_v14, %v86_v16 }
  0x80   :  { %v5410_v24 = vadd.f32 %v5397_v15, %v249_v21  ;;  %v5413_v26 = vadd.f32 %v5400_v18, %v250_v22  ;;  %v5416_v27 = vadd.f32 %v5403_v19, %v251_v23  ;;  %v5422_v31 = vadd.f32 %v5400_v18, %v256_v20 }
  0x81   :  { %v81_v25 = vpop.permute.xlu0 %80  ;;  %v91_v37 = vpop.permute.xlu1 %90  ;;  %v5456_v47 = vadd.f32 %v5403_v19, %v257_v29  ;;  %v5459_v48 = vadd.f32 %v5397_v15, %v255_v28 }
  0x82   :  { %v252_v30 = vmul.f32 %v5388_v12, %v81_v25  ;;  %v253_v32 = vmul.f32 %v5391_v13, %v81_v25  ;;  %v254_v33 = vmul.f32 %v5394_v14, %v81_v25  ;;  %v10286_v34 = vmax.f32 %v5413_v26, 0.0 }
  0x83   :  { %v10285_v35 = vmax.f32 %v5416_v27, 0.0  ;;  %v10284_v38 = vmax.f32 %v5410_v24, 0.0  ;;  %v259_v40 = vmul.f32 %v5391_v13, %v91_v37  ;;  %v10272_v50 = vmax.f32 %v5422_v31, 0.0 }
  0x84   :  { %v5433_v39 = vadd.f32 %v5397_v15, %v252_v30  ;;  %779 = vmatprep.mubr.f32.mxu0 %v10286_v34  ;;  %v5441_v41 = vadd.f32 %v5400_v18, %v253_v32  ;;  %v5444_v42 = vadd.f32 %v5403_v19, %v254_v33  ;;  %v258_v51 = vmul.f32 %v5388_v12, %v91_v37  ;;  %v589_v30 = vld [vmem:[%s10242_s3 + $0x118] sm:$0xff] }
  0x85   :  { %1037 = vmatmul.mubr.f32.vlgmr.msra.gmra.mxu1 %v10285_v35  ;;  %780 = vmatmul.mubr.f32.vlgmr.msra.gmra.mxu0 %v10284_v38  ;;  %v96_v44 = vpop.permute.xlu0 %95  ;;  %v260_v52 = vmul.f32 %v5394_v14, %v91_v37  ;;  %v5472_v55 = vadd.f32 %v5400_v18, %v259_v40  ;;  %v101_v56 = vpop.permute.xlu1 %100  ;;  %v10278_v57 = vmax.f32 %v5456_v47, 0.0  ;;  %v10267_v58 = vmax.f32 %v5459_v48, 0.0  ;;  %v685_v32 = vld [vmem:[%s10242_s3 + $0x418] sm:$0xff]  ;;  %v667_v35 = vld [vmem:[%s10242_s3 + $0x388] sm:$0xff] }
  0x86   :  { %1230 = vmatpush1.msra.mxu1 %v601_v36  ;;  %v10274_v45 = vmax.f32 %v5433_v39, 0.0  ;;  %4680 = vmatpush3.msra.mxu0 %v697_v3  ;;  %v10279_v49 = vmax.f32 %v5441_v41, 0.0  ;;  %v10282_v53 = vmax.f32 %v5444_v42, 0.0  ;;  %v262_v54 = vmul.f32 %v5391_v13, %v96_v44 }
  0x87   :  { %1042 = vmatprep.mubr.f32.mxu1 %v10292_v5  ;;  %1231 = vmatprep.subr.mxu1 %v10292_v5  ;;  %v261_v61 = vmul.f32 %v5388_v12, %v96_v44  ;;  %v263_v62 = vmul.f32 %v5394_v14, %v96_v44  ;;  %v5493_v63 = vadd.f32 %v5403_v19, %v260_v52  ;;  %v10262_v2 = vmax.f32 %v5472_v55, 0.0 }
  0x88   :  { %4681 = vmatprep.subr.mxu0 %v694_v43  ;;  %785 = vmatprep.mubr.f32.mxu0 %v10279_v49  ;;  %v5496_v0 = vadd.f32 %v5397_v15, %v258_v51  ;;  %v265_v1 = vmul.f32 %v5391_v13, %v101_v56  ;;  %v5501_v3 = vadd.f32 %v5400_v18, %v262_v54 }
  0x89   :  { %1232 = vmatpush1.msra.mxu1 %v598_v46  ;;  %786 = vmatmul.mubr.f32.gmra.mxu0 %v10274_v45  ;;  %v106_v4 = vpop.permute.xlu0 %105  ;;  %v264_v11 = vmul.f32 %v5388_v12, %v101_v56  ;;  %v266_v16 = vmul.f32 %v5394_v14, %v101_v56  ;;  %v10273_v17 = vmax.f32 %v5493_v63, 0.0  ;;  %v5522_v21 = vadd.f32 %v5403_v19, %v263_v62  ;;  %v111_v29 = vpop.permute.xlu1 %110  ;;  %v586_v56 = vld [vmem:[%s10242_s3 + $0x100] sm:$0xff] }
  0x8a   :  { %1043 = vmatmul.mubr.f32.gmra.mxu1 %v10282_v53  ;;  %791 = vmatprep.mubr.f32.mxu0 %v10272_v50  ;;  %v10260_v20 = vmax.f32 %v5496_v0, 0.0  ;;  %v5525_v22 = vadd.f32 %v5397_v15, %v261_v61  ;;  %v268_v23 = vmul.f32 %v5391_v13, %v106_v4  ;;  %v10258_v25 = vmax.f32 %v5501_v3, 0.0 }
  0x8b   :  { %1048 = vmatprep.mubr.f32.mxu1 %v10292_v5  ;;  %1233 = vmatprep.subr.mxu1 %v10292_v5  ;;  %v5530_v28 = vadd.f32 %v5400_v18, %v265_v1  ;;  %v267_v33 = vmul.f32 %v5388_v12, %v106_v4  ;;  %v269_v36 = vmul.f32 %v5394_v14, %v106_v4  ;;  %v10268_v37 = vmax.f32 %v5522_v21, 0.0 }
  0x8c   :  { %4682 = vmatpush3.msra.mxu0 %v694_v43  ;;  %1234 = vmatpush1.msra.mxu1 %v595_v59  ;;  %v10256_v40 = vmax.f32 %v5525_v22, 0.0  ;;  %v5551_v43 = vadd.f32 %v5403_v19, %v266_v16  ;;  %v5554_v44 = vadd.f32 %v5397_v15, %v264_v11  ;;  %v271_v46 = vmul.f32 %v5391_v13, %v111_v29  ;;  %v682_v59 = vld [vmem:[%s10242_s3 + $0x400] sm:$0xff] }
  0x8d   :  { %4683 = vmatprep.subr.mxu0 %v691_v60  ;;  %792 = vmatmul.mubr.f32.gmra.mxu0 %v10267_v58  ;;  %v10255_v51 = vmax.f32 %v5530_v28, 0.0  ;;  %v5559_v52 = vadd.f32 %v5400_v18, %v268_v23  ;;  %v116_v54 = vpop.permute.xlu0 %115  ;;  %v272_v61 = vmul.f32 %v5394_v14, %v111_v29  ;;  %v5580_v4 = vadd.f32 %v5403_v19, %v269_v36  ;;  %v121_v23 = vpop.permute.xlu1 %120  ;;  %v673_v58 = vld [vmem:[%s10242_s3 + $0x3b8] sm:$0xff] }
  0x8e   :  { %1049 = vmatmul.mubr.f32.gmra.mxu1 %v10278_v57  ;;  %797 = vmatprep.mubr.f32.mxu0 %v10262_v2  ;;  %v10266_v62 = vmax.f32 %v5551_v43, 0.0  ;;  %v10254_v1 = vmax.f32 %v5554_v44, 0.0  ;;  %v5588_v16 = vadd.f32 %v5400_v18, %v271_v46 }
  0x8f   :  { %1054 = vmatprep.mubr.f32.mxu1 %v10292_v5  ;;  %1235 = vmatprep.subr.mxu1 %v10292_v5  ;;  %v10253_v11 = vmax.f32 %v5559_v52, 0.0  ;;  %v5606_v46 = vadd.f32 %v5403_v19, %v272_v61  ;;  %v278_v61 = vmul.f32 %v5394_v14, %v121_v23 }
  0x90   :  { %4684 = vmatpush3.msra.mxu0 %v691_v60  ;;  %1236 = vmatpush1.msra.mxu1 %v592_v6  ;;  %v270_v60 = vmul.f32 %v5388_v12, %v111_v29  ;;  %v5583_v6 = vadd.f32 %v5397_v15, %v267_v33  ;;  %v583_v29 = vld [vmem:[%s10242_s3 + $0xe8] sm:$0xff]  ;;  %v10261_v33 = vmax.f32 %v5580_v4, 0.0 }
  0x91   :  { %4685 = vmatprep.subr.mxu0 %v688_v8  ;;  %798 = vmatmul.mubr.f32.gmra.mxu0 %v10260_v20  ;;  %v131_v2 = vpop.permute.xlu1 %130 }
  0x92   :  { %1055 = vmatmul.mubr.f32.gmra.mxu1 %v10273_v17  ;;  %803 = vmatprep.mubr.f32.mxu0 %v10258_v25  ;;  %v10257_v36 = vmax.f32 %v5583_v6, 0.0  ;;  %v670_v17 = vld [vmem:[%s10242_s3 + $0x3a0] sm:$0xff] }
  0x93   :  { %1060 = vmatprep.mubr.f32.mxu1 %v10292_v5  ;;  %1237 = vmatprep.subr.mxu1 %v10292_v5 }
  0x94   :  { %4686 = vmatpush3.msra.mxu0 %v688_v8  ;;  %1238 = vmatpush1.msra.mxu1 %v589_v30  ;;  %v274_v8 = vmul.f32 %v5391_v13, %v116_v54  ;;  %v273_v30 = vmul.f32 %v5388_v12, %v116_v54 }
  0x95   :  { %4687 = vmatprep.subr.mxu0 %v685_v32  ;;  %804 = vmatmul.mubr.f32.gmra.mxu0 %v10256_v40  ;;  %v126_v40 = vpop.permute.xlu0 %125  ;;  %v141_v45 = vpop.permute.xlu1 %140 }
  0x96   :  { %1061 = vmatmul.mubr.f32.gmra.mxu1 %v10268_v37  ;;  %809 = vmatprep.mubr.f32.mxu0 %v10255_v51  ;;  %v679_v51 = vld [vmem:[%s10242_s3 + $0x3e8] sm:$0xff]  ;;  %v5638_v25 = vadd.f32 %v5397_v15, %v273_v30  ;;  %v577_v30 = vld [vmem:[%s10242_s3 + $0xb8] sm:$0xff] }
  0x97   :  { %1066 = vmatprep.mubr.f32.mxu1 %v10292_v5  ;;  %1239 = vmatprep.subr.mxu1 %v10292_v5 }
  0x98   :  { %4688 = vmatpush3.msra.mxu0 %v685_v32  ;;  %1240 = vmatpush1.msra.mxu1 %v586_v56  ;;  %v275_v32 = vmul.f32 %v5394_v14, %v116_v54  ;;  %v5609_v56 = vadd.f32 %v5397_v15, %v270_v60  ;;  %v277_v54 = vmul.f32 %v5391_v13, %v121_v23 }
  0x99   :  { %4689 = vmatprep.subr.mxu0 %v682_v59  ;;  %810 = vmatmul.mubr.f32.gmra.mxu0 %v10254_v1  ;;  %v5614_v1 = vadd.f32 %v5400_v18, %v274_v8  ;;  %v276_v60 = vmul.f32 %v5388_v12, %v121_v23  ;;  %v10264_v8 = vmax.f32 %v5606_v46, 0.0  ;;  %v280_v23 = vmul.f32 %v5391_v13, %v126_v40  ;;  %v136_v37 = vpop.permute.xlu0 %135  ;;  %v151_v34 = vpop.permute.xlu1 %150 }
  0x9a   :  { %1067 = vmatmul.mubr.f32.gmra.mxu1 %v10266_v62  ;;  %815 = vmatprep.mubr.f32.mxu0 %v10253_v11  ;;  %v10259_v11 = vmax.f32 %v5588_v16, 0.0  ;;  %v5643_v20 = vadd.f32 %v5400_v18, %v277_v54  ;;  %v281_v54 = vmul.f32 %v5394_v14, %v126_v40 }
  0x9b   :  { %1072 = vmatprep.mubr.f32.mxu1 %v10292_v5  ;;  %1241 = vmatprep.subr.mxu1 %v10292_v5  ;;  %v5672_v62 = vadd.f32 %v5400_v18, %v280_v23  ;;  %v284_v23 = vmul.f32 %v5394_v14, %v131_v2 }
  0x9c   :  { %4690 = vmatpush3.msra.mxu0 %v682_v59  ;;  %1242 = vmatpush1.msra.mxu1 %v583_v29  ;;  %v580_v59 = vld [vmem:[%s10242_s3 + $0xd0] sm:$0xff]  ;;  %v10263_v29 = vmax.f32 %v5609_v56, 0.0 }
  0x9d   :  { %816 = vmatmul.mubr.f32.gmra.mxu0 %v10257_v36  ;;  %1243 = vmatprep.subr.mxu1 %v10292_v5  ;;  %v5635_v36 = vadd.f32 %v5403_v19, %v275_v32  ;;  %v279_v32 = vmul.f32 %v5388_v12, %v126_v40  ;;  %v283_v40 = vmul.f32 %v5391_v13, %v131_v2  ;;  %v146_v49 = vpop.permute.xlu0 %145  ;;  %v161_v9 = vpop.permute.xlu1 %160 }
  0x9e   :  { %1073 = vmatmul.mubr.f32.gmra.mxu1 %v10261_v33  ;;  %821 = vmatprep.mubr.f32.mxu0 %v10259_v11  ;;  %v10265_v11 = vmax.f32 %v5614_v1, 0.0  ;;  %v676_v33 = vld [vmem:[%s10242_s3 + $0x3d0] sm:$0xff]  ;;  %10649 = vst [vmem:[#allocation7_spill] sm:$0xff] %v5672_v62 }
  0x9f   :  { %1078 = vmatprep.mubr.f32.mxu1 %v10292_v5  ;;  %4691 = vmatprep.subr.mxu0 %v679_v51  ;;  %v5701_v50 = vadd.f32 %v5400_v18, %v283_v40  ;;  %v287_v40 = vmul.f32 %v5394_v14, %v136_v37 }
  0xa0   :  { %1244 = vmatpush1.msra.mxu1 %v580_v59  ;;  %4692 = vmatpush3.msra.mxu0 %v679_v51  ;;  %v10270_v51 = vmax.f32 %v5635_v36, 0.0  ;;  %v10269_v59 = vmax.f32 %v5638_v25, 0.0 }
  0xa1   :  { %822 = vmatmul.mubr.f32.gmra.mxu0 %v10263_v29  ;;  %1245 = vmatprep.subr.mxu1 %v10292_v5  ;;  %v5664_v29 = vadd.f32 %v5403_v19, %v278_v61  ;;  %v282_v61 = vmul.f32 %v5388_v12, %v131_v2  ;;  %v286_v2 = vmul.f32 %v5391_v13, %v136_v37 }
  0xa2   :  { %1079 = vmatmul.mubr.f32.gmra.mxu1 %v10264_v8  ;;  %827 = vmatprep.mubr.f32.mxu0 %v10265_v11  ;;  %v5667_v8 = vadd.f32 %v5397_v15, %v276_v60  ;;  %v10271_v11 = vmax.f32 %v5643_v20, 0.0  ;;  %v574_v60 = vld [vmem:[%s10242_s3 + $0xa0] sm:$0xff]  ;;  %10651 = vst [vmem:[#allocation9_spill] sm:$0xff] %v5701_v50 }
  0xa3   :  { %1084 = vmatprep.mubr.f32.mxu1 %v10292_v5  ;;  %4693 = vmatprep.subr.mxu0 %v676_v33  ;;  %v5730_v57 = vadd.f32 %v5400_v18, %v286_v2 }
  0xa4   :  { %10648 = vst [vmem:[#allocation6_spill] sm:$0xff] %v5667_v8  ;;  %1246 = vmatpush1.msra.mxu1 %v577_v30  ;;  %4694 = vmatpush3.msra.mxu0 %v676_v33  ;;  %v10276_v33 = vmax.f32 %v5664_v29, 0.0  ;;  %v10275_v30 = vmax.f32 %v5667_v8, 0.0 }
  0xa5   :  { %828 = vmatmul.mubr.f32.gmra.mxu0 %v10269_v59  ;;  %1247 = vmatprep.subr.mxu1 %v10292_v5  ;;  %v5693_v59 = vadd.f32 %v5403_v19, %v281_v54  ;;  %v285_v54 = vmul.f32 %v5388_v12, %v136_v37  ;;  %v289_v37 = vmul.f32 %v5391_v13, %v141_v45 }
  0xa6   :  { %1085 = vmatmul.mubr.f32.gmra.mxu1 %v10270_v51  ;;  %833 = vmatprep.mubr.f32.mxu0 %v10271_v11  ;;  %v5696_v51 = vadd.f32 %v5397_v15, %v279_v32  ;;  %v10277_v11 = vmax.f32 %v5672_v62, 0.0  ;;  %v571_v32 = vld [vmem:[%s10242_s3 + $0x88] sm:$0xff]  ;;  %10653 = vst [vmem:[#allocation11_spill] sm:$0xff] %v5730_v57 }
  0xa7   :  { %1090 = vmatprep.mubr.f32.mxu1 %v10292_v5  ;;  %4695 = vmatprep.subr.mxu0 %v673_v58  ;;  %v5751_v53 = vadd.f32 %v5397_v15, %v285_v54  ;;  %v5756_v38 = vadd.f32 %v5400_v18, %v289_v37  ;;  %v291_v54 = vmul.f32 %v5388_v12, %v146_v49 }
  0xa8   :  { %10650 = vst [vmem:[#allocation8_spill] sm:$0xff] %v5696_v51  ;;  %1248 = vmatpush1.msra.mxu1 %v574_v60  ;;  %4696 = vmatpush3.msra.mxu0 %v673_v58  ;;  %v10280_v58 = vmax.f32 %v5693_v59, 0.0  ;;  %v10281_v60 = vmax.f32 %v5696_v51, 0.0 }
  0xa9   :  { %834 = vmatmul.mubr.f32.gmra.mxu0 %v10275_v30  ;;  %1249 = vmatprep.subr.mxu1 %v10292_v5  ;;  %v5722_v30 = vadd.f32 %v5403_v19, %v284_v23  ;;  %v288_v23 = vmul.f32 %v5388_v12, %v141_v45  ;;  %10654 = vst [vmem:[#allocation12_spill] sm:$0xff] %v5751_v53  ;;  %10655 = vst [vmem:[#allocation13_spill] sm:$0xff] %v5756_v38 }
  0xaa   :  { %1091 = vmatmul.mubr.f32.gmra.mxu1 %v10276_v33  ;;  %839 = vmatprep.mubr.f32.mxu0 %v10277_v11  ;;  %v5725_v33 = vadd.f32 %v5397_v15, %v282_v61  ;;  %v10283_v11 = vmax.f32 %v5701_v50, 0.0  ;;  %v568_v61 = vld [vmem:[%s10242_s3 + $0x70] sm:$0xff]  ;;  %v5809_v7 = vadd.f32 %v5397_v15, %v291_v54 }
  0xab   :  { %1096 = vmatprep.mubr.f32.mxu1 %v10292_v5  ;;  %4697 = vmatprep.subr.mxu0 %v670_v17  ;;  %v10288_v2 = vmax.f32 %v5722_v30, 0.0 }
  0xac   :  { %10652 = vst [vmem:[#allocation10_spill] sm:$0xff] %v5725_v33  ;;  %1250 = vmatpush1.msra.mxu1 %v571_v32  ;;  %v290_v32 = vmul.f32 %v5394_v14, %v141_v45  ;;  %4698 = vmatpush3.msra.mxu0 %v670_v17  ;;  %v292_v45 = vmul.f32 %v5391_v13, %v146_v49  ;;  %v565_v17 = vld [vmem:[%s10242_s3 + $0x58] sm:$0xff]  ;;  %10660 = vst [vmem:[#allocation16_spill] sm:$0xff] %v5809_v7 }
  0xad   :  { %840 = vmatmul.mubr.f32.gmra.mxu0 %v10281_v60  ;;  %1251 = vmatprep.subr.mxu1 %v10292_v5  ;;  %v5748_v60 = vadd.f32 %v5403_v19, %v287_v40  ;;  %v293_v40 = vmul.f32 %v5394_v14, %v146_v49  ;;  %v295_v49 = vmul.f32 %v5391_v13, %v151_v34 }
  0xae   :  { %1097 = vmatmul.mubr.f32.gmra.mxu1 %v10280_v58  ;;  %845 = vmatprep.mubr.f32.mxu0 %v10283_v11  ;;  %v10287_v58 = vmax.f32 %v5725_v33, 0.0  ;;  %v10289_v11 = vmax.f32 %v5730_v57, 0.0  ;;  %v5785_v10 = vadd.f32 %v5400_v18, %v292_v45  ;;  %v296_v45 = vmul.f32 %v5394_v14, %v151_v34 }
  0xaf   :  { %1102 = vmatprep.mubr.f32.mxu1 %v10292_v5  ;;  %1252 = vmatpush1.msra.mxu1 %v568_v61  ;;  %v10296_v37 = vmax.f32 %v5748_v60, 0.0  ;;  %v156_v61 = vpop.permute.xlu0 %155 }
  0xb0   :  { %1253 = vmatprep.subr.mxu1 %v10292_v5  ;;  %4699 = vmatprep.subr.mxu0 %v667_v35  ;;  %10657 = vst [vmem:[#allocation15_spill] sm:$0xff] %v5785_v10 }
  0xb1   :  { %846 = vmatmul.mubr.f32.gmra.mxu0 %v10287_v58  ;;  %v5777_v58 = vadd.f32 %v5403_v19, %v290_v32  ;;  %1254 = vmatpush1.msra.mxu1 %v565_v17  ;;  %v562_v32 = vld [vmem:[%s10242_s3 + $0x40] sm:$0xff]  ;;  %v294_v17 = vmul.f32 %v5388_v12, %v151_v34  ;;  %v298_v34 = vmul.f32 %v5391_v13, %v156_v61 }
  0xb2   :  { %1103 = vmatmul.mubr.f32.gmra.mxu1 %v10288_v2  ;;  %851 = vmatprep.mubr.f32.mxu0 %v10289_v11  ;;  %v5780_v2 = vadd.f32 %v5397_v15, %v288_v23  ;;  %v10299_v11 = vmax.f32 %v5756_v38, 0.0  ;;  %v10658_v23 = vmax.f32 %v5751_v53, 0.0  ;;  %v5814_v38 = vadd.f32 %v5400_v18, %v295_v49 }
  0xb3   :  { %1108 = vmatprep.mubr.f32.mxu1 %v10292_v5  ;;  %4700 = vmatpush3.msra.mxu0 %v667_v35  ;;  %v664_v5 = vld [vmem:[%s10242_s3 + $0x370] sm:$0xff]  ;;  %v10659_v35 = vmov 0.0   ;;  %v299_v49 = vmul.f32 %v5394_v14, %v156_v61  ;;  %v166_v53 = vpop.permute.xlu0 %165 }
  0xb4   :  { %10656 = vst [vmem:[#allocation14_spill] sm:$0xff] %v5780_v2  ;;  %1255 = vmatprep.subr.mxu1 %v10659_v35  ;;  %4701 = vmatprep.subr.mxu0 %v664_v5  ;;  %10661 = vst [vmem:[#allocation17_spill] sm:$0xff] %v5814_v38  ;;  %v10663_v54 = vmax.f32 %v5780_v2, 0.0  ;;  %v5838_v2 = vadd.f32 %v5397_v15, %v294_v17  ;;  %v556_v17 = vld [vmem:[%s10242_s3 + $0x10] sm:$0xff] }
  0xb5   :  { %852 = vmatmul.mubr.f32.gmra.mxu0 %v10658_v23  ;;  %v5806_v23 = vadd.f32 %v5403_v19, %v293_v40  ;;  %1256 = vmatpush1.msra.mxu1 %v562_v32  ;;  %v10662_v40 = vmax.f32 %v5777_v58, 0.0  ;;  %v559_v32 = vld [vmem:[%s10242_s3 + $0x28] sm:$0xff] }
  0xb6   :  { %1109 = vmatmul.mubr.f32.gmra.mxu1 %v10296_v37  ;;  %857 = vmatprep.mubr.f32.mxu0 %v10299_v11  ;;  %v661_v37 = vld [vmem:[%s10242_s3 + $0x358] sm:$0xff]  ;;  %v297_v11 = vmul.f32 %v5388_v12, %v156_v61  ;;  %10665 = vst [vmem:[#allocation18_spill] sm:$0xff] %v5838_v2  ;;  %v301_v61 = vmul.f32 %v5391_v13, %v161_v9 }
  0xb7   :  { %1114 = vmatprep.mubr.f32.mxu1 %v10659_v35  ;;  %4702 = vmatpush3.msra.mxu0 %v664_v5  ;;  %v10664_v5 = vmax.f32 %v5785_v10, 0.0  ;;  %v5843_v10 = vadd.f32 %v5400_v18, %v298_v34  ;;  %v10667_v57 = vmax.f32 %v5806_v23, 0.0  ;;  %v302_v34 = vmul.f32 %v5394_v14, %v161_v9 }
  0xb8   :  { %1257 = vmatprep.subr.mxu1 %v10659_v35  ;;  %4703 = vmatprep.subr.mxu0 %v661_v37  ;;  %v5867_v33 = vadd.f32 %v5397_v15, %v297_v11  ;;  %v649_v11 = vld [vmem:[%s10242_s3 + $0x2f8] sm:$0xff] }
  0xb9   :  { %858 = vmatmul.mubr.f32.gmra.mxu0 %v10663_v54  ;;  %v5835_v54 = vadd.f32 %v5403_v19, %v296_v45  ;;  %1258 = vmatpush1.msra.mxu1 %v559_v32  ;;  %10666 = vst [vmem:[#allocation19_spill] sm:$0xff] %v5843_v10  ;;  %v658_v45 = vld [vmem:[%s10242_s3 + $0x340] sm:$0xff]  ;;  %v300_v32 = vmul.f32 %v5388_v12, %v161_v9 }
  0xba   :  { %1115 = vmatmul.mubr.f32.gmra.mxu1 %v10662_v40  ;;  %863 = vmatprep.mubr.f32.mxu0 %v10664_v5  ;;  %v10305_v40 = vmax.f32 %v5809_v7, 0.0  ;;  %v10308_v5 = vmax.f32 %v5814_v38, 0.0  ;;  %v5864_v7 = vadd.f32 %v5403_v19, %v299_v49  ;;  %10668 = vst [vmem:[#allocation20_spill] sm:$0xff] %v5867_v33  ;;  %v304_v9 = vmul.f32 %v5391_v13, %v166_v53 }
  0xbb   :  { %1120 = vmatprep.mubr.f32.mxu1 %v10659_v35  ;;  %1259 = vmatprep.subr.mxu1 %v10659_v35  ;;  %v5872_v38 = vadd.f32 %v5400_v18, %v301_v61  ;;  %v10670_v50 = vmax.f32 %v5835_v54, 0.0  ;;  %v303_v49 = vmul.f32 %v5388_v12, %v166_v53  ;;  %v305_v61 = vmul.f32 %v5394_v14, %v166_v53 }
  0xbc   :  { %4704 = vmatpush3.msra.mxu0 %v661_v37  ;;  %1260 = vmatpush1.msra.mxu1 %v556_v17  ;;  %v655_v37 = vld [vmem:[%s10242_s3 + $0x328] sm:$0xff]  ;;  %v10316_v17 = vmax.f32 %v5867_v33, 0.0  ;;  %v10673_v51 = vmax.f32 %v5864_v7, 0.0 }
  0xbd   :  { %864 = vmatmul.mubr.f32.gmra.mxu0 %v10305_v40  ;;  %v10311_v40 = vmax.f32 %v5838_v2, 0.0  ;;  %10669 = vst [vmem:[#allocation21_spill] sm:$0xff] %v5872_v38  ;;  %4705 = vmatprep.subr.mxu0 %v658_v45  ;;  %v5896_v2 = vadd.f32 %v5397_v15, %v300_v32  ;;  %v652_v32 = vld [vmem:[%s10242_s3 + $0x310] sm:$0xff]  ;;  %v5925_v33 = vadd.f32 %v5397_v15, %v303_v49 }
  0xbe   :  { %1121 = vmatmul.mubr.f32.gmra.mxu1 %v10667_v57  ;;  %869 = vmatprep.mubr.f32.mxu0 %v10308_v5  ;;  %v10313_v5 = vmax.f32 %v5843_v10, 0.0  ;;  %v171_v57 = vpop.permute.xlu1 %170  ;;  %v5901_v10 = vadd.f32 %v5400_v18, %v304_v9  ;;  %v1821_v49 = vld [vmem:[%s10245_s5 + $0x170] sm:$0xff] }
  0xbf   :  { %1126 = vmatprep.mubr.f32.mxu1 %v10659_v35  ;;  %1261 = vmatprep.subr.mxu1 %v10659_v35  ;;  %10671 = vst [vmem:[#allocation22_spill] sm:$0xff] %v5896_v2  ;;  %v307_v53 = vmul.f32 %v5391_v13, %v171_v57  ;;  %v308_v9 = vmul.f32 %v5394_v14, %v171_v57  ;;  %10674 = vst [vmem:[#allocation24_spill] sm:$0xff] %v5925_v33 }
  0xc0   :  { %4706 = vmatpush3.msra.mxu0 %v658_v45  ;;  %1262 = vmatpush2.msra.mxu1 %v649_v11  ;;  %10672 = vst [vmem:[#allocation23_spill] sm:$0xff] %v5901_v10  ;;  %v646_v45 = vld [vmem:[%s10242_s3 + $0x2e0] sm:$0xff]  ;;  %v10321_v11 = vmax.f32 %v5896_v2, 0.0 }
  0xc1   :  { %870 = vmatmul.mubr.f32.gmra.mxu0 %v10311_v40  ;;  %v5893_v40 = vadd.f32 %v5403_v19, %v302_v34  ;;  %4707 = vmatprep.subr.mxu0 %v655_v37  ;;  %v306_v34 = vmul.f32 %v5388_v12, %v171_v57 }
  0xc2   :  { %1127 = vmatmul.mubr.f32.gmra.mxu1 %v10670_v50  ;;  %875 = vmatprep.mubr.f32.mxu0 %v10313_v5  ;;  %v10318_v5 = vmax.f32 %v5872_v38, 0.0  ;;  %v176_v50 = vpop.permute.xlu0 %175  ;;  %v5930_v38 = vadd.f32 %v5400_v18, %v307_v53 }
  0xc3   :  { %1132 = vmatprep.mubr.f32.mxu1 %v10659_v35  ;;  %1263 = vmatprep.subr.mxu1 %v10659_v35  ;;  %v310_v57 = vmul.f32 %v5391_v13, %v176_v50  ;;  %v10676_v62 = vmax.f32 %v5893_v40, 0.0  ;;  %v311_v53 = vmul.f32 %v5394_v14, %v176_v50  ;;  %v5954_v2 = vadd.f32 %v5397_v15, %v306_v34 }
  0xc4   :  { %4708 = vmatpush3.msra.mxu0 %v655_v37  ;;  %1264 = vmatpush2.msra.mxu1 %v646_v45  ;;  %10675 = vst [vmem:[#allocation25_spill] sm:$0xff] %v5930_v38  ;;  %v643_v37 = vld [vmem:[%s10242_s3 + $0x2c8] sm:$0xff]  ;;  %v10326_v45 = vmax.f32 %v5925_v33, 0.0 }
  0xc5   :  { %876 = vmatmul.mubr.f32.gmra.mxu0 %v10316_v17  ;;  %v5922_v17 = vadd.f32 %v5403_v19, %v305_v61  ;;  %4709 = vmatprep.subr.mxu0 %v652_v32  ;;  %v309_v61 = vmul.f32 %v5388_v12, %v176_v50  ;;  %10677 = vst [vmem:[#allocation26_spill] sm:$0xff] %v5954_v2 }
  0xc6   :  { %1133 = vmatmul.mubr.f32.gmra.mxu1 %v10673_v51  ;;  %881 = vmatprep.mubr.f32.mxu0 %v10318_v5  ;;  %v10323_v5 = vmax.f32 %v5901_v10, 0.0  ;;  %v181_v51 = vpop.permute.xlu1 %180  ;;  %v5959_v10 = vadd.f32 %v5400_v18, %v310_v57 }
  0xc7   :  { %1138 = vmatprep.mubr.f32.mxu1 %v10659_v35  ;;  %1265 = vmatprep.subr.mxu1 %v10659_v35  ;;  %v313_v50 = vmul.f32 %v5391_v13, %v181_v51  ;;  %v10679_v8 = vmax.f32 %v5922_v17, 0.0  ;;  %v312_v34 = vmul.f32 %v5388_v12, %v181_v51 }
  0xc8   :  { %4710 = vmatpush3.msra.mxu0 %v652_v32  ;;  %1266 = vmatpush2.msra.mxu1 %v643_v37  ;;  %10678 = vst [vmem:[#allocation27_spill] sm:$0xff] %v5959_v10  ;;  %v640_v32 = vld [vmem:[%s10242_s3 + $0x2b0] sm:$0xff]  ;;  %v5977_v37 = vadd.f32 %v5403_v19, %v311_v53 }
  0xc9   :  { %882 = vmatmul.mubr.f32.gmra.mxu0 %v10321_v11  ;;  %v5951_v11 = vadd.f32 %v5403_v19, %v308_v9  ;;  %1936 = vmatprep.subr.mxu0 %v1821_v49  ;;  %v314_v9 = vmul.f32 %v5394_v14, %v181_v51  ;;  %v5980_v49 = vadd.f32 %v5397_v15, %v309_v61  ;;  %v10333_v51 = vmax.f32 %v5959_v10, 0.0  ;;  %v637_v61 = vld [vmem:[%s10242_s3 + $0x298] sm:$0xff] }
  0xca   :  { %1139 = vmatmul.mubr.f32.gmra.mxu1 %v10676_v62  ;;  %887 = vmatprep.mubr.f32.mxu0 %v10323_v5  ;;  %v10327_v5 = vmax.f32 %v5930_v38, 0.0  ;;  %v186_v62 = vpop.permute.xlu0 %185  ;;  %10680 = vst [vmem:[#allocation28_spill] sm:$0xff] %v5977_v37  ;;  %v191_v38 = vpop.permute.xlu1 %190 }
  0xcb   :  { %1144 = vmatprep.mubr.f32.mxu1 %v10659_v35  ;;  %v10329_v57 = vmax.f32 %v5951_v11, 0.0  ;;  %1267 = vmatprep.subr.mxu1 %v10659_v35  ;;  %10681 = vst [vmem:[#allocation29_spill] sm:$0xff] %v5980_v49  ;;  %v315_v53 = vmul.f32 %v5388_v12, %v186_v62  ;;  %v319_v33 = vmul.f32 %v5391_v13, %v191_v38 }
  0xcc   :  { %1268 = vmatpush2.msra.mxu1 %v640_v32  ;;  %v317_v32 = vmul.f32 %v5394_v14, %v186_v62 }
  0xcd   :  { %888 = vmatmul.mubr.f32.gmra.mxu0 %v10326_v45  ;;  %v316_v45 = vmul.f32 %v5391_v13, %v186_v62  ;;  %1269 = vmatprep.subr.mxu1 %v10659_v35 }
  0xce   :  { %1145 = vmatmul.mubr.f32.gmra.mxu1 %v10679_v8  ;;  %893 = vmatprep.mubr.f32.mxu0 %v10327_v5  ;;  %v10330_v8 = vmax.f32 %v5954_v2, 0.0  ;;  %v5985_v5 = vadd.f32 %v5400_v18, %v313_v50  ;;  %v10335_v50 = vmax.f32 %v5977_v37, 0.0  ;;  %v6006_v2 = vadd.f32 %v5397_v15, %v312_v34  ;;  %v196_v10 = vpop.permute.xlu0 %195  ;;  %v634_v34 = vld [vmem:[%s10242_s3 + $0x280] sm:$0xff] }
  0xcf   :  { %1150 = vmatprep.mubr.f32.mxu1 %v10659_v35  ;;  %1270 = vmatpush2.msra.mxu1 %v637_v61  ;;  %v320_v61 = vmul.f32 %v5394_v14, %v191_v38  ;;  %v322_v37 = vmul.f32 %v5391_v13, %v196_v10 }
  0xd0   :  { %10682 = vst [vmem:[#allocation30_spill] sm:$0xff] %v5985_v5  ;;  %10684 = vst [vmem:[#allocation32_spill] sm:$0xff] %v6006_v2  ;;  %v10339_v62 = vmax.f32 %v5985_v5, 0.0  ;;  %1271 = vmatprep.subr.mxu1 %v10659_v35  ;;  %v201_v5 = vpop.permute.xlu1 %200 }
  0xd1   :  { %894 = vmatmul.mubr.f32.gmra.mxu0 %v10330_v8  ;;  %v6003_v8 = vadd.f32 %v5403_v19, %v314_v9  ;;  %v318_v9 = vmul.f32 %v5388_v12, %v191_v38  ;;  %1272 = vmatpush2.msra.mxu1 %v634_v34  ;;  %v323_v34 = vmul.f32 %v5394_v14, %v196_v10 }
  0xd2   :  { %1151 = vmatmul.mubr.f32.gmra.mxu1 %v10329_v57  ;;  %899 = vmatprep.mubr.f32.mxu0 %v10333_v51  ;;  %v10336_v57 = vmax.f32 %v5980_v49, 0.0  ;;  %v6011_v51 = vadd.f32 %v5400_v18, %v316_v45  ;;  %v6032_v49 = vadd.f32 %v5397_v15, %v315_v53  ;;  %v631_v53 = vld [vmem:[%s10242_s3 + $0x268] sm:$0xff] }
  0xd3   :  { %1156 = vmatprep.mubr.f32.mxu1 %v10659_v35  ;;  %10683 = vst [vmem:[#allocation31_spill] sm:$0xff] %v6003_v8  ;;  %v10341_v45 = vmax.f32 %v6003_v8, 0.0  ;;  %1273 = vmatprep.subr.mxu1 %v10659_v35  ;;  %v325_v8 = vmul.f32 %v5391_v13, %v201_v5 }
  0xd4   :  { %10685 = vst [vmem:[#allocation33_spill] sm:$0xff] %v6011_v51  ;;  %10687 = vst [vmem:[#allocation35_spill] sm:$0xff] %v6032_v49  ;;  %v10345_v38 = vmax.f32 %v6011_v51, 0.0  ;;  %1274 = vmatpush2.msra.mxu1 %v631_v53  ;;  %v206_v51 = vpop.permute.xlu0 %205  ;;  %v326_v53 = vmul.f32 %v5394_v14, %v201_v5 }
  0xd5   :  { %900 = vmatmul.mubr.f32.gmra.mxu0 %v10336_v57  ;;  %v6029_v57 = vadd.f32 %v5403_v19, %v317_v32  ;;  %v321_v32 = vmul.f32 %v5388_v12, %v196_v10  ;;  %1275 = vmatprep.subr.mxu1 %v10659_v35 }
  0xd6   :  { %1157 = vmatmul.mubr.f32.gmra.mxu1 %v10335_v50  ;;  %905 = vmatprep.mubr.f32.mxu0 %v10339_v62  ;;  %v10342_v50 = vmax.f32 %v6006_v2, 0.0  ;;  %v6037_v62 = vadd.f32 %v5400_v18, %v319_v33  ;;  %v6058_v2 = vadd.f32 %v5397_v15, %v318_v9  ;;  %v628_v9 = vld [vmem:[%s10242_s3 + $0x250] sm:$0xff] }
  0xd7   :  { %1162 = vmatprep.mubr.f32.mxu1 %v10659_v35  ;;  %10686 = vst [vmem:[#allocation34_spill] sm:$0xff] %v6029_v57  ;;  %v10347_v33 = vmax.f32 %v6029_v57, 0.0  ;;  %v328_v57 = vmul.f32 %v5391_v13, %v206_v51  ;;  %1276 = vmatpush2.msra.mxu1 %v628_v9  ;;  %v329_v9 = vmul.f32 %v5394_v14, %v206_v51 }
  0xd8   :  { %10688 = vst [vmem:[#allocation36_spill] sm:$0xff] %v6037_v62  ;;  %10690 = vst [vmem:[#allocation38_spill] sm:$0xff] %v6058_v2  ;;  %v10351_v10 = vmax.f32 %v6037_v62, 0.0  ;;  %v211_v62 = vpop.permute.xlu1 %210  ;;  %1277 = vmatprep.subr.mxu1 %v10659_v35 }
  0xd9   :  { %906 = vmatmul.mubr.f32.gmra.mxu0 %v10342_v50  ;;  %v6055_v50 = vadd.f32 %v5403_v19, %v320_v61  ;;  %v324_v61 = vmul.f32 %v5388_v12, %v201_v5 }
  0xda   :  { %1163 = vmatmul.mubr.f32.gmra.mxu1 %v10341_v45  ;;  %911 = vmatprep.mubr.f32.mxu0 %v10345_v38  ;;  %v10348_v45 = vmax.f32 %v6032_v49, 0.0  ;;  %v6063_v38 = vadd.f32 %v5400_v18, %v322_v37  ;;  %v6084_v49 = vadd.f32 %v5397_v15, %v321_v32  ;;  %v625_v32 = vld [vmem:[%s10242_s3 + $0x238] sm:$0xff] }
  0xdb   :  { %1168 = vmatprep.mubr.f32.mxu1 %v10659_v35  ;;  %10689 = vst [vmem:[#allocation37_spill] sm:$0xff] %v6055_v50  ;;  %v10353_v37 = vmax.f32 %v6055_v50, 0.0  ;;  %v331_v50 = vmul.f32 %v5391_v13, %v211_v62  ;;  %1278 = vmatpush2.msra.mxu1 %v625_v32  ;;  %v332_v32 = vmul.f32 %v5394_v14, %v211_v62 }
  0xdc   :  { %10691 = vst [vmem:[#allocation39_spill] sm:$0xff] %v6063_v38  ;;  %10693 = vst [vmem:[#allocation41_spill] sm:$0xff] %v6084_v49  ;;  %v10357_v5 = vmax.f32 %v6063_v38, 0.0  ;;  %v216_v38 = vpop.permute.xlu0 %215  ;;  %1279 = vmatprep.subr.mxu1 %v10659_v35 }
  0xdd   :  { %912 = vmatmul.mubr.f32.gmra.mxu0 %v10348_v45  ;;  %v6081_v45 = vadd.f32 %v5403_v19, %v323_v34  ;;  %v327_v34 = vmul.f32 %v5388_v12, %v206_v51 }
  0xde   :  { %1169 = vmatmul.mubr.f32.gmra.mxu1 %v10347_v33  ;;  %917 = vmatprep.mubr.f32.mxu0 %v10351_v10  ;;  %v10354_v33 = vmax.f32 %v6058_v2, 0.0  ;;  %v6089_v10 = vadd.f32 %v5400_v18, %v325_v8  ;;  %v6110_v2 = vadd.f32 %v5397_v15, %v324_v61  ;;  %v622_v61 = vld [vmem:[%s10242_s3 + $0x220] sm:$0xff] }
  0xdf   :  { %1174 = vmatprep.mubr.f32.mxu1 %v10659_v35  ;;  %10692 = vst [vmem:[#allocation40_spill] sm:$0xff] %v6081_v45  ;;  %v10359_v8 = vmax.f32 %v6081_v45, 0.0  ;;  %v334_v45 = vmul.f32 %v5391_v13, %v216_v38  ;;  %1280 = vmatpush2.msra.mxu1 %v622_v61  ;;  %v335_v61 = vmul.f32 %v5394_v14, %v216_v38 }
  0xe0   :  { %10694 = vst [vmem:[#allocation42_spill] sm:$0xff] %v6089_v10  ;;  %10696 = vst [vmem:[#allocation44_spill] sm:$0xff] %v6110_v2  ;;  %v10363_v51 = vmax.f32 %v6089_v10, 0.0  ;;  %v221_v10 = vpop.permute.xlu1 %220  ;;  %1281 = vmatprep.subr.mxu1 %v10659_v35 }
  0xe1   :  { %918 = vmatmul.mubr.f32.gmra.mxu0 %v10354_v33  ;;  %v6107_v33 = vadd.f32 %v5403_v19, %v326_v53  ;;  %v330_v53 = vmul.f32 %v5388_v12, %v211_v62 }
  0xe2   :  { %1175 = vmatmul.mubr.f32.gmra.mxu1 %v10353_v37  ;;  %923 = vmatprep.mubr.f32.mxu0 %v10357_v5  ;;  %v10360_v37 = vmax.f32 %v6084_v49, 0.0  ;;  %v6115_v5 = vadd.f32 %v5400_v18, %v328_v57  ;;  %v6136_v49 = vadd.f32 %v5397_v15, %v327_v34  ;;  %v619_v34 = vld [vmem:[%s10242_s3 + $0x208] sm:$0xff] }
  0xe3   :  { %1180 = vmatprep.mubr.f32.mxu1 %v10659_v35  ;;  %10695 = vst [vmem:[#allocation43_spill] sm:$0xff] %v6107_v33  ;;  %v10365_v57 = vmax.f32 %v6107_v33, 0.0  ;;  %v337_v33 = vmul.f32 %v5391_v13, %v221_v10  ;;  %1282 = vmatpush2.msra.mxu1 %v619_v34  ;;  %v338_v34 = vmul.f32 %v5394_v14, %v221_v10 }
  0xe4   :  { %10697 = vst [vmem:[#allocation45_spill] sm:$0xff] %v6115_v5  ;;  %10699 = vst [vmem:[#allocation47_spill] sm:$0xff] %v6136_v49  ;;  %v10369_v62 = vmax.f32 %v6115_v5, 0.0  ;;  %v226_v5 = vpop.permute.xlu0 %225  ;;  %1283 = vmatprep.subr.mxu1 %v10659_v35 }
  0xe5   :  { %924 = vmatmul.mubr.f32.gmra.mxu0 %v10360_v37  ;;  %v6133_v37 = vadd.f32 %v5403_v19, %v329_v9  ;;  %v333_v9 = vmul.f32 %v5388_v12, %v216_v38 }
  0xe6   :  { %1181 = vmatmul.mubr.f32.gmra.mxu1 %v10359_v8  ;;  %929 = vmatprep.mubr.f32.mxu0 %v10363_v51  ;;  %v10366_v8 = vmax.f32 %v6110_v2, 0.0  ;;  %v6141_v51 = vadd.f32 %v5400_v18, %v331_v50  ;;  %v6162_v2 = vadd.f32 %v5397_v15, %v330_v53  ;;  %v616_v53 = vld [vmem:[%s10242_s3 + $0x1f0] sm:$0xff] }
  0xe7   :  { %1186 = vmatprep.mubr.f32.mxu1 %v10659_v35  ;;  %10698 = vst [vmem:[#allocation46_spill] sm:$0xff] %v6133_v37  ;;  %v10371_v50 = vmax.f32 %v6133_v37, 0.0  ;;  %v340_v37 = vmul.f32 %v5391_v13, %v226_v5  ;;  %1284 = vmatpush2.msra.mxu1 %v616_v53  ;;  %v341_v53 = vmul.f32 %v5394_v14, %v226_v5 }
  0xe8   :  { %10700 = vst [vmem:[#allocation48_spill] sm:$0xff] %v6141_v51  ;;  %10702 = vst [vmem:[#allocation50_spill] sm:$0xff] %v6162_v2  ;;  %v10375_v38 = vmax.f32 %v6141_v51, 0.0  ;;  %v231_v51 = vpop.permute.xlu1 %230  ;;  %1285 = vmatprep.subr.mxu1 %v10659_v35 }
  0xe9   :  { %930 = vmatmul.mubr.f32.gmra.mxu0 %v10366_v8  ;;  %v6159_v8 = vadd.f32 %v5403_v19, %v332_v32  ;;  %v336_v32 = vmul.f32 %v5388_v12, %v221_v10 }
  0xea   :  { %1187 = vmatmul.mubr.f32.gmra.mxu1 %v10365_v57  ;;  %935 = vmatprep.mubr.f32.mxu0 %v10369_v62  ;;  %v10372_v57 = vmax.f32 %v6136_v49, 0.0  ;;  %v6167_v62 = vadd.f32 %v5400_v18, %v334_v45  ;;  %v6188_v49 = vadd.f32 %v5397_v15, %v333_v9  ;;  %v613_v9 = vld [vmem:[%s10242_s3 + $0x1d8] sm:$0xff] }
  0xeb   :  { %1192 = vmatprep.mubr.f32.mxu1 %v10659_v35  ;;  %10701 = vst [vmem:[#allocation49_spill] sm:$0xff] %v6159_v8  ;;  %v10377_v45 = vmax.f32 %v6159_v8, 0.0  ;;  %v343_v8 = vmul.f32 %v5391_v13, %v231_v51  ;;  %1286 = vmatpush2.msra.mxu1 %v613_v9  ;;  %v344_v13 = vmul.f32 %v5394_v14, %v231_v51 }
  0xec   :  { %v10381_v10 = vmax.f32 %v6167_v62, 0.0  ;;  %1287 = vmatprep.subr.mxu1 %v10659_v35 }
  0xed   :  { %936 = vmatmul.mubr.f32.gmra.mxu0 %v10372_v57  ;;  %v6185_v57 = vadd.f32 %v5403_v19, %v335_v61  ;;  %v339_v61 = vmul.f32 %v5388_v12, %v226_v5  ;;  %v6244_v14 = vadd.f32 %v5400_v18, %v343_v8  ;;  %v6260_v8 = vadd.f32 %v5403_v19, %v344_v13 }
  0xee   :  { %1193 = vmatmul.mubr.f32.gmra.mxu1 %v10371_v50  ;;  %941 = vmatprep.mubr.f32.mxu0 %v10375_v38  ;;  %v10378_v50 = vmax.f32 %v6162_v2, 0.0  ;;  %v6193_v38 = vadd.f32 %v5400_v18, %v337_v33  ;;  %v6214_v2 = vadd.f32 %v5397_v15, %v336_v32  ;;  %v342_v32 = vmul.f32 %v5388_v12, %v231_v51  ;;  %v607_v51 = vld [vmem:[%s10242_s3 + $0x1a8] sm:$0xff] }
  0xef   :  { %1198 = vmatprep.mubr.f32.mxu1 %v10659_v35  ;;  %v10383_v33 = vmax.f32 %v6185_v57, 0.0  ;;  %v10703_v13 = vmax.f32 %v5413_v26, 0.0  ;;  %v1818_v26 = vld [vmem:[%s10245_s5 + $0x158] sm:$0xff] }
  0xf0   :  { %v546_v5 = vmax.f32 %v6193_v38, 0.0  ;;  %v545_v9 = vmax.f32 %v6214_v2, 0.0 }
  0xf1   :  { %942 = vmatmul.mubr.f32.gmra.mxu0 %v10378_v50  ;;  %v6211_v50 = vadd.f32 %v5403_v19, %v338_v34  ;;  %v610_v34 = vld [vmem:[%s10242_s3 + $0x1c0] sm:$0xff] }
  0xf2   :  { %1199 = vmatmul.mubr.f32.gmra.mxu1 %v10377_v45  ;;  %947 = vmatprep.mubr.f32.mxu0 %v10381_v10  ;;  %v10382_v45 = vmax.f32 %v6188_v49, 0.0  ;;  %v6219_v10 = vadd.f32 %v5400_v18, %v340_v37 }
  0xf3   :  { %1204 = vmatprep.mubr.f32.mxu1 %v10659_v35  ;;  %v547_v37 = vmax.f32 %v6211_v50, 0.0  ;;  %1288 = vmatpush2.msra.mxu1 %v610_v34  ;;  %v10385_v34 = vmax.f32 %v6244_v14, 0.0  ;;  %v10783_v50 = vld [vmem:[#allocation18_spill] sm:$0xff] }
  0xf4   :  { %v10384_v12 = vmax.f32 %v6219_v10, 0.0  ;;  %1289 = vmatprep.subr.mxu1 %v10659_v35 }
  0xf5   :  { %948 = vmatmul.mubr.f32.gmra.mxu0 %v10382_v45  ;;  %v6237_v45 = vadd.f32 %v5403_v19, %v341_v53  ;;  %v6263_v53 = vadd.f32 %v5397_v15, %v342_v32  ;;  %1290 = vmatpush2.msra.mxu1 %v607_v51  ;;  %v1917_v32 = vld [vmem:[%s10245_s5 + $0x470] sm:$0xff]  ;;  %v10704_v51 = vmax.f32 %v5416_v27, 0.0  ;;  %v1914_v27 = vld [vmem:[%s10245_s5 + $0x458] sm:$0xff] }
  0xf6   :  { %1205 = vmatmul.mubr.f32.gmra.mxu1 %v10383_v33  ;;  %953 = vmatprep.mubr.f32.mxu0 %v546_v5  ;;  %v6240_v33 = vadd.f32 %v5397_v15, %v339_v61  ;;  %v553_v15 = vmax.f32 %v6260_v8, 0.0  ;;  %v1895_v8 = vld [vmem:[%s10245_s5 + $0x3c0] sm:$0xff] }
  0xf7   :  { %1210 = vmatprep.mubr.f32.mxu1 %v10659_v35  ;;  %v550_v61 = vmax.f32 %v6237_v45, 0.0  ;;  %1291 = vmatprep.subr.mxu1 %v10659_v35  ;;  %v10387_v19 = vmax.f32 %v6263_v53, 0.0  ;;  %v1896_v45 = vld [vmem:[%s10245_s5 + $0x3c8] sm:$0xff] }
  0xf8   :  { %v10386_v18 = vmax.f32 %v6240_v33, 0.0 }
  0xf9   :  { %954 = vmatmul.mubr.f32.gmra.mxu0 %v545_v9 }
  0xfa   :  { %1211 = vmatmul.mubr.f32.gmra.mxu1 %v547_v37  ;;  %959 = vmatprep.mubr.f32.mxu0 %v10384_v12  ;;  %v604_v12 = vld [vmem:[%s10242_s3 + $0x190] sm:$0xff] }
  0xfb   :  { %1216 = vmatprep.mubr.f32.mxu1 %v10659_v35  ;;  %1292 = vmatpush2.msra.mxu1 %v604_v12  ;;  %v1820_v12 = vld [vmem:[%s10245_s5 + $0x168] sm:$0xff] }
  0xfc   :  { %2193 = vmatprep.subr.mxu1 %v1917_v32  ;;  %v10707_v32 = vmax.f32 %v5441_v41, 0.0  ;;  %v10710_v41 = vmax.f32 %v5493_v63, 0.0  ;;  %v1910_v63 = vld [vmem:[%s10245_s5 + $0x438] sm:$0xff] }
  0xfd   :  { %960 = vmatmul.mubr.f32.gmra.mxu0 %v10386_v18  ;;  %v10705_v18 = vmax.f32 %v5410_v24, 0.0  ;;  %v1817_v24 = vld [vmem:[%s10245_s5 + $0x150] sm:$0xff] }
  0xfe   :  { %1217 = vmatmul.mubr.f32.gmra.mxu1 %v550_v61  ;;  %965 = vmatprep.mubr.f32.mxu0 %v10385_v34  ;;  %v1916_v34 = vld [vmem:[%s10245_s5 + $0x468] sm:$0xff] }
  0xff   :  { %1222 = vmatprep.mubr.f32.mxu1 %v10659_v35 }
 0x101   :  { %966 = vmatmul.mubr.f32.gmra.mxu0 %v10387_v19  ;;  %v10706_v19 = vmax.f32 %v5444_v42, 0.0  ;;  %v1913_v42 = vld [vmem:[%s10245_s5 + $0x450] sm:$0xff] }
 0x102   :  { %1223 = vmatmul.mubr.f32.gmra.mxu1 %v553_v15  ;;  %4711 = vmatprep.mubr.f32.mxu0 %v10704_v51  ;;  %v10712_v51 = vmax.f32 %v5522_v21, 0.0  ;;  %v1812_v21 = vld [vmem:[%s10245_s5 + $0x128] sm:$0xff] }
 0x103   :  { %1293 = vmatprep.mubr.f32.mxu1 %v10703_v13  ;;  %v10708_v13 = vmax.f32 %v5456_v47, 0.0  ;;  %v1815_v47 = vld [vmem:[%s10245_s5 + $0x140] sm:$0xff] }
 0x105   :  { %4712 = vmatmul.mubr.f32.vlgmr.msra.gmra.mxu0 %v10706_v19  ;;  %v10711_v19 = vmax.f32 %v5422_v31, 0.0  ;;  %v10714_v31 = vmax.f32 %v5551_v43, 0.0  ;;  %v1907_v43 = vld [vmem:[%s10245_s5 + $0x420] sm:$0xff] }
 0x106   :  { %1294 = vmatmul.mubr.f32.vlgmr.msra.gmra.mxu1 %v10705_v18  ;;  %4714 = vmatprep.mubr.f32.mxu0 %v10708_v13  ;;  %v10709_v18 = vmax.f32 %v5433_v39, 0.0  ;;  %v1814_v39 = vld [vmem:[%s10245_s5 + $0x138] sm:$0xff]  ;;  %v10717_v13 = vmax.f32 %v5496_v0, 0.0  ;;  %v1808_v0 = vld [vmem:[%s10245_s5 + $0x108] sm:$0xff] }
 0x107   :  { %1298 = vmatprep.mubr.f32.mxu1 %v10707_v32  ;;  %1937 = vmatpush1.msra.mxu0 %v1820_v12  ;;  %v10713_v12 = vmax.f32 %v5459_v48, 0.0  ;;  %v10716_v32 = vmax.f32 %v5580_v4, 0.0  ;;  %v1811_v48 = vld [vmem:[%s10245_s5 + $0x120] sm:$0xff]  ;;  %v1809_v4 = vld [vmem:[%s10245_s5 + $0x110] sm:$0xff] }
 0x108   :  { %2194 = vmatpush1.msra.mxu1 %v1916_v34  ;;  %1938 = vmatprep.subr.mxu0 %v1818_v26  ;;  %v1911_v34 = vld [vmem:[%s10245_s5 + $0x440] sm:$0xff]  ;;  %v1908_v26 = vld [vmem:[%s10245_s5 + $0x428] sm:$0xff] }
 0x109   :  { %2195 = vmatprep.subr.mxu1 %v1914_v27  ;;  %4715 = vmatmul.mubr.f32.gmra.mxu0 %v10710_v41  ;;  %v10715_v27 = vmax.f32 %v5472_v55, 0.0  ;;  %v10718_v55 = vmax.f32 %v5606_v46, 0.0  ;;  %v1904_v46 = vld [vmem:[%s10245_s5 + $0x408] sm:$0xff]  ;;  %v10721_v41 = vmax.f32 %v5525_v22, 0.0  ;;  %v1805_v22 = vld [vmem:[%s10245_s5 + $0xf0] sm:$0xff] }
 0x10a   :  { %1299 = vmatmul.mubr.f32.gmra.mxu1 %v10709_v18  ;;  %4717 = vmatprep.mubr.f32.mxu0 %v10712_v51  ;;  %v10720_v18 = vmax.f32 %v5635_v36, 0.0  ;;  %v1806_v36 = vld [vmem:[%s10245_s5 + $0xf8] sm:$0xff]  ;;  %v10725_v51 = vmax.f32 %v5554_v44, 0.0 }
 0x10b   :  { %1303 = vmatprep.mubr.f32.mxu1 %v10711_v19  ;;  %1939 = vmatpush1.msra.mxu0 %v1817_v24  ;;  %v1905_v24 = vld [vmem:[%s10245_s5 + $0x410] sm:$0xff]  ;;  %v10724_v19 = vmax.f32 %v5693_v59, 0.0  ;;  %v1803_v59 = vld [vmem:[%s10245_s5 + $0xe0] sm:$0xff]  ;;  %v1802_v44 = vld [vmem:[%s10245_s5 + $0xd8] sm:$0xff] }
 0x10c   :  { %2196 = vmatpush1.msra.mxu1 %v1913_v42  ;;  %1940 = vmatprep.subr.mxu0 %v1815_v47  ;;  %v10719_v42 = vmax.f32 %v5501_v3, 0.0  ;;  %v10722_v3 = vmax.f32 %v5664_v29, 0.0  ;;  %v1902_v47 = vld [vmem:[%s10245_s5 + $0x3f8] sm:$0xff]  ;;  %v1901_v29 = vld [vmem:[%s10245_s5 + $0x3f0] sm:$0xff] }
 0x10d   :  { %2197 = vmatprep.subr.mxu1 %v1911_v34  ;;  %4718 = vmatmul.mubr.f32.gmra.mxu0 %v10714_v31  ;;  %v10723_v34 = vmax.f32 %v5530_v28, 0.0  ;;  %v10726_v28 = vmax.f32 %v5722_v30, 0.0  ;;  %v1800_v30 = vld [vmem:[%s10245_s5 + $0xc8] sm:$0xff]  ;;  %v10729_v31 = vmax.f32 %v5583_v6, 0.0  ;;  %v1797_v6 = vld [vmem:[%s10245_s5 + $0xb0] sm:$0xff] }
 0x10e   :  { %1304 = vmatmul.mubr.f32.gmra.mxu1 %v10713_v12  ;;  %4720 = vmatprep.mubr.f32.mxu0 %v10716_v32  ;;  %v10728_v12 = vmax.f32 %v5748_v60, 0.0  ;;  %v1898_v60 = vld [vmem:[%s10245_s5 + $0x3d8] sm:$0xff]  ;;  %v1796_v32 = vld [vmem:[%s10245_s5 + $0xa8] sm:$0xff] }
 0x10f   :  { %1308 = vmatprep.mubr.f32.mxu1 %v10715_v27  ;;  %1941 = vmatpush1.msra.mxu0 %v1814_v39  ;;  %v1899_v39 = vld [vmem:[%s10245_s5 + $0x3e0] sm:$0xff]  ;;  %v10732_v27 = vmax.f32 %v5806_v23, 0.0  ;;  %v10734_v23 = vmax.f32 %v5614_v1, 0.0  ;;  %v1788_v1 = vld [vmem:[%s10245_s5 + $0x68] sm:$0xff] }
 0x110   :  { %2198 = vmatpush1.msra.mxu1 %v1910_v63  ;;  %1942 = vmatprep.subr.mxu0 %v1812_v21  ;;  %v10727_v63 = vmax.f32 %v5559_v52, 0.0  ;;  %v1799_v52 = vld [vmem:[%s10245_s5 + $0xc0] sm:$0xff]  ;;  %v10730_v21 = vmax.f32 %v5588_v16, 0.0  ;;  %v1794_v16 = vld [vmem:[%s10245_s5 + $0x98] sm:$0xff] }
 0x111   :  { %2199 = vmatprep.subr.mxu1 %v1908_v26  ;;  %4721 = vmatmul.mubr.f32.gmra.mxu0 %v10718_v55  ;;  %v10731_v26 = vmax.f32 %v5777_v58, 0.0  ;;  %v10733_v58 = vmax.f32 %v5609_v56, 0.0  ;;  %v1790_v56 = vld [vmem:[%s10245_s5 + $0x78] sm:$0xff]  ;;  %v10736_v55 = vmax.f32 %v5864_v7, 0.0  ;;  %v1785_v7 = vld [vmem:[%s10245_s5 + $0x50] sm:$0xff] }
 0x112   :  { %1309 = vmatmul.mubr.f32.gmra.mxu1 %v10717_v13  ;;  %4723 = vmatprep.mubr.f32.mxu0 %v10720_v18  ;;  %v10735_v13 = vmax.f32 %v5835_v54, 0.0  ;;  %v1787_v54 = vld [vmem:[%s10245_s5 + $0x60] sm:$0xff]  ;;  %v10740_v18 = vmax.f32 %v5922_v17, 0.0 }
 0x113   :  { %1313 = vmatprep.mubr.f32.mxu1 %v10719_v42  ;;  %1943 = vmatpush1.msra.mxu0 %v1811_v48  ;;  %v1793_v48 = vld [vmem:[%s10245_s5 + $0x90] sm:$0xff]  ;;  %v10739_v42 = vmax.f32 %v5893_v40, 0.0  ;;  %v1779_v17 = vld [vmem:[%s10245_s5 + $0x20] sm:$0xff] }
 0x114   :  { %2200 = vmatpush1.msra.mxu1 %v1907_v43  ;;  %1944 = vmatprep.subr.mxu0 %v1809_v4  ;;  %v1791_v43 = vld [vmem:[%s10245_s5 + $0x80] sm:$0xff]  ;;  %v10737_v4 = vmax.f32 %v5638_v25, 0.0  ;;  %v1784_v25 = vld [vmem:[%s10245_s5 + $0x48] sm:$0xff]  ;;  %v1781_v40 = vld [vmem:[%s10245_s5 + $0x30] sm:$0xff] }
 0x115   :  { %2201 = vmatprep.subr.mxu1 %v1905_v24  ;;  %4724 = vmatmul.mubr.f32.gmra.mxu0 %v10722_v3  ;;  %v10738_v24 = vmax.f32 %v5643_v20, 0.0  ;;  %v1782_v20 = vld [vmem:[%s10245_s5 + $0x38] sm:$0xff] }
 0x116   :  { %1314 = vmatmul.mubr.f32.gmra.mxu1 %v10721_v41  ;;  %4726 = vmatprep.mubr.f32.mxu0 %v10724_v19  ;;  %v10743_v41 = vld [vmem:[#allocation7_spill] sm:$0xff] }
 0x117   :  { %1318 = vmatprep.mubr.f32.mxu1 %v10723_v34  ;;  %1945 = vmatpush1.msra.mxu0 %v1808_v0  ;;  %v10741_v0 = vld [vmem:[#allocation6_spill] sm:$0xff]  ;;  %v10744_v3 = vmax.f32 %v10743_v41, 0.0  ;;  %v10746_v34 = vld [vmem:[#allocation28_spill] sm:$0xff] }
 0x118   :  { %2202 = vmatpush1.msra.mxu1 %v1904_v46  ;;  %1946 = vmatprep.subr.mxu0 %v1806_v36  ;;  %v10742_v46 = vmax.f32 %v10741_v0, 0.0  ;;  %v10745_v36 = vmax.f32 %v5951_v11, 0.0  ;;  %v10747_v19 = vmax.f32 %v10746_v34, 0.0  ;;  %v1775_v11 = vld [vmem:[%s10245_s5] sm:$0xff]  ;;  %v1854_v0 = vld [vmem:[%s10245_s5 + $0x278] sm:$0xff]  ;;  %v1853_v41 = vld [vmem:[%s10245_s5 + $0x270] sm:$0xff] }
 0x119   :  { %2203 = vmatprep.subr.mxu1 %v1902_v47  ;;  %4727 = vmatmul.mubr.f32.gmra.mxu0 %v10726_v28  ;;  %v1778_v47 = vld [vmem:[%s10245_s5 + $0x18] sm:$0xff] }
 0x11a   :  { %1319 = vmatmul.mubr.f32.gmra.mxu1 %v10725_v51  ;;  %4729 = vmatprep.mubr.f32.mxu0 %v10728_v12  ;;  %v10750_v28 = vld [vmem:[#allocation9_spill] sm:$0xff] }
 0x11b   :  { %1323 = vmatprep.mubr.f32.mxu1 %v10727_v63  ;;  %1947 = vmatpush1.msra.mxu0 %v1805_v22  ;;  %v1776_v22 = vld [vmem:[%s10245_s5 + $0x8] sm:$0xff] }
 0x11c   :  { %2204 = vmatpush1.msra.mxu1 %v1901_v29  ;;  %1948 = vmatprep.subr.mxu0 %v1803_v59  ;;  %v10748_v29 = vld [vmem:[#allocation8_spill] sm:$0xff]  ;;  %v10751_v59 = vmax.f32 %v10750_v28, 0.0  ;;  %v10752_v63 = vld [vmem:[#allocation31_spill] sm:$0xff] }
 0x11d   :  { %2205 = vmatprep.subr.mxu1 %v1899_v39  ;;  %1949 = vmatpush1.msra.mxu0 %v1802_v44  ;;  %v10749_v51 = vmax.f32 %v10748_v29, 0.0  ;;  %v1869_v39 = vld [vmem:[%s10245_s5 + $0x2f0] sm:$0xff]  ;;  %v10753_v12 = vmax.f32 %v10752_v63, 0.0  ;;  %v1868_v44 = vld [vmem:[%s10245_s5 + $0x2e8] sm:$0xff]  ;;  %v1847_v28 = vld [vmem:[%s10245_s5 + $0x240] sm:$0xff] }
 0x11e   :  { %1324 = vmatmul.mubr.f32.gmra.mxu1 %v10729_v31  ;;  %4730 = vmatmul.mubr.f32.gmra.mxu0 %v10731_v26  ;;  %v1865_v26 = vld [vmem:[%s10245_s5 + $0x2d0] sm:$0xff]  ;;  %v1848_v29 = vld [vmem:[%s10245_s5 + $0x248] sm:$0xff] }
 0x11f   :  { %1328 = vmatprep.mubr.f32.mxu1 %v10730_v21  ;;  %1950 = vmatprep.subr.mxu0 %v1800_v30  ;;  %v10754_v30 = vld [vmem:[#allocation34_spill] sm:$0xff]  ;;  %v1844_v63 = vld [vmem:[%s10245_s5 + $0x228] sm:$0xff] }
 0x120   :  { %4732 = vmatprep.mubr.f32.mxu0 %v10732_v27  ;;  %1951 = vmatpush1.msra.mxu0 %v1799_v52  ;;  %v10755_v31 = vmax.f32 %v10754_v30, 0.0  ;;  %v1866_v52 = vld [vmem:[%s10245_s5 + $0x2d8] sm:$0xff]  ;;  %v1841_v30 = vld [vmem:[%s10245_s5 + $0x210] sm:$0xff] }
 0x121   :  { %2206 = vmatpush1.msra.mxu1 %v1898_v60  ;;  %1952 = vmatprep.subr.mxu0 %v1797_v6  ;;  %v10756_v60 = vld [vmem:[#allocation10_spill] sm:$0xff]  ;;  %v10758_v6 = vld [vmem:[#allocation11_spill] sm:$0xff] }
 0x122   :  { %1329 = vmatmul.mubr.f32.gmra.mxu1 %v10733_v58  ;;  %1953 = vmatpush1.msra.mxu0 %v1796_v32  ;;  %v10757_v21 = vmax.f32 %v10756_v60, 0.0  ;;  %v10759_v27 = vmax.f32 %v10758_v6, 0.0  ;;  %v1863_v32 = vld [vmem:[%s10245_s5 + $0x2c0] sm:$0xff]  ;;  %v1838_v60 = vld [vmem:[%s10245_s5 + $0x1f8] sm:$0xff] }
 0x123   :  { %1333 = vmatprep.mubr.f32.mxu1 %v10734_v23  ;;  %4733 = vmatmul.mubr.f32.gmra.mxu0 %v10735_v13  ;;  %v10762_v23 = vld [vmem:[#allocation40_spill] sm:$0xff] }
 0x124   :  { %1954 = vmatprep.subr.mxu0 %v1794_v16  ;;  %4735 = vmatprep.mubr.f32.mxu0 %v10736_v55  ;;  %v10760_v16 = vld [vmem:[#allocation37_spill] sm:$0xff]  ;;  %v1860_v13 = vld [vmem:[%s10245_s5 + $0x2a8] sm:$0xff] }
 0x125   :  { %1955 = vmatpush1.msra.mxu0 %v1793_v48  ;;  %v10761_v58 = vmax.f32 %v10760_v16, 0.0  ;;  %v1862_v48 = vld [vmem:[%s10245_s5 + $0x2b8] sm:$0xff]  ;;  %2207 = vmatprep.subr.mxu1 %v1896_v45 }
 0x126   :  { %1956 = vmatprep.subr.mxu0 %v1791_v43  ;;  %1334 = vmatmul.mubr.f32.gmra.mxu1 %v10737_v4  ;;  %v10763_v43 = vmax.f32 %v10762_v23, 0.0  ;;  %v10766_v4 = vld [vmem:[#allocation13_spill] sm:$0xff]  ;;  %v1835_v23 = vld [vmem:[%s10245_s5 + $0x1e0] sm:$0xff] }
 0x127   :  { %1957 = vmatpush1.msra.mxu0 %v1790_v56  ;;  %1338 = vmatprep.mubr.f32.mxu1 %v10738_v24  ;;  %v10764_v56 = vld [vmem:[#allocation12_spill] sm:$0xff] }
 0x128   :  { %4736 = vmatmul.mubr.f32.gmra.mxu0 %v10739_v42  ;;  %1958 = vmatprep.subr.mxu0 %v1788_v1  ;;  %v10765_v55 = vmax.f32 %v10764_v56, 0.0  ;;  %v1859_v1 = vld [vmem:[%s10245_s5 + $0x2a0] sm:$0xff]  ;;  %v1857_v24 = vld [vmem:[%s10245_s5 + $0x290] sm:$0xff] }
 0x129   :  { %4738 = vmatprep.mubr.f32.mxu0 %v10740_v18  ;;  %1959 = vmatpush1.msra.mxu0 %v1787_v54  ;;  %v10767_v54 = vmax.f32 %v10766_v4, 0.0  ;;  %v10770_v18 = vld [vmem:[#allocation46_spill] sm:$0xff] }
 0x12a   :  { %1960 = vmatprep.subr.mxu0 %v1785_v7  ;;  %1339 = vmatmul.mubr.f32.gmra.mxu1 %v10742_v46  ;;  %v10768_v7 = vld [vmem:[#allocation43_spill] sm:$0xff]  ;;  %v10772_v46 = vld [vmem:[#allocation14_spill] sm:$0xff] }
 0x12b   :  { %1961 = vmatpush1.msra.mxu0 %v1784_v25  ;;  %1343 = vmatprep.mubr.f32.mxu1 %v10744_v3  ;;  %v10769_v42 = vmax.f32 %v10768_v7, 0.0  ;;  %v1856_v25 = vld [vmem:[%s10245_s5 + $0x288] sm:$0xff] }
 0x12c   :  { %4739 = vmatmul.mubr.f32.gmra.mxu0 %v10745_v36  ;;  %1962 = vmatprep.subr.mxu0 %v1782_v20  ;;  %v10771_v20 = vmax.f32 %v10770_v18, 0.0  ;;  %v10774_v3 = vld [vmem:[#allocation15_spill] sm:$0xff] }
 0x12d   :  { %4741 = vmatprep.mubr.f32.mxu0 %v10747_v19  ;;  %1963 = vmatpush1.msra.mxu0 %v1781_v40  ;;  %v10773_v40 = vmax.f32 %v10772_v46, 0.0  ;;  %v1851_v36 = vld [vmem:[%s10245_s5 + $0x260] sm:$0xff]  ;;  %v1850_v19 = vld [vmem:[%s10245_s5 + $0x258] sm:$0xff] }
 0x12e   :  { %1964 = vmatprep.subr.mxu0 %v1779_v17  ;;  %1344 = vmatmul.mubr.f32.gmra.mxu1 %v10749_v51  ;;  %v10775_v17 = vmax.f32 %v10774_v3, 0.0  ;;  %v10779_v51 = vld [vmem:[#allocation16_spill] sm:$0xff] }
 0x12f   :  { %1965 = vmatpush1.msra.mxu0 %v1778_v47  ;;  %1348 = vmatprep.mubr.f32.mxu1 %v10751_v59  ;;  %v10776_v47 = vld [vmem:[#allocation49_spill] sm:$0xff] }
 0x130   :  { %4742 = vmatmul.mubr.f32.gmra.mxu0 %v10753_v12  ;;  %1966 = vmatprep.subr.mxu0 %v1776_v22  ;;  %v10777_v34 = vmax.f32 %v10776_v47, 0.0  ;;  %v10778_v22 = vmax.f32 %v6185_v57, 0.0  ;;  %v10781_v59 = vld [vmem:[#allocation17_spill] sm:$0xff]  ;;  %v1827_v47 = vld [vmem:[%s10245_s5 + $0x1a0] sm:$0xff] }
 0x131   :  { %4744 = vmatprep.mubr.f32.mxu0 %v10755_v31  ;;  %1967 = vmatpush1.msra.mxu0 %v1775_v11  ;;  %v10780_v11 = vmax.f32 %v10779_v51, 0.0  ;;  %v1845_v57 = vld [vmem:[%s10245_s5 + $0x230] sm:$0xff]  ;;  %v1842_v12 = vld [vmem:[%s10245_s5 + $0x218] sm:$0xff] }
 0x132   :  { %1968 = vmatprep.subr.mxu0 %v1869_v39  ;;  %1349 = vmatmul.mubr.f32.gmra.mxu1 %v10757_v21  ;;  %v10782_v39 = vmax.f32 %v10781_v59, 0.0  ;;  %v10787_v21 = vld [vmem:[#allocation3_spill] sm:$0xff]  ;;  %v1826_v51 = vld [vmem:[%s10245_s5 + $0x198] sm:$0xff] }
 0x133   :  { %1969 = vmatpush2.msra.mxu0 %v1868_v44  ;;  %1353 = vmatprep.mubr.f32.mxu1 %v10759_v27  ;;  %v698_v44 = vld [vmem:[%s10246_s4] sm:$0x7]  ;;  %v1836_v27 = vld [vmem:[%s10245_s5 + $0x1e8] sm:$0xff] }
 0x134   :  { %4745 = vmatmul.mubr.f32.gmra.mxu0 %v10761_v58  ;;  %1970 = vmatprep.subr.mxu0 %v1866_v52  ;;  %v1839_v52 = vld [vmem:[%s10245_s5 + $0x200] sm:$0xff] }
 0x135   :  { %4747 = vmatprep.mubr.f32.mxu0 %v10763_v43  ;;  %1971 = vmatpush2.msra.mxu0 %v1865_v26  ;;  %v6621_v26 = vrot.slane %v698_v44, %v10787_v21  ;;  %v1893_v43 = vld [vmem:[%s10245_s5 + $0x3b0] sm:$0xff]  ;;  %v1831_v21 = vld [vmem:[%s10245_s5 + $0x1c0] sm:$0xff] }
 0x136   :  { %1972 = vmatprep.subr.mxu0 %v1863_v32  ;;  %1354 = vmatmul.mubr.f32.gmra.mxu1 %v10765_v55  ;;  %v10788_v32 = vld [vmem:[#allocation4_spill] sm:$0xff] }
 0x137   :  { %1973 = vmatpush2.msra.mxu0 %v1862_v48  ;;  %1358 = vmatprep.mubr.f32.mxu1 %v10767_v54  ;;  %v6627_v16 = vrot.slane %v698_v44, %v10788_v32  ;;  %v1823_v44 = vld [vmem:[%s10245_s5 + $0x180] sm:$0xff] }
 0x138   :  { %4748 = vmatmul.mubr.f32.gmra.mxu0 %v10769_v42  ;;  %1974 = vmatprep.subr.mxu0 %v1860_v13  ;;  %v10791_v13 = vld [vmem:[#allocation21_spill] sm:$0xff] }
 0x139   :  { %4750 = vmatprep.mubr.f32.mxu0 %v10771_v20  ;;  %1975 = vmatpush2.msra.mxu0 %v1859_v1  ;;  %v10792_v56 = vmax.f32 %v10791_v13, 0.0  ;;  %v1833_v1 = vld [vmem:[%s10245_s5 + $0x1d0] sm:$0xff]  ;;  %v1830_v42 = vld [vmem:[%s10245_s5 + $0x1b8] sm:$0xff] }
 0x13a   :  { %1976 = vmatprep.subr.mxu0 %v1857_v24  ;;  %1359 = vmatmul.mubr.f32.gmra.mxu1 %v10773_v40  ;;  %v1832_v24 = vld [vmem:[%s10245_s5 + $0x1c8] sm:$0xff]  ;;  %v10793_v20 = vld [vmem:[#allocation22_spill] sm:$0xff]  ;;  %v1829_v40 = vld [vmem:[%s10245_s5 + $0x1b0] sm:$0xff] }
 0x13b   :  { %1977 = vmatpush2.msra.mxu0 %v1856_v25  ;;  %1363 = vmatprep.mubr.f32.mxu1 %v10775_v17  ;;  %v1892_v25 = vld [vmem:[%s10245_s5 + $0x3a8] sm:$0xff]  ;;  %v1822_v13 = vld [vmem:[%s10245_s5 + $0x178] sm:$0xff] }
 0x13c   :  { %4751 = vmatmul.mubr.f32.gmra.mxu0 %v10777_v34  ;;  %1978 = vmatprep.subr.mxu0 %v1854_v0  ;;  %v10794_v0 = vmax.f32 %v10793_v20, 0.0  ;;  %v10795_v17 = vld [vmem:[#allocation23_spill] sm:$0xff] }
 0x13d   :  { %4753 = vmatprep.mubr.f32.mxu0 %v10778_v22  ;;  %1979 = vmatpush2.msra.mxu0 %v1853_v41  ;;  %v1890_v41 = vld [vmem:[%s10245_s5 + $0x398] sm:$0xff] }
 0x13e   :  { %1980 = vmatprep.subr.mxu0 %v1851_v36  ;;  %1364 = vmatmul.mubr.f32.gmra.mxu1 %v10780_v11  ;;  %v10796_v36 = vmax.f32 %v10795_v17, 0.0 }
 0x13f   :  { %1981 = vmatpush2.msra.mxu0 %v1850_v19  ;;  %1368 = vmatprep.mubr.f32.mxu1 %v10782_v39 }
 0x140   :  { %4754 = vmatmul.mubr.f32.gmra.mxu0 %v547_v37  ;;  %1982 = vmatprep.subr.mxu0 %v1848_v29  ;;  %v10784_v37 = vmax.f32 %v10783_v50, 0.0  ;;  %v1889_v50 = vld [vmem:[%s10245_s5 + $0x390] sm:$0xff] }
 0x141   :  { %4756 = vmatprep.mubr.f32.mxu0 %v550_v61  ;;  %1983 = vmatpush2.msra.mxu0 %v1847_v28  ;;  %v10785_v61 = vld [vmem:[#allocation19_spill] sm:$0xff] }
 0x142   :  { %1984 = vmatprep.subr.mxu0 %v1845_v57  ;;  %1369 = vmatmul.mubr.f32.gmra.mxu1 %v10784_v37  ;;  %v10786_v31 = vmax.f32 %v10785_v61, 0.0  ;;  %v1824_v28 = vld [vmem:[%s10245_s5 + $0x188] sm:$0xff] }
 0x143   :  { %1985 = vmatpush2.msra.mxu0 %v1844_v63  ;;  %2208 = vmatpush1.msra.mxu1 %v1895_v8  ;;  %v10797_v57 = vld [vmem:[#allocation24_spill] sm:$0xff] }
 0x144   :  { %1373 = vmatprep.mubr.f32.mxu1 %v10786_v31  ;;  %4757 = vmatmul.mubr.f32.gmra.mxu0 %v553_v15  ;;  %v10789_v15 = vld [vmem:[#allocation20_spill] sm:$0xff]  ;;  %v10798_v63 = vmax.f32 %v10797_v57, 0.0 }
 0x145   :  { %1986 = vmatprep.subr.mxu0 %v1842_v12  ;;  %v1038_v6 = vpop.f32.mrf.mxu1  ;;  %v10790_v58 = vmax.f32 %v10789_v15, 0.0  ;;  %v781_v48 = vpop.f32.mrf.mxu0  ;;  %2209 = vmatprep.subr.mxu1 %v1893_v43  ;;  %v1887_v15 = vld [vmem:[%s10245_s5 + $0x380] sm:$0xff] }
 0x146   :  { %1987 = vmatpush2.msra.mxu0 %v1841_v30  ;;  %v782_v4 = vadd.f32 %v781_v48, %v6621_v26  ;;  %2210 = vmatpush1.msra.mxu1 %v1892_v25  ;;  %v10799_v30 = vld [vmem:[#allocation25_spill] sm:$0xff]  ;;  %v10801_v48 = vld [vmem:[#allocation26_spill] sm:$0xff] }
 0x147   :  { %1988 = vmatprep.subr.mxu0 %v1839_v52  ;;  %1374 = vmatmul.mubr.f32.gmra.mxu1 %v10790_v58  ;;  %v1040_v55 = vpop.f32.mrf.mxu1  ;;  %v783_v54 = vpop.f32.mrf.mxu0  ;;  %v10800_v45 = vmax.f32 %v10799_v30, 0.0  ;;  %v10809_v30 = vld [vmem:[#allocation32_spill] sm:$0xff] }
 0x148   :  { %1989 = vmatpush2.msra.mxu0 %v1838_v60  ;;  %1378 = vmatprep.mubr.f32.mxu1 %v10792_v56  ;;  %v784_v7 = vadd.f32 %v783_v54, %v6627_v16  ;;  %v6671_v34 = vadd.f32 %v1038_v6, %v782_v4  ;;  %v1886_v56 = vld [vmem:[%s10245_s5 + $0x378] sm:$0xff] }
 0x149   :  { %1990 = vmatprep.subr.mxu0 %v1836_v27  ;;  %v787_v46 = vpop.f32.mrf.mxu0  ;;  %2211 = vmatprep.subr.mxu1 %v1890_v41 }
 0x14a   :  { %1991 = vmatpush2.msra.mxu0 %v1835_v23  ;;  %v1044_v18 = vpop.f32.mrf.mxu1  ;;  %v6664_v3 = vadd.f32 %v1040_v55, %v784_v7  ;;  %v788_v19 = vadd.f32 %v787_v46, %v6621_v26  ;;  %v10426_v61 = vmax.f32 %v6671_v34, 0.0  ;;  %2212 = vmatpush1.msra.mxu1 %v1889_v50  ;;  %v10802_v23 = vmax.f32 %v10801_v48, 0.0 }
 0x14b   :  { %1992 = vmatprep.subr.mxu0 %v1833_v1  ;;  %1379 = vmatmul.mubr.f32.gmra.mxu1 %v10794_v0  ;;  %v789_v29 = vpop.f32.mrf.mxu0  ;;  %v10803_v1 = vld [vmem:[#allocation27_spill] sm:$0xff] }
 0x14c   :  { %1993 = vmatpush2.msra.mxu0 %v1832_v24  ;;  %1383 = vmatprep.mubr.f32.mxu1 %v10796_v36  ;;  %v1046_v22 = vpop.f32.mrf.mxu1  ;;  %v790_v11 = vadd.f32 %v789_v29, %v6627_v16  ;;  %v10427_v59 = vmax.f32 %v6664_v3, 0.0  ;;  %v6695_v31 = vadd.f32 %v1044_v18, %v788_v19  ;;  %v10804_v4 = vmax.f32 %v10803_v1, 0.0  ;;  %v1884_v0 = vld [vmem:[%s10245_s5 + $0x368] sm:$0xff]  ;;  %v1819_v36 = vld [vmem:[%s10245_s5 + $0x160] sm:$0xff] }
 0x14d   :  { %1994 = vmatprep.subr.mxu0 %v1830_v42  ;;  %v793_v12 = vpop.f32.mrf.mxu0  ;;  %2213 = vmatprep.subr.mxu1 %v1887_v15  ;;  %v10811_v15 = vld [vmem:[#allocation33_spill] sm:$0xff] }
 0x14e   :  { %1995 = vmatpush2.msra.mxu0 %v1829_v40  ;;  %v1050_v39 = vpop.f32.mrf.mxu1  ;;  %v6690_v37 = vadd.f32 %v1046_v22, %v790_v11  ;;  %v794_v52 = vadd.f32 %v793_v12, %v6621_v26  ;;  %2000 = vmatprep.mubr.f32.mxu0 %v10427_v59  ;;  %v10422_v54 = vmax.f32 %v6695_v31, 0.0  ;;  %v10805_v40 = vld [vmem:[#allocation29_spill] sm:$0xff]  ;;  %v10807_v22 = vld [vmem:[#allocation30_spill] sm:$0xff] }
 0x14f   :  { %1996 = vmatprep.subr.mxu0 %v1827_v47  ;;  %1384 = vmatmul.mubr.f32.gmra.mxu1 %v10798_v63  ;;  %v795_v6 = vpop.f32.mrf.mxu0  ;;  %v10806_v41 = vmax.f32 %v10805_v40, 0.0  ;;  %v1883_v47 = vld [vmem:[%s10245_s5 + $0x360] sm:$0xff]  ;;  %v10808_v29 = vmax.f32 %v10807_v22, 0.0  ;;  %v1877_v40 = vld [vmem:[%s10245_s5 + $0x330] sm:$0xff] }
 0x150   :  { %1997 = vmatpush2.msra.mxu0 %v1826_v51  ;;  %1388 = vmatprep.mubr.f32.mxu1 %v10800_v45  ;;  %v1052_v60 = vpop.f32.mrf.mxu1  ;;  %v796_v27 = vadd.f32 %v795_v6, %v6627_v16  ;;  %v10423_v8 = vmax.f32 %v6690_v37, 0.0  ;;  %v6722_v24 = vadd.f32 %v1050_v39, %v794_v52  ;;  %v10810_v45 = vmax.f32 %v10809_v30, 0.0  ;;  %v1880_v6 = vld [vmem:[%s10245_s5 + $0x348] sm:$0xff]  ;;  %v10817_v30 = vld [vmem:[#allocation38_spill] sm:$0xff]  ;;  %v1837_v59 = vld [vmem:[%s10245_s5 + $0x1f0] sm:$0xff] }
 0x151   :  { %1998 = vmatprep.subr.mxu0 %v1824_v28  ;;  %v799_v43 = vpop.f32.mrf.mxu0  ;;  %2214 = vmatpush1.msra.mxu1 %v1886_v56 }
 0x152   :  { %1999 = vmatpush2.msra.mxu0 %v1823_v44  ;;  %v1056_v58 = vpop.f32.mrf.mxu1  ;;  %v6715_v55 = vadd.f32 %v1052_v60, %v796_v27  ;;  %v800_v7 = vadd.f32 %v799_v43, %v6621_v26  ;;  %v10418_v51 = vmax.f32 %v6722_v24, 0.0  ;;  %2215 = vmatprep.subr.mxu1 %v1884_v0  ;;  %v1881_v44 = vld [vmem:[%s10245_s5 + $0x350] sm:$0xff]  ;;  %v1816_v60 = vld [vmem:[%s10245_s5 + $0x148] sm:$0xff] }
 0x153   :  { %2001 = vmatmul.mubr.f32.vlgmr.msra.gmra.mxu0 %v10426_v61  ;;  %1389 = vmatmul.mubr.f32.gmra.mxu1 %v10802_v23  ;;  %v801_v25 = vpop.f32.mrf.mxu0 }
 0x154   :  { %1393 = vmatprep.mubr.f32.mxu1 %v10804_v4  ;;  %2006 = vmatprep.mubr.f32.mxu0 %v10423_v8  ;;  %v1058_v42 = vpop.f32.mrf.mxu1  ;;  %v802_v18 = vadd.f32 %v801_v25, %v6627_v16  ;;  %v10419_v20 = vmax.f32 %v6715_v55, 0.0  ;;  %v6748_v11 = vadd.f32 %v1056_v58, %v800_v7  ;;  %v10812_v58 = vmax.f32 %v10811_v15, 0.0  ;;  %v1878_v7 = vld [vmem:[%s10245_s5 + $0x338] sm:$0xff]  ;;  %v10813_v25 = vld [vmem:[#allocation35_spill] sm:$0xff] }
 0x155   :  { %2450 = vmatprep.subr.mxu0 %v10659_v35  ;;  %v805_v17 = vpop.f32.mrf.mxu0  ;;  %2216 = vmatpush1.msra.mxu1 %v1883_v47  ;;  %v1843_v8 = vld [vmem:[%s10245_s5 + $0x220] sm:$0xff] }
 0x156   :  { %2451 = vmatpush1.msra.mxu0 %v1822_v13  ;;  %v1062_v46 = vpop.f32.mrf.mxu1  ;;  %v6741_v19 = vadd.f32 %v1058_v42, %v802_v18  ;;  %v806_v28 = vadd.f32 %v805_v17, %v6621_v26  ;;  %v10414_v48 = vmax.f32 %v6748_v11, 0.0  ;;  %2217 = vmatprep.subr.mxu1 %v1881_v44  ;;  %v10814_v18 = vmax.f32 %v10813_v25, 0.0  ;;  %v10815_v17 = vld [vmem:[#allocation36_spill] sm:$0xff]  ;;  %v1875_v44 = vld [vmem:[%s10245_s5 + $0x320] sm:$0xff] }
 0x157   :  { %2007 = vmatmul.mubr.f32.gmra.mxu0 %v10422_v54  ;;  %1394 = vmatmul.mubr.f32.gmra.mxu1 %v10806_v41  ;;  %v807_v57 = vpop.f32.mrf.mxu0 }
 0x158   :  { %1398 = vmatprep.mubr.f32.mxu1 %v10808_v29  ;;  %2012 = vmatprep.mubr.f32.mxu0 %v10419_v20  ;;  %v1064_v39 = vpop.f32.mrf.mxu1  ;;  %v808_v63 = vadd.f32 %v807_v57, %v6627_v16  ;;  %v10415_v12 = vmax.f32 %v6741_v19, 0.0  ;;  %v6774_v23 = vadd.f32 %v1062_v46, %v806_v28  ;;  %v1813_v46 = vld [vmem:[%s10245_s5 + $0x130] sm:$0xff] }
 0x159   :  { %2452 = vmatprep.subr.mxu0 %v10659_v35  ;;  %v811_v52 = vpop.f32.mrf.mxu0  ;;  %2218 = vmatpush1.msra.mxu1 %v1880_v6  ;;  %v1874_v6 = vld [vmem:[%s10245_s5 + $0x318] sm:$0xff]  ;;  %v1849_v20 = vld [vmem:[%s10245_s5 + $0x250] sm:$0xff] }
 0x15a   :  { %2453 = vmatpush1.msra.mxu0 %v1819_v36  ;;  %v1068_v50 = vpop.f32.mrf.mxu1  ;;  %v6767_v27 = vadd.f32 %v1064_v39, %v808_v63  ;;  %v812_v43 = vadd.f32 %v811_v52, %v6621_v26  ;;  %v10816_v36 = vmax.f32 %v10815_v17, 0.0  ;;  %v10410_v47 = vmax.f32 %v6774_v23, 0.0  ;;  %2219 = vmatprep.subr.mxu1 %v1878_v7 }
 0x15b   :  { %2013 = vmatmul.mubr.f32.gmra.mxu0 %v10418_v51  ;;  %1399 = vmatmul.mubr.f32.gmra.mxu1 %v10810_v45  ;;  %v813_v56 = vpop.f32.mrf.mxu0  ;;  %v10818_v45 = vmax.f32 %v10817_v30, 0.0 }
 0x15c   :  { %1403 = vmatprep.mubr.f32.mxu1 %v10812_v58  ;;  %2018 = vmatprep.mubr.f32.mxu0 %v10415_v12  ;;  %v1070_v13 = vpop.f32.mrf.mxu1  ;;  %v814_v1 = vadd.f32 %v813_v56, %v6627_v16  ;;  %v10411_v4 = vmax.f32 %v6767_v27, 0.0  ;;  %v6800_v22 = vadd.f32 %v1068_v50, %v812_v43  ;;  %v10819_v58 = vld [vmem:[#allocation39_spill] sm:$0xff] }
 0x15d   :  { %2454 = vmatprep.subr.mxu0 %v10659_v35  ;;  %v817_v0 = vpop.f32.mrf.mxu0  ;;  %2220 = vmatpush1.msra.mxu1 %v1877_v40  ;;  %v10820_v43 = vmax.f32 %v10819_v58, 0.0  ;;  %v10821_v40 = vld [vmem:[#allocation41_spill] sm:$0xff]  ;;  %v1855_v12 = vld [vmem:[%s10245_s5 + $0x280] sm:$0xff] }
 0x15e   :  { %2455 = vmatpush1.msra.mxu0 %v1816_v60  ;;  %v1074_v42 = vpop.f32.mrf.mxu1  ;;  %v6793_v41 = vadd.f32 %v1070_v13, %v814_v1  ;;  %v818_v29 = vadd.f32 %v817_v0, %v6621_v26  ;;  %v1810_v60 = vld [vmem:[%s10245_s5 + $0x118] sm:$0xff]  ;;  %v10406_v13 = vmax.f32 %v6800_v22, 0.0  ;;  %2221 = vmatprep.subr.mxu1 %v1875_v44  ;;  %v10822_v17 = vmax.f32 %v10821_v40, 0.0 }
 0x15f   :  { %2019 = vmatmul.mubr.f32.gmra.mxu0 %v10414_v48  ;;  %1404 = vmatmul.mubr.f32.gmra.mxu1 %v10814_v18  ;;  %v819_v39 = vpop.f32.mrf.mxu0 }
 0x160   :  { %1408 = vmatprep.mubr.f32.mxu1 %v10816_v36  ;;  %2024 = vmatprep.mubr.f32.mxu0 %v10411_v4  ;;  %v1076_v28 = vpop.f32.mrf.mxu1  ;;  %v820_v57 = vadd.f32 %v819_v39, %v6627_v16  ;;  %v10407_v63 = vmax.f32 %v6793_v41, 0.0  ;;  %v6826_v56 = vadd.f32 %v1074_v42, %v818_v29  ;;  %v1807_v29 = vld [vmem:[%s10245_s5 + $0x100] sm:$0xff]  ;;  %v1861_v4 = vld [vmem:[%s10245_s5 + $0x2b0] sm:$0xff] }
 0x161   :  { %2456 = vmatprep.subr.mxu0 %v10659_v35  ;;  %v823_v52 = vpop.f32.mrf.mxu0  ;;  %2222 = vmatpush1.msra.mxu1 %v1874_v6 }
 0x162   :  { %2457 = vmatpush1.msra.mxu0 %v1813_v46  ;;  %v1080_v50 = vpop.f32.mrf.mxu1  ;;  %v6819_v15 = vadd.f32 %v1076_v28, %v820_v57  ;;  %v824_v1 = vadd.f32 %v823_v52, %v6621_v26  ;;  %v1872_v46 = vld [vmem:[%s10245_s5 + $0x308] sm:$0xff]  ;;  %v1871_v28 = vld [vmem:[%s10245_s5 + $0x300] sm:$0xff]  ;;  %v10390_v30 = vmax.f32 %v6826_v56, 0.0 }
 0x163   :  { %2025 = vmatmul.mubr.f32.gmra.mxu0 %v10410_v47  ;;  %1409 = vmatmul.mubr.f32.gmra.mxu1 %v10818_v45  ;;  %v825_v25 = vpop.f32.mrf.mxu0  ;;  %v10823_v57 = vld [vmem:[#allocation42_spill] sm:$0xff] }
 0x164   :  { %1413 = vmatprep.mubr.f32.mxu1 %v10820_v43  ;;  %2030 = vmatprep.mubr.f32.mxu0 %v10407_v63  ;;  %v1082_v7 = vpop.f32.mrf.mxu1  ;;  %v826_v18 = vadd.f32 %v825_v25, %v6627_v16  ;;  %v10393_v0 = vmax.f32 %v6819_v15, 0.0  ;;  %v10824_v44 = vmax.f32 %v10823_v57, 0.0  ;;  %v6852_v45 = vadd.f32 %v1080_v50, %v824_v1  ;;  %v10825_v1 = vld [vmem:[#allocation44_spill] sm:$0xff]  ;;  %v1867_v63 = vld [vmem:[%s10245_s5 + $0x2e0] sm:$0xff] }
 0x165   :  { %2458 = vmatprep.subr.mxu0 %v10659_v35  ;;  %v829_v36 = vpop.f32.mrf.mxu0  ;;  %2223 = vmatprep.subr.mxu1 %v1872_v46  ;;  %v10826_v25 = vmax.f32 %v10825_v1, 0.0  ;;  %v1804_v46 = vld [vmem:[%s10245_s5 + $0xe8] sm:$0xff] }
 0x166   :  { %2459 = vmatpush1.msra.mxu0 %v1810_v60  ;;  %v1086_v42 = vpop.f32.mrf.mxu1  ;;  %v6845_v39 = vadd.f32 %v1082_v7, %v826_v18  ;;  %v830_v52 = vadd.f32 %v829_v36, %v6621_v26  ;;  %2224 = vmatpush1.msra.mxu1 %v1871_v28  ;;  %v6861_v7 = vld [vmem:[%s10245_s5 + $0x478] sm:$0xff] }
 0x167   :  { %2031 = vmatmul.mubr.f32.gmra.mxu0 %v10406_v13  ;;  %1414 = vmatmul.mubr.f32.gmra.mxu1 %v10822_v17  ;;  %v831_v6 = vpop.f32.mrf.mxu0  ;;  %v10827_v17 = vld [vmem:[#allocation45_spill] sm:$0xff] }
 0x168   :  { %1418 = vmatprep.mubr.f32.mxu1 %v10824_v44  ;;  %2036 = vmatprep.mubr.f32.mxu0 %v10393_v0  ;;  %v1088_v60 = vpop.f32.mrf.mxu1  ;;  %v832_v58 = vadd.f32 %v831_v6, %v6627_v16  ;;  %v10388_v43 = vmax.f32 %v6845_v39, 0.0  ;;  %v10828_v36 = vmax.f32 %v10827_v17, 0.0  ;;  %v6877_v28 = vadd.f32 %v1086_v42, %v830_v52 }
 0x169   :  { %2460 = vmatprep.subr.mxu0 %v10659_v35  ;;  %v835_v18 = vpop.f32.mrf.mxu0  ;;  %4759 = vmatprep.subr.mxu1 %v6861_v7 }
 0x16a   :  { %2461 = vmatpush1.msra.mxu0 %v1807_v29  ;;  %v1092_v50 = vpop.f32.mrf.mxu1  ;;  %v6870_v40 = vadd.f32 %v1088_v60, %v832_v58  ;;  %v10389_v29 = vmax.f32 %v6852_v45, 0.0  ;;  %v836_v57 = vadd.f32 %v835_v18, %v6621_v26  ;;  %v1801_v18 = vld [vmem:[%s10245_s5 + $0xd0] sm:$0xff] }
 0x16b   :  { %2037 = vmatmul.mubr.f32.gmra.mxu0 %v10390_v30  ;;  %1419 = vmatmul.mubr.f32.gmra.mxu1 %v10826_v25  ;;  %v837_v6 = vpop.f32.mrf.mxu0  ;;  %v10829_v25 = vld [vmem:[#allocation47_spill] sm:$0xff] }
 0x16c   :  { %1423 = vmatprep.mubr.f32.mxu1 %v10828_v36  ;;  %2042 = vmatprep.mubr.f32.mxu0 %v10388_v43  ;;  %v1094_v44 = vpop.f32.mrf.mxu1  ;;  %v838_v60 = vadd.f32 %v837_v6, %v6627_v16  ;;  %v10391_v58 = vmax.f32 %v6870_v40, 0.0  ;;  %v10830_v42 = vmax.f32 %v10829_v25, 0.0  ;;  %v10831_v36 = vld [vmem:[#allocation48_spill] sm:$0xff]  ;;  %v6898_v6 = vadd.f32 %v1092_v50, %v836_v57  ;;  %v1798_v57 = vld [vmem:[%s10245_s5 + $0xb8] sm:$0xff] }
 0x16d   :  { %2462 = vmatprep.subr.mxu0 %v10659_v35  ;;  %v841_v52 = vpop.f32.mrf.mxu0  ;;  %v10832_v43 = vmax.f32 %v10831_v36, 0.0 }
 0x16e   :  { %2463 = vmatpush1.msra.mxu0 %v1804_v46  ;;  %v1098_v1 = vpop.f32.mrf.mxu1  ;;  %v6891_v17 = vadd.f32 %v1094_v44, %v838_v60  ;;  %v10392_v46 = vmax.f32 %v6877_v28, 0.0  ;;  %v842_v25 = vadd.f32 %v841_v52, %v6621_v26  ;;  %v10833_v60 = vld [vmem:[#allocation50_spill] sm:$0xff] }
 0x16f   :  { %2043 = vmatmul.mubr.f32.gmra.mxu0 %v10389_v29  ;;  %1424 = vmatmul.mubr.f32.gmra.mxu1 %v10830_v42  ;;  %v843_v29 = vpop.f32.mrf.mxu0  ;;  %v10834_v36 = vmax.f32 %v10833_v60, 0.0 }
 0x170   :  { %1428 = vmatprep.mubr.f32.mxu1 %v10832_v43  ;;  %2048 = vmatprep.mubr.f32.mxu0 %v10391_v58  ;;  %v1100_v42 = vpop.f32.mrf.mxu1  ;;  %v844_v30 = vadd.f32 %v843_v29, %v6627_v16  ;;  %v10403_v44 = vmax.f32 %v6891_v17, 0.0  ;;  %v10835_v58 = vmax.f32 %v6167_v62, 0.0  ;;  %v10394_v29 = vmax.f32 %v6898_v6, 0.0 }
 0x171   :  { %2464 = vmatprep.subr.mxu0 %v10659_v35  ;;  %v847_v50 = vpop.f32.mrf.mxu0 }
 0x172   :  { %2465 = vmatpush1.msra.mxu0 %v1801_v18  ;;  %v1104_v43 = vpop.f32.mrf.mxu1  ;;  %v6911_v52 = vadd.f32 %v1100_v42, %v844_v30  ;;  %v6918_v18 = vadd.f32 %v1098_v1, %v842_v25  ;;  %v848_v60 = vadd.f32 %v847_v50, %v6621_v26  ;;  %v1795_v25 = vld [vmem:[%s10245_s5 + $0xa0] sm:$0xff] }
 0x173   :  { %2049 = vmatmul.mubr.f32.gmra.mxu0 %v10392_v46  ;;  %1429 = vmatmul.mubr.f32.gmra.mxu1 %v10834_v36  ;;  %v849_v46 = vpop.f32.mrf.mxu0 }
 0x174   :  { %1433 = vmatprep.mubr.f32.mxu1 %v10835_v58  ;;  %2054 = vmatprep.mubr.f32.mxu0 %v10403_v44  ;;  %v1106_v36 = vpop.f32.mrf.mxu1  ;;  %v850_v0 = vadd.f32 %v849_v46, %v6627_v16  ;;  %v10401_v30 = vmax.f32 %v6911_v52, 0.0  ;;  %v10836_v58 = vmax.f32 %v6188_v49, 0.0  ;;  %v10395_v46 = vmax.f32 %v6918_v18, 0.0  ;;  %v1777_v44 = vld [vmem:[%s10245_s5 + $0x10] sm:$0xff] }
 0x175   :  { %2466 = vmatprep.subr.mxu0 %v10659_v35  ;;  %v853_v1 = vpop.f32.mrf.mxu0  ;;  %v6938_v50 = vadd.f32 %v1104_v43, %v848_v60  ;;  %v1792_v43 = vld [vmem:[%s10245_s5 + $0x88] sm:$0xff] }
 0x176   :  { %2467 = vmatpush1.msra.mxu0 %v1798_v57  ;;  %v1110_v62 = vpop.f32.mrf.mxu1  ;;  %v6931_v42 = vadd.f32 %v1106_v36, %v850_v0  ;;  %v854_v49 = vadd.f32 %v853_v1, %v6621_v26  ;;  %v10837_v36 = vmax.f32 %v6219_v10, 0.0 }
 0x177   :  { %2055 = vmatmul.mubr.f32.gmra.mxu0 %v10394_v29  ;;  %1434 = vmatmul.mubr.f32.gmra.mxu1 %v10836_v58  ;;  %v855_v58 = vpop.f32.mrf.mxu0  ;;  %v10396_v1 = vmax.f32 %v6938_v50, 0.0 }
 0x178   :  { %1438 = vmatprep.mubr.f32.mxu1 %v546_v5  ;;  %2060 = vmatprep.mubr.f32.mxu0 %v10401_v30  ;;  %v1112_v57 = vpop.f32.mrf.mxu1  ;;  %v856_v29 = vadd.f32 %v855_v58, %v6627_v16  ;;  %v10397_v0 = vmax.f32 %v6931_v42, 0.0 }
 0x179   :  { %2468 = vmatprep.subr.mxu0 %v10659_v35  ;;  %v859_v5 = vpop.f32.mrf.mxu0 }
 0x17a   :  { %2469 = vmatpush1.msra.mxu0 %v1795_v25  ;;  %v1116_v38 = vpop.f32.mrf.mxu1  ;;  %v6951_v60 = vadd.f32 %v1112_v57, %v856_v29  ;;  %v6958_v25 = vadd.f32 %v1110_v62, %v854_v49  ;;  %v860_v2 = vadd.f32 %v859_v5, %v6621_v26  ;;  %v10838_v57 = vmax.f32 %v6240_v33, 0.0  ;;  %v1789_v49 = vld [vmem:[%s10245_s5 + $0x70] sm:$0xff] }
 0x17b   :  { %2061 = vmatmul.mubr.f32.gmra.mxu0 %v10395_v46  ;;  %1439 = vmatmul.mubr.f32.gmra.mxu1 %v545_v9  ;;  %v861_v58 = vpop.f32.mrf.mxu0 }
 0x17c   :  { %1443 = vmatprep.mubr.f32.mxu1 %v10837_v36  ;;  %2066 = vmatprep.mubr.f32.mxu0 %v10397_v0  ;;  %v1118_v9 = vpop.f32.mrf.mxu1  ;;  %v862_v46 = vadd.f32 %v861_v58, %v6627_v16  ;;  %v10398_v29 = vmax.f32 %v6951_v60, 0.0  ;;  %v10839_v36 = vmax.f32 %v6244_v14, 0.0  ;;  %v6978_v58 = vadd.f32 %v1116_v38, %v860_v2  ;;  %v1786_v14 = vld [vmem:[%s10245_s5 + $0x58] sm:$0xff] }
 0x17d   :  { %2470 = vmatprep.subr.mxu0 %v10659_v35  ;;  %v865_v62 = vpop.f32.mrf.mxu0  ;;  %v10840_v2 = vmax.f32 %v6263_v53, 0.0  ;;  %v1783_v53 = vld [vmem:[%s10245_s5 + $0x40] sm:$0xff] }
 0x17e   :  { %2471 = vmatpush1.msra.mxu0 %v1792_v43  ;;  %v1122_v10 = vpop.f32.mrf.mxu1  ;;  %v6971_v5 = vadd.f32 %v1118_v9, %v862_v46  ;;  %v10399_v43 = vmax.f32 %v6958_v25, 0.0  ;;  %v866_v33 = vadd.f32 %v865_v62, %v6621_v26 }
 0x17f   :  { %2067 = vmatmul.mubr.f32.gmra.mxu0 %v10396_v1  ;;  %1444 = vmatmul.mubr.f32.gmra.mxu1 %v10838_v57  ;;  %v867_v1 = vpop.f32.mrf.mxu0 }
 0x180   :  { %1448 = vmatprep.mubr.f32.mxu1 %v10839_v36  ;;  %2072 = vmatprep.mubr.f32.mxu0 %v10398_v29  ;;  %v1124_v57 = vpop.f32.mrf.mxu1  ;;  %v868_v0 = vadd.f32 %v867_v1, %v6627_v16  ;;  %v10400_v46 = vmax.f32 %v6971_v5, 0.0  ;;  %v10402_v1 = vmax.f32 %v6978_v58, 0.0 }
 0x181   :  { %2472 = vmatprep.subr.mxu0 %v10659_v35  ;;  %v871_v9 = vpop.f32.mrf.mxu0 }
 0x182   :  { %2473 = vmatpush1.msra.mxu0 %v1789_v49  ;;  %v1128_v38 = vpop.f32.mrf.mxu1  ;;  %v6991_v62 = vadd.f32 %v1124_v57, %v868_v0  ;;  %v6997_v49 = vadd.f32 %v1122_v10, %v866_v33  ;;  %v872_v36 = vadd.f32 %v871_v9, %v6621_v26 }
 0x183   :  { %2073 = vmatmul.mubr.f32.gmra.mxu0 %v10399_v43  ;;  %1449 = vmatmul.mubr.f32.gmra.mxu1 %v10840_v2  ;;  %v873_v43 = vpop.f32.mrf.mxu0 }
 0x184   :  { %2078 = vmatprep.mubr.f32.mxu0 %v10400_v46  ;;  %2474 = vmatprep.subr.mxu0 %v10659_v35  ;;  %v1130_v29 = vpop.f32.mrf.mxu1  ;;  %v874_v0 = vadd.f32 %v873_v43, %v6627_v16  ;;  %v10405_v57 = vmax.f32 %v6991_v62, 0.0  ;;  %v10404_v43 = vmax.f32 %v6997_v49, 0.0  ;;  %v7017_v9 = vadd.f32 %v1128_v38, %v872_v36 }
 0x185   :  { %2475 = vmatpush1.msra.mxu0 %v1786_v14  ;;  %2257 = vmatprep.mubr.f32.mxu1 %v10659_v35  ;;  %v877_v33 = vpop.f32.mrf.mxu0  ;;  %v1780_v14 = vld [vmem:[%s10245_s5 + $0x28] sm:$0xff] }
 0x186   :  { %2476 = vmatprep.subr.mxu0 %v10659_v35  ;;  %v1134_v10 = vpop.f32.mrf.mxu1  ;;  %v7012_v2 = vadd.f32 %v1130_v29, %v874_v0  ;;  %v878_v46 = vadd.f32 %v877_v33, %v6621_v26 }
 0x187   :  { %2079 = vmatmul.mubr.f32.gmra.mxu0 %v10402_v1  ;;  %v879_v1 = vpop.f32.mrf.mxu0 }
 0x188   :  { %2084 = vmatprep.mubr.f32.mxu0 %v10405_v57  ;;  %2477 = vmatpush1.msra.mxu0 %v1783_v53  ;;  %v1136_v30 = vpop.f32.mrf.mxu1  ;;  %v880_v29 = vadd.f32 %v879_v1, %v6627_v16  ;;  %v10409_v0 = vmax.f32 %v7012_v2, 0.0  ;;  %v1870_v53 = vld [vmem:[%s10245_s5 + $0x2f8] sm:$0xff]  ;;  %v10408_v1 = vmax.f32 %v7017_v9, 0.0 }
 0x189   :  { %2478 = vmatprep.subr.mxu0 %v10659_v35  ;;  %v883_v36 = vpop.f32.mrf.mxu0 }
 0x18a   :  { %2479 = vmatpush1.msra.mxu0 %v1780_v14  ;;  %v1140_v38 = vpop.f32.mrf.mxu1  ;;  %v7032_v33 = vadd.f32 %v1136_v30, %v880_v29  ;;  %v7037_v14 = vadd.f32 %v1134_v10, %v878_v46  ;;  %v1864_v10 = vld [vmem:[%s10245_s5 + $0x2c8] sm:$0xff] }
 0x18b   :  { %2085 = vmatmul.mubr.f32.gmra.mxu0 %v10404_v43  ;;  %2480 = vmatprep.subr.mxu0 %v10659_v35  ;;  %v884_v43 = vadd.f32 %v883_v36, %v6621_v26  ;;  %v885_v13 = vpop.f32.mrf.mxu0 }
 0x18c   :  { %2090 = vmatprep.mubr.f32.mxu0 %v10409_v0  ;;  %2481 = vmatpush1.msra.mxu0 %v1777_v44  ;;  %v1142_v57 = vpop.f32.mrf.mxu1  ;;  %v886_v30 = vadd.f32 %v885_v13, %v6627_v16  ;;  %v10413_v29 = vmax.f32 %v7032_v33, 0.0  ;;  %v10412_v13 = vmax.f32 %v7037_v14, 0.0 }
 0x18d   :  { %2482 = vmatprep.subr.mxu0 %v10659_v35  ;;  %v889_v46 = vpop.f32.mrf.mxu0 }
 0x18e   :  { %2483 = vmatpush2.msra.mxu0 %v1870_v53  ;;  %v1146_v44 = vpop.f32.mrf.mxu1  ;;  %v7052_v36 = vadd.f32 %v1142_v57, %v886_v30  ;;  %v7057_v53 = vadd.f32 %v1140_v38, %v884_v43  ;;  %v1858_v38 = vld [vmem:[%s10245_s5 + $0x298] sm:$0xff] }
 0x18f   :  { %2091 = vmatmul.mubr.f32.gmra.mxu0 %v10408_v1  ;;  %2484 = vmatprep.subr.mxu0 %v10659_v35  ;;  %v890_v1 = vadd.f32 %v889_v46, %v6621_v26  ;;  %v891_v47 = vpop.f32.mrf.mxu0 }
 0x190   :  { %2096 = vmatprep.mubr.f32.mxu0 %v10413_v29  ;;  %2485 = vmatpush2.msra.mxu0 %v1867_v63  ;;  %v1148_v0 = vpop.f32.mrf.mxu1  ;;  %v892_v57 = vadd.f32 %v891_v47, %v6627_v16  ;;  %v10417_v30 = vmax.f32 %v7052_v36, 0.0  ;;  %v10416_v47 = vmax.f32 %v7057_v53, 0.0 }
 0x191   :  { %2486 = vmatprep.subr.mxu0 %v10659_v35  ;;  %v895_v43 = vpop.f32.mrf.mxu0 }
 0x192   :  { %2487 = vmatpush2.msra.mxu0 %v1864_v10  ;;  %v1152_v63 = vpop.f32.mrf.mxu1  ;;  %v7072_v46 = vadd.f32 %v1148_v0, %v892_v57  ;;  %v7077_v10 = vadd.f32 %v1146_v44, %v890_v1  ;;  %v1852_v44 = vld [vmem:[%s10245_s5 + $0x268] sm:$0xff] }
 0x193   :  { %2097 = vmatmul.mubr.f32.gmra.mxu0 %v10412_v13  ;;  %2488 = vmatprep.subr.mxu0 %v10659_v35  ;;  %v896_v13 = vadd.f32 %v895_v43, %v6621_v26  ;;  %v897_v48 = vpop.f32.mrf.mxu0 }
 0x194   :  { %2102 = vmatprep.mubr.f32.mxu0 %v10417_v30  ;;  %2489 = vmatpush2.msra.mxu0 %v1861_v4  ;;  %v1154_v29 = vpop.f32.mrf.mxu1  ;;  %v898_v0 = vadd.f32 %v897_v48, %v6627_v16  ;;  %v10421_v57 = vmax.f32 %v7072_v46, 0.0  ;;  %v10420_v48 = vmax.f32 %v7077_v10, 0.0 }
 0x195   :  { %2490 = vmatprep.subr.mxu0 %v10659_v35  ;;  %v901_v1 = vpop.f32.mrf.mxu0 }
 0x196   :  { %2491 = vmatpush2.msra.mxu0 %v1858_v38  ;;  %v1158_v4 = vpop.f32.mrf.mxu1  ;;  %v7092_v43 = vadd.f32 %v1154_v29, %v898_v0  ;;  %v7097_v38 = vadd.f32 %v1152_v63, %v896_v13  ;;  %v1846_v63 = vld [vmem:[%s10245_s5 + $0x238] sm:$0xff] }
 0x197   :  { %2103 = vmatmul.mubr.f32.gmra.mxu0 %v10416_v47  ;;  %2492 = vmatprep.subr.mxu0 %v10659_v35  ;;  %v902_v47 = vadd.f32 %v901_v1, %v6621_v26  ;;  %v903_v51 = vpop.f32.mrf.mxu0 }
 0x198   :  { %2108 = vmatprep.mubr.f32.mxu0 %v10421_v57  ;;  %2493 = vmatpush2.msra.mxu0 %v1855_v12  ;;  %v1160_v30 = vpop.f32.mrf.mxu1  ;;  %v904_v29 = vadd.f32 %v903_v51, %v6627_v16  ;;  %v10425_v0 = vmax.f32 %v7092_v43, 0.0  ;;  %v10424_v51 = vmax.f32 %v7097_v38, 0.0 }
 0x199   :  { %2494 = vmatprep.subr.mxu0 %v10659_v35  ;;  %v907_v13 = vpop.f32.mrf.mxu0 }
 0x19a   :  { %2495 = vmatpush2.msra.mxu0 %v1852_v44  ;;  %v1164_v12 = vpop.f32.mrf.mxu1  ;;  %v7112_v1 = vadd.f32 %v1160_v30, %v904_v29  ;;  %v7117_v44 = vadd.f32 %v1158_v4, %v902_v47  ;;  %v1840_v4 = vld [vmem:[%s10245_s5 + $0x208] sm:$0xff] }
 0x19b   :  { %2109 = vmatmul.mubr.f32.gmra.mxu0 %v10420_v48  ;;  %2496 = vmatprep.subr.mxu0 %v10659_v35  ;;  %v908_v48 = vadd.f32 %v907_v13, %v6621_v26  ;;  %v909_v54 = vpop.f32.mrf.mxu0 }
 0x19c   :  { %2114 = vmatprep.mubr.f32.mxu0 %v10425_v0  ;;  %2497 = vmatpush2.msra.mxu0 %v1849_v20  ;;  %10841 = vst [vmem:[#allocation6_spill] sm:$0xff] %v7117_v44  ;;  %v1166_v57 = vpop.f32.mrf.mxu1  ;;  %v910_v30 = vadd.f32 %v909_v54, %v6627_v16  ;;  %v10429_v29 = vmax.f32 %v7112_v1, 0.0  ;;  %v10428_v54 = vmax.f32 %v7117_v44, 0.0 }
 0x19d   :  { %2498 = vmatprep.subr.mxu0 %v10659_v35  ;;  %v913_v47 = vpop.f32.mrf.mxu0 }
 0x19e   :  { %2499 = vmatpush2.msra.mxu0 %v1846_v63  ;;  %v1170_v20 = vpop.f32.mrf.mxu1  ;;  %v7132_v13 = vadd.f32 %v1166_v57, %v910_v30  ;;  %v7137_v63 = vadd.f32 %v1164_v12, %v908_v48  ;;  %v1834_v12 = vld [vmem:[%s10245_s5 + $0x1d8] sm:$0xff] }
 0x19f   :  { %2115 = vmatmul.mubr.f32.gmra.mxu0 %v10424_v51  ;;  %2500 = vmatprep.subr.mxu0 %v10659_v35  ;;  %v914_v51 = vadd.f32 %v913_v47, %v6621_v26  ;;  %v915_v61 = vpop.f32.mrf.mxu0 }
 0x1a0   :  { %10842 = vst [vmem:[#allocation7_spill] sm:$0xff] %v7132_v13  ;;  %2120 = vmatprep.mubr.f32.mxu0 %v10429_v29  ;;  %2501 = vmatpush2.msra.mxu0 %v1843_v8  ;;  %10843 = vst [vmem:[#allocation28_spill] sm:$0xff] %v7137_v63  ;;  %v1172_v0 = vpop.f32.mrf.mxu1  ;;  %v916_v57 = vadd.f32 %v915_v61, %v6627_v16  ;;  %v10431_v30 = vmax.f32 %v7132_v13, 0.0  ;;  %v10430_v61 = vmax.f32 %v7137_v63, 0.0  ;;  %v1825_v13 = vld [vmem:[%s10245_s5 + $0x190] sm:$0xff] }
 0x1a1   :  { %2502 = vmatprep.subr.mxu0 %v10659_v35  ;;  %v919_v48 = vpop.f32.mrf.mxu0 }
 0x1a2   :  { %2503 = vmatpush2.msra.mxu0 %v1840_v4  ;;  %v1176_v8 = vpop.f32.mrf.mxu1  ;;  %v7152_v47 = vadd.f32 %v1172_v0, %v916_v57  ;;  %v7157_v4 = vadd.f32 %v1170_v20, %v914_v51  ;;  %v1828_v20 = vld [vmem:[%s10245_s5 + $0x1a8] sm:$0xff] }
 0x1a3   :  { %2121 = vmatmul.mubr.f32.gmra.mxu0 %v10428_v54  ;;  %2504 = vmatprep.subr.mxu0 %v10659_v35  ;;  %v920_v54 = vadd.f32 %v919_v48, %v6621_v26  ;;  %v921_v32 = vpop.f32.mrf.mxu0 }
 0x1a4   :  { %10844 = vst [vmem:[#allocation8_spill] sm:$0xff] %v7152_v47  ;;  %2126 = vmatprep.mubr.f32.mxu0 %v10431_v30  ;;  %2505 = vmatpush2.msra.mxu0 %v1837_v59  ;;  %10845 = vst [vmem:[#allocation9_spill] sm:$0xff] %v7157_v4  ;;  %v1178_v29 = vpop.f32.mrf.mxu1  ;;  %v922_v0 = vadd.f32 %v921_v32, %v6627_v16  ;;  %v10434_v57 = vmax.f32 %v7152_v47, 0.0  ;;  %v10436_v32 = vmax.f32 %v7157_v4, 0.0 }
 0x1a5   :  { %2506 = vmatprep.subr.mxu0 %v10659_v35  ;;  %v925_v51 = vpop.f32.mrf.mxu0 }
 0x1a6   :  { %2507 = vmatpush2.msra.mxu0 %v1834_v12  ;;  %v1182_v59 = vpop.f32.mrf.mxu1  ;;  %v7172_v48 = vadd.f32 %v1178_v29, %v922_v0  ;;  %v7177_v12 = vadd.f32 %v1176_v8, %v920_v54 }
 0x1a7   :  { %2127 = vmatmul.mubr.f32.gmra.mxu0 %v10430_v61  ;;  %2508 = vmatprep.subr.mxu0 %v10659_v35  ;;  %v926_v61 = vadd.f32 %v925_v51, %v6621_v26  ;;  %v927_v63 = vpop.f32.mrf.mxu0 }
 0x1a8   :  { %10846 = vst [vmem:[#allocation31_spill] sm:$0xff] %v7172_v48  ;;  %2132 = vmatprep.mubr.f32.mxu0 %v10434_v57  ;;  %2509 = vmatpush2.msra.mxu0 %v1831_v21  ;;  %10847 = vst [vmem:[#allocation34_spill] sm:$0xff] %v7177_v12  ;;  %v1184_v30 = vpop.f32.mrf.mxu1  ;;  %v928_v29 = vadd.f32 %v927_v63, %v6627_v16  ;;  %v10439_v0 = vmax.f32 %v7172_v48, 0.0  ;;  %v10441_v51 = vmax.f32 %v7177_v12, 0.0 }
 0x1a9   :  { %2510 = vmatprep.subr.mxu0 %v10659_v35  ;;  %v931_v54 = vpop.f32.mrf.mxu0  ;;  %v7194_v57 = vadd.f32 %v1182_v59, %v926_v61 }
 0x1aa   :  { %2511 = vmatpush2.msra.mxu0 %v1828_v20  ;;  %v1188_v21 = vpop.f32.mrf.mxu1  ;;  %v7189_v8 = vadd.f32 %v1184_v30, %v928_v29  ;;  %v932_v63 = vadd.f32 %v931_v54, %v6621_v26 }
 0x1ab   :  { %2133 = vmatmul.mubr.f32.gmra.mxu0 %v10436_v32  ;;  %2512 = vmatprep.subr.mxu0 %v10659_v35  ;;  %10849 = vst [vmem:[#allocation11_spill] sm:$0xff] %v7194_v57  ;;  %v933_v47 = vpop.f32.mrf.mxu0 }
 0x1ac   :  { %10848 = vst [vmem:[#allocation10_spill] sm:$0xff] %v7189_v8  ;;  %2138 = vmatprep.mubr.f32.mxu0 %v10439_v0  ;;  %2513 = vmatpush2.msra.mxu0 %v1825_v13  ;;  %v1190_v20 = vpop.f32.mrf.mxu1  ;;  %v934_v32 = vadd.f32 %v933_v47, %v6627_v16  ;;  %v10442_v4 = vmax.f32 %v7189_v8, 0.0  ;;  %v10445_v13 = vmax.f32 %v7194_v57, 0.0  ;;  %v7206_v61 = vadd.f32 %v1188_v21, %v932_v63 }
 0x1ad   :  { %v937_v29 = vpop.f32.mrf.mxu0 }
 0x1ae   :  { %v1194_v30 = vpop.f32.mrf.mxu1  ;;  %v7201_v48 = vadd.f32 %v1190_v20, %v934_v32  ;;  %10851 = vst [vmem:[#allocation40_spill] sm:$0xff] %v7206_v61  ;;  %v938_v59 = vadd.f32 %v937_v29, %v6621_v26  ;;  %v10449_v21 = vmax.f32 %v7206_v61, 0.0 }
 0x1af   :  { %2139 = vmatmul.mubr.f32.gmra.mxu0 %v10441_v51  ;;  %v939_v47 = vpop.f32.mrf.mxu0 }
 0x1b0   :  { %10850 = vst [vmem:[#allocation37_spill] sm:$0xff] %v7201_v48  ;;  %2144 = vmatprep.mubr.f32.mxu0 %v10442_v4  ;;  %v1196_v54 = vpop.f32.mrf.mxu1  ;;  %v940_v0 = vadd.f32 %v939_v47, %v6627_v16  ;;  %v10446_v12 = vmax.f32 %v7201_v48, 0.0  ;;  %v7218_v63 = vadd.f32 %v1194_v30, %v938_v59 }
 0x1b1   :  { %v943_v20 = vpop.f32.mrf.mxu0 }
 0x1b2   :  { %v1200_v32 = vpop.f32.mrf.mxu1  ;;  %v7213_v51 = vadd.f32 %v1196_v54, %v940_v0  ;;  %10853 = vst [vmem:[#allocation13_spill] sm:$0xff] %v7218_v63  ;;  %v944_v29 = vadd.f32 %v943_v20, %v6621_v26  ;;  %v10453_v30 = vmax.f32 %v7218_v63, 0.0 }
 0x1b3   :  { %2145 = vmatmul.mubr.f32.gmra.mxu0 %v10445_v13  ;;  %v945_v47 = vpop.f32.mrf.mxu0 }
 0x1b4   :  { %10852 = vst [vmem:[#allocation12_spill] sm:$0xff] %v7213_v51  ;;  %2150 = vmatprep.mubr.f32.mxu0 %v10446_v12  ;;  %v1202_v4 = vpop.f32.mrf.mxu1  ;;  %v946_v8 = vadd.f32 %v945_v47, %v6627_v16  ;;  %v10450_v57 = vmax.f32 %v7213_v51, 0.0  ;;  %v7230_v59 = vadd.f32 %v1200_v32, %v944_v29 }
 0x1b5   :  { %v949_v54 = vpop.f32.mrf.mxu0 }
 0x1b6   :  { %v1206_v0 = vpop.f32.mrf.mxu1  ;;  %v7225_v13 = vadd.f32 %v1202_v4, %v946_v8  ;;  %10855 = vst [vmem:[#allocation46_spill] sm:$0xff] %v7230_v59  ;;  %v950_v20 = vadd.f32 %v949_v54, %v6621_v26  ;;  %v10457_v32 = vmax.f32 %v7230_v59, 0.0 }
 0x1b7   :  { %2151 = vmatmul.mubr.f32.gmra.mxu0 %v10449_v21  ;;  %v951_v47 = vpop.f32.mrf.mxu0 }
 0x1b8   :  { %10854 = vst [vmem:[#allocation43_spill] sm:$0xff] %v7225_v13  ;;  %2156 = vmatprep.mubr.f32.mxu0 %v10450_v57  ;;  %v1208_v12 = vpop.f32.mrf.mxu1  ;;  %v952_v48 = vadd.f32 %v951_v47, %v6627_v16  ;;  %v10454_v61 = vmax.f32 %v7225_v13, 0.0  ;;  %v7242_v29 = vadd.f32 %v1206_v0, %v950_v20 }
 0x1b9   :  { %v955_v8 = vpop.f32.mrf.mxu0 }
 0x1ba   :  { %v1212_v4 = vpop.f32.mrf.mxu1  ;;  %v7237_v21 = vadd.f32 %v1208_v12, %v952_v48  ;;  %10857 = vst [vmem:[#allocation15_spill] sm:$0xff] %v7242_v29  ;;  %v956_v54 = vadd.f32 %v955_v8, %v6621_v26  ;;  %v10459_v0 = vmax.f32 %v7242_v29, 0.0 }
 0x1bb   :  { %2157 = vmatmul.mubr.f32.gmra.mxu0 %v10453_v30  ;;  %v957_v47 = vpop.f32.mrf.mxu0 }
 0x1bc   :  { %10856 = vst [vmem:[#allocation14_spill] sm:$0xff] %v7237_v21  ;;  %2162 = vmatprep.mubr.f32.mxu0 %v10454_v61  ;;  %v1214_v57 = vpop.f32.mrf.mxu1  ;;  %v958_v51 = vadd.f32 %v957_v47, %v6627_v16  ;;  %v10458_v63 = vmax.f32 %v7237_v21, 0.0  ;;  %v7254_v20 = vadd.f32 %v1212_v4, %v956_v54  ;;  %v4923_v4 = vld [vmem:[%s10246_s4] sm:$0x7]  ;;  %v10859_v54 = vld [vmem:[#allocation5_spill] sm:$0xff] }
 0x1bd   :  { %v961_v12 = vpop.f32.mrf.mxu0 }
 0x1be   :  { %v1218_v48 = vpop.f32.mrf.mxu1  ;;  %v7249_v30 = vadd.f32 %v1214_v57, %v958_v51  ;;  %v962_v8 = vadd.f32 %v961_v12, %v6621_v26  ;;  %v7269_v12 = vrot.slane %v4923_v4, %v10859_v54 }
 0x1bf   :  { %2163 = vmatmul.mubr.f32.gmra.mxu0 %v10457_v32  ;;  %v963_v47 = vpop.f32.mrf.mxu0 }
 0x1c0   :  { %10858 = vst [vmem:[#allocation49_spill] sm:$0xff] %v7249_v30  ;;  %2168 = vmatprep.mubr.f32.mxu0 %v10458_v63  ;;  %v1220_v61 = vpop.f32.mrf.mxu1  ;;  %v964_v13 = vadd.f32 %v963_v47, %v6627_v16  ;;  %v10462_v59 = vmax.f32 %v7249_v30, 0.0  ;;  %v10465_v47 = vmax.f32 %v7254_v20, 0.0  ;;  %v7272_v63 = vadd.f32 %v1218_v48, %v962_v8 }
 0x1c1   :  { %v967_v51 = vpop.f32.mrf.mxu0 }
 0x1c2   :  { %v1224_v57 = vpop.f32.mrf.mxu1  ;;  %v7261_v32 = vadd.f32 %v1220_v61, %v964_v13 }
 0x1c3   :  { %2169 = vmatmul.mubr.f32.gmra.mxu0 %v10459_v0  ;;  %v968_v0 = vadd.f32 %v967_v51, %v6621_v26  ;;  %v969_v21 = vpop.f32.mrf.mxu0  ;;  %v10467_v26 = vmax.f32 %v7272_v63, 0.0 }
 0x1c4   :  { %2174 = vmatprep.mubr.f32.mxu0 %v10462_v59  ;;  %v1226_v29 = vpop.f32.mrf.mxu1  ;;  %v970_v13 = vadd.f32 %v969_v21, %v6627_v16  ;;  %v10469_v61 = vmax.f32 %v7261_v32, 0.0 }
 0x1c5   :  { %v4713_v30 = vpop.f32.mrf.mxu0  ;;  %v7285_v48 = vadd.f32 %v1224_v57, %v968_v0 }
 0x1c6   :  { %v1295_v59 = vpop.f32.mrf.mxu1  ;;  %v7279_v44 = vadd.f32 %v1226_v29, %v970_v13 }
 0x1c7   :  { %2175 = vmatmul.mubr.f32.gmra.mxu0 %v10465_v47  ;;  %v1296_v4 = vadd.f32 %v1295_v59, %v7269_v12  ;;  %10860 = vst [vmem:[#allocation16_spill] sm:$0xff] %v7285_v48  ;;  %v1520_v16 = vpop.f32.mrf.mxu0  ;;  %v10470_v0 = vmax.f32 %v7285_v48, 0.0 }
 0x1c8   :  { %2180 = vmatprep.mubr.f32.mxu0 %v10469_v61  ;;  %v1297_v8 = vpop.f32.mrf.mxu1  ;;  %v10466_v51 = vmax.f32 %v7279_v44, 0.0 }
 0x1c9   :  { %v7287_v21 = vadd.f32 %v1520_v16, %v1296_v4  ;;  %v4716_v13 = vpop.f32.mrf.mxu0  ;;  %v1915_v16 = vld [vmem:[%s10245_s5 + $0x460] sm:$0xff] }
 0x1ca   :  { %v1300_v29 = vpop.f32.mrf.mxu1 }
 0x1cb   :  { %2181 = vmatmul.mubr.f32.gmra.mxu0 %v10467_v26  ;;  %v10468_v59 = vmax.f32 %v7287_v21, 0.0  ;;  %v1301_v47 = vadd.f32 %v1300_v29, %v7269_v12  ;;  %v1530_v8 = vpop.f32.mrf.mxu0 }
 0x1cc   :  { %2186 = vmatprep.mubr.f32.mxu0 %v10466_v51  ;;  %v1302_v57 = vpop.f32.mrf.mxu1 }
 0x1cd   :  { %v7297_v4 = vadd.f32 %v4713_v30, %v1301_v47  ;;  %2258 = vmatmul.mubr.f32.vlgmr.msra.gmra.mxu1 %v10468_v59  ;;  %v4719_v51 = vpop.f32.mrf.mxu0  ;;  %v10861_v30 = vmax.f32 %v6664_v3, 0.0 }
 0x1ce   :  { %v1305_v29 = vpop.f32.mrf.mxu1  ;;  %4760 = vmatpush3.msra.mxu1 %v6861_v7  ;;  %2263 = vmatprep.mubr.f32.mxu1 %v10659_v35  ;;  %v1912_v7 = vld [vmem:[%s10245_s5 + $0x448] sm:$0xff] }
 0x1cf   :  { %2187 = vmatmul.mubr.f32.gmra.mxu0 %v10470_v0  ;;  %v10471_v26 = vmax.f32 %v7297_v4, 0.0  ;;  %v1306_v57 = vadd.f32 %v1305_v29, %v7269_v12  ;;  %v1540_v59 = vpop.f32.mrf.mxu0  ;;  %4761 = vmatprep.subr.mxu1 %v1915_v16  ;;  %v10862_v0 = vmax.f32 %v6671_v34, 0.0  ;;  %v1909_v34 = vld [vmem:[%s10245_s5 + $0x430] sm:$0xff] }
 0x1d0   :  { %2514 = vmatprep.mubr.f32.mxu0 %v10861_v30  ;;  %v1307_v47 = vpop.f32.mrf.mxu1  ;;  %4762 = vmatpush3.msra.mxu1 %v1915_v16  ;;  %v10865_v16 = vmax.f32 %v6715_v55, 0.0 }
 0x1d1   :  { %v7312_v61 = vadd.f32 %v1530_v8, %v1306_v57  ;;  %2264 = vmatmul.mubr.f32.gmra.mxu1 %v10471_v26  ;;  %v7321_v3 = vpop.f32.mrf.mxu0  ;;  %v10863_v57 = vmax.f32 %v6690_v37, 0.0  ;;  %4763 = vmatprep.subr.mxu1 %v1912_v7 }
 0x1d2   :  { %v1310_v29 = vpop.f32.mrf.mxu1  ;;  %2269 = vmatprep.mubr.f32.mxu1 %v10659_v35  ;;  %4764 = vmatpush3.msra.mxu1 %v1912_v7  ;;  %v10867_v7 = vmax.f32 %v6741_v19, 0.0 }
 0x1d3   :  { %2515 = vmatmul.mubr.f32.vlgmr.msra.gmra.mxu0 %v10862_v0  ;;  %v10473_v30 = vmax.f32 %v7312_v61, 0.0  ;;  %v1311_v8 = vadd.f32 %v1310_v29, %v7269_v12  ;;  %v1550_v26 = vpop.f32.mrf.mxu0  ;;  %v10864_v0 = vmax.f32 %v6695_v31, 0.0  ;;  %4765 = vmatprep.subr.mxu1 %v1909_v34  ;;  %v1906_v31 = vld [vmem:[%s10245_s5 + $0x418] sm:$0xff] }
 0x1d4   :  { %2519 = vmatprep.mubr.f32.mxu0 %v10863_v57  ;;  %v1312_v47 = vpop.f32.mrf.mxu1  ;;  %4766 = vmatpush3.msra.mxu1 %v1909_v34 }
 0x1d5   :  { %v7328_v54 = vadd.f32 %v4716_v13, %v1311_v8  ;;  %2270 = vmatmul.mubr.f32.gmra.mxu1 %v10473_v30  ;;  %v7337_v48 = vpop.f32.mrf.mxu0  ;;  %4767 = vmatprep.subr.mxu1 %v1906_v31 }
 0x1d6   :  { %v1315_v29 = vpop.f32.mrf.mxu1  ;;  %2275 = vmatprep.mubr.f32.mxu1 %v10659_v35  ;;  %4768 = vmatpush3.msra.mxu1 %v1906_v31 }
 0x1d7   :  { %2520 = vmatmul.mubr.f32.gmra.mxu0 %v10864_v0  ;;  %v10495_v37 = vmax.f32 %v7328_v54, 0.0  ;;  %v1316_v13 = vadd.f32 %v1315_v29, %v7269_v12  ;;  %v1560_v57 = vpop.f32.mrf.mxu0  ;;  %v10866_v0 = vmax.f32 %v6722_v24, 0.0  ;;  %v1903_v24 = vld [vmem:[%s10245_s5 + $0x400] sm:$0xff] }
 0x1d8   :  { %2524 = vmatprep.mubr.f32.mxu0 %v10865_v16  ;;  %v1317_v8 = vpop.f32.mrf.mxu1  ;;  %4769 = vmatprep.subr.mxu1 %v1903_v24 }
 0x1d9   :  { %v7344_v47 = vadd.f32 %v1540_v59, %v1316_v13  ;;  %2276 = vmatmul.mubr.f32.gmra.mxu1 %v10495_v37  ;;  %v7353_v30 = vpop.f32.mrf.mxu0 }
 0x1da   :  { %v1320_v29 = vpop.f32.mrf.mxu1  ;;  %2281 = vmatprep.mubr.f32.mxu1 %v10659_v35  ;;  %4770 = vmatpush3.msra.mxu1 %v1903_v24 }
 0x1db   :  { %2525 = vmatmul.mubr.f32.gmra.mxu0 %v10866_v0  ;;  %v10474_v55 = vmax.f32 %v7344_v47, 0.0  ;;  %v1321_v59 = vadd.f32 %v1320_v29, %v7269_v12  ;;  %v7360_v16 = vpop.f32.mrf.mxu0  ;;  %v10868_v0 = vmax.f32 %v6748_v11, 0.0  ;;  %v1900_v11 = vld [vmem:[%s10245_s5 + $0x3e8] sm:$0xff] }
 0x1dc   :  { %2529 = vmatprep.mubr.f32.mxu0 %v10867_v7  ;;  %v1322_v13 = vpop.f32.mrf.mxu1  ;;  %4771 = vmatprep.subr.mxu1 %v1900_v11 }
 0x1dd   :  { %v7362_v8 = vadd.f32 %v4719_v51, %v1321_v59  ;;  %2282 = vmatmul.mubr.f32.gmra.mxu1 %v10474_v55  ;;  %v10869_v51 = vmax.f32 %v6767_v27, 0.0 }
 0x1de   :  { %v1325_v29 = vpop.f32.mrf.mxu1  ;;  %2287 = vmatprep.mubr.f32.mxu1 %v10659_v35  ;;  %v7376_v59 = vpop.f32.mrf.mxu0  ;;  %4772 = vmatpush3.msra.mxu1 %v1900_v11 }
 0x1df   :  { %2530 = vmatmul.mubr.f32.gmra.mxu0 %v10868_v0  ;;  %v10493_v19 = vmax.f32 %v7362_v8, 0.0  ;;  %v1326_v34 = vadd.f32 %v1325_v29, %v7269_v12  ;;  %v10870_v0 = vmax.f32 %v6774_v23, 0.0  ;;  %v10871_v29 = vmax.f32 %v6793_v41, 0.0  ;;  %v1897_v23 = vld [vmem:[%s10245_s5 + $0x3d0] sm:$0xff] }
 0x1e0   :  { %2534 = vmatprep.mubr.f32.mxu0 %v10869_v51  ;;  %v1327_v7 = vpop.f32.mrf.mxu1  ;;  %v7380_v55 = vpop.f32.mrf.mxu0  ;;  %v10872_v41 = vmax.f32 %v6800_v22, 0.0  ;;  %4773 = vmatprep.subr.mxu1 %v1897_v23  ;;  %v1894_v22 = vld [vmem:[%s10245_s5 + $0x3b8] sm:$0xff] }
 0x1e1   :  { %v7378_v13 = vadd.f32 %v1550_v26, %v1326_v34  ;;  %2288 = vmatmul.mubr.f32.gmra.mxu1 %v10493_v19 }
 0x1e2   :  { %v1330_v27 = vpop.f32.mrf.mxu1  ;;  %2293 = vmatprep.mubr.f32.mxu1 %v10659_v35  ;;  %4774 = vmatpush3.msra.mxu1 %v1897_v23 }
 0x1e3   :  { %2535 = vmatmul.mubr.f32.gmra.mxu0 %v10870_v0  ;;  %v10475_v31 = vmax.f32 %v7378_v13, 0.0  ;;  %v1331_v26 = vadd.f32 %v1330_v27, %v7269_v12  ;;  %v7394_v34 = vpop.f32.mrf.mxu0  ;;  %4775 = vmatprep.subr.mxu1 %v1894_v22 }
 0x1e4   :  { %2539 = vmatprep.mubr.f32.mxu0 %v10871_v29  ;;  %v1332_v51 = vpop.f32.mrf.mxu1  ;;  %4776 = vmatpush3.msra.mxu1 %v1894_v22 }
 0x1e5   :  { %v7397_v7 = vadd.f32 %v7321_v3, %v1331_v26  ;;  %2294 = vmatmul.mubr.f32.gmra.mxu1 %v10475_v31  ;;  %v7404_v0 = vpop.f32.mrf.mxu0  ;;  %v10873_v26 = vmax.f32 %v6819_v15, 0.0 }
 0x1e6   :  { %v1335_v24 = vpop.f32.mrf.mxu1  ;;  %2299 = vmatprep.mubr.f32.mxu1 %v10659_v35 }
 0x1e7   :  { %2540 = vmatmul.mubr.f32.gmra.mxu0 %v10872_v41  ;;  %v10476_v27 = vmax.f32 %v7397_v7, 0.0  ;;  %v1336_v3 = vadd.f32 %v1335_v24, %v7269_v12  ;;  %v10874_v24 = vmax.f32 %v6826_v56, 0.0  ;;  %v1891_v56 = vld [vmem:[%s10245_s5 + $0x3a0] sm:$0xff] }
 0x1e8   :  { %2544 = vmatprep.mubr.f32.mxu0 %v10873_v26  ;;  %v7413_v29 = vpop.f32.mrf.mxu0  ;;  %v1337_v51 = vpop.f32.mrf.mxu1  ;;  %4777 = vmatprep.subr.mxu1 %v1891_v56 }
 0x1e9   :  { %v7415_v31 = vadd.f32 %v1560_v57, %v1336_v3  ;;  %2300 = vmatmul.mubr.f32.gmra.mxu1 %v10476_v27  ;;  %v10875_v3 = vmax.f32 %v6845_v39, 0.0  ;;  %v10876_v39 = vmax.f32 %v6852_v45, 0.0  ;;  %v1888_v45 = vld [vmem:[%s10245_s5 + $0x388] sm:$0xff] }
 0x1ea   :  { %v7422_v41 = vpop.f32.mrf.mxu0  ;;  %v1340_v15 = vpop.f32.mrf.mxu1  ;;  %2305 = vmatprep.mubr.f32.mxu1 %v10659_v35  ;;  %4778 = vmatpush3.msra.mxu1 %v1891_v56 }
 0x1eb   :  { %2545 = vmatmul.mubr.f32.gmra.mxu0 %v10874_v24  ;;  %v10477_v11 = vmax.f32 %v7415_v31, 0.0  ;;  %v1341_v57 = vadd.f32 %v1340_v15, %v7269_v12  ;;  %4779 = vmatprep.subr.mxu1 %v1888_v45 }
 0x1ec   :  { %2549 = vmatprep.mubr.f32.mxu0 %v10875_v3  ;;  %v7431_v26 = vpop.f32.mrf.mxu0  ;;  %v1342_v51 = vpop.f32.mrf.mxu1  ;;  %4780 = vmatpush3.msra.mxu1 %v1888_v45 }
 0x1ed   :  { %v7434_v27 = vadd.f32 %v7337_v48, %v1341_v57  ;;  %2306 = vmatmul.mubr.f32.gmra.mxu1 %v10477_v11  ;;  %v10877_v57 = vmax.f32 %v6870_v40, 0.0  ;;  %v10878_v40 = vmax.f32 %v6877_v28, 0.0  ;;  %v1885_v28 = vld [vmem:[%s10245_s5 + $0x370] sm:$0xff] }
 0x1ee   :  { %v7441_v24 = vpop.f32.mrf.mxu0  ;;  %v1345_v23 = vpop.f32.mrf.mxu1  ;;  %2311 = vmatprep.mubr.f32.mxu1 %v10659_v35  ;;  %4781 = vmatprep.subr.mxu1 %v1885_v28 }
 0x1ef   :  { %2550 = vmatmul.mubr.f32.gmra.mxu0 %v10876_v39  ;;  %v10478_v15 = vmax.f32 %v7434_v27, 0.0  ;;  %v1346_v48 = vadd.f32 %v1345_v23, %v7269_v12  ;;  %4782 = vmatpush3.msra.mxu1 %v1885_v28 }
 0x1f0   :  { %2554 = vmatprep.mubr.f32.mxu0 %v10877_v57  ;;  %v7450_v3 = vpop.f32.mrf.mxu0  ;;  %v1347_v51 = vpop.f32.mrf.mxu1 }
 0x1f1   :  { %v7453_v11 = vadd.f32 %v7360_v16, %v1346_v48  ;;  %2312 = vmatmul.mubr.f32.gmra.mxu1 %v10478_v15  ;;  %v10879_v48 = vmax.f32 %v6891_v17, 0.0  ;;  %v10880_v17 = vmax.f32 %v6898_v6, 0.0  ;;  %v1882_v6 = vld [vmem:[%s10245_s5 + $0x358] sm:$0xff] }
 0x1f2   :  { %v7460_v39 = vpop.f32.mrf.mxu0  ;;  %v1350_v22 = vpop.f32.mrf.mxu1  ;;  %2317 = vmatprep.mubr.f32.mxu1 %v10659_v35  ;;  %4783 = vmatprep.subr.mxu1 %v1882_v6 }
 0x1f3   :  { %2555 = vmatmul.mubr.f32.gmra.mxu0 %v10878_v40  ;;  %v10479_v23 = vmax.f32 %v7453_v11, 0.0  ;;  %v1351_v16 = vadd.f32 %v1350_v22, %v7269_v12  ;;  %4784 = vmatpush3.msra.mxu1 %v1882_v6 }
 0x1f4   :  { %2559 = vmatprep.mubr.f32.mxu0 %v10879_v48  ;;  %v7469_v57 = vpop.f32.mrf.mxu0  ;;  %v1352_v51 = vpop.f32.mrf.mxu1 }
 0x1f5   :  { %v7472_v15 = vadd.f32 %v7353_v30, %v1351_v16  ;;  %2318 = vmatmul.mubr.f32.gmra.mxu1 %v10479_v23  ;;  %v10881_v16 = vmax.f32 %v6911_v52, 0.0  ;;  %v10882_v52 = vmax.f32 %v6918_v18, 0.0  ;;  %v1879_v18 = vld [vmem:[%s10245_s5 + $0x340] sm:$0xff] }
 0x1f6   :  { %v7479_v40 = vpop.f32.mrf.mxu0  ;;  %v1355_v56 = vpop.f32.mrf.mxu1  ;;  %2323 = vmatprep.mubr.f32.mxu1 %v10659_v35  ;;  %4785 = vmatprep.subr.mxu1 %v1879_v18 }
 0x1f7   :  { %2560 = vmatmul.mubr.f32.gmra.mxu0 %v10880_v17  ;;  %v10480_v22 = vmax.f32 %v7472_v15, 0.0  ;;  %v1356_v30 = vadd.f32 %v1355_v56, %v7269_v12  ;;  %4786 = vmatpush3.msra.mxu1 %v1879_v18 }
 0x1f8   :  { %2564 = vmatprep.mubr.f32.mxu0 %v10881_v16  ;;  %v7488_v48 = vpop.f32.mrf.mxu0  ;;  %v1357_v51 = vpop.f32.mrf.mxu1 }
 0x1f9   :  { %v7491_v23 = vadd.f32 %v7380_v55, %v1356_v30  ;;  %2324 = vmatmul.mubr.f32.gmra.mxu1 %v10480_v22  ;;  %v10883_v30 = vmax.f32 %v6931_v42, 0.0 }
 0x1fa   :  { %v7498_v17 = vpop.f32.mrf.mxu0  ;;  %v1360_v45 = vpop.f32.mrf.mxu1  ;;  %2329 = vmatprep.mubr.f32.mxu1 %v10659_v35 }
 0x1fb   :  { %2565 = vmatmul.mubr.f32.gmra.mxu0 %v10882_v52  ;;  %v10492_v56 = vmax.f32 %v7491_v23, 0.0  ;;  %v1361_v55 = vadd.f32 %v1360_v45, %v7269_v12  ;;  %v10884_v52 = vmax.f32 %v6938_v50, 0.0  ;;  %v1876_v50 = vld [vmem:[%s10245_s5 + $0x328] sm:$0xff] }
 0x1fc   :  { %2569 = vmatprep.mubr.f32.mxu0 %v10883_v30  ;;  %v7507_v16 = vpop.f32.mrf.mxu0  ;;  %v1362_v51 = vpop.f32.mrf.mxu1  ;;  %4787 = vmatprep.subr.mxu1 %v1876_v50 }
 0x1fd   :  { %v7510_v22 = vadd.f32 %v7376_v59, %v1361_v55  ;;  %2330 = vmatmul.mubr.f32.gmra.mxu1 %v10492_v56  ;;  %v10885_v59 = vmax.f32 %v6951_v60, 0.0 }
 0x1fe   :  { %v1365_v42 = vpop.f32.mrf.mxu1  ;;  %2335 = vmatprep.mubr.f32.mxu1 %v10659_v35  ;;  %v7524_v55 = vpop.f32.mrf.mxu0  ;;  %4788 = vmatpush3.msra.mxu1 %v1876_v50 }
 0x1ff   :  { %2570 = vmatmul.mubr.f32.gmra.mxu0 %v10884_v52  ;;  %v10490_v28 = vmax.f32 %v7510_v22, 0.0  ;;  %v1366_v45 = vadd.f32 %v1365_v42, %v7269_v12  ;;  %v10886_v52 = vmax.f32 %v6958_v25, 0.0  ;;  %v1873_v25 = vld [vmem:[%s10245_s5 + $0x310] sm:$0xff] }
 0x200   :  { %2574 = vmatprep.mubr.f32.mxu0 %v10885_v59  ;;  %v1367_v30 = vpop.f32.mrf.mxu1  ;;  %4789 = vmatprep.subr.mxu1 %v1873_v25 }
 0x201   :  { %v7527_v51 = vadd.f32 %v7404_v0, %v1366_v45  ;;  %2336 = vmatmul.mubr.f32.gmra.mxu1 %v10490_v28  ;;  %v10887_v0 = vmax.f32 %v6971_v5, 0.0  ;;  %v7541_v45 = vpop.f32.mrf.mxu0 }
 0x202   :  { %v1370_v60 = vpop.f32.mrf.mxu1  ;;  %2341 = vmatprep.mubr.f32.mxu1 %v10659_v35  ;;  %4790 = vmatpush3.msra.mxu1 %v1873_v25 }
 0x203   :  { %2575 = vmatmul.mubr.f32.gmra.mxu0 %v10886_v52  ;;  %v10489_v6 = vmax.f32 %v7527_v51, 0.0  ;;  %v1371_v42 = vadd.f32 %v1370_v60, %v7269_v12  ;;  %v10888_v52 = vmax.f32 %v6978_v58, 0.0  ;;  %v3042_v58 = vld [vmem:[%s10247_s7 + $0x170] sm:$0xff] }
 0x204   :  { %2579 = vmatprep.mubr.f32.mxu0 %v10887_v0  ;;  %v1372_v59 = vpop.f32.mrf.mxu1  ;;  %3157 = vmatprep.subr.mxu1 %v3042_v58 }
 0x205   :  { %v7544_v30 = vadd.f32 %v7394_v34, %v1371_v42  ;;  %2342 = vmatmul.mubr.f32.gmra.mxu1 %v10489_v6  ;;  %v10889_v34 = vmax.f32 %v6991_v62, 0.0  ;;  %v7558_v42 = vpop.f32.mrf.mxu0 }
 0x206   :  { %2347 = vmatprep.mubr.f32.mxu1 %v10659_v35 }
 0x207   :  { %2580 = vmatmul.mubr.f32.gmra.mxu0 %v10888_v52  ;;  %v1375_v5 = vpop.f32.mrf.mxu1  ;;  %v10487_v18 = vmax.f32 %v7544_v30, 0.0  ;;  %v10890_v52 = vmax.f32 %v6997_v49, 0.0  ;;  %v10892_v49 = vmax.f32 %v7017_v9, 0.0 }
 0x208   :  { %v1376_v60 = vadd.f32 %v1375_v5, %v7269_v12  ;;  %2584 = vmatprep.mubr.f32.mxu0 %v10889_v34 }
 0x209   :  { %v1377_v0 = vpop.f32.mrf.mxu1  ;;  %2348 = vmatmul.mubr.f32.gmra.mxu1 %v10487_v18 }
 0x20a   :  { %v7561_v59 = vadd.f32 %v7422_v41, %v1376_v60  ;;  %2353 = vmatprep.mubr.f32.mxu1 %v10659_v35  ;;  %v10891_v41 = vmax.f32 %v7012_v2, 0.0  ;;  %v7575_v60 = vpop.f32.mrf.mxu0 }
 0x20b   :  { %2585 = vmatmul.mubr.f32.gmra.mxu0 %v10890_v52  ;;  %v1380_v62 = vpop.f32.mrf.mxu1 }
 0x20c   :  { %v10486_v50 = vmax.f32 %v7561_v59, 0.0  ;;  %v1381_v5 = vadd.f32 %v1380_v62, %v7269_v12  ;;  %2589 = vmatprep.mubr.f32.mxu0 %v10891_v41  ;;  %v10893_v62 = vmax.f32 %v7032_v33, 0.0  ;;  %v7589_v58 = vpop.f32.mrf.mxu0  ;;  %v10894_v41 = vmax.f32 %v7037_v14, 0.0 }
 0x20d   :  { %v1382_v34 = vpop.f32.mrf.mxu1 }
 0x20e   :  { %v7578_v0 = vadd.f32 %v7413_v29, %v1381_v5  ;;  %2354 = vmatmul.mubr.f32.gmra.mxu1 %v10486_v50 }
 0x20f   :  { %2590 = vmatmul.mubr.f32.gmra.mxu0 %v10892_v49  ;;  %v1385_v52 = vpop.f32.mrf.mxu1  ;;  %2359 = vmatprep.mubr.f32.mxu1 %v10659_v35 }
 0x210   :  { %v10484_v2 = vmax.f32 %v7578_v0, 0.0  ;;  %v1386_v25 = vadd.f32 %v1385_v52, %v7269_v12  ;;  %2594 = vmatprep.mubr.f32.mxu0 %v10893_v62  ;;  %v10895_v52 = vmax.f32 %v7052_v36, 0.0  ;;  %v3138_v36 = vld [vmem:[%s10247_s7 + $0x470] sm:$0xff] }
 0x211   :  { %v1387_v29 = vpop.f32.mrf.mxu1  ;;  %3414 = vmatprep.subr.mxu0 %v3138_v36 }
 0x212   :  { %v7592_v5 = vadd.f32 %v7441_v24, %v1386_v25  ;;  %2360 = vmatmul.mubr.f32.gmra.mxu1 %v10484_v2  ;;  %v10896_v29 = vmax.f32 %v7057_v53, 0.0  ;;  %v3137_v53 = vld [vmem:[%s10247_s7 + $0x468] sm:$0xff] }
 0x213   :  { %v7596_v9 = vpop.f32.mrf.mxu0  ;;  %2595 = vmatmul.mubr.f32.gmra.mxu0 %v10894_v41  ;;  %v1390_v34 = vpop.f32.mrf.mxu1  ;;  %2365 = vmatprep.mubr.f32.mxu1 %v10659_v35 }
 0x214   :  { %v10481_v33 = vmax.f32 %v7592_v5, 0.0  ;;  %v1391_v49 = vadd.f32 %v1390_v34, %v7269_v12  ;;  %2599 = vmatprep.mubr.f32.mxu0 %v10895_v52  ;;  %3415 = vmatpush1.msra.mxu0 %v3137_v53  ;;  %v10899_v53 = vmax.f32 %v7092_v43, 0.0  ;;  %v3135_v43 = vld [vmem:[%s10247_s7 + $0x458] sm:$0xff] }
 0x215   :  { %v7605_v24 = vpop.f32.mrf.mxu0  ;;  %v1392_v25 = vpop.f32.mrf.mxu1  ;;  %3416 = vmatprep.subr.mxu0 %v3135_v43 }
 0x216   :  { %v7608_v62 = vadd.f32 %v7431_v26, %v1391_v49  ;;  %2366 = vmatmul.mubr.f32.gmra.mxu1 %v10481_v33  ;;  %v10897_v49 = vmax.f32 %v7072_v46, 0.0  ;;  %v10898_v46 = vmax.f32 %v7077_v10, 0.0 }
 0x217   :  { %v7612_v14 = vpop.f32.mrf.mxu0  ;;  %2600 = vmatmul.mubr.f32.gmra.mxu0 %v10896_v29  ;;  %v1395_v41 = vpop.f32.mrf.mxu1  ;;  %2371 = vmatprep.mubr.f32.mxu1 %v10659_v35 }
 0x218   :  { %v10482_v34 = vmax.f32 %v7608_v62, 0.0  ;;  %v1396_v26 = vadd.f32 %v1395_v41, %v7269_v12  ;;  %2604 = vmatprep.mubr.f32.mxu0 %v10897_v49 }
 0x219   :  { %v7627_v52 = vpop.f32.mrf.mxu0  ;;  %v1397_v25 = vpop.f32.mrf.mxu1 }
 0x21a   :  { %v7630_v29 = vadd.f32 %v7460_v39, %v1396_v26  ;;  %2372 = vmatmul.mubr.f32.gmra.mxu1 %v10482_v34 }
 0x21b   :  { %v7634_v33 = vpop.f32.mrf.mxu0  ;;  %2605 = vmatmul.mubr.f32.gmra.mxu0 %v10898_v46  ;;  %v1400_v41 = vpop.f32.mrf.mxu1  ;;  %2377 = vmatprep.mubr.f32.mxu1 %v10659_v35  ;;  %v10900_v46 = vmax.f32 %v7097_v38, 0.0  ;;  %v3134_v38 = vld [vmem:[%s10247_s7 + $0x450] sm:$0xff] }
 0x21c   :  { %v10483_v36 = vmax.f32 %v7630_v29, 0.0  ;;  %v1401_v49 = vadd.f32 %v1400_v41, %v7269_v12  ;;  %2609 = vmatprep.mubr.f32.mxu0 %v10899_v53  ;;  %3417 = vmatpush1.msra.mxu0 %v3134_v38 }
 0x21d   :  { %v7643_v39 = vpop.f32.mrf.mxu0  ;;  %v1402_v26 = vpop.f32.mrf.mxu1 }
 0x21e   :  { %v7646_v25 = vadd.f32 %v7450_v3, %v1401_v49  ;;  %2378 = vmatmul.mubr.f32.gmra.mxu1 %v10483_v36  ;;  %v10901_v49 = vmax.f32 %v7112_v1, 0.0 }
 0x21f   :  { %v7650_v10 = vpop.f32.mrf.mxu0  ;;  %2610 = vmatmul.mubr.f32.gmra.mxu0 %v10900_v46  ;;  %v1405_v34 = vpop.f32.mrf.mxu1  ;;  %2383 = vmatprep.mubr.f32.mxu1 %v10659_v35 }
 0x220   :  { %v10485_v41 = vmax.f32 %v7646_v25, 0.0  ;;  %v1406_v3 = vadd.f32 %v1405_v34, %v7269_v12  ;;  %2614 = vmatprep.mubr.f32.mxu0 %v10901_v49  ;;  %v10902_v34 = vld [vmem:[#allocation6_spill] sm:$0xff] }
 0x221   :  { %v7665_v53 = vpop.f32.mrf.mxu0  ;;  %v1407_v26 = vpop.f32.mrf.mxu1  ;;  %v10903_v1 = vmax.f32 %v10902_v34, 0.0 }
 0x222   :  { %v7668_v46 = vadd.f32 %v7479_v40, %v1406_v3  ;;  %2384 = vmatmul.mubr.f32.gmra.mxu1 %v10485_v41  ;;  %v10904_v26 = vld [vmem:[#allocation7_spill] sm:$0xff] }
 0x223   :  { %v7672_v36 = vpop.f32.mrf.mxu0  ;;  %2615 = vmatmul.mubr.f32.gmra.mxu0 %v10903_v1  ;;  %v1410_v43 = vpop.f32.mrf.mxu1  ;;  %2389 = vmatprep.mubr.f32.mxu1 %v10659_v35  ;;  %v10905_v38 = vmax.f32 %v10904_v26, 0.0  ;;  %v10906_v1 = vld [vmem:[#allocation28_spill] sm:$0xff] }
 0x224   :  { %v10488_v49 = vmax.f32 %v7668_v46, 0.0  ;;  %v1411_v2 = vadd.f32 %v1410_v43, %v7269_v12  ;;  %v10907_v50 = vmax.f32 %v10906_v1, 0.0  ;;  %v3132_v43 = vld [vmem:[%s10247_s7 + $0x440] sm:$0xff] }
 0x225   :  { %2619 = vmatprep.mubr.f32.mxu0 %v10905_v38  ;;  %v7681_v40 = vpop.f32.mrf.mxu0  ;;  %v1412_v3 = vpop.f32.mrf.mxu1  ;;  %3418 = vmatprep.subr.mxu0 %v3132_v43 }
 0x226   :  { %v7684_v41 = vadd.f32 %v7469_v57, %v1411_v2  ;;  %2390 = vmatmul.mubr.f32.gmra.mxu1 %v10488_v49  ;;  %v10908_v2 = vld [vmem:[#allocation8_spill] sm:$0xff]  ;;  %v3131_v3 = vld [vmem:[%s10247_s7 + $0x438] sm:$0xff] }
 0x227   :  { %v7688_v34 = vpop.f32.mrf.mxu0  ;;  %2620 = vmatmul.mubr.f32.gmra.mxu0 %v10907_v50  ;;  %v1415_v18 = vpop.f32.mrf.mxu1  ;;  %2395 = vmatprep.mubr.f32.mxu1 %v10659_v35  ;;  %v10909_v38 = vmax.f32 %v10908_v2, 0.0 }
 0x228   :  { %v10491_v26 = vmax.f32 %v7684_v41, 0.0  ;;  %v1416_v57 = vadd.f32 %v1415_v18, %v7269_v12  ;;  %3419 = vmatpush1.msra.mxu0 %v3131_v3  ;;  %v10910_v18 = vld [vmem:[#allocation9_spill] sm:$0xff] }
 0x229   :  { %2624 = vmatprep.mubr.f32.mxu0 %v10909_v38  ;;  %v7703_v50 = vpop.f32.mrf.mxu0  ;;  %v1417_v1 = vpop.f32.mrf.mxu1  ;;  %v10911_v2 = vmax.f32 %v10910_v18, 0.0 }
 0x22a   :  { %v7706_v49 = vadd.f32 %v7498_v17, %v1416_v57  ;;  %2396 = vmatmul.mubr.f32.gmra.mxu1 %v10491_v26  ;;  %v10912_v1 = vld [vmem:[#allocation31_spill] sm:$0xff] }
 0x22b   :  { %v7710_v6 = vpop.f32.mrf.mxu0  ;;  %2625 = vmatmul.mubr.f32.gmra.mxu0 %v10911_v2  ;;  %v1420_v43 = vpop.f32.mrf.mxu1  ;;  %2401 = vmatprep.mubr.f32.mxu1 %v10659_v35  ;;  %v10913_v3 = vmax.f32 %v10912_v1, 0.0  ;;  %v10915_v2 = vld [vmem:[#allocation34_spill] sm:$0xff] }
 0x22c   :  { %v10494_v38 = vmax.f32 %v7706_v49, 0.0  ;;  %v1421_v28 = vadd.f32 %v1420_v43, %v7269_v12  ;;  %v10916_v56 = vmax.f32 %v10915_v2, 0.0  ;;  %v3129_v43 = vld [vmem:[%s10247_s7 + $0x428] sm:$0xff] }
 0x22d   :  { %2629 = vmatprep.mubr.f32.mxu0 %v10913_v3  ;;  %v7719_v17 = vpop.f32.mrf.mxu0  ;;  %v1422_v57 = vpop.f32.mrf.mxu1  ;;  %3420 = vmatprep.subr.mxu0 %v3129_v43 }
 0x22e   :  { %v7722_v26 = vadd.f32 %v7488_v48, %v1421_v28  ;;  %2402 = vmatmul.mubr.f32.gmra.mxu1 %v10494_v38  ;;  %v10917_v28 = vld [vmem:[#allocation10_spill] sm:$0xff] }
 0x22f   :  { %v7726_v18 = vpop.f32.mrf.mxu0  ;;  %2630 = vmatmul.mubr.f32.gmra.mxu0 %v10916_v56  ;;  %v1425_v19 = vpop.f32.mrf.mxu1  ;;  %2407 = vmatprep.mubr.f32.mxu1 %v10659_v35  ;;  %v10918_v3 = vmax.f32 %v10917_v28, 0.0  ;;  %v3128_v57 = vld [vmem:[%s10247_s7 + $0x420] sm:$0xff] }
 0x230   :  { %10914 = vst [vmem:[#allocation17_spill] sm:$0xff] %v7726_v18  ;;  %v10496_v1 = vmax.f32 %v7722_v26, 0.0  ;;  %v1426_v48 = vadd.f32 %v1425_v19, %v7269_v12  ;;  %3421 = vmatpush1.msra.mxu0 %v3128_v57  ;;  %v10921_v19 = vld [vmem:[#allocation11_spill] sm:$0xff] }
 0x231   :  { %2634 = vmatprep.mubr.f32.mxu0 %v10918_v3  ;;  %v7741_v56 = vpop.f32.mrf.mxu0  ;;  %v1427_v2 = vpop.f32.mrf.mxu1  ;;  %v10922_v28 = vmax.f32 %v10921_v19, 0.0 }
 0x232   :  { %10919 = vst [vmem:[#allocation18_spill] sm:$0xff] %v7741_v56  ;;  %v7744_v38 = vadd.f32 %v7524_v55, %v1426_v48  ;;  %2408 = vmatmul.mubr.f32.gmra.mxu1 %v10496_v1  ;;  %v10923_v2 = vld [vmem:[#allocation37_spill] sm:$0xff] }
 0x233   :  { %v7748_v37 = vpop.f32.mrf.mxu0  ;;  %2635 = vmatmul.mubr.f32.gmra.mxu0 %v10922_v28  ;;  %v1430_v43 = vpop.f32.mrf.mxu1  ;;  %2413 = vmatprep.mubr.f32.mxu1 %v10659_v35  ;;  %v10924_v57 = vmax.f32 %v10923_v2, 0.0  ;;  %v10927_v28 = vld [vmem:[#allocation40_spill] sm:$0xff] }
 0x234   :  { %10920 = vst [vmem:[#allocation19_spill] sm:$0xff] %v7748_v37  ;;  %v10497_v3 = vmax.f32 %v7744_v38, 0.0  ;;  %v1431_v56 = vadd.f32 %v1430_v43, %v7269_v12  ;;  %v10928_v37 = vmax.f32 %v10927_v28, 0.0  ;;  %v3126_v43 = vld [vmem:[%s10247_s7 + $0x410] sm:$0xff] }
 0x235   :  { %2639 = vmatprep.mubr.f32.mxu0 %v10924_v57  ;;  %v7757_v55 = vpop.f32.mrf.mxu0  ;;  %v1432_v48 = vpop.f32.mrf.mxu1  ;;  %3422 = vmatprep.subr.mxu0 %v3126_v43 }
 0x236   :  { %10925 = vst [vmem:[#allocation20_spill] sm:$0xff] %v7757_v55  ;;  %v7760_v1 = vadd.f32 %v7507_v16, %v1431_v56  ;;  %2414 = vmatmul.mubr.f32.gmra.mxu1 %v10497_v3  ;;  %v10929_v56 = vld [vmem:[#allocation12_spill] sm:$0xff] }
 0x237   :  { %v7764_v19 = vpop.f32.mrf.mxu0  ;;  %2640 = vmatmul.mubr.f32.gmra.mxu0 %v10928_v37  ;;  %v1435_v18 = vpop.f32.mrf.mxu1  ;;  %2419 = vmatprep.mubr.f32.mxu1 %v10659_v35  ;;  %v10930_v57 = vmax.f32 %v10929_v56, 0.0  ;;  %v3125_v48 = vld [vmem:[%s10247_s7 + $0x408] sm:$0xff] }
 0x238   :  { %10926 = vst [vmem:[#allocation21_spill] sm:$0xff] %v7764_v19  ;;  %v10498_v2 = vmax.f32 %v7760_v1, 0.0  ;;  %v1436_v16 = vadd.f32 %v1435_v18, %v7269_v12  ;;  %3423 = vmatpush1.msra.mxu0 %v3125_v48  ;;  %v10933_v18 = vld [vmem:[#allocation13_spill] sm:$0xff] }
 0x239   :  { %2644 = vmatprep.mubr.f32.mxu0 %v10930_v57  ;;  %v7779_v37 = vpop.f32.mrf.mxu0  ;;  %v1437_v28 = vpop.f32.mrf.mxu1  ;;  %v10934_v56 = vmax.f32 %v10933_v18, 0.0 }
 0x23a   :  { %10931 = vst [vmem:[#allocation22_spill] sm:$0xff] %v7779_v37  ;;  %v7782_v3 = vadd.f32 %v7558_v42, %v1436_v16  ;;  %2420 = vmatmul.mubr.f32.gmra.mxu1 %v10498_v2  ;;  %v10935_v28 = vld [vmem:[#allocation43_spill] sm:$0xff] }
 0x23b   :  { %v7786_v19 = vpop.f32.mrf.mxu0  ;;  %2645 = vmatmul.mubr.f32.gmra.mxu0 %v10934_v56  ;;  %v1440_v43 = vpop.f32.mrf.mxu1  ;;  %2425 = vmatprep.mubr.f32.mxu1 %v10659_v35  ;;  %v10936_v48 = vmax.f32 %v10935_v28, 0.0  ;;  %v10938_v56 = vld [vmem:[#allocation46_spill] sm:$0xff] }
 0x23c   :  { %10932 = vst [vmem:[#allocation23_spill] sm:$0xff] %v7786_v19  ;;  %v10499_v57 = vmax.f32 %v7782_v3, 0.0  ;;  %v1441_v37 = vadd.f32 %v1440_v43, %v7269_v12  ;;  %v10939_v19 = vmax.f32 %v10938_v56, 0.0  ;;  %v3123_v43 = vld [vmem:[%s10247_s7 + $0x3f8] sm:$0xff] }
 0x23d   :  { %2649 = vmatprep.mubr.f32.mxu0 %v10936_v48  ;;  %v7795_v42 = vpop.f32.mrf.mxu0  ;;  %v1442_v16 = vpop.f32.mrf.mxu1  ;;  %3424 = vmatprep.subr.mxu0 %v3123_v43 }
 0x23e   :  { %v7798_v2 = vadd.f32 %v7541_v45, %v1441_v37  ;;  %2426 = vmatmul.mubr.f32.gmra.mxu1 %v10499_v57  ;;  %v10940_v37 = vld [vmem:[#allocation14_spill] sm:$0xff]  ;;  %v3122_v16 = vld [vmem:[%s10247_s7 + $0x3f0] sm:$0xff] }
 0x23f   :  { %v7802_v18 = vpop.f32.mrf.mxu0  ;;  %2650 = vmatmul.mubr.f32.gmra.mxu0 %v10939_v19  ;;  %v1445_v55 = vpop.f32.mrf.mxu1  ;;  %2431 = vmatprep.mubr.f32.mxu1 %v10659_v35  ;;  %v10941_v48 = vmax.f32 %v10940_v37, 0.0 }
 0x240   :  { %10937 = vst [vmem:[#allocation24_spill] sm:$0xff] %v7802_v18  ;;  %v10500_v28 = vmax.f32 %v7798_v2, 0.0  ;;  %v1446_v45 = vadd.f32 %v1445_v55, %v7269_v12  ;;  %3425 = vmatpush1.msra.mxu0 %v3122_v16  ;;  %v10943_v55 = vld [vmem:[#allocation15_spill] sm:$0xff] }
 0x241   :  { %2654 = vmatprep.mubr.f32.mxu0 %v10941_v48  ;;  %v7817_v19 = vpop.f32.mrf.mxu0  ;;  %v1447_v56 = vpop.f32.mrf.mxu1  ;;  %v10944_v37 = vmax.f32 %v10943_v55, 0.0 }
 0x242   :  { %10942 = vst [vmem:[#allocation25_spill] sm:$0xff] %v7817_v19  ;;  %v7820_v57 = vadd.f32 %v7589_v58, %v1446_v45  ;;  %2432 = vmatmul.mubr.f32.gmra.mxu1 %v10500_v28  ;;  %v10945_v56 = vld [vmem:[#allocation49_spill] sm:$0xff] }
 0x243   :  { %v7824_v18 = vpop.f32.mrf.mxu0  ;;  %2655 = vmatmul.mubr.f32.gmra.mxu0 %v10944_v37  ;;  %v1450_v43 = vpop.f32.mrf.mxu1  ;;  %2437 = vmatprep.mubr.f32.mxu1 %v10659_v35  ;;  %v10946_v16 = vmax.f32 %v10945_v56, 0.0  ;;  %v10947_v37 = vmax.f32 %v7254_v20, 0.0  ;;  %v10948_v56 = vmax.f32 %v7261_v32, 0.0  ;;  %v10951_v32 = vmax.f32 %v7279_v44, 0.0 }
 0x244   :  { %v1771_v48 = vmax.f32 %v7820_v57, 0.0  ;;  %v1451_v19 = vadd.f32 %v1450_v43, %v7269_v12  ;;  %v3120_v12 = vld [vmem:[%s10247_s7 + $0x3e0] sm:$0xff]  ;;  %v10955_v44 = vmax.f32 %v7312_v61, 0.0  ;;  %v3095_v57 = vld [vmem:[%s10247_s7 + $0x318] sm:$0xff] }
 0x245   :  { %2659 = vmatprep.mubr.f32.mxu0 %v10946_v16  ;;  %v7833_v58 = vpop.f32.mrf.mxu0  ;;  %v1452_v45 = vpop.f32.mrf.mxu1  ;;  %3426 = vmatprep.subr.mxu0 %v3120_v12  ;;  %v10949_v16 = vmax.f32 %v7272_v63, 0.0  ;;  %v3041_v12 = vld [vmem:[%s10247_s7 + $0x168] sm:$0xff]  ;;  %v3039_v63 = vld [vmem:[%s10247_s7 + $0x158] sm:$0xff]  ;;  %v3036_v61 = vld [vmem:[%s10247_s7 + $0x140] sm:$0xff] }
 0x246   :  { %v7836_v28 = vadd.f32 %v7575_v60, %v1451_v19  ;;  %2438 = vmatmul.mubr.f32.gmra.mxu1 %v1771_v48  ;;  %v3119_v60 = vld [vmem:[%s10247_s7 + $0x3d8] sm:$0xff]  ;;  %v10950_v45 = vmax.f32 %v7287_v21, 0.0  ;;  %v10953_v21 = vld [vmem:[#allocation16_spill] sm:$0xff] }
 0x247   :  { %v7840_v55 = vpop.f32.mrf.mxu0  ;;  %2660 = vmatmul.mubr.f32.gmra.mxu0 %v10947_v37  ;;  %2443 = vmatprep.mubr.f32.mxu1 %v10659_v35 }
 0x248   :  { %v1774_v43 = vmax.f32 %v7836_v28, 0.0  ;;  %2664 = vmatprep.mubr.f32.mxu0 %v10948_v56  ;;  %3427 = vmatpush1.msra.mxu0 %v3119_v60  ;;  %v10952_v56 = vmax.f32 %v7297_v4, 0.0  ;;  %v3038_v4 = vld [vmem:[%s10247_s7 + $0x150] sm:$0xff]  ;;  %v3044_v28 = vld [vmem:[%s10247_s7 + $0x180] sm:$0xff] }
 0x249   :  { %v7854_v19 = vpop.f32.mrf.mxu0 }
 0x24a   :  { %2444 = vmatmul.mubr.f32.gmra.mxu1 %v1774_v43 }
 0x24b   :  { %v7858_v20 = vpop.f32.mrf.mxu0  ;;  %2665 = vmatmul.mubr.f32.gmra.mxu0 %v10949_v16  ;;  %4791 = vmatprep.mubr.f32.mxu1 %v10950_v45  ;;  %v10954_v16 = vmax.f32 %v10953_v21, 0.0  ;;  %v3117_v45 = vld [vmem:[%s10247_s7 + $0x3c8] sm:$0xff]  ;;  %v10956_v21 = vmax.f32 %v7328_v54, 0.0  ;;  %v3032_v54 = vld [vmem:[%s10247_s7 + $0x120] sm:$0xff] }
 0x24c   :  { %2669 = vmatprep.mubr.f32.mxu0 %v10951_v32  ;;  %3428 = vmatprep.subr.mxu0 %v3117_v45  ;;  %v3116_v32 = vld [vmem:[%s10247_s7 + $0x3c0] sm:$0xff] }
 0x24d   :  { %v7866_v37 = vpop.f32.mrf.mxu0  ;;  %3429 = vmatpush1.msra.mxu0 %v3116_v32  ;;  %v3030_v32 = vld [vmem:[%s10247_s7 + $0x110] sm:$0xff] }
 0x24e   :  { %4792 = vmatmul.mubr.f32.vlgmr.msra.gmra.mxu1 %v10952_v56 }
 0x24f   :  { %v7876_v60 = vpop.f32.mrf.mxu0  ;;  %2670 = vmatmul.mubr.f32.gmra.mxu0 %v10954_v16  ;;  %4794 = vmatprep.mubr.f32.mxu1 %v10955_v44  ;;  %v10957_v44 = vmax.f32 %v7344_v47, 0.0  ;;  %v10958_v47 = vmax.f32 %v7362_v8, 0.0  ;;  %v3114_v8 = vld [vmem:[%s10247_s7 + $0x3b0] sm:$0xff] }
 0x250   :  { %3158 = vmatpush1.msra.mxu1 %v3041_v12  ;;  %v3035_v12 = vld [vmem:[%s10247_s7 + $0x138] sm:$0xff]  ;;  %3478 = vmatprep.mubr.f32.mxu0 %v10659_v35 }
 0x251   :  { %v7891_v56 = vpop.f32.mrf.mxu0  ;;  %3159 = vmatprep.subr.mxu1 %v3039_v63  ;;  %v3033_v63 = vld [vmem:[%s10247_s7 + $0x128] sm:$0xff]  ;;  %3430 = vmatprep.subr.mxu0 %v3114_v8  ;;  %v10961_v8 = vmax.f32 %v7415_v31, 0.0  ;;  %v10962_v31 = vmax.f32 %v7434_v27, 0.0  ;;  %v3111_v27 = vld [vmem:[%s10247_s7 + $0x398] sm:$0xff] }
 0x252   :  { %4795 = vmatmul.mubr.f32.gmra.mxu1 %v10956_v21  ;;  %v10959_v21 = vmax.f32 %v7378_v13, 0.0  ;;  %v3113_v13 = vld [vmem:[%s10247_s7 + $0x3a8] sm:$0xff] }
 0x253   :  { %v7902_v16 = vpop.f32.mrf.mxu0  ;;  %4797 = vmatprep.mubr.f32.mxu1 %v10957_v44  ;;  %3160 = vmatpush1.msra.mxu1 %v3038_v4  ;;  %v3029_v4 = vld [vmem:[%s10247_s7 + $0x108] sm:$0xff]  ;;  %v3026_v44 = vld [vmem:[%s10247_s7 + $0xf0] sm:$0xff] }
 0x254   :  { %3161 = vmatprep.subr.mxu1 %v3036_v61  ;;  %3431 = vmatpush1.msra.mxu0 %v3113_v13  ;;  %v3018_v13 = vld [vmem:[%s10247_s7 + $0xb0] sm:$0xff] }
 0x255   :  { %v7912_v45 = vpop.f32.mrf.mxu0  ;;  %3162 = vmatpush1.msra.mxu1 %v3035_v12  ;;  %v3027_v12 = vld [vmem:[%s10247_s7 + $0xf8] sm:$0xff]  ;;  %3432 = vmatprep.subr.mxu0 %v3111_v27  ;;  %v10965_v27 = vmax.f32 %v7491_v23, 0.0  ;;  %v10966_v23 = vmax.f32 %v7510_v22, 0.0  ;;  %v3108_v22 = vld [vmem:[%s10247_s7 + $0x380] sm:$0xff] }
 0x256   :  { %4798 = vmatmul.mubr.f32.gmra.mxu1 %v10958_v47  ;;  %3163 = vmatprep.subr.mxu1 %v3033_v63  ;;  %v10960_v47 = vmax.f32 %v7397_v7, 0.0  ;;  %v3020_v7 = vld [vmem:[%s10247_s7 + $0xc0] sm:$0xff] }
 0x257   :  { %v7922_v61 = vpop.f32.mrf.mxu0  ;;  %4800 = vmatprep.mubr.f32.mxu1 %v10959_v21  ;;  %3164 = vmatpush1.msra.mxu1 %v3032_v54  ;;  %v3024_v54 = vld [vmem:[%s10247_s7 + $0xe0] sm:$0xff] }
 0x258   :  { %3165 = vmatprep.subr.mxu1 %v3030_v32  ;;  %v3023_v32 = vld [vmem:[%s10247_s7 + $0xd8] sm:$0xff] }
 0x259   :  { %v7938_v63 = vpop.f32.mrf.mxu0  ;;  %3166 = vmatpush1.msra.mxu1 %v3029_v4  ;;  %v3021_v4 = vld [vmem:[%s10247_s7 + $0xc8] sm:$0xff] }
 0x25a   :  { %4801 = vmatmul.mubr.f32.gmra.mxu1 %v10960_v47  ;;  %3167 = vmatprep.subr.mxu1 %v3027_v12  ;;  %v10963_v47 = vmax.f32 %v7453_v11, 0.0  ;;  %v3110_v11 = vld [vmem:[%s10247_s7 + $0x390] sm:$0xff] }
 0x25b   :  { %v7948_v21 = vpop.f32.mrf.mxu0  ;;  %4803 = vmatprep.mubr.f32.mxu1 %v10961_v8  ;;  %3168 = vmatpush1.msra.mxu1 %v3026_v44  ;;  %v3017_v44 = vld [vmem:[%s10247_s7 + $0xa8] sm:$0xff]  ;;  %v3014_v8 = vld [vmem:[%s10247_s7 + $0x90] sm:$0xff] }
 0x25c   :  { %3169 = vmatprep.subr.mxu1 %v3024_v54  ;;  %3433 = vmatpush1.msra.mxu0 %v3110_v11  ;;  %v3006_v11 = vld [vmem:[%s10247_s7 + $0x50] sm:$0xff] }
 0x25d   :  { %v7958_v12 = vpop.f32.mrf.mxu0  ;;  %3170 = vmatpush1.msra.mxu1 %v3023_v32  ;;  %v3015_v32 = vld [vmem:[%s10247_s7 + $0x98] sm:$0xff]  ;;  %3434 = vmatprep.subr.mxu0 %v3108_v22  ;;  %v10969_v22 = vmax.f32 %v7561_v59, 0.0  ;;  %v10970_v59 = vmax.f32 %v7578_v0, 0.0  ;;  %v3105_v0 = vld [vmem:[%s10247_s7 + $0x368] sm:$0xff] }
 0x25e   :  { %4804 = vmatmul.mubr.f32.gmra.mxu1 %v10962_v31  ;;  %3171 = vmatprep.subr.mxu1 %v3021_v4  ;;  %v10964_v31 = vmax.f32 %v7472_v15, 0.0  ;;  %v3008_v15 = vld [vmem:[%s10247_s7 + $0x60] sm:$0xff] }
 0x25f   :  { %v7968_v54 = vpop.f32.mrf.mxu0  ;;  %4806 = vmatprep.mubr.f32.mxu1 %v10963_v47  ;;  %3172 = vmatpush1.msra.mxu1 %v3020_v7  ;;  %v3012_v7 = vld [vmem:[%s10247_s7 + $0x80] sm:$0xff] }
 0x260   :  { %3173 = vmatprep.subr.mxu1 %v3018_v13  ;;  %v3011_v13 = vld [vmem:[%s10247_s7 + $0x78] sm:$0xff] }
 0x261   :  { %v7984_v4 = vpop.f32.mrf.mxu0  ;;  %3174 = vmatpush1.msra.mxu1 %v3017_v44  ;;  %v3009_v44 = vld [vmem:[%s10247_s7 + $0x68] sm:$0xff] }
 0x262   :  { %4807 = vmatmul.mubr.f32.gmra.mxu1 %v10964_v31  ;;  %3175 = vmatprep.subr.mxu1 %v3015_v32  ;;  %v10967_v31 = vmax.f32 %v7527_v51, 0.0  ;;  %v3107_v51 = vld [vmem:[%s10247_s7 + $0x378] sm:$0xff] }
 0x263   :  { %v7994_v47 = vpop.f32.mrf.mxu0  ;;  %4809 = vmatprep.mubr.f32.mxu1 %v10965_v27  ;;  %3176 = vmatpush1.msra.mxu1 %v3014_v8  ;;  %v3005_v8 = vld [vmem:[%s10247_s7 + $0x48] sm:$0xff]  ;;  %v3002_v27 = vld [vmem:[%s10247_s7 + $0x30] sm:$0xff] }
 0x264   :  { %3177 = vmatprep.subr.mxu1 %v3012_v7  ;;  %3435 = vmatpush1.msra.mxu0 %v3107_v51  ;;  %v3090_v51 = vld [vmem:[%s10247_s7 + $0x2f0] sm:$0xff] }
 0x265   :  { %v8004_v32 = vpop.f32.mrf.mxu0  ;;  %3178 = vmatpush1.msra.mxu1 %v3011_v13  ;;  %v3003_v13 = vld [vmem:[%s10247_s7 + $0x38] sm:$0xff]  ;;  %3436 = vmatprep.subr.mxu0 %v3105_v0  ;;  %v10973_v0 = vmax.f32 %v7630_v29, 0.0  ;;  %v10974_v29 = vmax.f32 %v7646_v25, 0.0  ;;  %v3102_v25 = vld [vmem:[%s10247_s7 + $0x350] sm:$0xff] }
 0x266   :  { %4810 = vmatmul.mubr.f32.gmra.mxu1 %v10966_v23  ;;  %3179 = vmatprep.subr.mxu1 %v3009_v44  ;;  %v10968_v23 = vmax.f32 %v7544_v30, 0.0  ;;  %v2996_v30 = vld [vmem:[%s10247_s7] sm:$0xff] }
 0x267   :  { %v8014_v7 = vpop.f32.mrf.mxu0  ;;  %4812 = vmatprep.mubr.f32.mxu1 %v10967_v31  ;;  %3180 = vmatpush1.msra.mxu1 %v3008_v15  ;;  %v3000_v15 = vld [vmem:[%s10247_s7 + $0x20] sm:$0xff] }
 0x268   :  { %3181 = vmatprep.subr.mxu1 %v3006_v11  ;;  %v2999_v11 = vld [vmem:[%s10247_s7 + $0x18] sm:$0xff] }
 0x269   :  { %v8030_v44 = vpop.f32.mrf.mxu0  ;;  %3182 = vmatpush1.msra.mxu1 %v3005_v8  ;;  %v2997_v8 = vld [vmem:[%s10247_s7 + $0x8] sm:$0xff] }
 0x26a   :  { %4813 = vmatmul.mubr.f32.gmra.mxu1 %v10968_v23  ;;  %3183 = vmatprep.subr.mxu1 %v3003_v13  ;;  %v10971_v23 = vmax.f32 %v7592_v5, 0.0  ;;  %v3104_v5 = vld [vmem:[%s10247_s7 + $0x360] sm:$0xff] }
 0x26b   :  { %v8040_v31 = vpop.f32.mrf.mxu0  ;;  %4815 = vmatprep.mubr.f32.mxu1 %v10969_v22  ;;  %3184 = vmatpush1.msra.mxu1 %v3002_v27  ;;  %v3089_v27 = vld [vmem:[%s10247_s7 + $0x2e8] sm:$0xff]  ;;  %v3086_v22 = vld [vmem:[%s10247_s7 + $0x2d0] sm:$0xff] }
 0x26c   :  { %3185 = vmatprep.subr.mxu1 %v3000_v15  ;;  %3437 = vmatpush1.msra.mxu0 %v3104_v5  ;;  %v3078_v5 = vld [vmem:[%s10247_s7 + $0x290] sm:$0xff] }
 0x26d   :  { %v8050_v13 = vpop.f32.mrf.mxu0  ;;  %3186 = vmatpush1.msra.mxu1 %v2999_v11  ;;  %v3087_v11 = vld [vmem:[%s10247_s7 + $0x2d8] sm:$0xff]  ;;  %3438 = vmatprep.subr.mxu0 %v3102_v25  ;;  %v10977_v25 = vmax.f32 %v7706_v49, 0.0  ;;  %v10978_v49 = vmax.f32 %v7722_v26, 0.0 }
 0x26e   :  { %4816 = vmatmul.mubr.f32.gmra.mxu1 %v10970_v59  ;;  %3187 = vmatprep.subr.mxu1 %v2997_v8  ;;  %v10972_v59 = vmax.f32 %v7608_v62, 0.0  ;;  %v3080_v62 = vld [vmem:[%s10247_s7 + $0x2a0] sm:$0xff]  ;;  %v3099_v26 = vld [vmem:[%s10247_s7 + $0x338] sm:$0xff] }
 0x26f   :  { %v8060_v15 = vpop.f32.mrf.mxu0  ;;  %4818 = vmatprep.mubr.f32.mxu1 %v10971_v23  ;;  %3188 = vmatpush1.msra.mxu1 %v2996_v30  ;;  %v3084_v30 = vld [vmem:[%s10247_s7 + $0x2c0] sm:$0xff] }
 0x270   :  { %3189 = vmatprep.subr.mxu1 %v3090_v51  ;;  %v3083_v51 = vld [vmem:[%s10247_s7 + $0x2b8] sm:$0xff] }
 0x271   :  { %v8076_v8 = vpop.f32.mrf.mxu0  ;;  %3190 = vmatpush2.msra.mxu1 %v3089_v27  ;;  %v3081_v27 = vld [vmem:[%s10247_s7 + $0x2a8] sm:$0xff] }
 0x272   :  { %4819 = vmatmul.mubr.f32.gmra.mxu1 %v10972_v59  ;;  %3191 = vmatprep.subr.mxu1 %v3087_v11  ;;  %v10975_v59 = vmax.f32 %v7668_v46, 0.0  ;;  %v3101_v46 = vld [vmem:[%s10247_s7 + $0x348] sm:$0xff] }
 0x273   :  { %v8086_v23 = vpop.f32.mrf.mxu0  ;;  %4821 = vmatprep.mubr.f32.mxu1 %v10973_v0  ;;  %3192 = vmatpush2.msra.mxu1 %v3086_v22  ;;  %v3077_v22 = vld [vmem:[%s10247_s7 + $0x288] sm:$0xff]  ;;  %v3074_v0 = vld [vmem:[%s10247_s7 + $0x270] sm:$0xff] }
 0x274   :  { %3193 = vmatprep.subr.mxu1 %v3084_v30  ;;  %3439 = vmatpush1.msra.mxu0 %v3101_v46  ;;  %v3066_v46 = vld [vmem:[%s10247_s7 + $0x230] sm:$0xff] }
 0x275   :  { %v8096_v11 = vpop.f32.mrf.mxu0  ;;  %3194 = vmatpush2.msra.mxu1 %v3083_v51  ;;  %v3075_v51 = vld [vmem:[%s10247_s7 + $0x278] sm:$0xff]  ;;  %3440 = vmatprep.subr.mxu0 %v3099_v26  ;;  %v10981_v26 = vmax.f32 %v7782_v3, 0.0  ;;  %v10982_v3 = vmax.f32 %v7798_v2, 0.0 }
 0x276   :  { %4822 = vmatmul.mubr.f32.gmra.mxu1 %v10974_v29  ;;  %3195 = vmatprep.subr.mxu1 %v3081_v27  ;;  %v10976_v29 = vmax.f32 %v7684_v41, 0.0  ;;  %v3068_v41 = vld [vmem:[%s10247_s7 + $0x240] sm:$0xff]  ;;  %v3051_v2 = vld [vmem:[%s10247_s7 + $0x1b8] sm:$0xff] }
 0x277   :  { %v8106_v30 = vpop.f32.mrf.mxu0  ;;  %4824 = vmatprep.mubr.f32.mxu1 %v10975_v59  ;;  %3196 = vmatpush2.msra.mxu1 %v3080_v62  ;;  %v3072_v62 = vld [vmem:[%s10247_s7 + $0x260] sm:$0xff] }
 0x278   :  { %3197 = vmatprep.subr.mxu1 %v3078_v5  ;;  %v3071_v5 = vld [vmem:[%s10247_s7 + $0x258] sm:$0xff] }
 0x279   :  { %v8122_v27 = vpop.f32.mrf.mxu0  ;;  %3198 = vmatpush2.msra.mxu1 %v3077_v22  ;;  %v3069_v22 = vld [vmem:[%s10247_s7 + $0x248] sm:$0xff] }
 0x27a   :  { %4825 = vmatmul.mubr.f32.gmra.mxu1 %v10976_v29  ;;  %3199 = vmatprep.subr.mxu1 %v3075_v51  ;;  %v10979_v29 = vmax.f32 %v7744_v38, 0.0  ;;  %v3098_v38 = vld [vmem:[%s10247_s7 + $0x330] sm:$0xff] }
 0x27b   :  { %v8132_v59 = vpop.f32.mrf.mxu0  ;;  %4827 = vmatprep.mubr.f32.mxu1 %v10977_v25  ;;  %3200 = vmatpush2.msra.mxu1 %v3074_v0  ;;  %v3065_v0 = vld [vmem:[%s10247_s7 + $0x228] sm:$0xff]  ;;  %v3062_v25 = vld [vmem:[%s10247_s7 + $0x210] sm:$0xff] }
 0x27c   :  { %3201 = vmatprep.subr.mxu1 %v3072_v62  ;;  %3441 = vmatpush1.msra.mxu0 %v3098_v38  ;;  %v3054_v38 = vld [vmem:[%s10247_s7 + $0x1d0] sm:$0xff] }
 0x27d   :  { %v8142_v51 = vpop.f32.mrf.mxu0  ;;  %3202 = vmatpush2.msra.mxu1 %v3071_v5  ;;  %v3063_v5 = vld [vmem:[%s10247_s7 + $0x218] sm:$0xff] }
 0x27e   :  { %4828 = vmatmul.mubr.f32.gmra.mxu1 %v10978_v49  ;;  %3203 = vmatprep.subr.mxu1 %v3069_v22  ;;  %v10980_v49 = vmax.f32 %v7760_v1, 0.0  ;;  %v3056_v1 = vld [vmem:[%s10247_s7 + $0x1e0] sm:$0xff] }
 0x27f   :  { %v8152_v62 = vpop.f32.mrf.mxu0  ;;  %4830 = vmatprep.mubr.f32.mxu1 %v10979_v29  ;;  %3204 = vmatpush2.msra.mxu1 %v3068_v41  ;;  %v3060_v41 = vld [vmem:[%s10247_s7 + $0x200] sm:$0xff] }
 0x280   :  { %3205 = vmatprep.subr.mxu1 %v3066_v46  ;;  %v3059_v46 = vld [vmem:[%s10247_s7 + $0x1f8] sm:$0xff] }
 0x281   :  { %v8168_v22 = vpop.f32.mrf.mxu0  ;;  %3206 = vmatpush2.msra.mxu1 %v3065_v0  ;;  %v3057_v0 = vld [vmem:[%s10247_s7 + $0x1e8] sm:$0xff] }
 0x282   :  { %4831 = vmatmul.mubr.f32.gmra.mxu1 %v10980_v49  ;;  %3207 = vmatprep.subr.mxu1 %v3063_v5 }
 0x283   :  { %v8178_v29 = vpop.f32.mrf.mxu0  ;;  %4833 = vmatprep.mubr.f32.mxu1 %v10981_v26  ;;  %3208 = vmatpush2.msra.mxu1 %v3062_v25  ;;  %v3053_v25 = vld [vmem:[%s10247_s7 + $0x1c8] sm:$0xff]  ;;  %v3050_v26 = vld [vmem:[%s10247_s7 + $0x1b0] sm:$0xff] }
 0x284   :  { %3209 = vmatprep.subr.mxu1 %v3060_v41  ;;  %v8201_v41 = vld [vmem:[%s10248_s6] sm:$0x7] }
 0x285   :  { %v8188_v5 = vpop.f32.mrf.mxu0  ;;  %3210 = vmatpush2.msra.mxu1 %v3059_v46  ;;  %10983 = vst [vmem:[#allocation26_spill] sm:$0xff] %v8201_v41  ;;  %v3096_v46 = vld [vmem:[%s10247_s7 + $0x320] sm:$0xff] }
 0x286   :  { %4834 = vmatmul.mubr.f32.gmra.mxu1 %v10982_v3  ;;  %3211 = vmatprep.subr.mxu1 %v3057_v0  ;;  %v3048_v0 = vld [vmem:[%s10247_s7 + $0x1a0] sm:$0xff]  ;;  %v3047_v3 = vld [vmem:[%s10247_s7 + $0x198] sm:$0xff] }
 0x287   :  { %v8203_v49 = vpop.f32.mrf.mxu0  ;;  %4836 = vmatprep.mubr.f32.mxu1 %v1771_v48  ;;  %3212 = vmatpush2.msra.mxu1 %v3056_v1  ;;  %v10986_v1 = vld [vmem:[#allocation3_spill] sm:$0xff] }
 0x288   :  { %10984 = vst [vmem:[#allocation27_spill] sm:$0xff] %v8203_v49  ;;  %3213 = vmatprep.subr.mxu1 %v3054_v38  ;;  %3442 = vmatprep.subr.mxu0 %v3096_v46  ;;  %v8226_v38 = vrot.slane %v8201_v41, %v10986_v1  ;;  %v10987_v46 = vld [vmem:[#allocation4_spill] sm:$0xff] }
 0x289   :  { %v8219_v48 = vpop.f32.mrf.mxu0  ;;  %3214 = vmatpush2.msra.mxu1 %v3053_v25  ;;  %3443 = vmatpush1.msra.mxu0 %v3095_v57  ;;  %v8235_v25 = vrot.slane %v8201_v41, %v10987_v46  ;;  %v3045_v57 = vld [vmem:[%s10247_s7 + $0x188] sm:$0xff] }
 0x28a   :  { %10985 = vst [vmem:[#allocation29_spill] sm:$0xff] %v8219_v48  ;;  %4837 = vmatmul.mubr.f32.gmra.mxu1 %v1774_v43  ;;  %3215 = vmatprep.subr.mxu1 %v3051_v2  ;;  %v2003_v2 = vadd.f32 %v7596_v9, %v8226_v38  ;;  %v3092_v9 = vld [vmem:[%s10247_s7 + $0x300] sm:$0xff] }
 0x28b   :  { %v8237_v48 = vpop.f32.mrf.mxu0  ;;  %3216 = vmatpush2.msra.mxu1 %v3050_v26  ;;  %v2005_v26 = vadd.f32 %v7605_v24, %v8235_v25 }
 0x28c   :  { %10988 = vst [vmem:[#allocation30_spill] sm:$0xff] %v8237_v48  ;;  %3217 = vmatprep.subr.mxu1 %v3048_v0  ;;  %v3093_v0 = vld [vmem:[%s10247_s7 + $0x308] sm:$0xff] }
 0x28d   :  { %v8245_v43 = vpop.f32.mrf.mxu0  ;;  %3218 = vmatpush2.msra.mxu1 %v3047_v3  ;;  %v2259_v46 = vpop.f32.mrf.mxu1  ;;  %3444 = vmatprep.subr.mxu0 %v3093_v0 }
 0x28e   :  { %10989 = vst [vmem:[#allocation32_spill] sm:$0xff] %v8245_v43  ;;  %3219 = vmatprep.subr.mxu1 %v3045_v57  ;;  %v8256_v41 = vadd.f32 %v2259_v46, %v2003_v2  ;;  %3445 = vmatpush1.msra.mxu0 %v3092_v9  ;;  %v2009_v57 = vadd.f32 %v7612_v14, %v8226_v38 }
 0x28f   :  { %v8251_v1 = vpop.f32.mrf.mxu0  ;;  %3220 = vmatpush2.msra.mxu1 %v3044_v28  ;;  %v2261_v48 = vpop.f32.mrf.mxu1  ;;  %v2011_v46 = vadd.f32 %v7627_v52, %v8235_v25  ;;  %v2015_v14 = vadd.f32 %v7634_v33, %v8226_v38  ;;  %v8298_v33 = vld [vmem:[%s10247_s7 + $0x478] sm:$0xff] }
 0x290   :  { %10990 = vst [vmem:[#allocation33_spill] sm:$0xff] %v8251_v1  ;;  %10991 = vst [vmem:[#allocation35_spill] sm:$0xff] %v8256_v41  ;;  %3671 = vmatprep.subr.mxu1 %v10659_v35  ;;  %v8264_v24 = vadd.f32 %v2261_v48, %v2005_v26  ;;  %v10502_v0 = vmax.f32 %v8256_v41, 0.0  ;;  %v3043_v48 = vld [vmem:[%s10247_s7 + $0x178] sm:$0xff]  ;;  %4839 = vmatprep.subr.mxu0 %v8298_v33 }
 0x291   :  { %v8262_v3 = vpop.f32.mrf.mxu0  ;;  %v2265_v28 = vpop.f32.mrf.mxu1  ;;  %10994 = vst [vmem:[#allocation39_spill] sm:$0xff] %v8298_v33  ;;  %v3034_v33 = vld [vmem:[%s10247_s7 + $0x130] sm:$0xff] }
 0x292   :  { %v10503_v2 = vmax.f32 %v8264_v24, 0.0  ;;  %v8274_v43 = vadd.f32 %v2265_v28, %v2009_v57  ;;  %v3040_v57 = vld [vmem:[%s10247_s7 + $0x160] sm:$0xff]  ;;  %v2017_v28 = vadd.f32 %v7643_v39, %v8235_v25  ;;  %v3037_v39 = vld [vmem:[%s10247_s7 + $0x148] sm:$0xff] }
 0x293   :  { %v8271_v1 = vpop.f32.mrf.mxu0  ;;  %v2267_v49 = vpop.f32.mrf.mxu1 }
 0x294   :  { %10992 = vst [vmem:[#allocation36_spill] sm:$0xff] %v8274_v43  ;;  %v8279_v9 = vadd.f32 %v2267_v49, %v2011_v46  ;;  %3221 = vmatprep.mubr.f32.mxu1 %v10503_v2 }
 0x295   :  { %v2518_v26 = vpop.f32.mrf.mxu0  ;;  %v2271_v52 = vpop.f32.mrf.mxu1  ;;  %3222 = vmatmul.mubr.f32.vlgmr.msra.gmra.mxu1 %v10502_v0 }
 0x296   :  { %10993 = vst [vmem:[#allocation38_spill] sm:$0xff] %v8279_v9  ;;  %3672 = vmatpush1.msra.mxu1 %v3043_v48  ;;  %v10506_v26 = vmax.f32 %v8274_v43, 0.0  ;;  %v8301_v0 = vadd.f32 %v2271_v52, %v2015_v14  ;;  %v10996_v41 = vmax.f32 %v8279_v9, 0.0  ;;  %v2021_v14 = vadd.f32 %v7650_v10, %v8226_v38 }
 0x297   :  { %v8293_v46 = vpop.f32.mrf.mxu0  ;;  %v2273_v2 = vpop.f32.mrf.mxu1  ;;  %3673 = vmatprep.subr.mxu1 %v10659_v35 }
 0x298   :  { %10995 = vst [vmem:[#allocation41_spill] sm:$0xff] %v8301_v0  ;;  %v8308_v48 = vadd.f32 %v2273_v2, %v2017_v28  ;;  %3227 = vmatprep.mubr.f32.mxu1 %v10996_v41  ;;  %3674 = vmatpush1.msra.mxu1 %v3040_v57  ;;  %v2023_v2 = vadd.f32 %v7665_v53, %v8235_v25  ;;  %v10509_v10 = vmax.f32 %v8301_v0, 0.0 }
 0x299   :  { %v2523_v49 = vpop.f32.mrf.mxu0  ;;  %v2277_v52 = vpop.f32.mrf.mxu1  ;;  %3228 = vmatmul.mubr.f32.gmra.mxu1 %v10506_v26  ;;  %3675 = vmatprep.subr.mxu1 %v10659_v35  ;;  %v3031_v26 = vld [vmem:[%s10247_s7 + $0x118] sm:$0xff]  ;;  %v2027_v53 = vadd.f32 %v7672_v36, %v8226_v38 }
 0x29a   :  { %v10510_v28 = vmax.f32 %v8308_v48, 0.0  ;;  %3676 = vmatpush1.msra.mxu1 %v3037_v39  ;;  %v8326_v57 = vadd.f32 %v2277_v52, %v2021_v14  ;;  %v3028_v14 = vld [vmem:[%s10247_s7 + $0x100] sm:$0xff] }
 0x29b   :  { %v8323_v41 = vpop.f32.mrf.mxu0  ;;  %v2279_v49 = vpop.f32.mrf.mxu1  ;;  %3677 = vmatprep.subr.mxu1 %v10659_v35 }
 0x29c   :  { %10997 = vst [vmem:[#allocation42_spill] sm:$0xff] %v8326_v57  ;;  %v8332_v9 = vadd.f32 %v2279_v49, %v2023_v2  ;;  %3233 = vmatprep.mubr.f32.mxu1 %v10510_v28  ;;  %3678 = vmatpush1.msra.mxu1 %v3034_v33  ;;  %v10512_v36 = vmax.f32 %v8326_v57, 0.0 }
 0x29d   :  { %v2528_v43 = vpop.f32.mrf.mxu0  ;;  %v2283_v39 = vpop.f32.mrf.mxu1  ;;  %3234 = vmatmul.mubr.f32.gmra.mxu1 %v10509_v10  ;;  %3679 = vmatprep.subr.mxu1 %v10659_v35  ;;  %v3025_v10 = vld [vmem:[%s10247_s7 + $0xe8] sm:$0xff] }
 0x29e   :  { %v2029_v43 = vadd.f32 %v7681_v40, %v8235_v25  ;;  %v10513_v52 = vmax.f32 %v8332_v9, 0.0  ;;  %3680 = vmatpush1.msra.mxu1 %v3031_v26  ;;  %v8350_v33 = vadd.f32 %v2283_v39, %v2027_v53  ;;  %v2033_v40 = vadd.f32 %v7688_v34, %v8226_v38  ;;  %v3022_v53 = vld [vmem:[%s10247_s7 + $0xd0] sm:$0xff] }
 0x29f   :  { %v8347_v2 = vpop.f32.mrf.mxu0  ;;  %v2285_v49 = vpop.f32.mrf.mxu1  ;;  %3681 = vmatprep.subr.mxu1 %v10659_v35 }
 0x2a0   :  { %10998 = vst [vmem:[#allocation44_spill] sm:$0xff] %v8350_v33  ;;  %v8356_v0 = vadd.f32 %v2285_v49, %v2029_v43  ;;  %3239 = vmatprep.mubr.f32.mxu1 %v10513_v52  ;;  %3682 = vmatpush1.msra.mxu1 %v3028_v14  ;;  %v10515_v34 = vmax.f32 %v8350_v33, 0.0 }
 0x2a1   :  { %v2533_v28 = vpop.f32.mrf.mxu0  ;;  %v2289_v26 = vpop.f32.mrf.mxu1  ;;  %3240 = vmatmul.mubr.f32.gmra.mxu1 %v10512_v36  ;;  %3683 = vmatprep.subr.mxu1 %v10659_v35  ;;  %v3019_v36 = vld [vmem:[%s10247_s7 + $0xb8] sm:$0xff] }
 0x2a2   :  { %10999 = vst [vmem:[#allocation45_spill] sm:$0xff] %v8356_v0  ;;  %v2035_v28 = vadd.f32 %v7703_v50, %v8235_v25  ;;  %v10516_v39 = vmax.f32 %v8356_v0, 0.0  ;;  %3684 = vmatpush1.msra.mxu1 %v3025_v10  ;;  %v8374_v14 = vadd.f32 %v2289_v26, %v2033_v40  ;;  %v2039_v50 = vadd.f32 %v7710_v6, %v8226_v38  ;;  %v3016_v40 = vld [vmem:[%s10247_s7 + $0xa0] sm:$0xff] }
 0x2a3   :  { %v8371_v43 = vpop.f32.mrf.mxu0  ;;  %v2291_v49 = vpop.f32.mrf.mxu1  ;;  %3685 = vmatprep.subr.mxu1 %v10659_v35 }
 0x2a4   :  { %11000 = vst [vmem:[#allocation47_spill] sm:$0xff] %v8374_v14  ;;  %v8380_v57 = vadd.f32 %v2291_v49, %v2035_v28  ;;  %3245 = vmatprep.mubr.f32.mxu1 %v10516_v39  ;;  %3686 = vmatpush1.msra.mxu1 %v3022_v53 }
 0x2a5   :  { %v2538_v52 = vpop.f32.mrf.mxu0  ;;  %v2295_v10 = vpop.f32.mrf.mxu1  ;;  %3246 = vmatmul.mubr.f32.gmra.mxu1 %v10515_v34  ;;  %3687 = vmatprep.subr.mxu1 %v10659_v35  ;;  %v3013_v34 = vld [vmem:[%s10247_s7 + $0x88] sm:$0xff] }
 0x2a6   :  { %11001 = vst [vmem:[#allocation48_spill] sm:$0xff] %v8380_v57  ;;  %v2041_v52 = vadd.f32 %v7719_v17, %v8235_v25  ;;  %v10518_v26 = vmax.f32 %v8380_v57, 0.0  ;;  %3688 = vmatpush1.msra.mxu1 %v3019_v36  ;;  %v8398_v53 = vadd.f32 %v2295_v10, %v2039_v50  ;;  %v11004_v17 = vld [vmem:[#allocation17_spill] sm:$0xff]  ;;  %v11005_v50 = vmax.f32 %v8374_v14, 0.0 }
 0x2a7   :  { %v8395_v28 = vpop.f32.mrf.mxu0  ;;  %v2297_v49 = vpop.f32.mrf.mxu1  ;;  %3689 = vmatprep.subr.mxu1 %v10659_v35  ;;  %v2045_v36 = vadd.f32 %v11004_v17, %v8226_v38  ;;  %v3010_v10 = vld [vmem:[%s10247_s7 + $0x70] sm:$0xff] }
 0x2a8   :  { %11002 = vst [vmem:[#allocation50_spill] sm:$0xff] %v8398_v53  ;;  %v8404_v33 = vadd.f32 %v2297_v49, %v2041_v52  ;;  %3251 = vmatprep.mubr.f32.mxu1 %v10518_v26  ;;  %3690 = vmatpush1.msra.mxu1 %v3016_v40 }
 0x2a9   :  { %v2543_v39 = vpop.f32.mrf.mxu0  ;;  %v2301_v6 = vpop.f32.mrf.mxu1  ;;  %3252 = vmatmul.mubr.f32.gmra.mxu1 %v11005_v50  ;;  %3691 = vmatprep.subr.mxu1 %v10659_v35  ;;  %v3007_v50 = vld [vmem:[%s10247_s7 + $0x58] sm:$0xff] }
 0x2aa   :  { %11003 = vst [vmem:[#allocation6_spill] sm:$0xff] %v8404_v33  ;;  %v11006_v39 = vld [vmem:[#allocation18_spill] sm:$0xff]  ;;  %v10522_v49 = vmax.f32 %v8404_v33, 0.0  ;;  %3692 = vmatpush1.msra.mxu1 %v3013_v34  ;;  %v8422_v17 = vadd.f32 %v2301_v6, %v2045_v36  ;;  %v11010_v34 = vld [vmem:[#allocation19_spill] sm:$0xff]  ;;  %v11011_v6 = vmax.f32 %v8398_v53, 0.0 }
 0x2ab   :  { %v2047_v52 = vadd.f32 %v11006_v39, %v8235_v25  ;;  %v8419_v26 = vpop.f32.mrf.mxu0  ;;  %v2303_v14 = vpop.f32.mrf.mxu1  ;;  %3693 = vmatprep.subr.mxu1 %v10659_v35  ;;  %v2051_v39 = vadd.f32 %v11010_v34, %v8226_v38  ;;  %v3004_v36 = vld [vmem:[%s10247_s7 + $0x40] sm:$0xff] }
 0x2ac   :  { %11007 = vst [vmem:[#allocation7_spill] sm:$0xff] %v8419_v26  ;;  %11008 = vst [vmem:[#allocation28_spill] sm:$0xff] %v8422_v17  ;;  %3257 = vmatprep.mubr.f32.mxu1 %v10522_v49  ;;  %3694 = vmatpush1.msra.mxu1 %v3010_v10 }
 0x2ad   :  { %v2548_v57 = vpop.f32.mrf.mxu0  ;;  %v8428_v0 = vadd.f32 %v2303_v14, %v2047_v52  ;;  %v2307_v40 = vpop.f32.mrf.mxu1  ;;  %3258 = vmatmul.mubr.f32.gmra.mxu1 %v11011_v6  ;;  %3695 = vmatprep.subr.mxu1 %v10659_v35  ;;  %v3001_v6 = vld [vmem:[%s10247_s7 + $0x28] sm:$0xff] }
 0x2ae   :  { %v11012_v57 = vld [vmem:[#allocation20_spill] sm:$0xff]  ;;  %3696 = vmatpush1.msra.mxu1 %v3007_v50  ;;  %v8446_v34 = vadd.f32 %v2307_v40, %v2051_v39  ;;  %v11016_v50 = vld [vmem:[#allocation21_spill] sm:$0xff]  ;;  %v11017_v40 = vmax.f32 %v8422_v17, 0.0 }
 0x2af   :  { %11009 = vst [vmem:[#allocation8_spill] sm:$0xff] %v8428_v0  ;;  %v2053_v14 = vadd.f32 %v11012_v57, %v8235_v25  ;;  %v10525_v52 = vmax.f32 %v8428_v0, 0.0  ;;  %v8443_v49 = vpop.f32.mrf.mxu0  ;;  %v2309_v53 = vpop.f32.mrf.mxu1  ;;  %3697 = vmatprep.subr.mxu1 %v10659_v35  ;;  %v2057_v57 = vadd.f32 %v11016_v50, %v8226_v38  ;;  %v2998_v39 = vld [vmem:[%s10247_s7 + $0x10] sm:$0xff] }
 0x2b0   :  { %11013 = vst [vmem:[#allocation9_spill] sm:$0xff] %v8443_v49  ;;  %11014 = vst [vmem:[#allocation31_spill] sm:$0xff] %v8446_v34  ;;  %3698 = vmatpush1.msra.mxu1 %v3004_v36 }
 0x2b1   :  { %v2553_v33 = vpop.f32.mrf.mxu0  ;;  %v8452_v26 = vadd.f32 %v2309_v53, %v2053_v14  ;;  %3263 = vmatprep.mubr.f32.mxu1 %v10525_v52  ;;  %v2313_v10 = vpop.f32.mrf.mxu1  ;;  %3699 = vmatprep.subr.mxu1 %v10659_v35 }
 0x2b2   :  { %3264 = vmatmul.mubr.f32.gmra.mxu1 %v11017_v40  ;;  %v11018_v33 = vld [vmem:[#allocation22_spill] sm:$0xff]  ;;  %v8470_v50 = vadd.f32 %v2313_v10, %v2057_v57  ;;  %v11022_v10 = vmax.f32 %v8446_v34, 0.0 }
 0x2b3   :  { %11015 = vst [vmem:[#allocation34_spill] sm:$0xff] %v8452_v26  ;;  %v2059_v53 = vadd.f32 %v11018_v33, %v8235_v25  ;;  %v10528_v14 = vmax.f32 %v8452_v26, 0.0  ;;  %v8467_v52 = vpop.f32.mrf.mxu0  ;;  %3700 = vmatpush1.msra.mxu1 %v3001_v6  ;;  %v2315_v17 = vpop.f32.mrf.mxu1  ;;  %v3091_v40 = vld [vmem:[%s10247_s7 + $0x2f8] sm:$0xff]  ;;  %v11021_v6 = vld [vmem:[#allocation23_spill] sm:$0xff] }
 0x2b4   :  { %11019 = vst [vmem:[#allocation10_spill] sm:$0xff] %v8470_v50  ;;  %3701 = vmatprep.subr.mxu1 %v10659_v35  ;;  %v2063_v33 = vadd.f32 %v11021_v6, %v8226_v38  ;;  %v3088_v57 = vld [vmem:[%s10247_s7 + $0x2e0] sm:$0xff] }
 0x2b5   :  { %v2558_v0 = vpop.f32.mrf.mxu0  ;;  %v8476_v49 = vadd.f32 %v2315_v17, %v2059_v53  ;;  %3269 = vmatprep.mubr.f32.mxu1 %v10528_v14  ;;  %3702 = vmatpush1.msra.mxu1 %v2998_v39  ;;  %v2319_v36 = vpop.f32.mrf.mxu1 }
 0x2b6   :  { %3270 = vmatmul.mubr.f32.gmra.mxu1 %v11022_v10  ;;  %3703 = vmatprep.subr.mxu1 %v10659_v35  ;;  %v2065_v0 = vadd.f32 %v7795_v42, %v8235_v25  ;;  %v8494_v6 = vadd.f32 %v2319_v36, %v2063_v33  ;;  %v3085_v10 = vld [vmem:[%s10247_s7 + $0x2c8] sm:$0xff]  ;;  %v11026_v36 = vmax.f32 %v8470_v50, 0.0  ;;  %v3082_v33 = vld [vmem:[%s10247_s7 + $0x2b0] sm:$0xff] }
 0x2b7   :  { %11020 = vst [vmem:[#allocation11_spill] sm:$0xff] %v8476_v49  ;;  %v10531_v17 = vmax.f32 %v8476_v49, 0.0  ;;  %v8491_v53 = vpop.f32.mrf.mxu0  ;;  %3704 = vmatpush2.msra.mxu1 %v3091_v40  ;;  %v2321_v14 = vpop.f32.mrf.mxu1  ;;  %v11025_v42 = vld [vmem:[#allocation24_spill] sm:$0xff] }
 0x2b8   :  { %11023 = vst [vmem:[#allocation37_spill] sm:$0xff] %v8491_v53  ;;  %11024 = vst [vmem:[#allocation40_spill] sm:$0xff] %v8494_v6  ;;  %3705 = vmatprep.subr.mxu1 %v10659_v35  ;;  %v8500_v26 = vadd.f32 %v2321_v14, %v2065_v0  ;;  %v2069_v40 = vadd.f32 %v11025_v42, %v8226_v38 }
 0x2b9   :  { %v2563_v34 = vpop.f32.mrf.mxu0  ;;  %3275 = vmatprep.mubr.f32.mxu1 %v10531_v17  ;;  %3706 = vmatpush2.msra.mxu1 %v3088_v57  ;;  %v2325_v39 = vpop.f32.mrf.mxu1  ;;  %v10534_v57 = vmax.f32 %v8494_v6, 0.0 }
 0x2ba   :  { %3276 = vmatmul.mubr.f32.gmra.mxu1 %v11026_v36  ;;  %3707 = vmatprep.subr.mxu1 %v10659_v35  ;;  %v11027_v34 = vld [vmem:[#allocation25_spill] sm:$0xff]  ;;  %v10535_v0 = vmax.f32 %v8500_v26, 0.0  ;;  %v8518_v42 = vadd.f32 %v2325_v39, %v2069_v40  ;;  %v3076_v39 = vld [vmem:[%s10247_s7 + $0x280] sm:$0xff] }
 0x2bb   :  { %v2071_v14 = vadd.f32 %v11027_v34, %v8235_v25  ;;  %v8515_v17 = vpop.f32.mrf.mxu0  ;;  %3708 = vmatpush2.msra.mxu1 %v3085_v10  ;;  %v2327_v50 = vpop.f32.mrf.mxu1  ;;  %v3079_v36 = vld [vmem:[%s10247_s7 + $0x298] sm:$0xff]  ;;  %v2075_v10 = vadd.f32 %v7824_v18, %v8226_v38 }
 0x2bc   :  { %11028 = vst [vmem:[#allocation12_spill] sm:$0xff] %v8518_v42  ;;  %3709 = vmatprep.subr.mxu1 %v10659_v35  ;;  %3281 = vmatprep.mubr.f32.mxu1 %v10535_v0  ;;  %v10537_v18 = vmax.f32 %v8518_v42, 0.0 }
 0x2bd   :  { %v2568_v49 = vpop.f32.mrf.mxu0  ;;  %v8524_v53 = vadd.f32 %v2327_v50, %v2071_v14  ;;  %3710 = vmatpush2.msra.mxu1 %v3082_v33  ;;  %v2331_v34 = vpop.f32.mrf.mxu1 }
 0x2be   :  { %3282 = vmatmul.mubr.f32.gmra.mxu1 %v10534_v57  ;;  %3711 = vmatprep.subr.mxu1 %v10659_v35  ;;  %v2077_v49 = vadd.f32 %v7833_v58, %v8235_v25  ;;  %v8542_v33 = vadd.f32 %v2331_v34, %v2075_v10  ;;  %v3073_v57 = vld [vmem:[%s10247_s7 + $0x268] sm:$0xff]  ;;  %v2081_v58 = vadd.f32 %v7840_v55, %v8226_v38  ;;  %v3070_v10 = vld [vmem:[%s10247_s7 + $0x250] sm:$0xff] }
 0x2bf   :  { %v10538_v50 = vmax.f32 %v8524_v53, 0.0  ;;  %v8539_v40 = vpop.f32.mrf.mxu0  ;;  %3712 = vmatpush2.msra.mxu1 %v3079_v36  ;;  %v2333_v14 = vpop.f32.mrf.mxu1 }
 0x2c0   :  { %11029 = vst [vmem:[#allocation13_spill] sm:$0xff] %v8542_v33  ;;  %3713 = vmatprep.subr.mxu1 %v10659_v35  ;;  %v8548_v6 = vadd.f32 %v2333_v14, %v2077_v49  ;;  %v10540_v55 = vmax.f32 %v8542_v33, 0.0 }
 0x2c1   :  { %v2573_v0 = vpop.f32.mrf.mxu0  ;;  %3287 = vmatprep.mubr.f32.mxu1 %v10538_v50  ;;  %3714 = vmatpush2.msra.mxu1 %v3076_v39  ;;  %v2337_v36 = vpop.f32.mrf.mxu1 }
 0x2c2   :  { %3288 = vmatmul.mubr.f32.gmra.mxu1 %v10537_v18  ;;  %3715 = vmatprep.subr.mxu1 %v10659_v35  ;;  %v2083_v0 = vadd.f32 %v7854_v19, %v8235_v25  ;;  %v10541_v34 = vmax.f32 %v8548_v6, 0.0  ;;  %v8566_v39 = vadd.f32 %v2337_v36, %v2081_v58  ;;  %v3067_v18 = vld [vmem:[%s10247_s7 + $0x238] sm:$0xff]  ;;  %v2087_v19 = vadd.f32 %v7858_v20, %v8226_v38  ;;  %v3064_v58 = vld [vmem:[%s10247_s7 + $0x220] sm:$0xff] }
 0x2c3   :  { %v8563_v49 = vpop.f32.mrf.mxu0  ;;  %3716 = vmatpush2.msra.mxu1 %v3073_v57  ;;  %v2339_v14 = vpop.f32.mrf.mxu1 }
 0x2c4   :  { %11030 = vst [vmem:[#allocation43_spill] sm:$0xff] %v8566_v39  ;;  %3717 = vmatprep.subr.mxu1 %v10659_v35  ;;  %v8572_v42 = vadd.f32 %v2339_v14, %v2083_v0  ;;  %3293 = vmatprep.mubr.f32.mxu1 %v10541_v34  ;;  %v10543_v20 = vmax.f32 %v8566_v39, 0.0 }
 0x2c5   :  { %v2578_v50 = vpop.f32.mrf.mxu0  ;;  %3718 = vmatpush2.msra.mxu1 %v3070_v10  ;;  %v2343_v57 = vpop.f32.mrf.mxu1 }
 0x2c6   :  { %3294 = vmatmul.mubr.f32.gmra.mxu1 %v10540_v55  ;;  %3719 = vmatprep.subr.mxu1 %v10659_v35  ;;  %v2089_v50 = vadd.f32 %v7866_v37, %v8235_v25  ;;  %v10544_v36 = vmax.f32 %v8572_v42, 0.0  ;;  %v8590_v10 = vadd.f32 %v2343_v57, %v2087_v19  ;;  %v3061_v55 = vld [vmem:[%s10247_s7 + $0x208] sm:$0xff]  ;;  %v2093_v37 = vadd.f32 %v7876_v60, %v8226_v38  ;;  %v3058_v19 = vld [vmem:[%s10247_s7 + $0x1f0] sm:$0xff] }
 0x2c7   :  { %v8587_v0 = vpop.f32.mrf.mxu0  ;;  %3720 = vmatpush2.msra.mxu1 %v3067_v18  ;;  %v2345_v14 = vpop.f32.mrf.mxu1 }
 0x2c8   :  { %11031 = vst [vmem:[#allocation46_spill] sm:$0xff] %v8590_v10  ;;  %3721 = vmatprep.subr.mxu1 %v10659_v35  ;;  %v8596_v33 = vadd.f32 %v2345_v14, %v2089_v50  ;;  %3299 = vmatprep.mubr.f32.mxu1 %v10544_v36  ;;  %v10546_v60 = vmax.f32 %v8590_v10, 0.0 }
 0x2c9   :  { %v2583_v34 = vpop.f32.mrf.mxu0  ;;  %3722 = vmatpush2.msra.mxu1 %v3064_v58  ;;  %v2349_v18 = vpop.f32.mrf.mxu1 }
 0x2ca   :  { %3300 = vmatmul.mubr.f32.gmra.mxu1 %v10543_v20  ;;  %3723 = vmatprep.subr.mxu1 %v10659_v35  ;;  %v2095_v34 = vadd.f32 %v7891_v56, %v8235_v25  ;;  %v10547_v57 = vmax.f32 %v8596_v33, 0.0  ;;  %v8614_v58 = vadd.f32 %v2349_v18, %v2093_v37  ;;  %v3055_v20 = vld [vmem:[%s10247_s7 + $0x1d8] sm:$0xff]  ;;  %v2099_v56 = vadd.f32 %v7902_v16, %v8226_v38  ;;  %v3052_v37 = vld [vmem:[%s10247_s7 + $0x1c0] sm:$0xff] }
 0x2cb   :  { %v8611_v50 = vpop.f32.mrf.mxu0  ;;  %3724 = vmatpush2.msra.mxu1 %v3061_v55  ;;  %v2351_v14 = vpop.f32.mrf.mxu1 }
 0x2cc   :  { %11032 = vst [vmem:[#allocation14_spill] sm:$0xff] %v8614_v58  ;;  %3725 = vmatprep.subr.mxu1 %v10659_v35  ;;  %v8620_v39 = vadd.f32 %v2351_v14, %v2095_v34  ;;  %3305 = vmatprep.mubr.f32.mxu1 %v10547_v57  ;;  %v10549_v16 = vmax.f32 %v8614_v58, 0.0 }
 0x2cd   :  { %v2588_v36 = vpop.f32.mrf.mxu0  ;;  %3726 = vmatpush2.msra.mxu1 %v3058_v19 }
 0x2ce   :  { %v2355_v55 = vpop.f32.mrf.mxu1  ;;  %3306 = vmatmul.mubr.f32.gmra.mxu1 %v10546_v60  ;;  %3727 = vmatprep.subr.mxu1 %v10659_v35  ;;  %v2101_v36 = vadd.f32 %v7912_v45, %v8235_v25  ;;  %v10550_v18 = vmax.f32 %v8620_v39, 0.0  ;;  %v3049_v60 = vld [vmem:[%s10247_s7 + $0x1a8] sm:$0xff]  ;;  %v2105_v45 = vadd.f32 %v7922_v61, %v8226_v38 }
 0x2cf   :  { %v8635_v34 = vpop.f32.mrf.mxu0  ;;  %3728 = vmatpush2.msra.mxu1 %v3055_v20  ;;  %v8638_v19 = vadd.f32 %v2355_v55, %v2099_v56  ;;  %v3046_v56 = vld [vmem:[%s10247_s7 + $0x190] sm:$0xff] }
 0x2d0   :  { %v2357_v14 = vpop.f32.mrf.mxu1  ;;  %3729 = vmatprep.subr.mxu1 %v10659_v35  ;;  %3311 = vmatprep.mubr.f32.mxu1 %v10550_v18 }
 0x2d1   :  { %v2593_v57 = vpop.f32.mrf.mxu0  ;;  %v8644_v10 = vadd.f32 %v2357_v14, %v2101_v36  ;;  %3730 = vmatpush2.msra.mxu1 %v3052_v37  ;;  %v10553_v61 = vmax.f32 %v8638_v19, 0.0 }
 0x2d2   :  { %v2361_v20 = vpop.f32.mrf.mxu1  ;;  %3312 = vmatmul.mubr.f32.gmra.mxu1 %v10549_v16  ;;  %3731 = vmatprep.subr.mxu1 %v10659_v35  ;;  %v2107_v57 = vadd.f32 %v7938_v63, %v8235_v25  ;;  %v2111_v63 = vadd.f32 %v7948_v21, %v8226_v38  ;;  %v2117_v21 = vadd.f32 %v7968_v54, %v8226_v38 }
 0x2d3   :  { %v10552_v55 = vmax.f32 %v8644_v10, 0.0  ;;  %v8659_v36 = vpop.f32.mrf.mxu0  ;;  %3732 = vmatpush2.msra.mxu1 %v3049_v60  ;;  %v8662_v37 = vadd.f32 %v2361_v20, %v2105_v45  ;;  %v2113_v60 = vadd.f32 %v7958_v12, %v8235_v25  ;;  %v2119_v12 = vadd.f32 %v7984_v4, %v8235_v25 }
 0x2d4   :  { %v2363_v14 = vpop.f32.mrf.mxu1  ;;  %3733 = vmatprep.subr.mxu1 %v10659_v35  ;;  %v2123_v54 = vadd.f32 %v7994_v47, %v8226_v38  ;;  %v2125_v4 = vadd.f32 %v8004_v32, %v8235_v25  ;;  %v2129_v47 = vadd.f32 %v8014_v7, %v8226_v38  ;;  %v2131_v32 = vadd.f32 %v8030_v44, %v8235_v25 }
 0x2d5   :  { %v2598_v16 = vpop.f32.mrf.mxu0  ;;  %v8665_v18 = vadd.f32 %v2363_v14, %v2107_v57  ;;  %3317 = vmatprep.mubr.f32.mxu1 %v10552_v55  ;;  %3734 = vmatpush2.msra.mxu1 %v3046_v56  ;;  %v2135_v7 = vadd.f32 %v8040_v31, %v8226_v38  ;;  %v2137_v44 = vadd.f32 %v8050_v13, %v8235_v25 }
 0x2d6   :  { %v2367_v58 = vpop.f32.mrf.mxu1  ;;  %3318 = vmatmul.mubr.f32.gmra.mxu1 %v10553_v61  ;;  %v10556_v16 = vmax.f32 %v8662_v37, 0.0  ;;  %v2141_v31 = vadd.f32 %v8060_v15, %v8226_v38  ;;  %v2143_v13 = vadd.f32 %v8076_v8, %v8235_v25  ;;  %v2147_v15 = vadd.f32 %v8086_v23, %v8226_v38 }
 0x2d7   :  { %11033 = vst [vmem:[#allocation15_spill] sm:$0xff] %v8665_v18  ;;  %v10554_v45 = vmax.f32 %v8665_v18, 0.0  ;;  %v8676_v20 = vpop.f32.mrf.mxu0  ;;  %v8679_v57 = vadd.f32 %v2367_v58, %v2111_v63  ;;  %v2149_v8 = vadd.f32 %v8096_v11, %v8235_v25  ;;  %v2153_v23 = vadd.f32 %v8106_v30, %v8226_v38 }
 0x2d8   :  { %v2369_v14 = vpop.f32.mrf.mxu1  ;;  %v2155_v11 = vadd.f32 %v8122_v27, %v8235_v25  ;;  %v2159_v30 = vadd.f32 %v8132_v59, %v8226_v38  ;;  %v2161_v27 = vadd.f32 %v8142_v51, %v8235_v25  ;;  %v2165_v59 = vadd.f32 %v8152_v62, %v8226_v38 }
 0x2d9   :  { %v2603_v56 = vpop.f32.mrf.mxu0  ;;  %v8681_v55 = vadd.f32 %v2369_v14, %v2113_v60  ;;  %3323 = vmatprep.mubr.f32.mxu1 %v10554_v45  ;;  %v10559_v60 = vmax.f32 %v8679_v57, 0.0  ;;  %v2167_v51 = vadd.f32 %v8168_v22, %v8235_v25  ;;  %v2171_v62 = vadd.f32 %v8178_v29, %v8226_v38  ;;  %v11049_v29 = vld [vmem:[#allocation27_spill] sm:$0xff] }
 0x2da   :  { %v2373_v61 = vpop.f32.mrf.mxu1  ;;  %3324 = vmatmul.mubr.f32.gmra.mxu1 %v10556_v16  ;;  %v2173_v22 = vadd.f32 %v8188_v5, %v8235_v25  ;;  %v11050_v5 = vld [vmem:[#allocation29_spill] sm:$0xff] }
 0x2db   :  { %11034 = vst [vmem:[#allocation49_spill] sm:$0xff] %v8681_v55  ;;  %v10557_v58 = vmax.f32 %v8681_v55, 0.0  ;;  %v8692_v63 = vpop.f32.mrf.mxu0  ;;  %v8695_v14 = vadd.f32 %v2373_v61, %v2117_v21 }
 0x2dc   :  { %v2375_v56 = vpop.f32.mrf.mxu1 }
 0x2dd   :  { %v2608_v45 = vpop.f32.mrf.mxu0  ;;  %v8697_v18 = vadd.f32 %v2375_v56, %v2119_v12  ;;  %3329 = vmatprep.mubr.f32.mxu1 %v10557_v58 }
 0x2de   :  { %v2379_v16 = vpop.f32.mrf.mxu1  ;;  %3330 = vmatmul.mubr.f32.gmra.mxu1 %v10559_v60  ;;  %v10562_v45 = vmax.f32 %v8695_v14, 0.0 }
 0x2df   :  { %11035 = vst [vmem:[#allocation16_spill] sm:$0xff] %v8697_v18  ;;  %v10560_v61 = vmax.f32 %v8697_v18, 0.0  ;;  %v8708_v21 = vpop.f32.mrf.mxu0  ;;  %v8711_v12 = vadd.f32 %v2379_v16, %v2123_v54 }
 0x2e0   :  { %v2381_v56 = vpop.f32.mrf.mxu1 }
 0x2e1   :  { %v2613_v58 = vpop.f32.mrf.mxu0  ;;  %v8713_v55 = vadd.f32 %v2381_v56, %v2125_v4  ;;  %3335 = vmatprep.mubr.f32.mxu1 %v10560_v61 }
 0x2e2   :  { %v2385_v60 = vpop.f32.mrf.mxu1  ;;  %3336 = vmatmul.mubr.f32.gmra.mxu1 %v10562_v45  ;;  %v10565_v58 = vmax.f32 %v8711_v12, 0.0 }
 0x2e3   :  { %11036 = vst [vmem:[#allocation17_spill] sm:$0xff] %v8713_v55  ;;  %v10563_v16 = vmax.f32 %v8713_v55, 0.0  ;;  %v8724_v54 = vpop.f32.mrf.mxu0  ;;  %v8727_v4 = vadd.f32 %v2385_v60, %v2129_v47 }
 0x2e4   :  { %v2387_v56 = vpop.f32.mrf.mxu1 }
 0x2e5   :  { %v2618_v61 = vpop.f32.mrf.mxu0  ;;  %v8729_v18 = vadd.f32 %v2387_v56, %v2131_v32  ;;  %3341 = vmatprep.mubr.f32.mxu1 %v10563_v16 }
 0x2e6   :  { %v2391_v45 = vpop.f32.mrf.mxu1  ;;  %3342 = vmatmul.mubr.f32.gmra.mxu1 %v10565_v58  ;;  %v10568_v61 = vmax.f32 %v8727_v4, 0.0 }
 0x2e7   :  { %11037 = vst [vmem:[#allocation18_spill] sm:$0xff] %v8729_v18  ;;  %v10566_v60 = vmax.f32 %v8729_v18, 0.0  ;;  %v8740_v47 = vpop.f32.mrf.mxu0  ;;  %v8743_v32 = vadd.f32 %v2391_v45, %v2135_v7 }
 0x2e8   :  { %v2393_v56 = vpop.f32.mrf.mxu1 }
 0x2e9   :  { %v2623_v16 = vpop.f32.mrf.mxu0  ;;  %v8745_v55 = vadd.f32 %v2393_v56, %v2137_v44  ;;  %3347 = vmatprep.mubr.f32.mxu1 %v10566_v60 }
 0x2ea   :  { %v2397_v58 = vpop.f32.mrf.mxu1  ;;  %3348 = vmatmul.mubr.f32.gmra.mxu1 %v10568_v61  ;;  %v10571_v16 = vmax.f32 %v8743_v32, 0.0 }
 0x2eb   :  { %11038 = vst [vmem:[#allocation19_spill] sm:$0xff] %v8745_v55  ;;  %v10569_v45 = vmax.f32 %v8745_v55, 0.0  ;;  %v8756_v7 = vpop.f32.mrf.mxu0  ;;  %v8759_v44 = vadd.f32 %v2397_v58, %v2141_v31 }
 0x2ec   :  { %v2399_v56 = vpop.f32.mrf.mxu1 }
 0x2ed   :  { %v2628_v60 = vpop.f32.mrf.mxu0  ;;  %v8761_v18 = vadd.f32 %v2399_v56, %v2143_v13  ;;  %3353 = vmatprep.mubr.f32.mxu1 %v10569_v45 }
 0x2ee   :  { %v2403_v61 = vpop.f32.mrf.mxu1  ;;  %3354 = vmatmul.mubr.f32.gmra.mxu1 %v10571_v16  ;;  %v10574_v60 = vmax.f32 %v8759_v44, 0.0 }
 0x2ef   :  { %11039 = vst [vmem:[#allocation20_spill] sm:$0xff] %v8761_v18  ;;  %v10572_v58 = vmax.f32 %v8761_v18, 0.0  ;;  %v8772_v31 = vpop.f32.mrf.mxu0  ;;  %v8775_v13 = vadd.f32 %v2403_v61, %v2147_v15 }
 0x2f0   :  { %v2405_v56 = vpop.f32.mrf.mxu1 }
 0x2f1   :  { %v2633_v45 = vpop.f32.mrf.mxu0  ;;  %v8777_v55 = vadd.f32 %v2405_v56, %v2149_v8  ;;  %3359 = vmatprep.mubr.f32.mxu1 %v10572_v58 }
 0x2f2   :  { %v2409_v16 = vpop.f32.mrf.mxu1  ;;  %3360 = vmatmul.mubr.f32.gmra.mxu1 %v10574_v60  ;;  %v10577_v45 = vmax.f32 %v8775_v13, 0.0 }
 0x2f3   :  { %11040 = vst [vmem:[#allocation21_spill] sm:$0xff] %v8777_v55  ;;  %v10575_v61 = vmax.f32 %v8777_v55, 0.0  ;;  %v8788_v15 = vpop.f32.mrf.mxu0  ;;  %v8791_v8 = vadd.f32 %v2409_v16, %v2153_v23 }
 0x2f4   :  { %v2411_v56 = vpop.f32.mrf.mxu1 }
 0x2f5   :  { %11041 = vst [vmem:[#allocation22_spill] sm:$0xff] %v8791_v8  ;;  %v2638_v58 = vpop.f32.mrf.mxu0  ;;  %v8793_v18 = vadd.f32 %v2411_v56, %v2155_v11  ;;  %3365 = vmatprep.mubr.f32.mxu1 %v10575_v61 }
 0x2f6   :  { %v2415_v60 = vpop.f32.mrf.mxu1  ;;  %3366 = vmatmul.mubr.f32.gmra.mxu1 %v10577_v45  ;;  %v10580_v58 = vmax.f32 %v8791_v8, 0.0  ;;  %v2179_v8 = vadd.f32 %v11050_v5, %v8235_v25  ;;  %v11054_v5 = vld [vmem:[#allocation32_spill] sm:$0xff] }
 0x2f7   :  { %11042 = vst [vmem:[#allocation23_spill] sm:$0xff] %v8793_v18  ;;  %v10578_v16 = vmax.f32 %v8793_v18, 0.0  ;;  %v8804_v23 = vpop.f32.mrf.mxu0  ;;  %v8807_v11 = vadd.f32 %v2415_v60, %v2159_v30 }
 0x2f8   :  { %v2417_v56 = vpop.f32.mrf.mxu1 }
 0x2f9   :  { %11043 = vst [vmem:[#allocation24_spill] sm:$0xff] %v8807_v11  ;;  %v2643_v61 = vpop.f32.mrf.mxu0  ;;  %v8809_v55 = vadd.f32 %v2417_v56, %v2161_v27  ;;  %3371 = vmatprep.mubr.f32.mxu1 %v10578_v16 }
 0x2fa   :  { %v2421_v45 = vpop.f32.mrf.mxu1  ;;  %3372 = vmatmul.mubr.f32.gmra.mxu1 %v10580_v58  ;;  %v10583_v61 = vmax.f32 %v8807_v11, 0.0 }
 0x2fb   :  { %11044 = vst [vmem:[#allocation25_spill] sm:$0xff] %v8809_v55  ;;  %v10581_v60 = vmax.f32 %v8809_v55, 0.0  ;;  %v8820_v30 = vpop.f32.mrf.mxu0  ;;  %v8823_v27 = vadd.f32 %v2421_v45, %v2165_v59 }
 0x2fc   :  { %v2423_v56 = vpop.f32.mrf.mxu1 }
 0x2fd   :  { %11045 = vst [vmem:[#allocation51_spill] sm:$0xff] %v8823_v27  ;;  %v2648_v16 = vpop.f32.mrf.mxu0  ;;  %v8825_v18 = vadd.f32 %v2423_v56, %v2167_v51  ;;  %3377 = vmatprep.mubr.f32.mxu1 %v10581_v60 }
 0x2fe   :  { %v2427_v58 = vpop.f32.mrf.mxu1  ;;  %3378 = vmatmul.mubr.f32.gmra.mxu1 %v10583_v61  ;;  %v10588_v16 = vmax.f32 %v8823_v27, 0.0  ;;  %v2177_v61 = vadd.f32 %v11049_v29, %v8226_v38  ;;  %v11053_v29 = vld [vmem:[#allocation30_spill] sm:$0xff] }
 0x2ff   :  { %11046 = vst [vmem:[#allocation52_spill] sm:$0xff] %v8825_v18  ;;  %v10586_v45 = vmax.f32 %v8825_v18, 0.0  ;;  %v8836_v59 = vpop.f32.mrf.mxu0  ;;  %v8839_v51 = vadd.f32 %v2427_v58, %v2171_v62 }
 0x300   :  { %v2429_v56 = vpop.f32.mrf.mxu1 }
 0x301   :  { %11047 = vst [vmem:[#allocation53_spill] sm:$0xff] %v8839_v51  ;;  %v2653_v60 = vpop.f32.mrf.mxu0  ;;  %v8841_v55 = vadd.f32 %v2429_v56, %v2173_v22  ;;  %3383 = vmatprep.mubr.f32.mxu1 %v10586_v45 }
 0x302   :  { %v2433_v11 = vpop.f32.mrf.mxu1  ;;  %3384 = vmatmul.mubr.f32.gmra.mxu1 %v10588_v16  ;;  %v10592_v60 = vmax.f32 %v8839_v51, 0.0  ;;  %v2183_v16 = vadd.f32 %v11053_v29, %v8226_v38  ;;  %v11057_v29 = vld [vmem:[#allocation33_spill] sm:$0xff] }
 0x303   :  { %11048 = vst [vmem:[#allocation54_spill] sm:$0xff] %v8841_v55  ;;  %v10590_v58 = vmax.f32 %v8841_v55, 0.0  ;;  %v8852_v62 = vpop.f32.mrf.mxu0  ;;  %v8855_v22 = vadd.f32 %v2433_v11, %v2177_v61 }
 0x304   :  { %11051 = vst [vmem:[#allocation27_spill] sm:$0xff] %v8852_v62  ;;  %v2435_v56 = vpop.f32.mrf.mxu1  ;;  %v2185_v62 = vadd.f32 %v11054_v5, %v8235_v25  ;;  %v2191_v5 = vadd.f32 %v8262_v3, %v8235_v25 }
 0x305   :  { %v2658_v45 = vpop.f32.mrf.mxu0  ;;  %v8857_v18 = vadd.f32 %v2435_v56, %v2179_v8  ;;  %3389 = vmatprep.mubr.f32.mxu1 %v10590_v58  ;;  %v10596_v8 = vmax.f32 %v8855_v22, 0.0 }
 0x306   :  { %v2439_v27 = vpop.f32.mrf.mxu1  ;;  %3390 = vmatmul.mubr.f32.gmra.mxu1 %v10592_v60  ;;  %v2189_v60 = vadd.f32 %v11057_v29, %v8226_v38 }
 0x307   :  { %11052 = vst [vmem:[#allocation29_spill] sm:$0xff] %v8857_v18  ;;  %v10594_v11 = vmax.f32 %v8857_v18, 0.0  ;;  %v8868_v61 = vpop.f32.mrf.mxu0  ;;  %v8871_v45 = vadd.f32 %v2439_v27, %v2183_v16  ;;  %v11059_v27 = vld [vmem:[#allocation26_spill] sm:$0xff] }
 0x308   :  { %11055 = vst [vmem:[#allocation30_spill] sm:$0xff] %v8868_v61  ;;  %v2441_v56 = vpop.f32.mrf.mxu1  ;;  %v11058_v61 = vld [vmem:[#allocation5_spill] sm:$0xff] }
 0x309   :  { %11056 = vst [vmem:[#allocation32_spill] sm:$0xff] %v8871_v45  ;;  %v2663_v58 = vpop.f32.mrf.mxu0  ;;  %v8873_v55 = vadd.f32 %v2441_v56, %v2185_v62  ;;  %3395 = vmatprep.mubr.f32.mxu1 %v10594_v11  ;;  %v8885_v16 = vrot.slane %v11059_v27, %v11058_v61  ;;  %v10597_v56 = vmax.f32 %v8871_v45, 0.0  ;;  %v11062_v61 = vmax.f32 %v8264_v24, 0.0 }
 0x30a   :  { %v2445_v51 = vpop.f32.mrf.mxu1  ;;  %3396 = vmatmul.mubr.f32.gmra.mxu1 %v10596_v8 }
 0x30b   :  { %v10598_v58 = vmax.f32 %v8873_v55, 0.0  ;;  %v8888_v62 = vpop.f32.mrf.mxu0  ;;  %v8891_v11 = vadd.f32 %v2445_v51, %v2189_v60  ;;  %v2517_v3 = vadd.f32 %v8271_v1, %v8885_v16 }
 0x30c   :  { %v2447_v38 = vpop.f32.mrf.mxu1 }
 0x30d   :  { %v2668_v29 = vpop.f32.mrf.mxu0  ;;  %v8893_v18 = vadd.f32 %v2447_v38, %v2191_v5  ;;  %3401 = vmatprep.mubr.f32.mxu1 %v10598_v58  ;;  %v10600_v51 = vmax.f32 %v8891_v11, 0.0  ;;  %v2522_v5 = vadd.f32 %v8293_v46, %v8885_v16  ;;  %v2527_v46 = vadd.f32 %v8323_v41, %v8885_v16 }
 0x30e   :  { %v4793_v25 = vpop.f32.mrf.mxu1  ;;  %3402 = vmatmul.mubr.f32.gmra.mxu1 %v10597_v56 }
 0x30f   :  { %v10601_v27 = vmax.f32 %v8893_v18, 0.0  ;;  %v8902_v8 = vpop.f32.mrf.mxu0  ;;  %v8913_v1 = vadd.f32 %v4793_v25, %v2522_v5  ;;  %v11064_v5 = vld [vmem:[#allocation35_spill] sm:$0xff] }
 0x310   :  { %v2741_v60 = vpop.f32.mrf.mxu1 }
 0x311   :  { %v2673_v38 = vpop.f32.mrf.mxu0  ;;  %v8907_v29 = vadd.f32 %v2741_v60, %v2517_v3  ;;  %3407 = vmatprep.mubr.f32.mxu1 %v10601_v27  ;;  %11061 = vst [vmem:[#allocation26_spill] sm:$0xff] %v8913_v1  ;;  %v3136_v3 = vld [vmem:[%s10247_s7 + $0x460] sm:$0xff]  ;;  %v10603_v24 = vmax.f32 %v8913_v1, 0.0 }
 0x312   :  { %v4796_v56 = vpop.f32.mrf.mxu1  ;;  %3408 = vmatmul.mubr.f32.gmra.mxu1 %v10600_v51  ;;  %v11063_v60 = vld [vmem:[#allocation39_spill] sm:$0xff]  ;;  %v11065_v38 = vmax.f32 %v11064_v5, 0.0  ;;  %v11067_v51 = vld [vmem:[#allocation38_spill] sm:$0xff] }
 0x313   :  { %11060 = vst [vmem:[#allocation33_spill] sm:$0xff] %v8907_v29  ;;  %v10602_v58 = vmax.f32 %v8907_v29, 0.0  ;;  %3735 = vmatprep.mubr.f32.mxu1 %v11062_v61  ;;  %v11068_v27 = vmax.f32 %v11067_v51, 0.0 }
 0x314   :  { %v2751_v45 = vpop.f32.mrf.mxu1 }
 0x315   :  { %3479 = vmatmul.mubr.f32.vlgmr.msra.gmra.mxu0 %v10602_v58  ;;  %v8929_v61 = vadd.f32 %v2751_v45, %v2527_v46  ;;  %v2532_v58 = vadd.f32 %v8347_v2, %v8885_v16  ;;  %v11069_v45 = vld [vmem:[#allocation36_spill] sm:$0xff] }
 0x316   :  { %4840 = vmatpush3.msra.mxu0 %v11063_v60  ;;  %v4799_v25 = vpop.f32.mrf.mxu1  ;;  %3736 = vmatmul.mubr.f32.vlgmr.msra.gmra.mxu1 %v11065_v38  ;;  %v3133_v60 = vld [vmem:[%s10247_s7 + $0x448] sm:$0xff]  ;;  %v11070_v46 = vmax.f32 %v11069_v45, 0.0  ;;  %v11072_v38 = vmax.f32 %v8308_v48, 0.0  ;;  %v3130_v45 = vld [vmem:[%s10247_s7 + $0x430] sm:$0xff] }
 0x317   :  { %11066 = vst [vmem:[#allocation39_spill] sm:$0xff] %v8929_v61  ;;  %3740 = vmatprep.mubr.f32.mxu1 %v11068_v27  ;;  %3484 = vmatprep.mubr.f32.mxu0 %v10659_v35  ;;  %v8944_v27 = vadd.f32 %v4796_v56, %v2532_v58  ;;  %v10604_v51 = vmax.f32 %v8929_v61, 0.0  ;;  %v11073_v56 = vld [vmem:[#allocation41_spill] sm:$0xff] }
 0x318   :  { %v2761_v41 = vpop.f32.mrf.mxu1  ;;  %4841 = vmatprep.subr.mxu0 %v3136_v3 }
 0x319   :  { %3485 = vmatmul.mubr.f32.gmra.mxu0 %v10603_v24  ;;  %11071 = vst [vmem:[#allocation35_spill] sm:$0xff] %v8944_v27  ;;  %v2537_v24 = vadd.f32 %v8371_v43, %v8885_v16  ;;  %v10605_v48 = vmax.f32 %v8944_v27, 0.0  ;;  %v11076_v43 = vmax.f32 %v8332_v9, 0.0  ;;  %v11082_v27 = vld [vmem:[#allocation7_spill] sm:$0xff] }
 0x31a   :  { %v4802_v5 = vpop.f32.mrf.mxu1  ;;  %3741 = vmatmul.mubr.f32.gmra.mxu1 %v11070_v46  ;;  %3490 = vmatprep.mubr.f32.mxu0 %v10659_v35  ;;  %v11074_v46 = vmax.f32 %v11073_v56, 0.0  ;;  %v3127_v56 = vld [vmem:[%s10247_s7 + $0x418] sm:$0xff]  ;;  %v2547_v61 = vadd.f32 %v11082_v27, %v8885_v16 }
 0x31b   :  { %3745 = vmatprep.mubr.f32.mxu1 %v11072_v38  ;;  %4842 = vmatpush3.msra.mxu0 %v3136_v3  ;;  %v8962_v3 = vadd.f32 %v2761_v41, %v2537_v24  ;;  %v11077_v24 = vld [vmem:[#allocation42_spill] sm:$0xff] }
 0x31c   :  { %v2771_v2 = vpop.f32.mrf.mxu1  ;;  %4843 = vmatprep.subr.mxu0 %v3133_v60  ;;  %v11078_v41 = vmax.f32 %v11077_v24, 0.0  ;;  %v3124_v24 = vld [vmem:[%s10247_s7 + $0x400] sm:$0xff] }
 0x31d   :  { %3491 = vmatmul.mubr.f32.gmra.mxu0 %v10604_v51  ;;  %11075 = vst [vmem:[#allocation38_spill] sm:$0xff] %v8962_v3  ;;  %v2542_v51 = vadd.f32 %v8395_v28, %v8885_v16 }
 0x31e   :  { %v8956_v58 = vpop.f32.mrf.mxu1  ;;  %3746 = vmatmul.mubr.f32.gmra.mxu1 %v11074_v46  ;;  %3496 = vmatprep.mubr.f32.mxu0 %v10659_v35 }
 0x31f   :  { %3750 = vmatprep.mubr.f32.mxu1 %v11076_v43  ;;  %4844 = vmatpush3.msra.mxu0 %v3133_v60  ;;  %v8978_v9 = vadd.f32 %v4799_v25, %v2542_v51  ;;  %v10608_v60 = vmax.f32 %v8962_v3, 0.0  ;;  %v11080_v43 = vld [vmem:[#allocation45_spill] sm:$0xff]  ;;  %v11083_v51 = vld [vmem:[#allocation44_spill] sm:$0xff] }
 0x320   :  { %v2781_v38 = vpop.f32.mrf.mxu1  ;;  %4845 = vmatprep.subr.mxu0 %v3130_v45  ;;  %v11081_v28 = vmax.f32 %v11080_v43, 0.0  ;;  %v8996_v43 = vadd.f32 %v2771_v2, %v2547_v61  ;;  %v11088_v3 = vld [vmem:[#allocation9_spill] sm:$0xff]  ;;  %v11089_v61 = vld [vmem:[#allocation47_spill] sm:$0xff] }
 0x321   :  { %3497 = vmatmul.mubr.f32.gmra.mxu0 %v10605_v48  ;;  %11079 = vst [vmem:[#allocation36_spill] sm:$0xff] %v8978_v9  ;;  %v2552_v1 = vadd.f32 %v11088_v3, %v8885_v16  ;;  %v11090_v2 = vmax.f32 %v11089_v61, 0.0  ;;  %v11094_v61 = vld [vmem:[#allocation50_spill] sm:$0xff] }
 0x322   :  { %v8973_v46 = vpop.f32.mrf.mxu1  ;;  %3751 = vmatmul.mubr.f32.gmra.mxu1 %v11078_v41  ;;  %3502 = vmatprep.mubr.f32.mxu0 %v10659_v35  ;;  %v11084_v41 = vmax.f32 %v11083_v51, 0.0  ;;  %11085 = vst [vmem:[#allocation41_spill] sm:$0xff] %v8996_v43  ;;  %v3121_v51 = vld [vmem:[%s10247_s7 + $0x3e8] sm:$0xff] }
 0x323   :  { %3755 = vmatprep.mubr.f32.mxu1 %v11081_v28  ;;  %4846 = vmatpush3.msra.mxu0 %v3130_v45  ;;  %v10611_v45 = vmax.f32 %v8978_v9, 0.0  ;;  %v11086_v28 = vld [vmem:[#allocation48_spill] sm:$0xff]  ;;  %v2557_v9 = vadd.f32 %v8467_v52, %v8885_v16 }
 0x324   :  { %v2791_v48 = vpop.f32.mrf.mxu1  ;;  %4847 = vmatprep.subr.mxu0 %v3127_v56  ;;  %v11087_v27 = vmax.f32 %v11086_v28, 0.0  ;;  %v10613_v28 = vmax.f32 %v8996_v43, 0.0  ;;  %v11099_v43 = vld [vmem:[#allocation37_spill] sm:$0xff] }
 0x325   :  { %3503 = vmatmul.mubr.f32.gmra.mxu0 %v10608_v60  ;;  %v2562_v29 = vadd.f32 %v11099_v43, %v8885_v16  ;;  %v11102_v43 = vld [vmem:[#allocation34_spill] sm:$0xff] }
 0x326   :  { %v8990_v25 = vpop.f32.mrf.mxu1  ;;  %3756 = vmatmul.mubr.f32.gmra.mxu1 %v11084_v41  ;;  %3508 = vmatprep.mubr.f32.mxu0 %v10659_v35 }
 0x327   :  { %3760 = vmatprep.mubr.f32.mxu1 %v11087_v27  ;;  %4848 = vmatpush3.msra.mxu0 %v3127_v56  ;;  %v9014_v56 = vadd.f32 %v4802_v5, %v2552_v1  ;;  %v11092_v27 = vld [vmem:[#allocation6_spill] sm:$0xff]  ;;  %v3118_v1 = vld [vmem:[%s10247_s7 + $0x3d0] sm:$0xff] }
 0x328   :  { %v9000_v60 = vpop.f32.mrf.mxu1  ;;  %4849 = vmatprep.subr.mxu0 %v3124_v24  ;;  %v11093_v3 = vmax.f32 %v11092_v27, 0.0  ;;  %v9034_v27 = vadd.f32 %v2781_v38, %v2557_v9  ;;  %v11100_v38 = vld [vmem:[#allocation28_spill] sm:$0xff] }
 0x329   :  { %3509 = vmatmul.mubr.f32.gmra.mxu0 %v10611_v45  ;;  %11091 = vst [vmem:[#allocation42_spill] sm:$0xff] %v9014_v56  ;;  %v11101_v9 = vmax.f32 %v11100_v38, 0.0  ;;  %v11104_v38 = vld [vmem:[#allocation31_spill] sm:$0xff] }
 0x32a   :  { %v9009_v41 = vpop.f32.mrf.mxu1  ;;  %3761 = vmatmul.mubr.f32.gmra.mxu1 %v11090_v2  ;;  %3514 = vmatprep.mubr.f32.mxu0 %v10659_v35  ;;  %v11095_v2 = vmax.f32 %v11094_v61, 0.0  ;;  %11096 = vst [vmem:[#allocation45_spill] sm:$0xff] %v9034_v27  ;;  %v3115_v61 = vld [vmem:[%s10247_s7 + $0x3b8] sm:$0xff] }
 0x32b   :  { %3765 = vmatprep.mubr.f32.mxu1 %v11093_v3  ;;  %4850 = vmatpush3.msra.mxu0 %v3124_v24  ;;  %v10616_v24 = vmax.f32 %v9014_v56, 0.0  ;;  %v11097_v3 = vld [vmem:[#allocation8_spill] sm:$0xff]  ;;  %v2567_v56 = vadd.f32 %v8515_v17, %v8885_v16 }
 0x32c   :  { %v9019_v45 = vpop.f32.mrf.mxu1  ;;  %4851 = vmatprep.subr.mxu0 %v3121_v51  ;;  %v11098_v52 = vmax.f32 %v11097_v3, 0.0  ;;  %v10618_v3 = vmax.f32 %v9034_v27, 0.0  ;;  %v2572_v27 = vadd.f32 %v8539_v40, %v8885_v16  ;;  %v11110_v40 = vmax.f32 %v8500_v26, 0.0 }
 0x32d   :  { %3515 = vmatmul.mubr.f32.gmra.mxu0 %v10613_v28 }
 0x32e   :  { %v9028_v5 = vpop.f32.mrf.mxu1  ;;  %3766 = vmatmul.mubr.f32.gmra.mxu1 %v11095_v2  ;;  %3520 = vmatprep.mubr.f32.mxu0 %v10659_v35 }
 0x32f   :  { %3770 = vmatprep.mubr.f32.mxu1 %v11098_v52  ;;  %4852 = vmatpush3.msra.mxu0 %v3121_v51  ;;  %v9053_v51 = vadd.f32 %v8956_v58, %v2562_v29  ;;  %v11103_v52 = vmax.f32 %v11102_v43, 0.0  ;;  %v3112_v29 = vld [vmem:[%s10247_s7 + $0x3a0] sm:$0xff]  ;;  %v9073_v43 = vadd.f32 %v2791_v48, %v2567_v56 }
 0x330   :  { %v9038_v28 = vpop.f32.mrf.mxu1  ;;  %4853 = vmatprep.subr.mxu0 %v3118_v1  ;;  %v11108_v48 = vld [vmem:[#allocation10_spill] sm:$0xff] }
 0x331   :  { %3521 = vmatmul.mubr.f32.gmra.mxu0 %v10616_v24  ;;  %v11109_v56 = vmax.f32 %v11108_v48, 0.0  ;;  %v11111_v48 = vld [vmem:[#allocation40_spill] sm:$0xff] }
 0x332   :  { %v9047_v2 = vpop.f32.mrf.mxu1  ;;  %3771 = vmatmul.mubr.f32.gmra.mxu1 %v11101_v9  ;;  %3526 = vmatprep.mubr.f32.mxu0 %v10659_v35  ;;  %v11105_v9 = vmax.f32 %v11104_v38, 0.0  ;;  %v3109_v38 = vld [vmem:[%s10247_s7 + $0x388] sm:$0xff] }
 0x333   :  { %3775 = vmatprep.mubr.f32.mxu1 %v11103_v52  ;;  %4854 = vmatpush3.msra.mxu0 %v3118_v1  ;;  %v10620_v1 = vmax.f32 %v9053_v51, 0.0  ;;  %v11106_v52 = vld [vmem:[#allocation11_spill] sm:$0xff] }
 0x334   :  { %v9058_v24 = vpop.f32.mrf.mxu1  ;;  %4855 = vmatprep.subr.mxu0 %v3115_v61  ;;  %v11107_v17 = vmax.f32 %v11106_v52, 0.0  ;;  %v10621_v52 = vmax.f32 %v9073_v43, 0.0 }
 0x335   :  { %3527 = vmatmul.mubr.f32.gmra.mxu0 %v10618_v3 }
 0x336   :  { %v9067_v58 = vpop.f32.mrf.mxu1  ;;  %3776 = vmatmul.mubr.f32.gmra.mxu1 %v11105_v9  ;;  %3532 = vmatprep.mubr.f32.mxu0 %v10659_v35 }
 0x337   :  { %3780 = vmatprep.mubr.f32.mxu1 %v11107_v17  ;;  %4856 = vmatpush3.msra.mxu0 %v3115_v61  ;;  %v9092_v61 = vadd.f32 %v8973_v46, %v2572_v27  ;;  %v3106_v46 = vld [vmem:[%s10247_s7 + $0x370] sm:$0xff] }
 0x338   :  { %v9077_v3 = vpop.f32.mrf.mxu1  ;;  %4857 = vmatprep.subr.mxu0 %v3112_v29 }
 0x339   :  { %3533 = vmatmul.mubr.f32.gmra.mxu0 %v10620_v1  ;;  %v2577_v1 = vadd.f32 %v8563_v49, %v8885_v16  ;;  %v10622_v26 = vmax.f32 %v9092_v61, 0.0  ;;  %v11113_v49 = vmax.f32 %v8524_v53, 0.0 }
 0x33a   :  { %v9086_v9 = vpop.f32.mrf.mxu1  ;;  %3781 = vmatmul.mubr.f32.gmra.mxu1 %v11109_v56  ;;  %3538 = vmatprep.mubr.f32.mxu0 %v10659_v35  ;;  %v11112_v56 = vmax.f32 %v11111_v48, 0.0  ;;  %v3103_v48 = vld [vmem:[%s10247_s7 + $0x358] sm:$0xff] }
 0x33b   :  { %3785 = vmatprep.mubr.f32.mxu1 %v11110_v40  ;;  %4858 = vmatpush3.msra.mxu0 %v3112_v29  ;;  %v9113_v29 = vadd.f32 %v9000_v60, %v2577_v1  ;;  %v11114_v60 = vld [vmem:[#allocation12_spill] sm:$0xff] }
 0x33c   :  { %v9097_v17 = vpop.f32.mrf.mxu1  ;;  %4859 = vmatprep.subr.mxu0 %v3109_v38  ;;  %v11115_v1 = vmax.f32 %v11114_v60, 0.0 }
 0x33d   :  { %3539 = vmatmul.mubr.f32.gmra.mxu0 %v10621_v52  ;;  %v2582_v52 = vadd.f32 %v8587_v0, %v8885_v16  ;;  %v11116_v0 = vmax.f32 %v8548_v6, 0.0 }
 0x33e   :  { %v9106_v27 = vpop.f32.mrf.mxu1  ;;  %3786 = vmatmul.mubr.f32.gmra.mxu1 %v11112_v56  ;;  %3544 = vmatprep.mubr.f32.mxu0 %v10659_v35 }
 0x33f   :  { %3790 = vmatprep.mubr.f32.mxu1 %v11113_v49  ;;  %4860 = vmatpush3.msra.mxu0 %v3109_v38  ;;  %v9132_v53 = vadd.f32 %v8990_v25, %v2582_v52  ;;  %v10637_v38 = vmax.f32 %v9113_v29, 0.0  ;;  %v3100_v25 = vld [vmem:[%s10247_s7 + $0x340] sm:$0xff]  ;;  %v11117_v52 = vld [vmem:[#allocation13_spill] sm:$0xff] }
 0x340   :  { %v9117_v40 = vpop.f32.mrf.mxu1  ;;  %4861 = vmatprep.subr.mxu0 %v3106_v46  ;;  %v11118_v60 = vmax.f32 %v11117_v52, 0.0  ;;  %v3097_v52 = vld [vmem:[%s10247_s7 + $0x328] sm:$0xff] }
 0x341   :  { %3545 = vmatmul.mubr.f32.gmra.mxu0 %v10622_v26  ;;  %v2587_v26 = vadd.f32 %v8611_v50, %v8885_v16  ;;  %v10636_v6 = vmax.f32 %v9132_v53, 0.0 }
 0x342   :  { %v9126_v56 = vpop.f32.mrf.mxu1  ;;  %3791 = vmatmul.mubr.f32.gmra.mxu1 %v11115_v1  ;;  %3550 = vmatprep.mubr.f32.mxu0 %v10659_v35  ;;  %v11119_v1 = vmax.f32 %v8572_v42, 0.0 }
 0x343   :  { %3795 = vmatprep.mubr.f32.mxu1 %v11116_v0  ;;  %4862 = vmatpush3.msra.mxu0 %v3106_v46  ;;  %v9151_v46 = vadd.f32 %v9019_v45, %v2587_v26  ;;  %v2592_v0 = vadd.f32 %v8635_v34, %v8885_v16 }
 0x344   :  { %v9137_v49 = vpop.f32.mrf.mxu1  ;;  %4863 = vmatprep.subr.mxu0 %v3103_v48 }
 0x345   :  { %3551 = vmatmul.mubr.f32.gmra.mxu0 %v10637_v38  ;;  %v9168_v42 = vadd.f32 %v9009_v41, %v2592_v0  ;;  %v10634_v26 = vmax.f32 %v9151_v46, 0.0  ;;  %v3094_v41 = vld [vmem:[%s10247_s7 + $0x310] sm:$0xff]  ;;  %v11123_v0 = vld [vmem:[#allocation46_spill] sm:$0xff] }
 0x346   :  { %3796 = vmatmul.mubr.f32.gmra.mxu1 %v11118_v60  ;;  %3556 = vmatprep.mubr.f32.mxu0 %v10659_v35  ;;  %v9155_v50 = vpop.f32.mrf.mxu1  ;;  %v11120_v60 = vld [vmem:[#allocation43_spill] sm:$0xff] }
 0x347   :  { %3800 = vmatprep.mubr.f32.mxu1 %v11119_v1  ;;  %4864 = vmatpush3.msra.mxu0 %v3103_v48  ;;  %v11121_v45 = vmax.f32 %v11120_v60, 0.0  ;;  %v11122_v48 = vmax.f32 %v8596_v33, 0.0  ;;  %v2597_v1 = vadd.f32 %v8659_v36, %v8885_v16  ;;  %v11124_v60 = vmax.f32 %v11123_v0, 0.0  ;;  %v11126_v0 = vld [vmem:[#allocation14_spill] sm:$0xff] }
 0x348   :  { %4865 = vmatprep.subr.mxu0 %v3100_v25  ;;  %v9173_v34 = vpop.f32.mrf.mxu1  ;;  %v10633_v33 = vmax.f32 %v9168_v42, 0.0 }
 0x349   :  { %3557 = vmatmul.mubr.f32.gmra.mxu0 %v10636_v6 }
 0x34a   :  { %3801 = vmatmul.mubr.f32.gmra.mxu1 %v11121_v45  ;;  %3562 = vmatprep.mubr.f32.mxu0 %v10659_v35  ;;  %v11125_v45 = vmax.f32 %v8620_v39, 0.0  ;;  %v9191_v36 = vpop.f32.mrf.mxu1 }
 0x34b   :  { %3805 = vmatprep.mubr.f32.mxu1 %v11122_v48  ;;  %4866 = vmatpush3.msra.mxu0 %v3100_v25  ;;  %v9187_v25 = vadd.f32 %v9038_v28, %v2597_v1  ;;  %v2602_v48 = vadd.f32 %v8676_v20, %v8885_v16  ;;  %v2607_v20 = vadd.f32 %v8692_v63, %v8885_v16 }
 0x34c   :  { %4867 = vmatprep.subr.mxu0 %v3097_v52  ;;  %v9206_v1 = vpop.f32.mrf.mxu1  ;;  %v2612_v63 = vadd.f32 %v8708_v21, %v8885_v16  ;;  %v2617_v21 = vadd.f32 %v8724_v54, %v8885_v16  ;;  %v2622_v54 = vadd.f32 %v8740_v47, %v8885_v16  ;;  %v2627_v47 = vadd.f32 %v8756_v7, %v8885_v16 }
 0x34d   :  { %3563 = vmatmul.mubr.f32.gmra.mxu0 %v10634_v26  ;;  %v9201_v28 = vadd.f32 %v9028_v5, %v2602_v48  ;;  %v10631_v39 = vmax.f32 %v9187_v25, 0.0  ;;  %v2632_v7 = vadd.f32 %v8772_v31, %v8885_v16  ;;  %v2637_v31 = vadd.f32 %v8788_v15, %v8885_v16 }
 0x34e   :  { %3806 = vmatmul.mubr.f32.gmra.mxu1 %v11124_v60  ;;  %3568 = vmatprep.mubr.f32.mxu0 %v10659_v35  ;;  %v11127_v60 = vmax.f32 %v11126_v0, 0.0  ;;  %v11129_v0 = vmax.f32 %v8638_v19, 0.0  ;;  %v2642_v15 = vadd.f32 %v8804_v23, %v8885_v16  ;;  %v2647_v23 = vadd.f32 %v8820_v30, %v8885_v16 }
 0x34f   :  { %3810 = vmatprep.mubr.f32.mxu1 %v11125_v45  ;;  %4868 = vmatpush3.msra.mxu0 %v3097_v52  ;;  %v11128_v52 = vmax.f32 %v8644_v10, 0.0  ;;  %v10623_v5 = vmax.f32 %v9201_v28, 0.0  ;;  %v9219_v10 = vadd.f32 %v9058_v24, %v2607_v20  ;;  %v9235_v24 = vadd.f32 %v9047_v2, %v2612_v63 }
 0x350   :  { %4869 = vmatprep.subr.mxu0 %v3094_v41  ;;  %v9253_v63 = vadd.f32 %v9077_v3, %v2617_v21  ;;  %v9269_v3 = vadd.f32 %v9067_v58, %v2622_v54  ;;  %v9287_v54 = vadd.f32 %v9097_v17, %v2627_v47  ;;  %v9303_v17 = vadd.f32 %v9086_v9, %v2632_v7 }
 0x351   :  { %3569 = vmatmul.mubr.f32.gmra.mxu0 %v10633_v33  ;;  %v10624_v20 = vmax.f32 %v9219_v10, 0.0  ;;  %v10625_v2 = vmax.f32 %v9235_v24, 0.0  ;;  %v9321_v7 = vadd.f32 %v9117_v40, %v2637_v31  ;;  %v9337_v40 = vadd.f32 %v9106_v27, %v2642_v15 }
 0x352   :  { %3811 = vmatmul.mubr.f32.gmra.mxu1 %v11127_v60  ;;  %3574 = vmatprep.mubr.f32.mxu0 %v10659_v35  ;;  %v10626_v21 = vmax.f32 %v9253_v63, 0.0  ;;  %v10627_v58 = vmax.f32 %v9269_v3, 0.0  ;;  %v10628_v47 = vmax.f32 %v9287_v54, 0.0  ;;  %v10629_v9 = vmax.f32 %v9303_v17, 0.0 }
 0x353   :  { %3815 = vmatprep.mubr.f32.mxu1 %v11128_v52  ;;  %4870 = vmatpush3.msra.mxu0 %v3094_v41  ;;  %v11130_v41 = vld [vmem:[#allocation15_spill] sm:$0xff]  ;;  %v11132_v52 = vmax.f32 %v8662_v37, 0.0  ;;  %v10630_v31 = vmax.f32 %v9321_v7, 0.0  ;;  %v10632_v27 = vmax.f32 %v9337_v40, 0.0  ;;  %v9355_v15 = vadd.f32 %v9137_v49, %v2647_v23 }
 0x354   :  { %v11131_v48 = vmax.f32 %v11130_v41, 0.0  ;;  %v2652_v30 = vadd.f32 %v8836_v59, %v8885_v16  ;;  %v11160_v59 = vld [vmem:[#allocation27_spill] sm:$0xff] }
 0x355   :  { %3575 = vmatmul.mubr.f32.gmra.mxu0 %v10631_v39  ;;  %v9212_v45 = vpop.f32.mrf.mxu1  ;;  %v10635_v23 = vmax.f32 %v9355_v15, 0.0 }
 0x356   :  { %3816 = vmatmul.mubr.f32.gmra.mxu1 %v11129_v0  ;;  %3580 = vmatprep.mubr.f32.mxu0 %v10659_v35  ;;  %v11133_v0 = vld [vmem:[#allocation49_spill] sm:$0xff]  ;;  %v9371_v49 = vadd.f32 %v9126_v56, %v2652_v30 }
 0x357   :  { %3820 = vmatprep.mubr.f32.mxu1 %v11131_v48  ;;  %v9223_v60 = vpop.f32.mrf.mxu1  ;;  %v11134_v41 = vmax.f32 %v11133_v0, 0.0  ;;  %v11136_v0 = vld [vmem:[#allocation16_spill] sm:$0xff] }
 0x358   :  { %v10638_v56 = vmax.f32 %v9371_v49, 0.0 }
 0x359   :  { %3581 = vmatmul.mubr.f32.gmra.mxu0 %v10623_v5  ;;  %v9229_v19 = vpop.f32.mrf.mxu1 }
 0x35a   :  { %3821 = vmatmul.mubr.f32.gmra.mxu1 %v11132_v52  ;;  %3586 = vmatprep.mubr.f32.mxu0 %v10659_v35  ;;  %v11135_v52 = vmax.f32 %v8679_v57, 0.0 }
 0x35b   :  { %3825 = vmatprep.mubr.f32.mxu1 %v11134_v41  ;;  %v9240_v48 = vpop.f32.mrf.mxu1  ;;  %v11137_v41 = vmax.f32 %v11136_v0, 0.0  ;;  %v11139_v0 = vld [vmem:[#allocation17_spill] sm:$0xff] }
 0x35d   :  { %3587 = vmatmul.mubr.f32.gmra.mxu0 %v10624_v20  ;;  %v9246_v37 = vpop.f32.mrf.mxu1 }
 0x35e   :  { %3826 = vmatmul.mubr.f32.gmra.mxu1 %v11135_v52  ;;  %3592 = vmatprep.mubr.f32.mxu0 %v10659_v35  ;;  %v11138_v52 = vmax.f32 %v8695_v14, 0.0 }
 0x35f   :  { %3830 = vmatprep.mubr.f32.mxu1 %v11137_v41  ;;  %v9257_v5 = vpop.f32.mrf.mxu1  ;;  %v11140_v41 = vmax.f32 %v11139_v0, 0.0  ;;  %v11142_v0 = vld [vmem:[#allocation18_spill] sm:$0xff] }
 0x361   :  { %3593 = vmatmul.mubr.f32.gmra.mxu0 %v10625_v2  ;;  %v9263_v57 = vpop.f32.mrf.mxu1 }
 0x362   :  { %3831 = vmatmul.mubr.f32.gmra.mxu1 %v11138_v52  ;;  %3598 = vmatprep.mubr.f32.mxu0 %v10659_v35  ;;  %v11141_v52 = vmax.f32 %v8711_v12, 0.0 }
 0x363   :  { %3835 = vmatprep.mubr.f32.mxu1 %v11140_v41  ;;  %v9274_v20 = vpop.f32.mrf.mxu1  ;;  %v11143_v41 = vmax.f32 %v11142_v0, 0.0  ;;  %v11145_v0 = vld [vmem:[#allocation19_spill] sm:$0xff] }
 0x365   :  { %3599 = vmatmul.mubr.f32.gmra.mxu0 %v10626_v21  ;;  %v9280_v14 = vpop.f32.mrf.mxu1 }
 0x366   :  { %3836 = vmatmul.mubr.f32.gmra.mxu1 %v11141_v52  ;;  %3604 = vmatprep.mubr.f32.mxu0 %v10659_v35  ;;  %v11144_v52 = vmax.f32 %v8727_v4, 0.0 }
 0x367   :  { %3840 = vmatprep.mubr.f32.mxu1 %v11143_v41  ;;  %v9291_v2 = vpop.f32.mrf.mxu1  ;;  %v11146_v41 = vmax.f32 %v11145_v0, 0.0  ;;  %v11148_v0 = vld [vmem:[#allocation20_spill] sm:$0xff] }
 0x369   :  { %3605 = vmatmul.mubr.f32.gmra.mxu0 %v10627_v58  ;;  %v9297_v12 = vpop.f32.mrf.mxu1 }
 0x36a   :  { %3841 = vmatmul.mubr.f32.gmra.mxu1 %v11144_v52  ;;  %3610 = vmatprep.mubr.f32.mxu0 %v10659_v35  ;;  %v11147_v52 = vmax.f32 %v8743_v32, 0.0 }
 0x36b   :  { %3845 = vmatprep.mubr.f32.mxu1 %v11146_v41  ;;  %v9308_v21 = vpop.f32.mrf.mxu1  ;;  %v11149_v41 = vmax.f32 %v11148_v0, 0.0  ;;  %v11151_v0 = vld [vmem:[#allocation21_spill] sm:$0xff] }
 0x36d   :  { %3611 = vmatmul.mubr.f32.gmra.mxu0 %v10628_v47  ;;  %v9314_v4 = vpop.f32.mrf.mxu1 }
 0x36e   :  { %3846 = vmatmul.mubr.f32.gmra.mxu1 %v11147_v52  ;;  %3616 = vmatprep.mubr.f32.mxu0 %v10659_v35  ;;  %v11150_v52 = vmax.f32 %v8759_v44, 0.0 }
 0x36f   :  { %3850 = vmatprep.mubr.f32.mxu1 %v11149_v41  ;;  %v9325_v58 = vpop.f32.mrf.mxu1  ;;  %v11152_v41 = vmax.f32 %v11151_v0, 0.0  ;;  %v11154_v0 = vld [vmem:[#allocation23_spill] sm:$0xff] }
 0x371   :  { %3617 = vmatmul.mubr.f32.gmra.mxu0 %v10629_v9 }
 0x372   :  { %v9331_v32 = vpop.f32.mrf.mxu1  ;;  %3851 = vmatmul.mubr.f32.gmra.mxu1 %v11150_v52  ;;  %3622 = vmatprep.mubr.f32.mxu0 %v10659_v35  ;;  %v11153_v52 = vmax.f32 %v8775_v13, 0.0 }
 0x373   :  { %3855 = vmatprep.mubr.f32.mxu1 %v11152_v41  ;;  %v11155_v41 = vmax.f32 %v11154_v0, 0.0  ;;  %v11158_v0 = vld [vmem:[#allocation25_spill] sm:$0xff] }
 0x374   :  { %v9342_v47 = vpop.f32.mrf.mxu1 }
 0x375   :  { %3623 = vmatmul.mubr.f32.gmra.mxu0 %v10630_v31 }
 0x376   :  { %v9348_v44 = vpop.f32.mrf.mxu1  ;;  %3856 = vmatmul.mubr.f32.gmra.mxu1 %v11153_v52  ;;  %3628 = vmatprep.mubr.f32.mxu0 %v10659_v35  ;;  %v11156_v52 = vld [vmem:[#allocation22_spill] sm:$0xff] }
 0x377   :  { %3860 = vmatprep.mubr.f32.mxu1 %v11155_v41  ;;  %v11157_v31 = vmax.f32 %v11156_v52, 0.0  ;;  %v11159_v41 = vmax.f32 %v11158_v0, 0.0  ;;  %v11163_v0 = vld [vmem:[#allocation52_spill] sm:$0xff] }
 0x378   :  { %v9359_v9 = vpop.f32.mrf.mxu1 }
 0x379   :  { %3629 = vmatmul.mubr.f32.gmra.mxu0 %v10632_v27  ;;  %v2657_v27 = vadd.f32 %v11160_v59, %v8885_v16  ;;  %v11165_v59 = vld [vmem:[#allocation30_spill] sm:$0xff] }
 0x37a   :  { %v9365_v13 = vpop.f32.mrf.mxu1  ;;  %3861 = vmatmul.mubr.f32.gmra.mxu1 %v11157_v31  ;;  %3634 = vmatprep.mubr.f32.mxu0 %v10659_v35  ;;  %v11161_v31 = vld [vmem:[#allocation24_spill] sm:$0xff] }
 0x37b   :  { %3865 = vmatprep.mubr.f32.mxu1 %v11159_v41  ;;  %v11162_v33 = vmax.f32 %v11161_v31, 0.0  ;;  %v9389_v30 = vadd.f32 %v9173_v34, %v2657_v27  ;;  %v11164_v41 = vmax.f32 %v11163_v0, 0.0  ;;  %v11168_v0 = vld [vmem:[#allocation54_spill] sm:$0xff] }
 0x37c   :  { %v9376_v39 = vpop.f32.mrf.mxu1 }
 0x37d   :  { %3635 = vmatmul.mubr.f32.gmra.mxu0 %v10635_v23  ;;  %v2662_v23 = vadd.f32 %v11165_v59, %v8885_v16  ;;  %v10641_v27 = vmax.f32 %v9389_v30, 0.0  ;;  %v2667_v59 = vadd.f32 %v8888_v62, %v8885_v16  ;;  %v2672_v62 = vadd.f32 %v8902_v8, %v8885_v16  ;;  %v11177_v16 = vld [vmem:[#allocation32_spill] sm:$0xff] }
 0x37e   :  { %v9382_v52 = vpop.f32.mrf.mxu1  ;;  %3866 = vmatmul.mubr.f32.gmra.mxu1 %v11162_v33  ;;  %3640 = vmatprep.mubr.f32.mxu0 %v10659_v35  ;;  %v11166_v33 = vld [vmem:[#allocation51_spill] sm:$0xff] }
 0x37f   :  { %3870 = vmatprep.mubr.f32.mxu1 %v11164_v41  ;;  %v11167_v6 = vmax.f32 %v11166_v33, 0.0  ;;  %v9405_v34 = vadd.f32 %v9155_v50, %v2662_v23  ;;  %v11169_v41 = vmax.f32 %v11168_v0, 0.0  ;;  %v9423_v23 = vadd.f32 %v9206_v1, %v2667_v59  ;;  %v11173_v0 = vld [vmem:[#allocation29_spill] sm:$0xff] }
 0x380   :  { %v9393_v26 = vpop.f32.mrf.mxu1  ;;  %v9439_v1 = vadd.f32 %v9191_v36, %v2672_v62  ;;  %v11179_v62 = vmax.f32 %v8893_v18, 0.0 }
 0x381   :  { %3641 = vmatmul.mubr.f32.gmra.mxu0 %v10638_v56  ;;  %v10640_v50 = vmax.f32 %v9405_v34, 0.0  ;;  %v10639_v59 = vmax.f32 %v9423_v23, 0.0 }
 0x382   :  { %v9399_v31 = vpop.f32.mrf.mxu1  ;;  %3871 = vmatmul.mubr.f32.gmra.mxu1 %v11167_v6  ;;  %3646 = vmatprep.mubr.f32.mxu0 %v10659_v35  ;;  %v11171_v6 = vld [vmem:[#allocation53_spill] sm:$0xff]  ;;  %v10642_v36 = vmax.f32 %v9439_v1, 0.0 }
 0x383   :  { %3875 = vmatprep.mubr.f32.mxu1 %v11169_v41  ;;  %v11172_v56 = vmax.f32 %v11171_v6, 0.0  ;;  %v11174_v41 = vmax.f32 %v11173_v0, 0.0  ;;  %v11176_v0 = vmax.f32 %v8873_v55, 0.0 }
 0x384   :  { %v9410_v38 = vpop.f32.mrf.mxu1 }
 0x385   :  { %11170 = vst [vmem:[#allocation7_spill] sm:$0xff] %v9410_v38  ;;  %3647 = vmatmul.mubr.f32.gmra.mxu0 %v10641_v27 }
 0x386   :  { %v9416_v33 = vpop.f32.mrf.mxu1  ;;  %3876 = vmatmul.mubr.f32.gmra.mxu1 %v11172_v56  ;;  %3652 = vmatprep.mubr.f32.mxu0 %v10659_v35  ;;  %v11175_v56 = vmax.f32 %v8855_v22, 0.0  ;;  %v11178_v22 = vmax.f32 %v11177_v16, 0.0 }
 0x387   :  { %3880 = vmatprep.mubr.f32.mxu1 %v11174_v41 }
 0x388   :  { %v9427_v38 = vpop.f32.mrf.mxu1 }
 0x389   :  { %3653 = vmatmul.mubr.f32.gmra.mxu0 %v10640_v50 }
 0x38a   :  { %v9433_v6 = vpop.f32.mrf.mxu1  ;;  %3881 = vmatmul.mubr.f32.gmra.mxu1 %v11175_v56  ;;  %3658 = vmatprep.mubr.f32.mxu0 %v10659_v35 }
 0x38b   :  { %3885 = vmatprep.mubr.f32.mxu1 %v11176_v0  ;;  %v11182_v0 = vmax.f32 %v8891_v11, 0.0 }
 0x38c   :  { %v9444_v41 = vpop.f32.mrf.mxu1 }
 0x38d   :  { %3659 = vmatmul.mubr.f32.gmra.mxu0 %v10639_v59  ;;  %v11183_v59 = vld [vmem:[#allocation33_spill] sm:$0xff] }
 0x38e   :  { %v9448_v8 = vpop.f32.mrf.mxu1  ;;  %3886 = vmatmul.mubr.f32.gmra.mxu1 %v11178_v22  ;;  %3664 = vmatprep.mubr.f32.mxu0 %v10659_v35  ;;  %v11184_v16 = vmax.f32 %v11183_v59, 0.0  ;;  %v11186_v35 = vld [vmem:[#allocation26_spill] sm:$0xff] }
 0x38f   :  { %3890 = vmatprep.mubr.f32.mxu1 %v11179_v62  ;;  %v11187_v50 = vmax.f32 %v11186_v35, 0.0  ;;  %v11189_v62 = vld [vmem:[#allocation39_spill] sm:$0xff] }
 0x390   :  { %v9456_v56 = vpop.f32.mrf.mxu1  ;;  %v11190_v27 = vmax.f32 %v11189_v62, 0.0 }
 0x391   :  { %11180 = vst [vmem:[#allocation44_spill] sm:$0xff] %v9456_v56  ;;  %3665 = vmatmul.mubr.f32.gmra.mxu0 %v10642_v36  ;;  %v11192_v36 = vld [vmem:[#allocation35_spill] sm:$0xff] }
 0x392   :  { %v9460_v55 = vpop.f32.mrf.mxu1  ;;  %3891 = vmatmul.mubr.f32.gmra.mxu1 %v11182_v0  ;;  %4871 = vmatprep.mubr.f32.mxu0 %v11184_v16  ;;  %v11195_v0 = vld [vmem:[#allocation38_spill] sm:$0xff] }
 0x393   :  { %11181 = vst [vmem:[#allocation48_spill] sm:$0xff] %v9460_v55  ;;  %v11193_v55 = vmax.f32 %v11192_v36, 0.0  ;;  %v11196_v59 = vmax.f32 %v11195_v0, 0.0 }
 0x394   :  { %v9466_v22 = vpop.f32.mrf.mxu1 }
 0x395   :  { %11185 = vst [vmem:[#allocation9_spill] sm:$0xff] %v9466_v22  ;;  %4872 = vmatmul.mubr.f32.vlgmr.msra.gmra.mxu0 %v11187_v50  ;;  %v11197_v22 = vld [vmem:[#allocation36_spill] sm:$0xff] }
 0x396   :  { %v9470_v18 = vpop.f32.mrf.mxu1  ;;  %4874 = vmatprep.mubr.f32.mxu0 %v11190_v27  ;;  %v11198_v35 = vmax.f32 %v11197_v22, 0.0  ;;  %v11205_v22 = vmax.f32 %v9053_v51, 0.0  ;;  %v11209_v51 = vmax.f32 %v9132_v53, 0.0  ;;  %v11213_v53 = vmax.f32 %v9201_v28, 0.0 }
 0x397   :  { %11188 = vst [vmem:[#allocation47_spill] sm:$0xff] %v9470_v18  ;;  %v11199_v18 = vld [vmem:[#allocation41_spill] sm:$0xff]  ;;  %v11217_v28 = vmax.f32 %v9269_v3, 0.0  ;;  %v11224_v3 = vmax.f32 %v9337_v40, 0.0  ;;  %v9583_v40 = vld [vmem:[%s10249_s8] sm:$0x7] }
 0x398   :  { %v9474_v56 = vpop.f32.mrf.mxu1  ;;  %v11200_v62 = vmax.f32 %v11199_v18, 0.0  ;;  %v11206_v18 = vmax.f32 %v9073_v43, 0.0  ;;  %v11210_v43 = vmax.f32 %v9151_v46, 0.0  ;;  %v11214_v46 = vmax.f32 %v9219_v10, 0.0  ;;  %11232 = vst [vmem:[#allocation40_spill] sm:$0xff] %v9583_v40 }
 0x399   :  { %11191 = vst [vmem:[#allocation6_spill] sm:$0xff] %v9474_v56  ;;  %4875 = vmatmul.mubr.f32.gmra.mxu0 %v11193_v55  ;;  %v11201_v56 = vld [vmem:[#allocation42_spill] sm:$0xff]  ;;  %v11218_v10 = vmax.f32 %v9287_v54, 0.0  ;;  %v11226_v54 = vmax.f32 %v9355_v15, 0.0  ;;  %v11233_v15 = vmax.f32 %v9405_v34, 0.0 }
 0x39a   :  { %v9478_v11 = vpop.f32.mrf.mxu1  ;;  %4877 = vmatprep.mubr.f32.mxu0 %v11196_v59  ;;  %v11202_v36 = vmax.f32 %v11201_v56, 0.0  ;;  %v11207_v56 = vmax.f32 %v9092_v61, 0.0  ;;  %v11211_v61 = vmax.f32 %v9168_v42, 0.0  ;;  %v11215_v42 = vmax.f32 %v9235_v24, 0.0 }
 0x39b   :  { %11194 = vst [vmem:[#allocation50_spill] sm:$0xff] %v9478_v11  ;;  %v11203_v11 = vld [vmem:[#allocation45_spill] sm:$0xff]  ;;  %v11220_v24 = vmax.f32 %v9303_v17, 0.0  ;;  %v11228_v17 = vmax.f32 %v9371_v49, 0.0  ;;  %v11235_v49 = vmax.f32 %v9423_v23, 0.0 }
 0x39c   :  { %v9482_v16 = vpop.f32.mrf.mxu1  ;;  %v11204_v0 = vmax.f32 %v11203_v11, 0.0  ;;  %v11208_v11 = vmax.f32 %v9113_v29, 0.0  ;;  %v11212_v29 = vmax.f32 %v9187_v25, 0.0  ;;  %v11216_v25 = vmax.f32 %v9253_v63, 0.0 }
 0x39d   :  { %4878 = vmatmul.mubr.f32.gmra.mxu0 %v11198_v35  ;;  %v11222_v63 = vmax.f32 %v9321_v7, 0.0  ;;  %v11230_v7 = vmax.f32 %v9389_v30, 0.0 }
 0x39e   :  { %v9486_v50 = vpop.f32.mrf.mxu1  ;;  %4880 = vmatprep.mubr.f32.mxu0 %v11200_v62 }
 0x3a0   :  { %v9490_v27 = vpop.f32.mrf.mxu1 }
 0x3a1   :  { %4881 = vmatmul.mubr.f32.gmra.mxu0 %v11202_v36 }
 0x3a2   :  { %v9494_v55 = vpop.f32.mrf.mxu1  ;;  %4883 = vmatprep.mubr.f32.mxu0 %v11204_v0 }
 0x3a4   :  { %v9498_v59 = vpop.f32.mrf.mxu1 }
 0x3a5   :  { %4884 = vmatmul.mubr.f32.gmra.mxu0 %v11205_v22 }
 0x3a6   :  { %v9502_v35 = vpop.f32.mrf.mxu1  ;;  %4886 = vmatprep.mubr.f32.mxu0 %v11206_v18 }
 0x3a8   :  { %v9506_v62 = vpop.f32.mrf.mxu1 }
 0x3a9   :  { %4887 = vmatmul.mubr.f32.gmra.mxu0 %v11207_v56 }
 0x3aa   :  { %v9510_v36 = vpop.f32.mrf.mxu1  ;;  %4889 = vmatprep.mubr.f32.mxu0 %v11208_v11 }
 0x3ac   :  { %v9514_v0 = vpop.f32.mrf.mxu1 }
 0x3ad   :  { %4890 = vmatmul.mubr.f32.gmra.mxu0 %v11209_v51 }
 0x3ae   :  { %v9518_v22 = vpop.f32.mrf.mxu1  ;;  %4892 = vmatprep.mubr.f32.mxu0 %v11210_v43 }
 0x3b0   :  { %v9522_v18 = vpop.f32.mrf.mxu1 }
 0x3b1   :  { %4893 = vmatmul.mubr.f32.gmra.mxu0 %v11211_v61 }
 0x3b2   :  { %v9526_v56 = vpop.f32.mrf.mxu1  ;;  %4895 = vmatprep.mubr.f32.mxu0 %v11212_v29 }
 0x3b4   :  { %v9530_v11 = vpop.f32.mrf.mxu1 }
 0x3b5   :  { %4896 = vmatmul.mubr.f32.gmra.mxu0 %v11213_v53 }
 0x3b6   :  { %v9534_v51 = vpop.f32.mrf.mxu1  ;;  %4898 = vmatprep.mubr.f32.mxu0 %v11214_v46 }
 0x3b8   :  { %v9538_v43 = vpop.f32.mrf.mxu1 }
 0x3b9   :  { %4899 = vmatmul.mubr.f32.gmra.mxu0 %v11215_v42 }
 0x3ba   :  { %v9542_v61 = vpop.f32.mrf.mxu1  ;;  %4901 = vmatprep.mubr.f32.mxu0 %v11216_v25 }
 0x3bc   :  { %v9546_v29 = vpop.f32.mrf.mxu1 }
 0x3bd   :  { %4902 = vmatmul.mubr.f32.gmra.mxu0 %v11217_v28 }
 0x3be   :  { %v9550_v53 = vpop.f32.mrf.mxu1  ;;  %4904 = vmatprep.mubr.f32.mxu0 %v11218_v10 }
 0x3c0   :  { %v9554_v46 = vpop.f32.mrf.mxu1 }
 0x3c1   :  { %11219 = vst [vmem:[#allocation8_spill] sm:$0xff] %v9554_v46  ;;  %4905 = vmatmul.mubr.f32.gmra.mxu0 %v11220_v24 }
 0x3c2   :  { %v9558_v42 = vpop.f32.mrf.mxu1  ;;  %4907 = vmatprep.mubr.f32.mxu0 %v11222_v63 }
 0x3c3   :  { %11221 = vst [vmem:[#allocation37_spill] sm:$0xff] %v9558_v42 }
 0x3c4   :  { %v9562_v25 = vpop.f32.mrf.mxu1 }
 0x3c5   :  { %11223 = vst [vmem:[#allocation28_spill] sm:$0xff] %v9562_v25  ;;  %4908 = vmatmul.mubr.f32.gmra.mxu0 %v11224_v3 }
 0x3c6   :  { %v9566_v28 = vpop.f32.mrf.mxu1  ;;  %4910 = vmatprep.mubr.f32.mxu0 %v11226_v54  ;;  %v11236_v54 = vld [vmem:[#allocation3_spill] sm:$0xff] }
 0x3c7   :  { %11225 = vst [vmem:[#allocation34_spill] sm:$0xff] %v9566_v28 }
 0x3c8   :  { %v9570_v10 = vpop.f32.mrf.mxu1 }
 0x3c9   :  { %11227 = vst [vmem:[#allocation31_spill] sm:$0xff] %v9570_v10  ;;  %4911 = vmatmul.mubr.f32.gmra.mxu0 %v11228_v17  ;;  %v9593_v17 = vrot.slane %v9583_v40, %v11236_v54 }
 0x3ca   :  { %v9574_v24 = vpop.f32.mrf.mxu1  ;;  %4913 = vmatprep.mubr.f32.mxu0 %v11230_v7  ;;  %v11238_v7 = vmax.f32 %v9439_v1, 0.0 }
 0x3cb   :  { %11229 = vst [vmem:[#allocation11_spill] sm:$0xff] %v9574_v24 }
 0x3cc   :  { %v9578_v63 = vpop.f32.mrf.mxu1 }
 0x3cd   :  { %11231 = vst [vmem:[#allocation10_spill] sm:$0xff] %v9578_v63  ;;  %4914 = vmatmul.mubr.f32.gmra.mxu0 %v11233_v15  ;;  %v11239_v63 = vld [vmem:[#allocation4_spill] sm:$0xff]  ;;  %v3224_v15 = vadd.f32 %v9212_v45, %v9593_v17  ;;  %v3230_v45 = vadd.f32 %v9229_v19, %v9593_v17 }
 0x3ce   :  { %v9587_v3 = vpop.f32.mrf.mxu1  ;;  %4916 = vmatprep.mubr.f32.mxu0 %v11235_v49  ;;  %v9601_v24 = vrot.slane %v9583_v40, %v11239_v63  ;;  %v9612_v49 = vld [vmem:[%s10250_s9] sm:$0x7] }
 0x3cf   :  { %11234 = vst [vmem:[#allocation12_spill] sm:$0xff] %v9587_v3  ;;  %11242 = vst [vmem:[#allocation14_spill] sm:$0xff] %v9612_v49  ;;  %v9620_v40 = vrot.slane %v9612_v49, %v11236_v54  ;;  %v9626_v28 = vrot.slane %v9612_v49, %v11239_v63  ;;  %v3236_v54 = vadd.f32 %v9246_v37, %v9593_v17 }
 0x3d0   :  { %v9595_v30 = vpop.f32.mrf.mxu1  ;;  %v3226_v1 = vadd.f32 %v9223_v60, %v9601_v24  ;;  %v3232_v60 = vadd.f32 %v9240_v48, %v9601_v24  ;;  %v3238_v49 = vadd.f32 %v9257_v5, %v9601_v24  ;;  %v3242_v37 = vadd.f32 %v9263_v57, %v9593_v17 }
 0x3d1   :  { %11237 = vst [vmem:[#allocation13_spill] sm:$0xff] %v9595_v30  ;;  %4917 = vmatmul.mubr.f32.gmra.mxu0 %v11238_v7  ;;  %v3244_v5 = vadd.f32 %v9274_v20, %v9601_v24  ;;  %v3248_v57 = vadd.f32 %v9280_v14, %v9593_v17  ;;  %v3250_v20 = vadd.f32 %v9291_v2, %v9601_v24 }
 0x3d2   :  { %v9603_v34 = vpop.f32.mrf.mxu1  ;;  %v3254_v14 = vadd.f32 %v9297_v12, %v9593_v17  ;;  %v3256_v2 = vadd.f32 %v9308_v21, %v9601_v24  ;;  %v3260_v12 = vadd.f32 %v9314_v4, %v9593_v17  ;;  %v3262_v21 = vadd.f32 %v9325_v58, %v9601_v24 }
 0x3d3   :  { %11240 = vst [vmem:[#allocation43_spill] sm:$0xff] %v9603_v34  ;;  %v3266_v4 = vadd.f32 %v9331_v32, %v9593_v17  ;;  %v3268_v58 = vadd.f32 %v9342_v47, %v9601_v24  ;;  %v3272_v32 = vadd.f32 %v9348_v44, %v9593_v17  ;;  %v3274_v47 = vadd.f32 %v9359_v9, %v9601_v24 }
 0x3d4   :  { %v9607_v23 = vpop.f32.mrf.mxu1  ;;  %v3278_v44 = vadd.f32 %v9365_v13, %v9593_v17  ;;  %v3280_v9 = vadd.f32 %v9376_v39, %v9601_v24  ;;  %v3284_v13 = vadd.f32 %v9382_v52, %v9593_v17  ;;  %v3286_v39 = vadd.f32 %v9393_v26, %v9601_v24  ;;  %v11246_v26 = vld [vmem:[#allocation7_spill] sm:$0xff] }
 0x3d5   :  { %11241 = vst [vmem:[#allocation46_spill] sm:$0xff] %v9607_v23  ;;  %v3480_v30 = vpop.f32.mrf.mxu0  ;;  %v3290_v52 = vadd.f32 %v9399_v31, %v9593_v17  ;;  %v3296_v31 = vadd.f32 %v9416_v33, %v9593_v17  ;;  %v3302_v33 = vadd.f32 %v9433_v6, %v9593_v17  ;;  %v3308_v6 = vadd.f32 %v9448_v8, %v9593_v17  ;;  %v11252_v8 = vld [vmem:[#allocation48_spill] sm:$0xff] }
 0x3d6   :  { %v3481_v7 = vadd.f32 %v3480_v30, %v3224_v15  ;;  %v9616_v3 = vpop.f32.mrf.mxu1 }
 0x3d7   :  { %11243 = vst [vmem:[#allocation15_spill] sm:$0xff] %v9616_v3  ;;  %v3482_v34 = vpop.f32.mrf.mxu0 }
 0x3d8   :  { %v4121_v23 = vmax.f32 %v3481_v7, 0.0  ;;  %v3483_v10 = vadd.f32 %v3482_v34, %v3226_v1  ;;  %v3739_v25 = vpop.f32.mrf.mxu1 }
 0x3d9   :  { %v3486_v42 = vpop.f32.mrf.mxu0 }
 0x3da   :  { %v4122_v30 = vmax.f32 %v3483_v10, 0.0  ;;  %v3487_v15 = vadd.f32 %v3486_v42, %v3230_v45  ;;  %v9630_v3 = vpop.f32.mrf.mxu1  ;;  %v4234_v19 = vmul.f32 %v9620_v40, %v4121_v23 }
 0x3db   :  { %11244 = vst [vmem:[#allocation49_spill] sm:$0xff] %v9630_v3  ;;  %v3488_v46 = vpop.f32.mrf.mxu0 }
 0x3dc   :  { %v4235_v34 = vmul.f32 %v9626_v28, %v4122_v30  ;;  %v4124_v1 = vmax.f32 %v3487_v15, 0.0  ;;  %v3489_v63 = vadd.f32 %v3488_v46, %v3232_v60  ;;  %v3744_v7 = vpop.f32.mrf.mxu1 }
 0x3dd   :  { %v3492_v25 = vpop.f32.mrf.mxu0 }
 0x3de   :  { %v4125_v48 = vmax.f32 %v3489_v63, 0.0  ;;  %v3493_v10 = vadd.f32 %v3492_v25, %v3236_v54  ;;  %v9638_v42 = vpop.f32.mrf.mxu1  ;;  %v9640_v45 = vadd.f32 %v4235_v34, %v4234_v19  ;;  %v4237_v23 = vmul.f32 %v9620_v40, %v4124_v1 }
 0x3df   :  { %v3494_v3 = vpop.f32.mrf.mxu0 }
 0x3e0   :  { %v4238_v30 = vmul.f32 %v9626_v28, %v4125_v48  ;;  %v4127_v46 = vmax.f32 %v3493_v10, 0.0  ;;  %v3495_v60 = vadd.f32 %v3494_v3, %v3238_v49  ;;  %v3749_v15 = vpop.f32.mrf.mxu1 }
 0x3e1   :  { %v3498_v7 = vpop.f32.mrf.mxu0 }
 0x3e2   :  { %v4128_v54 = vmax.f32 %v3495_v60, 0.0  ;;  %v3499_v63 = vadd.f32 %v3498_v7, %v3242_v37  ;;  %v9648_v25 = vpop.f32.mrf.mxu1  ;;  %v9650_v19 = vadd.f32 %v4238_v30, %v4237_v23  ;;  %v4240_v1 = vmul.f32 %v9620_v40, %v4127_v46 }
 0x3e3   :  { %v3500_v34 = vpop.f32.mrf.mxu0 }
 0x3e4   :  { %v4241_v48 = vmul.f32 %v9626_v28, %v4128_v54  ;;  %v4130_v3 = vmax.f32 %v3499_v63, 0.0  ;;  %v3501_v49 = vadd.f32 %v3500_v34, %v3244_v5  ;;  %v3754_v10 = vpop.f32.mrf.mxu1 }
 0x3e5   :  { %v3504_v15 = vpop.f32.mrf.mxu0 }
 0x3e6   :  { %v4131_v37 = vmax.f32 %v3501_v49, 0.0  ;;  %v3505_v60 = vadd.f32 %v3504_v15, %v3248_v57  ;;  %v9658_v7 = vpop.f32.mrf.mxu1  ;;  %v9660_v23 = vadd.f32 %v4241_v48, %v4240_v1  ;;  %v4243_v46 = vmul.f32 %v9620_v40, %v4130_v3 }
 0x3e7   :  { %v3506_v30 = vpop.f32.mrf.mxu0 }
 0x3e8   :  { %v4244_v54 = vmul.f32 %v9626_v28, %v4131_v37  ;;  %v4133_v5 = vmax.f32 %v3505_v60, 0.0  ;;  %v3507_v63 = vadd.f32 %v3506_v30, %v3250_v20  ;;  %v3759_v34 = vpop.f32.mrf.mxu1 }
 0x3e9   :  { %v3510_v10 = vpop.f32.mrf.mxu0 }
 0x3ea   :  { %v4134_v57 = vmax.f32 %v3507_v63, 0.0  ;;  %v3511_v49 = vadd.f32 %v3510_v10, %v3254_v14  ;;  %v9668_v15 = vpop.f32.mrf.mxu1  ;;  %v9670_v1 = vadd.f32 %v4244_v54, %v4243_v46  ;;  %v4246_v3 = vmul.f32 %v9620_v40, %v4133_v5 }
 0x3eb   :  { %v3512_v48 = vpop.f32.mrf.mxu0 }
 0x3ec   :  { %v4247_v37 = vmul.f32 %v9626_v28, %v4134_v57  ;;  %v4136_v20 = vmax.f32 %v3511_v49, 0.0  ;;  %v3513_v60 = vadd.f32 %v3512_v48, %v3256_v2  ;;  %v3764_v30 = vpop.f32.mrf.mxu1 }
 0x3ed   :  { %v3516_v34 = vpop.f32.mrf.mxu0 }
 0x3ee   :  { %v4137_v14 = vmax.f32 %v3513_v60, 0.0  ;;  %v3517_v63 = vadd.f32 %v3516_v34, %v3260_v12  ;;  %v9678_v10 = vpop.f32.mrf.mxu1  ;;  %v9680_v46 = vadd.f32 %v4247_v37, %v4246_v3  ;;  %v4249_v5 = vmul.f32 %v9620_v40, %v4136_v20 }
 0x3ef   :  { %v3518_v54 = vpop.f32.mrf.mxu0 }
 0x3f0   :  { %v4250_v57 = vmul.f32 %v9626_v28, %v4137_v14  ;;  %v4139_v2 = vmax.f32 %v3517_v63, 0.0  ;;  %v3519_v49 = vadd.f32 %v3518_v54, %v3262_v21  ;;  %v3769_v48 = vpop.f32.mrf.mxu1 }
 0x3f1   :  { %v3522_v30 = vpop.f32.mrf.mxu0 }
 0x3f2   :  { %v4140_v12 = vmax.f32 %v3519_v49, 0.0  ;;  %v3523_v60 = vadd.f32 %v3522_v30, %v3266_v4  ;;  %v9688_v34 = vpop.f32.mrf.mxu1  ;;  %v9690_v3 = vadd.f32 %v4250_v57, %v4249_v5  ;;  %v4252_v20 = vmul.f32 %v9620_v40, %v4139_v2 }
 0x3f3   :  { %v3524_v37 = vpop.f32.mrf.mxu0 }
 0x3f4   :  { %v4253_v14 = vmul.f32 %v9626_v28, %v4140_v12  ;;  %v4142_v21 = vmax.f32 %v3523_v60, 0.0  ;;  %v3525_v63 = vadd.f32 %v3524_v37, %v3268_v58  ;;  %v3774_v54 = vpop.f32.mrf.mxu1 }
 0x3f5   :  { %v3528_v48 = vpop.f32.mrf.mxu0 }
 0x3f6   :  { %v4143_v4 = vmax.f32 %v3525_v63, 0.0  ;;  %v3529_v49 = vadd.f32 %v3528_v48, %v3272_v32  ;;  %v9698_v30 = vpop.f32.mrf.mxu1  ;;  %v9700_v5 = vadd.f32 %v4253_v14, %v4252_v20  ;;  %v4255_v2 = vmul.f32 %v9620_v40, %v4142_v21 }
 0x3f7   :  { %v3530_v57 = vpop.f32.mrf.mxu0 }
 0x3f8   :  { %11245 = vst [vmem:[#allocation16_spill] sm:$0xff] %v9700_v5  ;;  %v4256_v12 = vmul.f32 %v9626_v28, %v4143_v4  ;;  %v4145_v58 = vmax.f32 %v3529_v49, 0.0  ;;  %v3531_v60 = vadd.f32 %v3530_v57, %v3274_v47  ;;  %v3779_v37 = vpop.f32.mrf.mxu1 }
 0x3f9   :  { %v3534_v54 = vpop.f32.mrf.mxu0 }
 0x3fa   :  { %v4146_v32 = vmax.f32 %v3531_v60, 0.0  ;;  %v3535_v63 = vadd.f32 %v3534_v54, %v3278_v44  ;;  %v9708_v48 = vpop.f32.mrf.mxu1  ;;  %v9710_v20 = vadd.f32 %v4256_v12, %v4255_v2  ;;  %v4258_v21 = vmul.f32 %v9620_v40, %v4145_v58 }
 0x3fb   :  { %v3536_v14 = vpop.f32.mrf.mxu0 }
 0x3fc   :  { %v4259_v4 = vmul.f32 %v9626_v28, %v4146_v32  ;;  %v4148_v47 = vmax.f32 %v3535_v63, 0.0  ;;  %v3537_v49 = vadd.f32 %v3536_v14, %v3280_v9  ;;  %v3784_v57 = vpop.f32.mrf.mxu1 }
 0x3fd   :  { %v3540_v37 = vpop.f32.mrf.mxu0 }
 0x3fe   :  { %v4149_v44 = vmax.f32 %v3537_v49, 0.0  ;;  %v3541_v60 = vadd.f32 %v3540_v37, %v3284_v13  ;;  %v9718_v54 = vpop.f32.mrf.mxu1  ;;  %v9720_v2 = vadd.f32 %v4259_v4, %v4258_v21  ;;  %v4261_v58 = vmul.f32 %v9620_v40, %v4148_v47 }
 0x3ff   :  { %v3542_v12 = vpop.f32.mrf.mxu0  ;;  %v3292_v49 = vadd.f32 %v11246_v26, %v9601_v24 }
 0x400   :  { %v4262_v32 = vmul.f32 %v9626_v28, %v4149_v44  ;;  %v4151_v9 = vmax.f32 %v3541_v60, 0.0  ;;  %v3543_v63 = vadd.f32 %v3542_v12, %v3286_v39  ;;  %v3789_v14 = vpop.f32.mrf.mxu1 }
 0x401   :  { %v3546_v57 = vpop.f32.mrf.mxu0 }
 0x402   :  { %v4152_v13 = vmax.f32 %v3543_v63, 0.0  ;;  %v3547_v37 = vadd.f32 %v3546_v57, %v3290_v52  ;;  %v9728_v5 = vpop.f32.mrf.mxu1  ;;  %v9730_v21 = vadd.f32 %v4262_v32, %v4261_v58  ;;  %v4264_v47 = vmul.f32 %v9620_v40, %v4151_v9 }
 0x403   :  { %v3548_v4 = vpop.f32.mrf.mxu0  ;;  %v3298_v63 = vadd.f32 %v9427_v38, %v9601_v24  ;;  %v3304_v38 = vadd.f32 %v9444_v41, %v9601_v24  ;;  %v11249_v41 = vld [vmem:[#allocation44_spill] sm:$0xff] }
 0x404   :  { %v4265_v44 = vmul.f32 %v9626_v28, %v4152_v13  ;;  %v4154_v39 = vmax.f32 %v3547_v37, 0.0  ;;  %v3549_v60 = vadd.f32 %v3548_v4, %v3292_v49  ;;  %v3794_v12 = vpop.f32.mrf.mxu1 }
 0x405   :  { %v3552_v14 = vpop.f32.mrf.mxu0 }
 0x406   :  { %v4155_v52 = vmax.f32 %v3549_v60, 0.0  ;;  %v3553_v57 = vadd.f32 %v3552_v14, %v3296_v31  ;;  %v9738_v26 = vpop.f32.mrf.mxu1  ;;  %v9740_v58 = vadd.f32 %v4265_v44, %v4264_v47  ;;  %v4267_v9 = vmul.f32 %v9620_v40, %v4154_v39 }
 0x407   :  { %v3554_v32 = vpop.f32.mrf.mxu0 }
 0x408   :  { %11247 = vst [vmem:[#allocation17_spill] sm:$0xff] %v9740_v58  ;;  %v4268_v13 = vmul.f32 %v9626_v28, %v4155_v52  ;;  %v4157_v49 = vmax.f32 %v3553_v57, 0.0  ;;  %v3555_v37 = vadd.f32 %v3554_v32, %v3298_v63  ;;  %v3799_v4 = vpop.f32.mrf.mxu1 }
 0x409   :  { %v3558_v12 = vpop.f32.mrf.mxu0 }
 0x40a   :  { %v4158_v31 = vmax.f32 %v3555_v37, 0.0  ;;  %v3559_v60 = vadd.f32 %v3558_v12, %v3302_v33  ;;  %v9748_v14 = vpop.f32.mrf.mxu1  ;;  %v9750_v47 = vadd.f32 %v4268_v13, %v4267_v9  ;;  %v4270_v39 = vmul.f32 %v9620_v40, %v4157_v49 }
 0x40b   :  { %v3560_v44 = vpop.f32.mrf.mxu0  ;;  %v3310_v37 = vadd.f32 %v11249_v41, %v9601_v24  ;;  %v3314_v13 = vadd.f32 %v11252_v8, %v9593_v17  ;;  %v11253_v41 = vld [vmem:[#allocation9_spill] sm:$0xff] }
 0x40c   :  { %11248 = vst [vmem:[#allocation18_spill] sm:$0xff] %v9750_v47  ;;  %v4271_v52 = vmul.f32 %v9626_v28, %v4158_v31  ;;  %v4160_v63 = vmax.f32 %v3559_v60, 0.0  ;;  %v3561_v57 = vadd.f32 %v3560_v44, %v3304_v38  ;;  %v3804_v32 = vpop.f32.mrf.mxu1 }
 0x40d   :  { %v3564_v4 = vpop.f32.mrf.mxu0 }
 0x40e   :  { %v4161_v33 = vmax.f32 %v3561_v57, 0.0  ;;  %v3565_v12 = vadd.f32 %v3564_v4, %v3308_v6  ;;  %v9758_v58 = vpop.f32.mrf.mxu1  ;;  %v9760_v9 = vadd.f32 %v4271_v52, %v4270_v39  ;;  %v4273_v49 = vmul.f32 %v9620_v40, %v4160_v63  ;;  %v11256_v52 = vld [vmem:[#allocation47_spill] sm:$0xff] }
 0x40f   :  { %11250 = vst [vmem:[#allocation19_spill] sm:$0xff] %v9758_v58  ;;  %v3566_v47 = vpop.f32.mrf.mxu0  ;;  %v3316_v57 = vadd.f32 %v11253_v41, %v9601_v24  ;;  %v3320_v8 = vadd.f32 %v11256_v52, %v9593_v17  ;;  %v11257_v41 = vld [vmem:[#allocation6_spill] sm:$0xff] }
 0x410   :  { %11251 = vst [vmem:[#allocation20_spill] sm:$0xff] %v9760_v9  ;;  %v4274_v31 = vmul.f32 %v9626_v28, %v4161_v33  ;;  %v4163_v38 = vmax.f32 %v3565_v12, 0.0  ;;  %v3567_v60 = vadd.f32 %v3566_v47, %v3310_v37  ;;  %v3809_v44 = vpop.f32.mrf.mxu1 }
 0x411   :  { %v3570_v32 = vpop.f32.mrf.mxu0 }
 0x412   :  { %v4164_v6 = vmax.f32 %v3567_v60, 0.0  ;;  %v3571_v4 = vadd.f32 %v3570_v32, %v3314_v13  ;;  %v9768_v58 = vpop.f32.mrf.mxu1  ;;  %v9770_v39 = vadd.f32 %v4274_v31, %v4273_v49  ;;  %v4276_v63 = vmul.f32 %v9620_v40, %v4163_v38  ;;  %v11258_v31 = vld [vmem:[#allocation50_spill] sm:$0xff] }
 0x413   :  { %11254 = vst [vmem:[#allocation21_spill] sm:$0xff] %v9768_v58  ;;  %v3572_v9 = vpop.f32.mrf.mxu0  ;;  %v3322_v60 = vadd.f32 %v11257_v41, %v9601_v24  ;;  %v3326_v52 = vadd.f32 %v11258_v31, %v9593_v17 }
 0x414   :  { %11255 = vst [vmem:[#allocation23_spill] sm:$0xff] %v9770_v39  ;;  %v4277_v33 = vmul.f32 %v9626_v28, %v4164_v6  ;;  %v4166_v47 = vmax.f32 %v3571_v4, 0.0  ;;  %v3573_v37 = vadd.f32 %v3572_v9, %v3316_v57  ;;  %v3814_v12 = vpop.f32.mrf.mxu1 }
 0x415   :  { %v3576_v44 = vpop.f32.mrf.mxu0 }
 0x416   :  { %v4167_v13 = vmax.f32 %v3573_v37, 0.0  ;;  %v3577_v32 = vadd.f32 %v3576_v44, %v3320_v8  ;;  %v9778_v58 = vpop.f32.mrf.mxu1  ;;  %v9780_v49 = vadd.f32 %v4277_v33, %v4276_v63  ;;  %v4279_v38 = vmul.f32 %v9620_v40, %v4166_v47 }
 0x417   :  { %v3578_v39 = vpop.f32.mrf.mxu0  ;;  %v3328_v37 = vadd.f32 %v9482_v16, %v9601_v24  ;;  %v3332_v33 = vadd.f32 %v9486_v50, %v9593_v17  ;;  %v3334_v16 = vadd.f32 %v9490_v27, %v9601_v24  ;;  %v3338_v50 = vadd.f32 %v9494_v55, %v9593_v17 }
 0x418   :  { %v4280_v6 = vmul.f32 %v9626_v28, %v4167_v13  ;;  %v4169_v9 = vmax.f32 %v3577_v32, 0.0  ;;  %v3579_v57 = vadd.f32 %v3578_v39, %v3322_v60  ;;  %v3819_v4 = vpop.f32.mrf.mxu1  ;;  %v16_v27 = vstv %s10251_s10 }
 0x419   :  { %v3582_v12 = vpop.f32.mrf.mxu0  ;;  %17 = vst [vmem:[#allocation2] sm:$0x1] %v16_v27 }
 0x41a   :  { %v4170_v8 = vmax.f32 %v3579_v57, 0.0  ;;  %v3583_v44 = vadd.f32 %v3582_v12, %v3326_v52  ;;  %v9788_v41 = vpop.f32.mrf.mxu1  ;;  %v9790_v63 = vadd.f32 %v4280_v6, %v4279_v38  ;;  %v4282_v47 = vmul.f32 %v9620_v40, %v4169_v9 }
 0x41b   :  { %v3584_v31 = vpop.f32.mrf.mxu0 }
 0x41c   :  { %v4283_v13 = vmul.f32 %v9626_v28, %v4170_v8  ;;  %v4172_v39 = vmax.f32 %v3583_v44, 0.0  ;;  %v3585_v60 = vadd.f32 %v3584_v31, %v3328_v37  ;;  %v3824_v32 = vpop.f32.mrf.mxu1 }
 0x41d   :  { %v3588_v4 = vpop.f32.mrf.mxu0 }
 0x41e   :  { %v4173_v52 = vmax.f32 %v3585_v60, 0.0  ;;  %v3589_v57 = vadd.f32 %v3588_v4, %v3332_v33  ;;  %v9798_v12 = vpop.f32.mrf.mxu1  ;;  %v9800_v38 = vadd.f32 %v4283_v13, %v4282_v47  ;;  %v4285_v9 = vmul.f32 %v9620_v40, %v4172_v39 }
 0x41f   :  { %v3590_v6 = vpop.f32.mrf.mxu0  ;;  %v3340_v33 = vadd.f32 %v9498_v59, %v9601_v24  ;;  %v3344_v39 = vadd.f32 %v9502_v35, %v9593_v17  ;;  %v3346_v59 = vadd.f32 %v9506_v62, %v9601_v24  ;;  %v3350_v35 = vadd.f32 %v9510_v36, %v9593_v17 }
 0x420   :  { %11259 = vst [vmem:[#allocation22_spill] sm:$0xff] %v9800_v38  ;;  %v4286_v8 = vmul.f32 %v9626_v28, %v4173_v52  ;;  %v4175_v37 = vmax.f32 %v3589_v57, 0.0  ;;  %v3591_v44 = vadd.f32 %v3590_v6, %v3334_v16  ;;  %v3829_v31 = vpop.f32.mrf.mxu1  ;;  %v3352_v62 = vadd.f32 %v9514_v0, %v9601_v24 }
 0x421   :  { %v3594_v32 = vpop.f32.mrf.mxu0  ;;  %v3356_v36 = vadd.f32 %v9518_v22, %v9593_v17  ;;  %v3358_v0 = vadd.f32 %v9522_v18, %v9601_v24  ;;  %v3362_v22 = vadd.f32 %v9526_v56, %v9593_v17  ;;  %v3364_v18 = vadd.f32 %v9530_v11, %v9601_v24 }
 0x422   :  { %v4176_v47 = vmax.f32 %v3591_v44, 0.0  ;;  %v3595_v13 = vadd.f32 %v3594_v32, %v3338_v50  ;;  %v9811_v60 = vpop.f32.mrf.mxu1  ;;  %v9813_v55 = vadd.f32 %v4286_v8, %v4285_v9  ;;  %v4288_v16 = vmul.f32 %v9620_v40, %v4175_v37 }
 0x423   :  { %v3596_v4 = vpop.f32.mrf.mxu0  ;;  %v3368_v56 = vadd.f32 %v9534_v51, %v9593_v17  ;;  %v3370_v11 = vadd.f32 %v9538_v43, %v9601_v24  ;;  %v3374_v51 = vadd.f32 %v9542_v61, %v9593_v17  ;;  %v3376_v43 = vadd.f32 %v9546_v29, %v9601_v24  ;;  %v11262_v29 = vld [vmem:[#allocation8_spill] sm:$0xff] }
 0x424   :  { %v4289_v52 = vmul.f32 %v9626_v28, %v4176_v47  ;;  %v4178_v57 = vmax.f32 %v3595_v13, 0.0  ;;  %v3597_v6 = vadd.f32 %v3596_v4, %v3340_v33  ;;  %v3834_v31 = vpop.f32.mrf.mxu1  ;;  %v3380_v61 = vadd.f32 %v9550_v53, %v9593_v17  ;;  %v11265_v53 = vld [vmem:[#allocation37_spill] sm:$0xff] }
 0x425   :  { %v3600_v38 = vpop.f32.mrf.mxu0 }
 0x426   :  { %v4179_v50 = vmax.f32 %v3597_v6, 0.0  ;;  %v3601_v44 = vadd.f32 %v3600_v38, %v3344_v39  ;;  %v9821_v9 = vpop.f32.mrf.mxu1  ;;  %v9823_v8 = vadd.f32 %v4289_v52, %v4288_v16  ;;  %v4291_v37 = vmul.f32 %v9620_v40, %v4178_v57 }
 0x427   :  { %v3602_v32 = vpop.f32.mrf.mxu0 }
 0x428   :  { %v4292_v27 = vmul.f32 %v9626_v28, %v4179_v50  ;;  %v4181_v33 = vmax.f32 %v3601_v44, 0.0  ;;  %v3603_v47 = vadd.f32 %v3602_v32, %v3346_v59  ;;  %v3839_v13 = vpop.f32.mrf.mxu1 }
 0x429   :  { %v3606_v4 = vpop.f32.mrf.mxu0 }
 0x42a   :  { %v4182_v38 = vmax.f32 %v3603_v47, 0.0  ;;  %v3607_v39 = vadd.f32 %v3606_v4, %v3350_v35  ;;  %v9831_v6 = vpop.f32.mrf.mxu1  ;;  %v9833_v16 = vadd.f32 %v4292_v27, %v4291_v37  ;;  %v4294_v57 = vmul.f32 %v9620_v40, %v4181_v33 }
 0x42b   :  { %v3608_v52 = vpop.f32.mrf.mxu0 }
 0x42c   :  { %v4295_v31 = vmul.f32 %v9626_v28, %v4182_v38  ;;  %v4184_v59 = vmax.f32 %v3607_v39, 0.0  ;;  %v3609_v50 = vadd.f32 %v3608_v52, %v3352_v62  ;;  %v3844_v44 = vpop.f32.mrf.mxu1 }
 0x42d   :  { %v3612_v32 = vpop.f32.mrf.mxu0 }
 0x42e   :  { %v4185_v35 = vmax.f32 %v3609_v50, 0.0  ;;  %v3613_v47 = vadd.f32 %v3612_v32, %v3356_v36  ;;  %v9841_v13 = vpop.f32.mrf.mxu1  ;;  %v9843_v37 = vadd.f32 %v4295_v31, %v4294_v57  ;;  %v4297_v33 = vmul.f32 %v9620_v40, %v4184_v59 }
 0x42f   :  { %v3614_v27 = vpop.f32.mrf.mxu0 }
 0x430   :  { %v4298_v4 = vmul.f32 %v9626_v28, %v4185_v35  ;;  %v4187_v62 = vmax.f32 %v3613_v47, 0.0  ;;  %v3615_v38 = vadd.f32 %v3614_v27, %v3358_v0  ;;  %v3849_v39 = vpop.f32.mrf.mxu1 }
 0x431   :  { %v3618_v52 = vpop.f32.mrf.mxu0 }
 0x432   :  { %v4188_v36 = vmax.f32 %v3615_v38, 0.0  ;;  %v3619_v50 = vadd.f32 %v3618_v52, %v3362_v22  ;;  %v9851_v44 = vpop.f32.mrf.mxu1  ;;  %v9853_v57 = vadd.f32 %v4298_v4, %v4297_v33  ;;  %v4300_v59 = vmul.f32 %v9620_v40, %v4187_v62 }
 0x433   :  { %v3620_v31 = vpop.f32.mrf.mxu0 }
 0x434   :  { %v4301_v32 = vmul.f32 %v9626_v28, %v4188_v36  ;;  %v4190_v0 = vmax.f32 %v3619_v50, 0.0  ;;  %v3621_v35 = vadd.f32 %v3620_v31, %v3364_v18  ;;  %v3854_v47 = vpop.f32.mrf.mxu1 }
 0x435   :  { %v3624_v27 = vpop.f32.mrf.mxu0 }
 0x436   :  { %v4191_v22 = vmax.f32 %v3621_v35, 0.0  ;;  %v3625_v38 = vadd.f32 %v3624_v27, %v3368_v56  ;;  %v9861_v39 = vpop.f32.mrf.mxu1  ;;  %v9863_v33 = vadd.f32 %v4301_v32, %v4300_v59  ;;  %v4303_v62 = vmul.f32 %v9620_v40, %v4190_v0 }
 0x437   :  { %v3626_v4 = vpop.f32.mrf.mxu0 }
 0x438   :  { %11260 = vst [vmem:[#allocation25_spill] sm:$0xff] %v9863_v33  ;;  %v4304_v52 = vmul.f32 %v9626_v28, %v4191_v22  ;;  %v4193_v18 = vmax.f32 %v3625_v38, 0.0  ;;  %v3627_v36 = vadd.f32 %v3626_v4, %v3370_v11  ;;  %v3859_v50 = vpop.f32.mrf.mxu1 }
 0x439   :  { %v3630_v31 = vpop.f32.mrf.mxu0 }
 0x43a   :  { %v4194_v56 = vmax.f32 %v3627_v36, 0.0  ;;  %v3631_v35 = vadd.f32 %v3630_v31, %v3374_v51  ;;  %v9871_v47 = vpop.f32.mrf.mxu1  ;;  %v9873_v59 = vadd.f32 %v4304_v52, %v4303_v62  ;;  %v4306_v0 = vmul.f32 %v9620_v40, %v4193_v18 }
 0x43b   :  { %v3632_v32 = vpop.f32.mrf.mxu0  ;;  %v3382_v36 = vadd.f32 %v11262_v29, %v9601_v24  ;;  %v3386_v52 = vadd.f32 %v11265_v53, %v9593_v17  ;;  %v11266_v29 = vld [vmem:[#allocation28_spill] sm:$0xff] }
 0x43c   :  { %11261 = vst [vmem:[#allocation27_spill] sm:$0xff] %v9873_v59  ;;  %v4307_v27 = vmul.f32 %v9626_v28, %v4194_v56  ;;  %v4196_v11 = vmax.f32 %v3631_v35, 0.0  ;;  %v3633_v22 = vadd.f32 %v3632_v32, %v3376_v43  ;;  %v3864_v38 = vpop.f32.mrf.mxu1 }
 0x43d   :  { %v3636_v4 = vpop.f32.mrf.mxu0 }
 0x43e   :  { %v4197_v51 = vmax.f32 %v3633_v22, 0.0  ;;  %v3637_v50 = vadd.f32 %v3636_v4, %v3380_v61  ;;  %v9881_v31 = vpop.f32.mrf.mxu1  ;;  %v9883_v62 = vadd.f32 %v4307_v27, %v4306_v0  ;;  %v4309_v18 = vmul.f32 %v9620_v40, %v4196_v11  ;;  %v11269_v27 = vld [vmem:[#allocation34_spill] sm:$0xff] }
 0x43f   :  { %11263 = vst [vmem:[#allocation24_spill] sm:$0xff] %v9881_v31  ;;  %v3638_v33 = vpop.f32.mrf.mxu0  ;;  %v3388_v22 = vadd.f32 %v11266_v29, %v9601_v24  ;;  %v3392_v53 = vadd.f32 %v11269_v27, %v9593_v17  ;;  %v11270_v29 = vld [vmem:[#allocation31_spill] sm:$0xff] }
 0x440   :  { %11264 = vst [vmem:[#allocation52_spill] sm:$0xff] %v9883_v62  ;;  %v4310_v56 = vmul.f32 %v9626_v28, %v4197_v51  ;;  %v4199_v43 = vmax.f32 %v3637_v50, 0.0  ;;  %v3639_v35 = vadd.f32 %v3638_v33, %v3382_v36  ;;  %v3869_v32 = vpop.f32.mrf.mxu1 }
 0x441   :  { %v3642_v38 = vpop.f32.mrf.mxu0 }
 0x442   :  { %v4200_v61 = vmax.f32 %v3639_v35, 0.0  ;;  %v3643_v4 = vadd.f32 %v3642_v38, %v3386_v52  ;;  %v9891_v31 = vpop.f32.mrf.mxu1  ;;  %v9893_v0 = vadd.f32 %v4310_v56, %v4309_v18  ;;  %v4312_v11 = vmul.f32 %v9620_v40, %v4199_v43  ;;  %v11273_v56 = vld [vmem:[#allocation11_spill] sm:$0xff] }
 0x443   :  { %11267 = vst [vmem:[#allocation30_spill] sm:$0xff] %v9891_v31  ;;  %v3644_v62 = vpop.f32.mrf.mxu0  ;;  %v3394_v35 = vadd.f32 %v11270_v29, %v9601_v24  ;;  %v3398_v27 = vadd.f32 %v11273_v56, %v9593_v17  ;;  %v11274_v29 = vld [vmem:[#allocation10_spill] sm:$0xff]  ;;  %v11283_v31 = vld [vmem:[#allocation40_spill] sm:$0xff] }
 0x444   :  { %11268 = vst [vmem:[#allocation51_spill] sm:$0xff] %v9893_v0  ;;  %v4313_v51 = vmul.f32 %v9626_v28, %v4200_v61  ;;  %v4202_v33 = vmax.f32 %v3643_v4, 0.0  ;;  %v3645_v36 = vadd.f32 %v3644_v62, %v3388_v22  ;;  %v3874_v50 = vpop.f32.mrf.mxu1 }
 0x445   :  { %v3648_v32 = vpop.f32.mrf.mxu0 }
 0x446   :  { %v4203_v52 = vmax.f32 %v3645_v36, 0.0  ;;  %v3649_v38 = vadd.f32 %v3648_v32, %v3392_v53  ;;  %v9901_v59 = vpop.f32.mrf.mxu1  ;;  %v9903_v18 = vadd.f32 %v4313_v51, %v4312_v11  ;;  %v4315_v43 = vmul.f32 %v9620_v40, %v4202_v33  ;;  %v11277_v51 = vld [vmem:[#allocation12_spill] sm:$0xff] }
 0x447   :  { %11271 = vst [vmem:[#allocation54_spill] sm:$0xff] %v9901_v59  ;;  %v3650_v0 = vpop.f32.mrf.mxu0  ;;  %v3400_v36 = vadd.f32 %v11274_v29, %v9601_v24  ;;  %v3404_v56 = vadd.f32 %v11277_v51, %v9593_v17  ;;  %v11278_v29 = vld [vmem:[#allocation13_spill] sm:$0xff] }
 0x448   :  { %11272 = vst [vmem:[#allocation53_spill] sm:$0xff] %v9903_v18  ;;  %v4316_v61 = vmul.f32 %v9626_v28, %v4203_v52  ;;  %v4205_v62 = vmax.f32 %v3649_v38, 0.0  ;;  %v3651_v22 = vadd.f32 %v3650_v0, %v3394_v35  ;;  %v3879_v4 = vpop.f32.mrf.mxu1 }
 0x449   :  { %v3654_v50 = vpop.f32.mrf.mxu0 }
 0x44a   :  { %v4206_v53 = vmax.f32 %v3651_v22, 0.0  ;;  %v3655_v32 = vadd.f32 %v3654_v50, %v3398_v27  ;;  %v9911_v59 = vpop.f32.mrf.mxu1  ;;  %v9913_v11 = vadd.f32 %v4316_v61, %v4315_v43  ;;  %v4318_v33 = vmul.f32 %v9620_v40, %v4205_v62  ;;  %v11281_v61 = vld [vmem:[#allocation43_spill] sm:$0xff] }
 0x44b   :  { %11275 = vst [vmem:[#allocation29_spill] sm:$0xff] %v9911_v59  ;;  %v3656_v18 = vpop.f32.mrf.mxu0  ;;  %v3406_v22 = vadd.f32 %v11278_v29, %v9601_v24  ;;  %v3410_v51 = vadd.f32 %v11281_v61, %v9593_v17 }
 0x44c   :  { %11276 = vst [vmem:[#allocation32_spill] sm:$0xff] %v9913_v11  ;;  %v4319_v52 = vmul.f32 %v9626_v28, %v4206_v53  ;;  %v4208_v0 = vmax.f32 %v3655_v32, 0.0  ;;  %v3657_v35 = vadd.f32 %v3656_v18, %v3400_v36  ;;  %v3884_v38 = vpop.f32.mrf.mxu1 }
 0x44d   :  { %v3660_v4 = vpop.f32.mrf.mxu0  ;;  %v11282_v38 = vld [vmem:[#allocation5_spill] sm:$0xff] }
 0x44e   :  { %v4209_v27 = vmax.f32 %v3657_v35, 0.0  ;;  %v3661_v50 = vadd.f32 %v3660_v4, %v3404_v56  ;;  %v9921_v59 = vpop.f32.mrf.mxu1  ;;  %v9923_v43 = vadd.f32 %v4319_v52, %v4318_v33  ;;  %v4321_v62 = vmul.f32 %v9620_v40, %v4208_v0  ;;  %v11284_v35 = vld [vmem:[#allocation46_spill] sm:$0xff]  ;;  %v11285_v0 = vld [vmem:[#allocation49_spill] sm:$0xff] }
 0x44f   :  { %11279 = vst [vmem:[#allocation33_spill] sm:$0xff] %v9921_v59  ;;  %v3662_v11 = vpop.f32.mrf.mxu0  ;;  %v9931_v29 = vrot.slane %v11283_v31, %v11282_v38  ;;  %v3412_v33 = vadd.f32 %v11284_v35, %v9601_v24  ;;  %v11286_v59 = vld [vmem:[#allocation15_spill] sm:$0xff] }
 0x450   :  { %11280 = vst [vmem:[#allocation26_spill] sm:$0xff] %v9923_v43  ;;  %v4322_v53 = vmul.f32 %v9626_v28, %v4209_v27  ;;  %v4211_v18 = vmax.f32 %v3661_v50, 0.0  ;;  %v3663_v36 = vadd.f32 %v3662_v11, %v3406_v22  ;;  %v3889_v32 = vpop.f32.mrf.mxu1 }
 0x451   :  { %v3666_v56 = vpop.f32.mrf.mxu0  ;;  %v3743_v27 = vadd.f32 %v11285_v0, %v9931_v29  ;;  %v3738_v24 = vadd.f32 %v11286_v59, %v9931_v29  ;;  %v3748_v59 = vadd.f32 %v9638_v42, %v9931_v29  ;;  %v3758_v42 = vadd.f32 %v9658_v7, %v9931_v29 }
 0x452   :  { %v4212_v52 = vmax.f32 %v3663_v36, 0.0  ;;  %v3667_v4 = vadd.f32 %v3666_v56, %v3410_v51  ;;  %v9935_v43 = vpop.f32.mrf.mxu1  ;;  %v9937_v17 = vadd.f32 %v4322_v53, %v4321_v62  ;;  %v4324_v11 = vmul.f32 %v9620_v40, %v4211_v18  ;;  %v11287_v62 = vld [vmem:[#allocation14_spill] sm:$0xff] }
 0x453   :  { %v3668_v50 = vpop.f32.mrf.mxu0  ;;  %v9947_v53 = vrot.slane %v11287_v62, %v11282_v38  ;;  %v3753_v18 = vadd.f32 %v9648_v25, %v9931_v29  ;;  %v3763_v25 = vadd.f32 %v9668_v15, %v9931_v29  ;;  %v3773_v15 = vadd.f32 %v9688_v34, %v9931_v29 }
 0x454   :  { %v4325_v22 = vmul.f32 %v9626_v28, %v4212_v52  ;;  %v4214_v31 = vmax.f32 %v3667_v4, 0.0  ;;  %v3669_v61 = vadd.f32 %v3668_v50, %v3412_v33  ;;  %v3894_v32 = vpop.f32.mrf.mxu1  ;;  %v3768_v7 = vadd.f32 %v9678_v10, %v9931_v29 }
 0x455   :  { %v4873_v36 = vpop.f32.mrf.mxu0  ;;  %v3783_v34 = vadd.f32 %v9708_v48, %v9931_v29  ;;  %v3778_v10 = vadd.f32 %v9698_v30, %v9931_v29  ;;  %v3793_v48 = vadd.f32 %v9728_v5, %v9931_v29  ;;  %v3788_v30 = vadd.f32 %v9718_v54, %v9931_v29 }
 0x456   :  { %v4215_v51 = vmax.f32 %v3669_v61, 0.0  ;;  %v3968_v56 = vadd.f32 %v4873_v36, %v3743_v27  ;;  %v9949_v35 = vadd.f32 %v4325_v22, %v4324_v11  ;;  %v4327_v52 = vmul.f32 %v9620_v40, %v4214_v31 }
 0x457   :  { %v3962_v0 = vpop.f32.mrf.mxu0  ;;  %v3803_v5 = vadd.f32 %v9748_v14, %v9931_v29  ;;  %v3798_v54 = vadd.f32 %v9738_v26, %v9931_v29  ;;  %v11289_v14 = vld [vmem:[#allocation21_spill] sm:$0xff]  ;;  %v11291_v26 = vld [vmem:[#allocation19_spill] sm:$0xff] }
 0x458   :  { %v4328_v33 = vmul.f32 %v9626_v28, %v4215_v51  ;;  %v4126_v4 = vmax.f32 %v3968_v56, 0.0  ;;  %v3963_v50 = vadd.f32 %v3962_v0, %v3738_v24 }
 0x459   :  { %v4876_v27 = vpop.f32.mrf.mxu0 }
 0x45a   :  { %v4239_v61 = vmul.f32 %v9947_v53, %v4126_v4  ;;  %v4123_v38 = vmax.f32 %v3963_v50, 0.0  ;;  %v3978_v32 = vadd.f32 %v4876_v27, %v3753_v18  ;;  %v9958_v11 = vadd.f32 %v4328_v33, %v4327_v52 }
 0x45b   :  { %v3972_v22 = vpop.f32.mrf.mxu0 }
 0x45c   :  { %v4236_v40 = vmul.f32 %v9947_v53, %v4123_v38  ;;  %v4132_v31 = vmax.f32 %v3978_v32, 0.0  ;;  %v3973_v28 = vadd.f32 %v3972_v22, %v3748_v59  ;;  %v4335_v24 = vadd.f32 %v9650_v19, %v4239_v61 }
 0x45d   :  { %v4879_v36 = vpop.f32.mrf.mxu0 }
 0x45e   :  { %v4245_v51 = vmul.f32 %v9947_v53, %v4132_v31  ;;  %v4129_v56 = vmax.f32 %v3973_v28, 0.0  ;;  %v3988_v62 = vadd.f32 %v4879_v36, %v3763_v25  ;;  %4336 = vadd.xlane.f32.xlu1 %v4335_v24  ;;  %v4331_v18 = vadd.f32 %v9640_v45, %v4236_v40 }
 0x45f   :  { %v3982_v0 = vpop.f32.mrf.mxu0 }
 0x460   :  { %v4242_v52 = vmul.f32 %v9947_v53, %v4129_v56  ;;  %v4138_v33 = vmax.f32 %v3988_v62, 0.0  ;;  %v3983_v4 = vadd.f32 %v3982_v0, %v3758_v42  ;;  %4332 = vadd.xlane.f32.xlu0 %v4331_v18  ;;  %v4343_v19 = vadd.f32 %v9670_v1, %v4245_v51  ;;  %v11288_v0 = vld [vmem:[#allocation16_spill] sm:$0xff] }
 0x461   :  { %v4882_v50 = vpop.f32.mrf.mxu0 }
 0x462   :  { %v4251_v59 = vmul.f32 %v9947_v53, %v4138_v33  ;;  %v4135_v27 = vmax.f32 %v3983_v4, 0.0  ;;  %v3998_v61 = vadd.f32 %v4882_v50, %v3773_v15  ;;  %v4339_v45 = vadd.f32 %v9660_v23, %v4242_v52 }
 0x463   :  { %v3992_v38 = vpop.f32.mrf.mxu0 }
 0x464   :  { %v4248_v32 = vmul.f32 %v9947_v53, %v4135_v27  ;;  %v4144_v25 = vmax.f32 %v3998_v61, 0.0  ;;  %v3993_v22 = vadd.f32 %v3992_v38, %v3768_v7  ;;  %4344 = vadd.xlane.f32.xlu0 %v4343_v19  ;;  %v4351_v1 = vadd.f32 %v9690_v3, %v4251_v59 }
 0x465   :  { %v4885_v40 = vpop.f32.mrf.mxu0 }
 0x466   :  { %v4257_v31 = vmul.f32 %v9947_v53, %v4144_v25  ;;  %v4141_v28 = vmax.f32 %v3993_v22, 0.0  ;;  %v4008_v24 = vadd.f32 %v4885_v40, %v3783_v34  ;;  %v4347_v23 = vadd.f32 %v9680_v46, %v4248_v32 }
 0x467   :  { %v4002_v42 = vpop.f32.mrf.mxu0  ;;  %v3813_v34 = vadd.f32 %v11289_v14, %v9931_v29 }
 0x468   :  { %v4254_v36 = vmul.f32 %v9947_v53, %v4141_v28  ;;  %v4150_v51 = vmax.f32 %v4008_v24, 0.0  ;;  %v4003_v56 = vadd.f32 %v4002_v42, %v3778_v10  ;;  %4348 = vadd.xlane.f32.xlu1 %v4347_v23  ;;  %4340 = vadd.xlane.f32.xlu0 %v4339_v45  ;;  %v4359_v3 = vadd.f32 %v9710_v20, %v4257_v31  ;;  %v11292_v24 = vld [vmem:[#allocation17_spill] sm:$0xff] }
 0x469   :  { %v4888_v62 = vpop.f32.mrf.mxu0  ;;  %v3808_v10 = vadd.f32 %v11291_v26, %v9931_v29 }
 0x46a   :  { %v4263_v18 = vmul.f32 %v9947_v53, %v4150_v51  ;;  %v4147_v15 = vmax.f32 %v4003_v56, 0.0  ;;  %v4018_v46 = vadd.f32 %v4888_v62, %v3793_v48  ;;  %v4355_v52 = vadd.f32 %v11288_v0, %v4254_v36 }
 0x46b   :  { %v4012_v33 = vpop.f32.mrf.mxu0  ;;  %v3823_v48 = vadd.f32 %v9788_v41, %v9931_v29  ;;  %v3818_v62 = vadd.f32 %v9778_v58, %v9931_v29  ;;  %v3833_v41 = vadd.f32 %v9811_v60, %v9931_v29  ;;  %v3828_v58 = vadd.f32 %v9798_v12, %v9931_v29 }
 0x46c   :  { %v4260_v4 = vmul.f32 %v9947_v53, %v4147_v15  ;;  %v4156_v19 = vmax.f32 %v4018_v46, 0.0  ;;  %v4013_v7 = vadd.f32 %v4012_v33, %v3788_v30  ;;  %4356 = vadd.xlane.f32.xlu1 %v4355_v52  ;;  %4352 = vadd.xlane.f32.xlu0 %v4351_v1  ;;  %v4367_v20 = vadd.f32 %v9730_v21, %v4263_v18  ;;  %v11290_v21 = vld [vmem:[#allocation18_spill] sm:$0xff]  ;;  %v11294_v52 = vld [vmem:[#allocation20_spill] sm:$0xff] }
 0x46d   :  { %v4891_v50 = vpop.f32.mrf.mxu0  ;;  %v3843_v60 = vadd.f32 %v9831_v6, %v9931_v29  ;;  %v3838_v12 = vadd.f32 %v9821_v9, %v9931_v29  ;;  %v3853_v6 = vadd.f32 %v9851_v44, %v9931_v29  ;;  %v3848_v9 = vadd.f32 %v9841_v13, %v9931_v29 }
 0x46e   :  { %v4269_v59 = vmul.f32 %v9947_v53, %v4156_v19  ;;  %v4153_v27 = vmax.f32 %v4013_v7, 0.0  ;;  %v4028_v61 = vadd.f32 %v4891_v50, %v3803_v5  ;;  %v4363_v45 = vadd.f32 %v9720_v2, %v4260_v4 }
 0x46f   :  { %v4022_v38 = vpop.f32.mrf.mxu0  ;;  %v3863_v44 = vadd.f32 %v9871_v47, %v9931_v29  ;;  %v3858_v13 = vadd.f32 %v9861_v39, %v9931_v29  ;;  %v11296_v47 = vld [vmem:[#allocation30_spill] sm:$0xff]  ;;  %v11298_v39 = vld [vmem:[#allocation24_spill] sm:$0xff] }
 0x470   :  { %v4266_v32 = vmul.f32 %v9947_v53, %v4153_v27  ;;  %v4162_v25 = vmax.f32 %v4028_v61, 0.0  ;;  %v4023_v22 = vadd.f32 %v4022_v38, %v3798_v54  ;;  %4364 = vadd.xlane.f32.xlu1 %v4363_v45  ;;  %4360 = vadd.xlane.f32.xlu0 %v4359_v3  ;;  %v4375_v1 = vadd.f32 %v11290_v21, %v4269_v59  ;;  %v11293_v3 = vld [vmem:[#allocation23_spill] sm:$0xff]  ;;  %v11295_v21 = vld [vmem:[#allocation22_spill] sm:$0xff] }
 0x471   :  { %v4894_v40 = vpop.f32.mrf.mxu0 }
 0x472   :  { %v4275_v31 = vmul.f32 %v9947_v53, %v4162_v25  ;;  %v4159_v28 = vmax.f32 %v4023_v22, 0.0  ;;  %v4038_v2 = vadd.f32 %v4894_v40, %v3813_v34  ;;  %v4371_v23 = vadd.f32 %v11292_v24, %v4266_v32 }
 0x473   :  { %v4032_v42 = vpop.f32.mrf.mxu0 }
 0x474   :  { %v4272_v36 = vmul.f32 %v9947_v53, %v4159_v28  ;;  %v4168_v51 = vmax.f32 %v4038_v2, 0.0  ;;  %v4033_v56 = vadd.f32 %v4032_v42, %v3808_v10  ;;  %4372 = vadd.xlane.f32.xlu1 %v4371_v23  ;;  %4368 = vadd.xlane.f32.xlu0 %v4367_v20  ;;  %v4383_v30 = vadd.f32 %v11293_v3, %v4275_v31 }
 0x475   :  { %v4897_v18 = vpop.f32.mrf.mxu0 }
 0x476   :  { %v4281_v15 = vmul.f32 %v9947_v53, %v4168_v51  ;;  %v4165_v46 = vmax.f32 %v4033_v56, 0.0  ;;  %v4048_v0 = vadd.f32 %v4897_v18, %v3823_v48  ;;  %v4379_v5 = vadd.f32 %v11294_v52, %v4272_v36 }
 0x477   :  { %v4042_v33 = vpop.f32.mrf.mxu0 }
 0x478   :  { %v4278_v4 = vmul.f32 %v9947_v53, %v4165_v46  ;;  %v4174_v19 = vmax.f32 %v4048_v0, 0.0  ;;  %v4043_v7 = vadd.f32 %v4042_v33, %v3818_v62  ;;  %4380 = vadd.xlane.f32.xlu1 %v4379_v5  ;;  %4376 = vadd.xlane.f32.xlu0 %v4375_v1  ;;  %v4391_v20 = vadd.f32 %v9790_v63, %v4281_v15 }
 0x479   :  { %v4900_v54 = vpop.f32.mrf.mxu0  ;;  %v3873_v15 = vadd.f32 %v11296_v47, %v9931_v29  ;;  %v3868_v33 = vadd.f32 %v11298_v39, %v9931_v29 }
 0x47a   :  { %v4287_v50 = vmul.f32 %v9947_v53, %v4174_v19  ;;  %v4171_v59 = vmax.f32 %v4043_v7, 0.0  ;;  %v4058_v27 = vadd.f32 %v4900_v54, %v3833_v41  ;;  %v4387_v61 = vadd.f32 %v9780_v49, %v4278_v4  ;;  %v11300_v54 = vld [vmem:[#allocation29_spill] sm:$0xff] }
 0x47b   :  { %v4052_v45 = vpop.f32.mrf.mxu0 }
 0x47c   :  { %v4284_v14 = vmul.f32 %v9947_v53, %v4171_v59  ;;  %v4180_v34 = vmax.f32 %v4058_v27, 0.0  ;;  %v4053_v38 = vadd.f32 %v4052_v45, %v3828_v58  ;;  %4388 = vadd.xlane.f32.xlu1 %v4387_v61  ;;  %4384 = vadd.xlane.f32.xlu0 %v4383_v30  ;;  %v4399_v63 = vadd.f32 %v9813_v55, %v4287_v50  ;;  %v11301_v45 = vld [vmem:[#allocation51_spill] sm:$0xff] }
 0x47d   :  { %v4903_v32 = vpop.f32.mrf.mxu0  ;;  %v3883_v50 = vadd.f32 %v11300_v54, %v9931_v29 }
 0x47e   :  { %v4293_v25 = vmul.f32 %v9947_v53, %v4180_v34  ;;  %v4177_v22 = vmax.f32 %v4053_v38, 0.0  ;;  %v4068_v49 = vadd.f32 %v4903_v32, %v3843_v60  ;;  %v4395_v1 = vadd.f32 %v11295_v21, %v4284_v14  ;;  %v11302_v34 = vld [vmem:[#allocation54_spill] sm:$0xff] }
 0x47f   :  { %v4062_v26 = vpop.f32.mrf.mxu0  ;;  %v3878_v38 = vadd.f32 %v11302_v34, %v9931_v29  ;;  %v3893_v21 = vadd.f32 %v9935_v43, %v9931_v29 }
 0x480   :  { %v4290_v10 = vmul.f32 %v9947_v53, %v4177_v22  ;;  %v4186_v40 = vmax.f32 %v4068_v49, 0.0  ;;  %v4063_v31 = vadd.f32 %v4062_v26, %v3838_v12  ;;  %4396 = vadd.xlane.f32.xlu1 %v4395_v1  ;;  %4392 = vadd.xlane.f32.xlu0 %v4391_v20  ;;  %v4407_v55 = vadd.f32 %v9833_v16, %v4293_v25  ;;  %v11299_v20 = vld [vmem:[#allocation25_spill] sm:$0xff]  ;;  %v11303_v22 = vld [vmem:[#allocation52_spill] sm:$0xff] }
 0x481   :  { %v4906_v28 = vpop.f32.mrf.mxu0 }
 0x482   :  { %v4299_v2 = vmul.f32 %v9947_v53, %v4186_v40  ;;  %v4183_v24 = vmax.f32 %v4063_v31, 0.0  ;;  %v4078_v23 = vadd.f32 %v4906_v28, %v3853_v6  ;;  %v4403_v48 = vadd.f32 %v9823_v8, %v4290_v10  ;;  %v11304_v40 = vld [vmem:[#allocation32_spill] sm:$0xff] }
 0x483   :  { %v4072_v42 = vpop.f32.mrf.mxu0 }
 0x484   :  { %v4296_v36 = vmul.f32 %v9947_v53, %v4183_v24  ;;  %v4192_v51 = vmax.f32 %v4078_v23, 0.0  ;;  %v4073_v56 = vadd.f32 %v4072_v42, %v3848_v9  ;;  %4404 = vadd.xlane.f32.xlu1 %v4403_v48  ;;  %4400 = vadd.xlane.f32.xlu0 %v4399_v63  ;;  %v4415_v16 = vadd.f32 %v9853_v57, %v4299_v2  ;;  %v11297_v57 = vld [vmem:[#allocation27_spill] sm:$0xff]  ;;  %v11306_v48 = vld [vmem:[#allocation53_spill] sm:$0xff] }
 0x485   :  { %v4909_v3 = vpop.f32.mrf.mxu0 }
 0x486   :  { %v4305_v30 = vmul.f32 %v9947_v53, %v4192_v51  ;;  %v4189_v62 = vmax.f32 %v4073_v56, 0.0  ;;  %v4088_v8 = vadd.f32 %v4909_v3, %v3863_v44  ;;  %v4411_v18 = vadd.f32 %v9843_v37, %v4296_v36 }
 0x487   :  { %v4082_v46 = vpop.f32.mrf.mxu0 }
 0x488   :  { %v4302_v0 = vmul.f32 %v9947_v53, %v4189_v62  ;;  %v4198_v52 = vmax.f32 %v4088_v8, 0.0  ;;  %v4083_v5 = vadd.f32 %v4082_v46, %v3858_v13  ;;  %4412 = vadd.xlane.f32.xlu1 %v4411_v18  ;;  %4408 = vadd.xlane.f32.xlu0 %v4407_v55  ;;  %v4423_v41 = vadd.f32 %v11297_v57, %v4305_v30  ;;  %v11305_v55 = vld [vmem:[#allocation33_spill] sm:$0xff]  ;;  %v10079_v18 = vld [vmem:[#allocation2] ss:$0 sm:$0xff] }
 0x489   :  { %v4912_v4 = vpop.f32.mrf.mxu0  ;;  %v3888_v9 = vadd.f32 %v11305_v55, %v9931_v29  ;;  %v11307_v29 = vld [vmem:[#allocation26_spill] sm:$0xff] }
 0x48a   :  { %v4311_v19 = vmul.f32 %v9947_v53, %v4198_v52  ;;  %v4195_v7 = vmax.f32 %v4083_v5, 0.0  ;;  %v4098_v37 = vadd.f32 %v4912_v4, %v3873_v15  ;;  %v4419_v58 = vadd.f32 %v11299_v20, %v4302_v0 }
 0x48b   :  { %v4092_v59 = vpop.f32.mrf.mxu0 }
 0x48c   :  { %v4308_v27 = vmul.f32 %v9947_v53, %v4195_v7  ;;  %v4204_v61 = vmax.f32 %v4098_v37, 0.0  ;;  %v4093_v60 = vadd.f32 %v4092_v59, %v3868_v33  ;;  %4420 = vadd.xlane.f32.xlu1 %v4419_v58  ;;  %4416 = vadd.xlane.f32.xlu0 %v4415_v16  ;;  %v4431_v14 = vadd.f32 %v11301_v45, %v4311_v19 }
 0x48d   :  { %v4915_v63 = vpop.f32.mrf.mxu0 }
 0x48e   :  { %v4317_v12 = vmul.f32 %v9947_v53, %v4204_v61  ;;  %v4201_v32 = vmax.f32 %v4093_v60, 0.0  ;;  %v4108_v25 = vadd.f32 %v4915_v63, %v3883_v50  ;;  %v4427_v49 = vadd.f32 %v11303_v22, %v4308_v27 }
 0x48f   :  { %v4102_v1 = vpop.f32.mrf.mxu0 }
 0x490   :  { %v4314_v6 = vmul.f32 %v9947_v53, %v4201_v32  ;;  %v4210_v26 = vmax.f32 %v4108_v25, 0.0  ;;  %v4103_v10 = vadd.f32 %v4102_v1, %v3878_v38  ;;  %4428 = vadd.xlane.f32.xlu1 %v4427_v49  ;;  %4424 = vadd.xlane.f32.xlu0 %v4423_v41  ;;  %v4439_v31 = vadd.f32 %v11304_v40, %v4317_v12 }
 0x491   :  { %v4918_v28 = vpop.f32.mrf.mxu0 }
 0x492   :  { %v4323_v2 = vmul.f32 %v9947_v53, %v4210_v26  ;;  %v4207_v24 = vmax.f32 %v4103_v10, 0.0  ;;  %v4118_v23 = vadd.f32 %v4918_v28, %v3893_v21  ;;  %v4435_v44 = vadd.f32 %v11306_v48, %v4314_v6 }
 0x493   :  { %v4112_v43 = vpop.f32.mrf.mxu0 }
 0x494   :  { %v4320_v42 = vmul.f32 %v9947_v53, %v4207_v24  ;;  %v4216_v36 = vmax.f32 %v4118_v23, 0.0  ;;  %v4113_v51 = vadd.f32 %v4112_v43, %v3888_v9  ;;  %4436 = vadd.xlane.f32.xlu1 %v4435_v44  ;;  %4432 = vadd.xlane.f32.xlu0 %v4431_v14  ;;  %v4447_v56 = vadd.f32 %v9937_v17, %v4323_v2 }
 0x496   :  { %v4329_v16 = vmul.f32 %v9947_v53, %v4216_v36  ;;  %v4213_v13 = vmax.f32 %v4113_v51, 0.0  ;;  %v4443_v3 = vadd.f32 %v11307_v29, %v4320_v42 }
 0x498   :  { %v4326_v30 = vmul.f32 %v9947_v53, %v4213_v13  ;;  %4444 = vadd.xlane.f32.xlu1 %v4443_v3  ;;  %4440 = vadd.xlane.f32.xlu0 %v4439_v31  ;;  %v4455_v62 = vadd.f32 %v9958_v11, %v4329_v16 }
 0x49a   :  { %v4451_v8 = vadd.f32 %v9949_v35, %v4326_v30 }
 0x49c   :  { %4448 = vadd.xlane.f32.xlu0 %v4447_v56  ;;  %4452 = vadd.xlane.f32.xlu1 %v4451_v8 }
 0x4a0   :  { %4456 = vadd.xlane.f32.xlu0 %v4455_v62 }
 0x4e7   :  { %v4337_v17 = vpop.xlane.xlu1 %4336 }
 0x4e8   :  { %v4466_v47 = vadd.f32 %v10079_v18, %v4337_v17 }
 0x4e9   :  { %v4333_v15 = vpop.xlane.xlu0 %4332 }
 0x4ea   :  { %4499 = vst.msk [vmem:[%s10252_s11 + $0x8] sm:$0xff] %vm4497_vm0, %v4466_v47  ;;  %v4465_v53 = vadd.f32 %v10079_v18, %v4333_v15 }
 0x4ec   :  { %4498 = vst.msk [vmem:[%s10252_s11] sm:$0xff] %vm4497_vm0, %v4465_v53 }
 0x4ed   :  { %v4345_v35 = vpop.xlane.xlu0 %4344 }
 0x4ee   :  { %v4468_v11 = vadd.f32 %v10079_v18, %v4345_v35 }
 0x4f0   :  { %4501 = vst.msk [vmem:[%s10252_s11 + $0x18] sm:$0xff] %vm4497_vm0, %v4468_v11 }
 0x4f1   :  { %v4349_v46 = vpop.xlane.xlu1 %4348  ;;  %v4341_v0 = vpop.xlane.xlu0 %4340 }
 0x4f2   :  { %v4469_v52 = vadd.f32 %v10079_v18, %v4349_v46  ;;  %v4467_v5 = vadd.f32 %v10079_v18, %v4341_v0 }
 0x4f4   :  { %4502 = vst.msk [vmem:[%s10252_s11 + $0x20] sm:$0xff] %vm4497_vm0, %v4469_v52  ;;  %4500 = vst.msk [vmem:[%s10252_s11 + $0x10] sm:$0xff] %vm4497_vm0, %v4467_v5 }
 0x4f5   :  { %v4357_v57 = vpop.xlane.xlu1 %4356  ;;  %v4353_v41 = vpop.xlane.xlu0 %4352 }
 0x4f6   :  { %v4471_v39 = vadd.f32 %v10079_v18, %v4357_v57  ;;  %v4470_v33 = vadd.f32 %v10079_v18, %v4353_v41 }
 0x4f8   :  { %4504 = vst.msk [vmem:[%s10252_s11 + $0x30] sm:$0xff] %vm4497_vm0, %v4471_v39  ;;  %4503 = vst.msk [vmem:[%s10252_s11 + $0x28] sm:$0xff] %vm4497_vm0, %v4470_v33 }
 0x4f9   :  { %v4365_v4 = vpop.xlane.xlu1 %4364  ;;  %v4361_v19 = vpop.xlane.xlu0 %4360 }
 0x4fa   :  { %v4473_v7 = vadd.f32 %v10079_v18, %v4365_v4  ;;  %v4472_v37 = vadd.f32 %v10079_v18, %v4361_v19 }
 0x4fc   :  { %4506 = vst.msk [vmem:[%s10252_s11 + $0x40] sm:$0xff] %vm4497_vm0, %v4473_v7  ;;  %4505 = vst.msk [vmem:[%s10252_s11 + $0x38] sm:$0xff] %vm4497_vm0, %v4472_v37 }
 0x4fd   :  { %v4373_v20 = vpop.xlane.xlu1 %4372  ;;  %v4369_v58 = vpop.xlane.xlu0 %4368 }
 0x4fe   :  { %v4475_v54 = vadd.f32 %v10079_v18, %v4373_v20  ;;  %v4474_v50 = vadd.f32 %v10079_v18, %v4369_v58 }
 0x500   :  { %4508 = vst.msk [vmem:[%s10252_s11 + $0x50] sm:$0xff] %vm4497_vm0, %v4475_v54  ;;  %4507 = vst.msk [vmem:[%s10252_s11 + $0x48] sm:$0xff] %vm4497_vm0, %v4474_v50 }
 0x501   :  { %v4381_v59 = vpop.xlane.xlu1 %4380  ;;  %v4377_v27 = vpop.xlane.xlu0 %4376 }
 0x502   :  { %v4477_v61 = vadd.f32 %v10079_v18, %v4381_v59  ;;  %v4476_v60 = vadd.f32 %v10079_v18, %v4377_v27 }
 0x504   :  { %4510 = vst.msk [vmem:[%s10252_s11 + $0x60] sm:$0xff] %vm4497_vm0, %v4477_v61  ;;  %4509 = vst.msk [vmem:[%s10252_s11 + $0x58] sm:$0xff] %vm4497_vm0, %v4476_v60 }
 0x505   :  { %v4389_v45 = vpop.xlane.xlu1 %4388  ;;  %v4385_v14 = vpop.xlane.xlu0 %4384 }
 0x506   :  { %v4479_v34 = vadd.f32 %v10079_v18, %v4389_v45  ;;  %v4478_v38 = vadd.f32 %v10079_v18, %v4385_v14 }
 0x508   :  { %4512 = vst.msk [vmem:[%s10252_s11 + $0x70] sm:$0xff] %vm4497_vm0, %v4479_v34  ;;  %4511 = vst.msk [vmem:[%s10252_s11 + $0x68] sm:$0xff] %vm4497_vm0, %v4478_v38 }
 0x509   :  { %v4397_v63 = vpop.xlane.xlu1 %4396  ;;  %v4393_v12 = vpop.xlane.xlu0 %4392 }
 0x50a   :  { %v4481_v32 = vadd.f32 %v10079_v18, %v4397_v63  ;;  %v4480_v25 = vadd.f32 %v10079_v18, %v4393_v12 }
 0x50c   :  { %4514 = vst.msk [vmem:[%s10252_s11 + $0x80] sm:$0xff] %vm4497_vm0, %v4481_v32  ;;  %4513 = vst.msk [vmem:[%s10252_s11 + $0x78] sm:$0xff] %vm4497_vm0, %v4480_v25 }
 0x50d   :  { %v4405_v22 = vpop.xlane.xlu1 %4404  ;;  %v4401_v49 = vpop.xlane.xlu0 %4400 }
 0x50e   :  { %v4483_v21 = vadd.f32 %v10079_v18, %v4405_v22  ;;  %v4482_v1 = vadd.f32 %v10079_v18, %v4401_v49 }
 0x510   :  { %4516 = vst.msk [vmem:[%s10252_s11 + $0x90] sm:$0xff] %vm4497_vm0, %v4483_v21  ;;  %4515 = vst.msk [vmem:[%s10252_s11 + $0x88] sm:$0xff] %vm4497_vm0, %v4482_v1 }
 0x511   :  { %v4413_v6 = vpop.xlane.xlu1 %4412  ;;  %v4409_v26 = vpop.xlane.xlu0 %4408 }
 0x512   :  { %v4485_v10 = vadd.f32 %v10079_v18, %v4413_v6  ;;  %v4484_v40 = vadd.f32 %v10079_v18, %v4409_v26 }
 0x514   :  { %4518 = vst.msk [vmem:[%s10252_s11 + $0xa0] sm:$0xff] %vm4497_vm0, %v4485_v10  ;;  %4517 = vst.msk [vmem:[%s10252_s11 + $0x98] sm:$0xff] %vm4497_vm0, %v4484_v40 }
 0x515   :  { %v4421_v31 = vpop.xlane.xlu1 %4420  ;;  %v4417_v55 = vpop.xlane.xlu0 %4416 }
 0x516   :  { %v4487_v9 = vadd.f32 %v10079_v18, %v4421_v31  ;;  %v4486_v28 = vadd.f32 %v10079_v18, %v4417_v55 }
 0x518   :  { %4520 = vst.msk [vmem:[%s10252_s11 + $0xb0] sm:$0xff] %vm4497_vm0, %v4487_v9  ;;  %4519 = vst.msk [vmem:[%s10252_s11 + $0xa8] sm:$0xff] %vm4497_vm0, %v4486_v28 }
 0x519   :  { %v4429_v2 = vpop.xlane.xlu1 %4428  ;;  %v4425_v24 = vpop.xlane.xlu0 %4424 }
 0x51a   :  { %v4489_v23 = vadd.f32 %v10079_v18, %v4429_v2  ;;  %v4488_v48 = vadd.f32 %v10079_v18, %v4425_v24 }
 0x51c   :  { %4522 = vst.msk [vmem:[%s10252_s11 + $0xc0] sm:$0xff] %vm4497_vm0, %v4489_v23  ;;  %4521 = vst.msk [vmem:[%s10252_s11 + $0xb8] sm:$0xff] %vm4497_vm0, %v4488_v48 }
 0x51d   :  { %v4437_v44 = vpop.xlane.xlu1 %4436  ;;  %v4433_v43 = vpop.xlane.xlu0 %4432 }
 0x51e   :  { %v4491_v42 = vadd.f32 %v10079_v18, %v4437_v44  ;;  %v4490_v36 = vadd.f32 %v10079_v18, %v4433_v43 }
 0x520   :  { %4524 = vst.msk [vmem:[%s10252_s11 + $0xd0] sm:$0xff] %vm4497_vm0, %v4491_v42  ;;  %4523 = vst.msk [vmem:[%s10252_s11 + $0xc8] sm:$0xff] %vm4497_vm0, %v4490_v36 }
 0x521   :  { %v4445_v51 = vpop.xlane.xlu1 %4444  ;;  %v4441_v56 = vpop.xlane.xlu0 %4440 }
 0x522   :  { %v4493_v16 = vadd.f32 %v10079_v18, %v4445_v51  ;;  %v4492_v13 = vadd.f32 %v10079_v18, %v4441_v56 }
 0x524   :  { %4526 = vst.msk [vmem:[%s10252_s11 + $0xe0] sm:$0xff] %vm4497_vm0, %v4493_v16  ;;  %4525 = vst.msk [vmem:[%s10252_s11 + $0xd8] sm:$0xff] %vm4497_vm0, %v4492_v13 }
 0x525   :  { %v4449_v29 = vpop.xlane.xlu0 %4448  ;;  %v4453_v3 = vpop.xlane.xlu1 %4452 }
 0x526   :  { %v4494_v30 = vadd.f32 %v10079_v18, %v4449_v29  ;;  %v4495_v62 = vadd.f32 %v10079_v18, %v4453_v3 }
 0x528   :  { %4527 = vst.msk [vmem:[%s10252_s11 + $0xe8] sm:$0xff] %vm4497_vm0, %v4494_v30  ;;  %4528 = vst.msk [vmem:[%s10252_s11 + $0xf0] sm:$0xff] %vm4497_vm0, %v4495_v62 }
 0x529   :  { %v4457_v8 = vpop.xlane.xlu0 %4456 }
 0x52a   :  { %v4496_v17 = vadd.f32 %v10079_v18, %v4457_v8 }
 0x52c   :  { %4529 = vst.msk [vmem:[%s10252_s11 + $0xf8] sm:$0xff] %vm4497_vm0, %v4496_v17 }

</bundles_post_ra>
